<compile_context>
chip_gen: v5e
topology: v5e:2x2
jax: 0.10.0
libtpu: 0.0.40
codegen_flags: <defaults>
</compile_context>

<pallas_src>
import functools

import jax
import jax.numpy as jnp
from jax.experimental import pallas as pl
from jax.experimental.pallas import tpu as pltpu


def _round_up(n, m):
    return ((n + m - 1) // m) * m


# Packed gate order: PyTorch (i, f, g, o) -> (i, f, o, g) so the three sigmoid
# gates are lane-contiguous.
_GATE_ORDER = (0, 1, 3, 2)


# ----------------------------------------------------------------------------
# Kernel: full recurrence (all timesteps, all layers) + head in one invocation
# ----------------------------------------------------------------------------
def _lstm_kernel(n_layers, seq_len, hp, *refs):
    # refs = (g0, h0, c0, whh_0, [wih_l, whh_l, bias_l for l>=1], wlast, blast,
    #         hn, cn, y)
    n_w = 1 + 3 * (n_layers - 1)
    g0_ref, h0_ref, c0_ref = refs[0], refs[1], refs[2]
    wrefs = refs[3:3 + n_w]
    wlast_ref, blast_ref = refs[3 + n_w], refs[4 + n_w]
    hn_ref, cn_ref, y_ref = refs[5 + n_w], refs[6 + n_w], refs[7 + n_w]

    # Keep weights as Refs (loaded at the dot site); hoist only the small biases.
    whh_refs = [wrefs[0]]
    wih_refs = [None]
    bias = [None]
    for l in range(1, n_layers):
        wih_refs.append(wrefs[3 * l - 2])
        whh_refs.append(wrefs[3 * l - 1])
        bias.append(wrefs[3 * l][...])          # (1, 4*hp) -- tiny, safe to hoist

    def step(t, hs, cs):
        new_hs, new_cs = [], []
        x_l = None
        for l in range(n_layers):
            # RHS streamed straight from the weight's VMEM buffer.
            rec = jnp.dot(hs[l], whh_refs[l][...],
                          preferred_element_type=jnp.float32)
            if l == 0:
                # layer-0 input projection precomputed in the wrapper
                gates = g0_ref[t] + rec
            else:
                gates = (jnp.dot(x_l, wih_refs[l][...],
                                 preferred_element_type=jnp.float32)
                         + rec + bias[l])
            # Packed gate order i, f, o, g: one sigmoid over 3*hp lanes, one tanh.
            sig = jax.nn.sigmoid(gates[:, :3 * hp])
            g_g = jnp.tanh(gates[:, 3 * hp:])
            i_g = sig[:, 0 * hp:1 * hp]
            f_g = sig[:, 1 * hp:2 * hp]
            o_g = sig[:, 2 * hp:3 * hp]
            c_new = f_g * cs[l] + i_g * g_g
            h_new = o_g * jnp.tanh(c_new)
            new_hs.append(h_new)
            new_cs.append(c_new)
            x_l = h_new
        return tuple(new_hs), tuple(new_cs)

    hs = tuple(h0_ref[l] for l in range(n_layers))
    cs = tuple(c0_ref[l] for l in range(n_layers))

    if seq_len <= 32:
        # Short sequences: full unroll at trace time.
        for t in range(seq_len):
            hs, cs = step(t, hs, cs)
    else:
        # Long sequences: rolled in-kernel loop, partially unrolled so the
        # scheduler can overlap consecutive timesteps (layer0@t+1 is independent
        # of layer1@t).
        hs, cs = jax.lax.fori_loop(
            0, seq_len, lambda t, c: step(t, c[0], c[1]), (hs, cs), unroll=4)

    for l in range(n_layers):
        hn_ref[l] = hs[l]
        cn_ref[l] = cs[l]
    # Head: only the needed output column (lane 0), lane-dense 128-wide store.
    y_ref[...] = (jnp.dot(hs[n_layers - 1], wlast_ref[...],
                          preferred_element_type=jnp.float32)
                  + blast_ref[...])


# ----------------------------------------------------------------------------
# One-time parameter packing (NOT per forward call)
# ----------------------------------------------------------------------------
def _pack_gate_cols(w_t, h, hp):
    """(rows, 4*h) -> (rows, 4*hp), gate order (i,f,o,g), each block 128-aligned."""
    w_t = w_t.astype(jnp.float32)
    blocks = []
    for k in _GATE_ORDER:
        blk = w_t[:, k * h:(k + 1) * h]
        if hp != h:
            blk = jnp.pad(blk, ((0, 0), (0, hp - h)))
        blocks.append(blk)
    return jnp.concatenate(blocks, axis=1)


def _pad_rows(w, h, hp):
    if hp == h:
        return w
    return jnp.pad(w, ((0, hp - h), (0, 0)))


def prepare_params(params, *, input_dim, hidden_dim, output_dim, n_layers):
    """Transpose, fold b_ih+b_hh, reorder gates, pad to 128-lane boundaries."""
    H = hidden_dim
    HP = _round_up(H, 128)
    LANE = 128
    wih0, whh0, bih0, bhh0 = params["layers"][0]
    packed = {
        # layer-0 input projection (hoisted out of the recurrence)
        "w0": _pack_gate_cols(wih0.T, H, HP),                   # (input_dim, 4*HP)
        "b0": _pack_gate_cols((bih0 + bhh0)[None, :], H, HP),   # (1, 4*HP)
        "whh": [_pad_rows(_pack_gate_cols(whh0.T, H, HP), H, HP)],
        "wih": [None],
        "bias": [None],
    }
    for l in range(1, n_layers):
        wih, whh, bih, bhh = params["layers"][l]
        packed["wih"].append(_pad_rows(_pack_gate_cols(wih.T, H, HP), H, HP))
        packed["whh"].append(_pad_rows(_pack_gate_cols(whh.T, H, HP), H, HP))
        packed["bias"].append(_pack_gate_cols((bih + bhh)[None, :], H, HP))
    wout, bout = params["out"]
    # Only y[:, -1] is ever used -> keep just W_out[-1, :] in lane 0 of a
    # lane-dense 128-wide block.
    packed["wlast"] = (jnp.zeros((HP, LANE), jnp.float32)
                       .at[:H, 0].set(wout[output_dim - 1, :].astype(jnp.float32)))
    packed["blast"] = (jnp.zeros((1, LANE), jnp.float32)
                       .at[0, 0].set(bout[output_dim - 1].astype(jnp.float32)))
    return packed


# ----------------------------------------------------------------------------
# Forward wrapper (Pallas implementation of Model.forward)
# ----------------------------------------------------------------------------
def lstm_model_forward(x, hidden, packed, *, input_dim, hidden_dim, output_dim,
                       seq_len, n_layers):
    """Returns (out, (h_n, c_n)) matching the PyTorch Model.forward."""
    B = x.shape[0]
    H = hidden_dim
    HP = _round_up(H, 128)
    BP = _round_up(B, 8)          # full-sublane state updates / stores
    LANE = 128
    x = x.astype(jnp.float32)
    h0 = hidden[0].astype(jnp.float32)
    c0 = hidden[1].astype(jnp.float32)

    if BP != B:
        x = jnp.pad(x, ((0, BP - B), (0, 0), (0, 0)))
        h0 = jnp.pad(h0, ((0, 0), (0, BP - B), (0, 0)))
        c0 = jnp.pad(c0, ((0, 0), (0, BP - B), (0, 0)))
    if HP != H:
        h0 = jnp.pad(h0, ((0, 0), (0, 0), (0, HP - H)))
        c0 = jnp.pad(c0, ((0, 0), (0, 0), (0, HP - H)))

    # Hoisted layer-0 input projection for ALL timesteps (one big matmul, off
    # the serial critical path), emitted time-major: (T, BP, 4*HP).
    # HIGHEST precision so it exactly matches the f32 reference.
    g0 = (jnp.einsum("bti,ig->tbg", x, packed["w0"],
                     precision=jax.lax.Precision.HIGHEST)
          + packed["b0"])

    inputs = [g0, h0, c0, packed["whh"][0]]
    for l in range(1, n_layers):
        inputs += [packed["wih"][l], packed["whh"][l], packed["bias"][l]]
    inputs += [packed["wlast"], packed["blast"]]

    out_shapes = (
        jax.ShapeDtypeStruct((n_layers, BP, HP), jnp.float32),
        jax.ShapeDtypeStruct((n_layers, BP, HP), jnp.float32),
        jax.ShapeDtypeStruct((BP, LANE), jnp.float32),
    )

    # Explicit VMEM budget: everything single-buffered (no grid), sized from the
    # actual packed inputs + outputs with headroom.
    in_bytes = sum(int(a.size) * a.dtype.itemsize for a in inputs)
    out_bytes = sum(int(s.size) * s.dtype.itemsize
                    for s in jax.tree_util.tree_leaves(out_shapes))
    vmem_limit = int(1.5 * (in_bytes + out_bytes)) + (8 << 20)
    vmem_limit = min(max(vmem_limit, 32 << 20), 100 << 20)

    vmem_spec = pl.BlockSpec(memory_space=pltpu.MemorySpace.VMEM)
    kernel = functools.partial(_lstm_kernel, n_layers, seq_len, HP)
    hn_p, cn_p, y = pl.pallas_call(
        kernel,
        out_shape=out_shapes,
        in_specs=[vmem_spec] * len(inputs),
        out_specs=(vmem_spec, vmem_spec, vmem_spec),
        compiler_params=pltpu.CompilerParams(vmem_limit_bytes=vmem_limit),
    )(*inputs)

    # out.view(B, -1)[:, -1] == head output at last timestep, last output dim
    out = y[:B, 0] + 1e-8
    return out, (hn_p[:, :B, :H], cn_p[:, :B, :H])


# ----------------------------------------------------------------------------
# Pure-JAX reference (mirrors the PyTorch forward) + deterministic init
# ----------------------------------------------------------------------------
def reference_forward(x, hidden, params, *, hidden_dim, n_layers):
    x = x.astype(jnp.float32)
    B, T, _ = x.shape
    H = hidden_dim
    hs = [hidden[0][l] for l in range(n_layers)]
    cs = [hidden[1][l] for l in range(n_layers)]
    last = None
    for t in range(T):
        inp = x[:, t, :]
        for l in range(n_layers):
            wih, whh, bih, bhh = params["layers"][l]
            gates = inp @ wih.T + hs[l] @ whh.T + bih + bhh
            i = jax.nn.sigmoid(gates[:, 0 * H:1 * H])
            f = jax.nn.sigmoid(gates[:, 1 * H:2 * H])
            g = jnp.tanh(gates[:, 2 * H:3 * H])
            o = jax.nn.sigmoid(gates[:, 3 * H:4 * H])
            cs[l] = f * cs[l] + i * g
            hs[l] = o * jnp.tanh(cs[l])
            inp = hs[l]
        last = inp
    wout, bout = params["out"]
    y = last @ wout.T + bout
    out = y[:, -1] + 1e-8
    return out, (jnp.stack(hs), jnp.stack(cs))


def init_params(key, input_dim, hidden_dim, output_dim, n_layers):
    k = 1.0 / jnp.sqrt(jnp.float32(hidden_dim))
    layers = []
    for l in range(n_layers):
        in_l = input_dim if l == 0 else hidden_dim
        key, k1, k2, k3, k4 = jax.random.split(key, 5)
        layers.append((
            jax.random.uniform(k1, (4 * hidden_dim, in_l), jnp.float32, -k, k),
            jax.random.uniform(k2, (4 * hidden_dim, hidden_dim), jnp.float32, -k, k),
            jax.random.uniform(k3, (4 * hidden_dim,), jnp.float32, -k, k),
            jax.random.uniform(k4, (4 * hidden_dim,), jnp.float32, -k, k),
        ))
    key, k5, k6 = jax.random.split(key, 3)
    wout = jax.random.uniform(k5, (output_dim, hidden_dim), jnp.float32, -k, k)
    bout = jax.random.uniform(k6, (output_dim,), jnp.float32, -k, k)
    return {"layers": layers, "out": (wout, bout)}


if __name__ == "__main__":
    batch, input_dim, hidden_dim, output_dim, seq_len, n_layers = 2, 8, 32, 4, 8, 2

    key = jax.random.PRNGKey(0)
    key, kx = jax.random.split(key)
    params = init_params(key, input_dim, hidden_dim, output_dim, n_layers)
    packed = prepare_params(params, input_dim=input_dim, hidden_dim=hidden_dim,
                            output_dim=output_dim, n_layers=n_layers)

    x = jax.random.normal(kx, (batch, seq_len, input_dim), jnp.float32)
    # init_hidden: zeros of shape (n_layers, batch, hidden_dim)
    hidden = (jnp.zeros((n_layers, batch, hidden_dim), jnp.float32),
              jnp.zeros((n_layers, batch, hidden_dim), jnp.float32))

    fwd = jax.jit(functools.partial(
        lstm_model_forward, input_dim=input_dim, hidden_dim=hidden_dim,
        output_dim=output_dim, seq_len=seq_len, n_layers=n_layers))

    out, (hn, cn) = fwd(x, hidden, packed)
    jax.block_until_ready((out, hn, cn))

    ref_out, (ref_hn, ref_cn) = reference_forward(
        x, hidden, params, hidden_dim=hidden_dim, n_layers=n_layers)

    assert jnp.allclose(out, ref_out, atol=1e-5), (out, ref_out)
    assert jnp.allclose(hn, ref_hn, atol=1e-5)
    assert jnp.allclose(cn, ref_cn, atol=1e-5)

    print("KERNEL_OK")
</pallas_src>

<mosaic_0001>
module attributes {stable_mosaic.version = 11 : i64} {
  func.func @_lstm_kernel(%arg0: memref<8x8x512xf32, #tpu.memory_space<vmem>>, %arg1: memref<2x8x128xf32, #tpu.memory_space<vmem>>, %arg2: memref<2x8x128xf32, #tpu.memory_space<vmem>>, %arg3: memref<128x512xf32, #tpu.memory_space<vmem>>, %arg4: memref<128x512xf32, #tpu.memory_space<vmem>>, %arg5: memref<128x512xf32, #tpu.memory_space<vmem>>, %arg6: memref<1x512xf32, #tpu.memory_space<vmem>>, %arg7: memref<128x128xf32, #tpu.memory_space<vmem>>, %arg8: memref<1x128xf32, #tpu.memory_space<vmem>>, %arg9: memref<2x8x128xf32, #tpu.memory_space<vmem>>, %arg10: memref<2x8x128xf32, #tpu.memory_space<vmem>>, %arg11: memref<8x128xf32, #tpu.memory_space<vmem>>) attributes {dimension_semantics = [], scalar_prefetch = 0 : i64, scratch_operands = 0 : i64, tpu.core_type = #tpu.core_type<tc>} {
    %c0 = arith.constant 0 : index
    %c0_0 = arith.constant 0 : index
    %0 = vector.load %arg6[%c0, %c0_0] : memref<1x512xf32, #tpu.memory_space<vmem>>, vector<1x512xf32>
    %c0_1 = arith.constant 0 : index
    %c0_2 = arith.constant 0 : index
    %c0_3 = arith.constant 0 : index
    %1 = vector.load %arg1[%c0_1, %c0_2, %c0_3] : memref<2x8x128xf32, #tpu.memory_space<vmem>>, vector<1x8x128xf32>
    %2 = vector.shape_cast %1 : vector<1x8x128xf32> to vector<8x128xf32>
    %c1 = arith.constant 1 : index
    %c0_4 = arith.constant 0 : index
    %c0_5 = arith.constant 0 : index
    %3 = vector.load %arg1[%c1, %c0_4, %c0_5] : memref<2x8x128xf32, #tpu.memory_space<vmem>>, vector<1x8x128xf32>
    %4 = vector.shape_cast %3 : vector<1x8x128xf32> to vector<8x128xf32>
    %c0_6 = arith.constant 0 : index
    %c0_7 = arith.constant 0 : index
    %c0_8 = arith.constant 0 : index
    %5 = vector.load %arg2[%c0_6, %c0_7, %c0_8] : memref<2x8x128xf32, #tpu.memory_space<vmem>>, vector<1x8x128xf32>
    %6 = vector.shape_cast %5 : vector<1x8x128xf32> to vector<8x128xf32>
    %c1_9 = arith.constant 1 : index
    %c0_10 = arith.constant 0 : index
    %c0_11 = arith.constant 0 : index
    %7 = vector.load %arg2[%c1_9, %c0_10, %c0_11] : memref<2x8x128xf32, #tpu.memory_space<vmem>>, vector<1x8x128xf32>
    %8 = vector.shape_cast %7 : vector<1x8x128xf32> to vector<8x128xf32>
    %c0_12 = arith.constant 0 : index
    %c0_13 = arith.constant 0 : index
    %9 = vector.load %arg3[%c0_12, %c0_13] : memref<128x512xf32, #tpu.memory_space<vmem>>, vector<128x512xf32>
    %cst = arith.constant dense<0.000000e+00> : vector<8x512xf32>
    %10 = tpu.matmul %2, %9, %cst {dimension_numbers = #tpu.dot_dimension_numbers<[1], [0], [0], [1], [0, 0, 1, 1], [], []>} : vector<8x128xf32>, vector<128x512xf32>, vector<8x512xf32> -> vector<8x512xf32>
    %c0_14 = arith.constant 0 : index
    %c0_15 = arith.constant 0 : index
    %c0_16 = arith.constant 0 : index
    %11 = vector.load %arg0[%c0_14, %c0_15, %c0_16] : memref<8x8x512xf32, #tpu.memory_space<vmem>>, vector<1x8x512xf32>
    %12 = vector.shape_cast %11 : vector<1x8x512xf32> to vector<8x512xf32>
    %13 = arith.addf %12, %10 : vector<8x512xf32>
    %14 = vector.extract_strided_slice %13 {offsets = [0, 0], sizes = [8, 384], strides = [1, 1]} : vector<8x512xf32> to vector<8x384xf32>
    %15 = arith.negf %14 : vector<8x384xf32>
    %16 = math.exp %15 : vector<8x384xf32>
    %cst_17 = arith.constant 1.000000e+00 : f32
    %17 = vector.broadcast %cst_17 : f32 to vector<8x384xf32>
    %18 = arith.addf %17, %16 : vector<8x384xf32>
    %19 = arith.divf %17, %18 : vector<8x384xf32>
    %20 = vector.extract_strided_slice %13 {offsets = [0, 384], sizes = [8, 128], strides = [1, 1]} : vector<8x512xf32> to vector<8x128xf32>
    %21 = math.tanh %20 : vector<8x128xf32>
    %22 = vector.extract_strided_slice %19 {offsets = [0, 0], sizes = [8, 128], strides = [1, 1]} : vector<8x384xf32> to vector<8x128xf32>
    %23 = vector.extract_strided_slice %19 {offsets = [0, 128], sizes = [8, 128], strides = [1, 1]} : vector<8x384xf32> to vector<8x128xf32>
    %24 = vector.extract_strided_slice %19 {offsets = [0, 256], sizes = [8, 128], strides = [1, 1]} : vector<8x384xf32> to vector<8x128xf32>
    %25 = arith.mulf %23, %6 : vector<8x128xf32>
    %26 = arith.mulf %22, %21 : vector<8x128xf32>
    %27 = arith.addf %25, %26 : vector<8x128xf32>
    %28 = math.tanh %27 : vector<8x128xf32>
    %29 = arith.mulf %24, %28 : vector<8x128xf32>
    %c0_18 = arith.constant 0 : index
    %c0_19 = arith.constant 0 : index
    %30 = vector.load %arg5[%c0_18, %c0_19] : memref<128x512xf32, #tpu.memory_space<vmem>>, vector<128x512xf32>
    %cst_20 = arith.constant dense<0.000000e+00> : vector<8x512xf32>
    %31 = tpu.matmul %4, %30, %cst_20 {dimension_numbers = #tpu.dot_dimension_numbers<[1], [0], [0], [1], [0, 0, 1, 1], [], []>} : vector<8x128xf32>, vector<128x512xf32>, vector<8x512xf32> -> vector<8x512xf32>
    %c0_21 = arith.constant 0 : index
    %c0_22 = arith.constant 0 : index
    %32 = vector.load %arg4[%c0_21, %c0_22] : memref<128x512xf32, #tpu.memory_space<vmem>>, vector<128x512xf32>
    %cst_23 = arith.constant dense<0.000000e+00> : vector<8x512xf32>
    %33 = tpu.matmul %29, %32, %cst_23 {dimension_numbers = #tpu.dot_dimension_numbers<[1], [0], [0], [1], [0, 0, 1, 1], [], []>} : vector<8x128xf32>, vector<128x512xf32>, vector<8x512xf32> -> vector<8x512xf32>
    %34 = arith.addf %33, %31 : vector<8x512xf32>
    %35 = vector.broadcast %0 : vector<1x512xf32> to vector<8x512xf32>
    %36 = arith.addf %34, %35 : vector<8x512xf32>
    %37 = vector.extract_strided_slice %36 {offsets = [0, 0], sizes = [8, 384], strides = [1, 1]} : vector<8x512xf32> to vector<8x384xf32>
    %38 = arith.negf %37 : vector<8x384xf32>
    %39 = math.exp %38 : vector<8x384xf32>
    %cst_24 = arith.constant 1.000000e+00 : f32
    %40 = vector.broadcast %cst_24 : f32 to vector<8x384xf32>
    %41 = arith.addf %40, %39 : vector<8x384xf32>
    %42 = arith.divf %40, %41 : vector<8x384xf32>
    %43 = vector.extract_strided_slice %36 {offsets = [0, 384], sizes = [8, 128], strides = [1, 1]} : vector<8x512xf32> to vector<8x128xf32>
    %44 = math.tanh %43 : vector<8x128xf32>
    %45 = vector.extract_strided_slice %42 {offsets = [0, 0], sizes = [8, 128], strides = [1, 1]} : vector<8x384xf32> to vector<8x128xf32>
    %46 = vector.extract_strided_slice %42 {offsets = [0, 128], sizes = [8, 128], strides = [1, 1]} : vector<8x384xf32> to vector<8x128xf32>
    %47 = vector.extract_strided_slice %42 {offsets = [0, 256], sizes = [8, 128], strides = [1, 1]} : vector<8x384xf32> to vector<8x128xf32>
    %48 = arith.mulf %46, %8 : vector<8x128xf32>
    %49 = arith.mulf %45, %44 : vector<8x128xf32>
    %50 = arith.addf %48, %49 : vector<8x128xf32>
    %51 = math.tanh %50 : vector<8x128xf32>
    %52 = arith.mulf %47, %51 : vector<8x128xf32>
    %c0_25 = arith.constant 0 : index
    %c0_26 = arith.constant 0 : index
    %53 = vector.load %arg3[%c0_25, %c0_26] : memref<128x512xf32, #tpu.memory_space<vmem>>, vector<128x512xf32>
    %cst_27 = arith.constant dense<0.000000e+00> : vector<8x512xf32>
    %54 = tpu.matmul %29, %53, %cst_27 {dimension_numbers = #tpu.dot_dimension_numbers<[1], [0], [0], [1], [0, 0, 1, 1], [], []>} : vector<8x128xf32>, vector<128x512xf32>, vector<8x512xf32> -> vector<8x512xf32>
    %c1_28 = arith.constant 1 : index
    %c0_29 = arith.constant 0 : index
    %c0_30 = arith.constant 0 : index
    %55 = vector.load %arg0[%c1_28, %c0_29, %c0_30] : memref<8x8x512xf32, #tpu.memory_space<vmem>>, vector<1x8x512xf32>
    %56 = vector.shape_cast %55 : vector<1x8x512xf32> to vector<8x512xf32>
    %57 = arith.addf %56, %54 : vector<8x512xf32>
    %58 = vector.extract_strided_slice %57 {offsets = [0, 0], sizes = [8, 384], strides = [1, 1]} : vector<8x512xf32> to vector<8x384xf32>
    %59 = arith.negf %58 : vector<8x384xf32>
    %60 = math.exp %59 : vector<8x384xf32>
    %cst_31 = arith.constant 1.000000e+00 : f32
    %61 = vector.broadcast %cst_31 : f32 to vector<8x384xf32>
    %62 = arith.addf %61, %60 : vector<8x384xf32>
    %63 = arith.divf %61, %62 : vector<8x384xf32>
    %64 = vector.extract_strided_slice %57 {offsets = [0, 384], sizes = [8, 128], strides = [1, 1]} : vector<8x512xf32> to vector<8x128xf32>
    %65 = math.tanh %64 : vector<8x128xf32>
    %66 = vector.extract_strided_slice %63 {offsets = [0, 0], sizes = [8, 128], strides = [1, 1]} : vector<8x384xf32> to vector<8x128xf32>
    %67 = vector.extract_strided_slice %63 {offsets = [0, 128], sizes = [8, 128], strides = [1, 1]} : vector<8x384xf32> to vector<8x128xf32>
    %68 = vector.extract_strided_slice %63 {offsets = [0, 256], sizes = [8, 128], strides = [1, 1]} : vector<8x384xf32> to vector<8x128xf32>
    %69 = arith.mulf %67, %27 : vector<8x128xf32>
    %70 = arith.mulf %66, %65 : vector<8x128xf32>
    %71 = arith.addf %69, %70 : vector<8x128xf32>
    %72 = math.tanh %71 : vector<8x128xf32>
    %73 = arith.mulf %68, %72 : vector<8x128xf32>
    %c0_32 = arith.constant 0 : index
    %c0_33 = arith.constant 0 : index
    %74 = vector.load %arg5[%c0_32, %c0_33] : memref<128x512xf32, #tpu.memory_space<vmem>>, vector<128x512xf32>
    %cst_34 = arith.constant dense<0.000000e+00> : vector<8x512xf32>
    %75 = tpu.matmul %52, %74, %cst_34 {dimension_numbers = #tpu.dot_dimension_numbers<[1], [0], [0], [1], [0, 0, 1, 1], [], []>} : vector<8x128xf32>, vector<128x512xf32>, vector<8x512xf32> -> vector<8x512xf32>
    %c0_35 = arith.constant 0 : index
    %c0_36 = arith.constant 0 : index
    %76 = vector.load %arg4[%c0_35, %c0_36] : memref<128x512xf32, #tpu.memory_space<vmem>>, vector<128x512xf32>
    %cst_37 = arith.constant dense<0.000000e+00> : vector<8x512xf32>
    %77 = tpu.matmul %73, %76, %cst_37 {dimension_numbers = #tpu.dot_dimension_numbers<[1], [0], [0], [1], [0, 0, 1, 1], [], []>} : vector<8x128xf32>, vector<128x512xf32>, vector<8x512xf32> -> vector<8x512xf32>
    %78 = arith.addf %77, %75 : vector<8x512xf32>
    %79 = vector.broadcast %0 : vector<1x512xf32> to vector<8x512xf32>
    %80 = arith.addf %78, %79 : vector<8x512xf32>
    %81 = vector.extract_strided_slice %80 {offsets = [0, 0], sizes = [8, 384], strides = [1, 1]} : vector<8x512xf32> to vector<8x384xf32>
    %82 = arith.negf %81 : vector<8x384xf32>
    %83 = math.exp %82 : vector<8x384xf32>
    %cst_38 = arith.constant 1.000000e+00 : f32
    %84 = vector.broadcast %cst_38 : f32 to vector<8x384xf32>
    %85 = arith.addf %84, %83 : vector<8x384xf32>
    %86 = arith.divf %84, %85 : vector<8x384xf32>
    %87 = vector.extract_strided_slice %80 {offsets = [0, 384], sizes = [8, 128], strides = [1, 1]} : vector<8x512xf32> to vector<8x128xf32>
    %88 = math.tanh %87 : vector<8x128xf32>
    %89 = vector.extract_strided_slice %86 {offsets = [0, 0], sizes = [8, 128], strides = [1, 1]} : vector<8x384xf32> to vector<8x128xf32>
    %90 = vector.extract_strided_slice %86 {offsets = [0, 128], sizes = [8, 128], strides = [1, 1]} : vector<8x384xf32> to vector<8x128xf32>
    %91 = vector.extract_strided_slice %86 {offsets = [0, 256], sizes = [8, 128], strides = [1, 1]} : vector<8x384xf32> to vector<8x128xf32>
    %92 = arith.mulf %90, %50 : vector<8x128xf32>
    %93 = arith.mulf %89, %88 : vector<8x128xf32>
    %94 = arith.addf %92, %93 : vector<8x128xf32>
    %95 = math.tanh %94 : vector<8x128xf32>
    %96 = arith.mulf %91, %95 : vector<8x128xf32>
    %c0_39 = arith.constant 0 : index
    %c0_40 = arith.constant 0 : index
    %97 = vector.load %arg3[%c0_39, %c0_40] : memref<128x512xf32, #tpu.memory_space<vmem>>, vector<128x512xf32>
    %cst_41 = arith.constant dense<0.000000e+00> : vector<8x512xf32>
    %98 = tpu.matmul %73, %97, %cst_41 {dimension_numbers = #tpu.dot_dimension_numbers<[1], [0], [0], [1], [0, 0, 1, 1], [], []>} : vector<8x128xf32>, vector<128x512xf32>, vector<8x512xf32> -> vector<8x512xf32>
    %c2 = arith.constant 2 : index
    %c0_42 = arith.constant 0 : index
    %c0_43 = arith.constant 0 : index
    %99 = vector.load %arg0[%c2, %c0_42, %c0_43] : memref<8x8x512xf32, #tpu.memory_space<vmem>>, vector<1x8x512xf32>
    %100 = vector.shape_cast %99 : vector<1x8x512xf32> to vector<8x512xf32>
    %101 = arith.addf %100, %98 : vector<8x512xf32>
    %102 = vector.extract_strided_slice %101 {offsets = [0, 0], sizes = [8, 384], strides = [1, 1]} : vector<8x512xf32> to vector<8x384xf32>
    %103 = arith.negf %102 : vector<8x384xf32>
    %104 = math.exp %103 : vector<8x384xf32>
    %cst_44 = arith.constant 1.000000e+00 : f32
    %105 = vector.broadcast %cst_44 : f32 to vector<8x384xf32>
    %106 = arith.addf %105, %104 : vector<8x384xf32>
    %107 = arith.divf %105, %106 : vector<8x384xf32>
    %108 = vector.extract_strided_slice %101 {offsets = [0, 384], sizes = [8, 128], strides = [1, 1]} : vector<8x512xf32> to vector<8x128xf32>
    %109 = math.tanh %108 : vector<8x128xf32>
    %110 = vector.extract_strided_slice %107 {offsets = [0, 0], sizes = [8, 128], strides = [1, 1]} : vector<8x384xf32> to vector<8x128xf32>
    %111 = vector.extract_strided_slice %107 {offsets = [0, 128], sizes = [8, 128], strides = [1, 1]} : vector<8x384xf32> to vector<8x128xf32>
    %112 = vector.extract_strided_slice %107 {offsets = [0, 256], sizes = [8, 128], strides = [1, 1]} : vector<8x384xf32> to vector<8x128xf32>
    %113 = arith.mulf %111, %71 : vector<8x128xf32>
    %114 = arith.mulf %110, %109 : vector<8x128xf32>
    %115 = arith.addf %113, %114 : vector<8x128xf32>
    %116 = math.tanh %115 : vector<8x128xf32>
    %117 = arith.mulf %112, %116 : vector<8x128xf32>
    %c0_45 = arith.constant 0 : index
    %c0_46 = arith.constant 0 : index
    %118 = vector.load %arg5[%c0_45, %c0_46] : memref<128x512xf32, #tpu.memory_space<vmem>>, vector<128x512xf32>
    %cst_47 = arith.constant dense<0.000000e+00> : vector<8x512xf32>
    %119 = tpu.matmul %96, %118, %cst_47 {dimension_numbers = #tpu.dot_dimension_numbers<[1], [0], [0], [1], [0, 0, 1, 1], [], []>} : vector<8x128xf32>, vector<128x512xf32>, vector<8x512xf32> -> vector<8x512xf32>
    %c0_48 = arith.constant 0 : index
    %c0_49 = arith.constant 0 : index
    %120 = vector.load %arg4[%c0_48, %c0_49] : memref<128x512xf32, #tpu.memory_space<vmem>>, vector<128x512xf32>
    %cst_50 = arith.constant dense<0.000000e+00> : vector<8x512xf32>
    %121 = tpu.matmul %117, %120, %cst_50 {dimension_numbers = #tpu.dot_dimension_numbers<[1], [0], [0], [1], [0, 0, 1, 1], [], []>} : vector<8x128xf32>, vector<128x512xf32>, vector<8x512xf32> -> vector<8x512xf32>
    %122 = arith.addf %121, %119 : vector<8x512xf32>
    %123 = vector.broadcast %0 : vector<1x512xf32> to vector<8x512xf32>
    %124 = arith.addf %122, %123 : vector<8x512xf32>
    %125 = vector.extract_strided_slice %124 {offsets = [0, 0], sizes = [8, 384], strides = [1, 1]} : vector<8x512xf32> to vector<8x384xf32>
    %126 = arith.negf %125 : vector<8x384xf32>
    %127 = math.exp %126 : vector<8x384xf32>
    %cst_51 = arith.constant 1.000000e+00 : f32
    %128 = vector.broadcast %cst_51 : f32 to vector<8x384xf32>
    %129 = arith.addf %128, %127 : vector<8x384xf32>
    %130 = arith.divf %128, %129 : vector<8x384xf32>
    %131 = vector.extract_strided_slice %124 {offsets = [0, 384], sizes = [8, 128], strides = [1, 1]} : vector<8x512xf32> to vector<8x128xf32>
    %132 = math.tanh %131 : vector<8x128xf32>
    %133 = vector.extract_strided_slice %130 {offsets = [0, 0], sizes = [8, 128], strides = [1, 1]} : vector<8x384xf32> to vector<8x128xf32>
    %134 = vector.extract_strided_slice %130 {offsets = [0, 128], sizes = [8, 128], strides = [1, 1]} : vector<8x384xf32> to vector<8x128xf32>
    %135 = vector.extract_strided_slice %130 {offsets = [0, 256], sizes = [8, 128], strides = [1, 1]} : vector<8x384xf32> to vector<8x128xf32>
    %136 = arith.mulf %134, %94 : vector<8x128xf32>
    %137 = arith.mulf %133, %132 : vector<8x128xf32>
    %138 = arith.addf %136, %137 : vector<8x128xf32>
    %139 = math.tanh %138 : vector<8x128xf32>
    %140 = arith.mulf %135, %139 : vector<8x128xf32>
    %c0_52 = arith.constant 0 : index
    %c0_53 = arith.constant 0 : index
    %141 = vector.load %arg3[%c0_52, %c0_53] : memref<128x512xf32, #tpu.memory_space<vmem>>, vector<128x512xf32>
    %cst_54 = arith.constant dense<0.000000e+00> : vector<8x512xf32>
    %142 = tpu.matmul %117, %141, %cst_54 {dimension_numbers = #tpu.dot_dimension_numbers<[1], [0], [0], [1], [0, 0, 1, 1], [], []>} : vector<8x128xf32>, vector<128x512xf32>, vector<8x512xf32> -> vector<8x512xf32>
    %c3 = arith.constant 3 : index
    %c0_55 = arith.constant 0 : index
    %c0_56 = arith.constant 0 : index
    %143 = vector.load %arg0[%c3, %c0_55, %c0_56] : memref<8x8x512xf32, #tpu.memory_space<vmem>>, vector<1x8x512xf32>
    %144 = vector.shape_cast %143 : vector<1x8x512xf32> to vector<8x512xf32>
    %145 = arith.addf %144, %142 : vector<8x512xf32>
    %146 = vector.extract_strided_slice %145 {offsets = [0, 0], sizes = [8, 384], strides = [1, 1]} : vector<8x512xf32> to vector<8x384xf32>
    %147 = arith.negf %146 : vector<8x384xf32>
    %148 = math.exp %147 : vector<8x384xf32>
    %cst_57 = arith.constant 1.000000e+00 : f32
    %149 = vector.broadcast %cst_57 : f32 to vector<8x384xf32>
    %150 = arith.addf %149, %148 : vector<8x384xf32>
    %151 = arith.divf %149, %150 : vector<8x384xf32>
    %152 = vector.extract_strided_slice %145 {offsets = [0, 384], sizes = [8, 128], strides = [1, 1]} : vector<8x512xf32> to vector<8x128xf32>
    %153 = math.tanh %152 : vector<8x128xf32>
    %154 = vector.extract_strided_slice %151 {offsets = [0, 0], sizes = [8, 128], strides = [1, 1]} : vector<8x384xf32> to vector<8x128xf32>
    %155 = vector.extract_strided_slice %151 {offsets = [0, 128], sizes = [8, 128], strides = [1, 1]} : vector<8x384xf32> to vector<8x128xf32>
    %156 = vector.extract_strided_slice %151 {offsets = [0, 256], sizes = [8, 128], strides = [1, 1]} : vector<8x384xf32> to vector<8x128xf32>
    %157 = arith.mulf %155, %115 : vector<8x128xf32>
    %158 = arith.mulf %154, %153 : vector<8x128xf32>
    %159 = arith.addf %157, %158 : vector<8x128xf32>
    %160 = math.tanh %159 : vector<8x128xf32>
    %161 = arith.mulf %156, %160 : vector<8x128xf32>
    %c0_58 = arith.constant 0 : index
    %c0_59 = arith.constant 0 : index
    %162 = vector.load %arg5[%c0_58, %c0_59] : memref<128x512xf32, #tpu.memory_space<vmem>>, vector<128x512xf32>
    %cst_60 = arith.constant dense<0.000000e+00> : vector<8x512xf32>
    %163 = tpu.matmul %140, %162, %cst_60 {dimension_numbers = #tpu.dot_dimension_numbers<[1], [0], [0], [1], [0, 0, 1, 1], [], []>} : vector<8x128xf32>, vector<128x512xf32>, vector<8x512xf32> -> vector<8x512xf32>
    %c0_61 = arith.constant 0 : index
    %c0_62 = arith.constant 0 : index
    %164 = vector.load %arg4[%c0_61, %c0_62] : memref<128x512xf32, #tpu.memory_space<vmem>>, vector<128x512xf32>
    %cst_63 = arith.constant dense<0.000000e+00> : vector<8x512xf32>
    %165 = tpu.matmul %161, %164, %cst_63 {dimension_numbers = #tpu.dot_dimension_numbers<[1], [0], [0], [1], [0, 0, 1, 1], [], []>} : vector<8x128xf32>, vector<128x512xf32>, vector<8x512xf32> -> vector<8x512xf32>
    %166 = arith.addf %165, %163 : vector<8x512xf32>
    %167 = vector.broadcast %0 : vector<1x512xf32> to vector<8x512xf32>
    %168 = arith.addf %166, %167 : vector<8x512xf32>
    %169 = vector.extract_strided_slice %168 {offsets = [0, 0], sizes = [8, 384], strides = [1, 1]} : vector<8x512xf32> to vector<8x384xf32>
    %170 = arith.negf %169 : vector<8x384xf32>
    %171 = math.exp %170 : vector<8x384xf32>
    %cst_64 = arith.constant 1.000000e+00 : f32
    %172 = vector.broadcast %cst_64 : f32 to vector<8x384xf32>
    %173 = arith.addf %172, %171 : vector<8x384xf32>
    %174 = arith.divf %172, %173 : vector<8x384xf32>
    %175 = vector.extract_strided_slice %168 {offsets = [0, 384], sizes = [8, 128], strides = [1, 1]} : vector<8x512xf32> to vector<8x128xf32>
    %176 = math.tanh %175 : vector<8x128xf32>
    %177 = vector.extract_strided_slice %174 {offsets = [0, 0], sizes = [8, 128], strides = [1, 1]} : vector<8x384xf32> to vector<8x128xf32>
    %178 = vector.extract_strided_slice %174 {offsets = [0, 128], sizes = [8, 128], strides = [1, 1]} : vector<8x384xf32> to vector<8x128xf32>
    %179 = vector.extract_strided_slice %174 {offsets = [0, 256], sizes = [8, 128], strides = [1, 1]} : vector<8x384xf32> to vector<8x128xf32>
    %180 = arith.mulf %178, %138 : vector<8x128xf32>
    %181 = arith.mulf %177, %176 : vector<8x128xf32>
    %182 = arith.addf %180, %181 : vector<8x128xf32>
    %183 = math.tanh %182 : vector<8x128xf32>
    %184 = arith.mulf %179, %183 : vector<8x128xf32>
    %c0_65 = arith.constant 0 : index
    %c0_66 = arith.constant 0 : index
    %185 = vector.load %arg3[%c0_65, %c0_66] : memref<128x512xf32, #tpu.memory_space<vmem>>, vector<128x512xf32>
    %cst_67 = arith.constant dense<0.000000e+00> : vector<8x512xf32>
    %186 = tpu.matmul %161, %185, %cst_67 {dimension_numbers = #tpu.dot_dimension_numbers<[1], [0], [0], [1], [0, 0, 1, 1], [], []>} : vector<8x128xf32>, vector<128x512xf32>, vector<8x512xf32> -> vector<8x512xf32>
    %c4 = arith.constant 4 : index
    %c0_68 = arith.constant 0 : index
    %c0_69 = arith.constant 0 : index
    %187 = vector.load %arg0[%c4, %c0_68, %c0_69] : memref<8x8x512xf32, #tpu.memory_space<vmem>>, vector<1x8x512xf32>
    %188 = vector.shape_cast %187 : vector<1x8x512xf32> to vector<8x512xf32>
    %189 = arith.addf %188, %186 : vector<8x512xf32>
    %190 = vector.extract_strided_slice %189 {offsets = [0, 0], sizes = [8, 384], strides = [1, 1]} : vector<8x512xf32> to vector<8x384xf32>
    %191 = arith.negf %190 : vector<8x384xf32>
    %192 = math.exp %191 : vector<8x384xf32>
    %cst_70 = arith.constant 1.000000e+00 : f32
    %193 = vector.broadcast %cst_70 : f32 to vector<8x384xf32>
    %194 = arith.addf %193, %192 : vector<8x384xf32>
    %195 = arith.divf %193, %194 : vector<8x384xf32>
    %196 = vector.extract_strided_slice %189 {offsets = [0, 384], sizes = [8, 128], strides = [1, 1]} : vector<8x512xf32> to vector<8x128xf32>
    %197 = math.tanh %196 : vector<8x128xf32>
    %198 = vector.extract_strided_slice %195 {offsets = [0, 0], sizes = [8, 128], strides = [1, 1]} : vector<8x384xf32> to vector<8x128xf32>
    %199 = vector.extract_strided_slice %195 {offsets = [0, 128], sizes = [8, 128], strides = [1, 1]} : vector<8x384xf32> to vector<8x128xf32>
    %200 = vector.extract_strided_slice %195 {offsets = [0, 256], sizes = [8, 128], strides = [1, 1]} : vector<8x384xf32> to vector<8x128xf32>
    %201 = arith.mulf %199, %159 : vector<8x128xf32>
    %202 = arith.mulf %198, %197 : vector<8x128xf32>
    %203 = arith.addf %201, %202 : vector<8x128xf32>
    %204 = math.tanh %203 : vector<8x128xf32>
    %205 = arith.mulf %200, %204 : vector<8x128xf32>
    %c0_71 = arith.constant 0 : index
    %c0_72 = arith.constant 0 : index
    %206 = vector.load %arg5[%c0_71, %c0_72] : memref<128x512xf32, #tpu.memory_space<vmem>>, vector<128x512xf32>
    %cst_73 = arith.constant dense<0.000000e+00> : vector<8x512xf32>
    %207 = tpu.matmul %184, %206, %cst_73 {dimension_numbers = #tpu.dot_dimension_numbers<[1], [0], [0], [1], [0, 0, 1, 1], [], []>} : vector<8x128xf32>, vector<128x512xf32>, vector<8x512xf32> -> vector<8x512xf32>
    %c0_74 = arith.constant 0 : index
    %c0_75 = arith.constant 0 : index
    %208 = vector.load %arg4[%c0_74, %c0_75] : memref<128x512xf32, #tpu.memory_space<vmem>>, vector<128x512xf32>
    %cst_76 = arith.constant dense<0.000000e+00> : vector<8x512xf32>
    %209 = tpu.matmul %205, %208, %cst_76 {dimension_numbers = #tpu.dot_dimension_numbers<[1], [0], [0], [1], [0, 0, 1, 1], [], []>} : vector<8x128xf32>, vector<128x512xf32>, vector<8x512xf32> -> vector<8x512xf32>
    %210 = arith.addf %209, %207 : vector<8x512xf32>
    %211 = vector.broadcast %0 : vector<1x512xf32> to vector<8x512xf32>
    %212 = arith.addf %210, %211 : vector<8x512xf32>
    %213 = vector.extract_strided_slice %212 {offsets = [0, 0], sizes = [8, 384], strides = [1, 1]} : vector<8x512xf32> to vector<8x384xf32>
    %214 = arith.negf %213 : vector<8x384xf32>
    %215 = math.exp %214 : vector<8x384xf32>
    %cst_77 = arith.constant 1.000000e+00 : f32
    %216 = vector.broadcast %cst_77 : f32 to vector<8x384xf32>
    %217 = arith.addf %216, %215 : vector<8x384xf32>
    %218 = arith.divf %216, %217 : vector<8x384xf32>
    %219 = vector.extract_strided_slice %212 {offsets = [0, 384], sizes = [8, 128], strides = [1, 1]} : vector<8x512xf32> to vector<8x128xf32>
    %220 = math.tanh %219 : vector<8x128xf32>
    %221 = vector.extract_strided_slice %218 {offsets = [0, 0], sizes = [8, 128], strides = [1, 1]} : vector<8x384xf32> to vector<8x128xf32>
    %222 = vector.extract_strided_slice %218 {offsets = [0, 128], sizes = [8, 128], strides = [1, 1]} : vector<8x384xf32> to vector<8x128xf32>
    %223 = vector.extract_strided_slice %218 {offsets = [0, 256], sizes = [8, 128], strides = [1, 1]} : vector<8x384xf32> to vector<8x128xf32>
    %224 = arith.mulf %222, %182 : vector<8x128xf32>
    %225 = arith.mulf %221, %220 : vector<8x128xf32>
    %226 = arith.addf %224, %225 : vector<8x128xf32>
    %227 = math.tanh %226 : vector<8x128xf32>
    %228 = arith.mulf %223, %227 : vector<8x128xf32>
    %c0_78 = arith.constant 0 : index
    %c0_79 = arith.constant 0 : index
    %229 = vector.load %arg3[%c0_78, %c0_79] : memref<128x512xf32, #tpu.memory_space<vmem>>, vector<128x512xf32>
    %cst_80 = arith.constant dense<0.000000e+00> : vector<8x512xf32>
    %230 = tpu.matmul %205, %229, %cst_80 {dimension_numbers = #tpu.dot_dimension_numbers<[1], [0], [0], [1], [0, 0, 1, 1], [], []>} : vector<8x128xf32>, vector<128x512xf32>, vector<8x512xf32> -> vector<8x512xf32>
    %c5 = arith.constant 5 : index
    %c0_81 = arith.constant 0 : index
    %c0_82 = arith.constant 0 : index
    %231 = vector.load %arg0[%c5, %c0_81, %c0_82] : memref<8x8x512xf32, #tpu.memory_space<vmem>>, vector<1x8x512xf32>
    %232 = vector.shape_cast %231 : vector<1x8x512xf32> to vector<8x512xf32>
    %233 = arith.addf %232, %230 : vector<8x512xf32>
    %234 = vector.extract_strided_slice %233 {offsets = [0, 0], sizes = [8, 384], strides = [1, 1]} : vector<8x512xf32> to vector<8x384xf32>
    %235 = arith.negf %234 : vector<8x384xf32>
    %236 = math.exp %235 : vector<8x384xf32>
    %cst_83 = arith.constant 1.000000e+00 : f32
    %237 = vector.broadcast %cst_83 : f32 to vector<8x384xf32>
    %238 = arith.addf %237, %236 : vector<8x384xf32>
    %239 = arith.divf %237, %238 : vector<8x384xf32>
    %240 = vector.extract_strided_slice %233 {offsets = [0, 384], sizes = [8, 128], strides = [1, 1]} : vector<8x512xf32> to vector<8x128xf32>
    %241 = math.tanh %240 : vector<8x128xf32>
    %242 = vector.extract_strided_slice %239 {offsets = [0, 0], sizes = [8, 128], strides = [1, 1]} : vector<8x384xf32> to vector<8x128xf32>
    %243 = vector.extract_strided_slice %239 {offsets = [0, 128], sizes = [8, 128], strides = [1, 1]} : vector<8x384xf32> to vector<8x128xf32>
    %244 = vector.extract_strided_slice %239 {offsets = [0, 256], sizes = [8, 128], strides = [1, 1]} : vector<8x384xf32> to vector<8x128xf32>
    %245 = arith.mulf %243, %203 : vector<8x128xf32>
    %246 = arith.mulf %242, %241 : vector<8x128xf32>
    %247 = arith.addf %245, %246 : vector<8x128xf32>
    %248 = math.tanh %247 : vector<8x128xf32>
    %249 = arith.mulf %244, %248 : vector<8x128xf32>
    %c0_84 = arith.constant 0 : index
    %c0_85 = arith.constant 0 : index
    %250 = vector.load %arg5[%c0_84, %c0_85] : memref<128x512xf32, #tpu.memory_space<vmem>>, vector<128x512xf32>
    %cst_86 = arith.constant dense<0.000000e+00> : vector<8x512xf32>
    %251 = tpu.matmul %228, %250, %cst_86 {dimension_numbers = #tpu.dot_dimension_numbers<[1], [0], [0], [1], [0, 0, 1, 1], [], []>} : vector<8x128xf32>, vector<128x512xf32>, vector<8x512xf32> -> vector<8x512xf32>
    %c0_87 = arith.constant 0 : index
    %c0_88 = arith.constant 0 : index
    %252 = vector.load %arg4[%c0_87, %c0_88] : memref<128x512xf32, #tpu.memory_space<vmem>>, vector<128x512xf32>
    %cst_89 = arith.constant dense<0.000000e+00> : vector<8x512xf32>
    %253 = tpu.matmul %249, %252, %cst_89 {dimension_numbers = #tpu.dot_dimension_numbers<[1], [0], [0], [1], [0, 0, 1, 1], [], []>} : vector<8x128xf32>, vector<128x512xf32>, vector<8x512xf32> -> vector<8x512xf32>
    %254 = arith.addf %253, %251 : vector<8x512xf32>
    %255 = vector.broadcast %0 : vector<1x512xf32> to vector<8x512xf32>
    %256 = arith.addf %254, %255 : vector<8x512xf32>
    %257 = vector.extract_strided_slice %256 {offsets = [0, 0], sizes = [8, 384], strides = [1, 1]} : vector<8x512xf32> to vector<8x384xf32>
    %258 = arith.negf %257 : vector<8x384xf32>
    %259 = math.exp %258 : vector<8x384xf32>
    %cst_90 = arith.constant 1.000000e+00 : f32
    %260 = vector.broadcast %cst_90 : f32 to vector<8x384xf32>
    %261 = arith.addf %260, %259 : vector<8x384xf32>
    %262 = arith.divf %260, %261 : vector<8x384xf32>
    %263 = vector.extract_strided_slice %256 {offsets = [0, 384], sizes = [8, 128], strides = [1, 1]} : vector<8x512xf32> to vector<8x128xf32>
    %264 = math.tanh %263 : vector<8x128xf32>
    %265 = vector.extract_strided_slice %262 {offsets = [0, 0], sizes = [8, 128], strides = [1, 1]} : vector<8x384xf32> to vector<8x128xf32>
    %266 = vector.extract_strided_slice %262 {offsets = [0, 128], sizes = [8, 128], strides = [1, 1]} : vector<8x384xf32> to vector<8x128xf32>
    %267 = vector.extract_strided_slice %262 {offsets = [0, 256], sizes = [8, 128], strides = [1, 1]} : vector<8x384xf32> to vector<8x128xf32>
    %268 = arith.mulf %266, %226 : vector<8x128xf32>
    %269 = arith.mulf %265, %264 : vector<8x128xf32>
    %270 = arith.addf %268, %269 : vector<8x128xf32>
    %271 = math.tanh %270 : vector<8x128xf32>
    %272 = arith.mulf %267, %271 : vector<8x128xf32>
    %c0_91 = arith.constant 0 : index
    %c0_92 = arith.constant 0 : index
    %273 = vector.load %arg3[%c0_91, %c0_92] : memref<128x512xf32, #tpu.memory_space<vmem>>, vector<128x512xf32>
    %cst_93 = arith.constant dense<0.000000e+00> : vector<8x512xf32>
    %274 = tpu.matmul %249, %273, %cst_93 {dimension_numbers = #tpu.dot_dimension_numbers<[1], [0], [0], [1], [0, 0, 1, 1], [], []>} : vector<8x128xf32>, vector<128x512xf32>, vector<8x512xf32> -> vector<8x512xf32>
    %c6 = arith.constant 6 : index
    %c0_94 = arith.constant 0 : index
    %c0_95 = arith.constant 0 : index
    %275 = vector.load %arg0[%c6, %c0_94, %c0_95] : memref<8x8x512xf32, #tpu.memory_space<vmem>>, vector<1x8x512xf32>
    %276 = vector.shape_cast %275 : vector<1x8x512xf32> to vector<8x512xf32>
    %277 = arith.addf %276, %274 : vector<8x512xf32>
    %278 = vector.extract_strided_slice %277 {offsets = [0, 0], sizes = [8, 384], strides = [1, 1]} : vector<8x512xf32> to vector<8x384xf32>
    %279 = arith.negf %278 : vector<8x384xf32>
    %280 = math.exp %279 : vector<8x384xf32>
    %cst_96 = arith.constant 1.000000e+00 : f32
    %281 = vector.broadcast %cst_96 : f32 to vector<8x384xf32>
    %282 = arith.addf %281, %280 : vector<8x384xf32>
    %283 = arith.divf %281, %282 : vector<8x384xf32>
    %284 = vector.extract_strided_slice %277 {offsets = [0, 384], sizes = [8, 128], strides = [1, 1]} : vector<8x512xf32> to vector<8x128xf32>
    %285 = math.tanh %284 : vector<8x128xf32>
    %286 = vector.extract_strided_slice %283 {offsets = [0, 0], sizes = [8, 128], strides = [1, 1]} : vector<8x384xf32> to vector<8x128xf32>
    %287 = vector.extract_strided_slice %283 {offsets = [0, 128], sizes = [8, 128], strides = [1, 1]} : vector<8x384xf32> to vector<8x128xf32>
    %288 = vector.extract_strided_slice %283 {offsets = [0, 256], sizes = [8, 128], strides = [1, 1]} : vector<8x384xf32> to vector<8x128xf32>
    %289 = arith.mulf %287, %247 : vector<8x128xf32>
    %290 = arith.mulf %286, %285 : vector<8x128xf32>
    %291 = arith.addf %289, %290 : vector<8x128xf32>
    %292 = math.tanh %291 : vector<8x128xf32>
    %293 = arith.mulf %288, %292 : vector<8x128xf32>
    %c0_97 = arith.constant 0 : index
    %c0_98 = arith.constant 0 : index
    %294 = vector.load %arg5[%c0_97, %c0_98] : memref<128x512xf32, #tpu.memory_space<vmem>>, vector<128x512xf32>
    %cst_99 = arith.constant dense<0.000000e+00> : vector<8x512xf32>
    %295 = tpu.matmul %272, %294, %cst_99 {dimension_numbers = #tpu.dot_dimension_numbers<[1], [0], [0], [1], [0, 0, 1, 1], [], []>} : vector<8x128xf32>, vector<128x512xf32>, vector<8x512xf32> -> vector<8x512xf32>
    %c0_100 = arith.constant 0 : index
    %c0_101 = arith.constant 0 : index
    %296 = vector.load %arg4[%c0_100, %c0_101] : memref<128x512xf32, #tpu.memory_space<vmem>>, vector<128x512xf32>
    %cst_102 = arith.constant dense<0.000000e+00> : vector<8x512xf32>
    %297 = tpu.matmul %293, %296, %cst_102 {dimension_numbers = #tpu.dot_dimension_numbers<[1], [0], [0], [1], [0, 0, 1, 1], [], []>} : vector<8x128xf32>, vector<128x512xf32>, vector<8x512xf32> -> vector<8x512xf32>
    %298 = arith.addf %297, %295 : vector<8x512xf32>
    %299 = vector.broadcast %0 : vector<1x512xf32> to vector<8x512xf32>
    %300 = arith.addf %298, %299 : vector<8x512xf32>
    %301 = vector.extract_strided_slice %300 {offsets = [0, 0], sizes = [8, 384], strides = [1, 1]} : vector<8x512xf32> to vector<8x384xf32>
    %302 = arith.negf %301 : vector<8x384xf32>
    %303 = math.exp %302 : vector<8x384xf32>
    %cst_103 = arith.constant 1.000000e+00 : f32
    %304 = vector.broadcast %cst_103 : f32 to vector<8x384xf32>
    %305 = arith.addf %304, %303 : vector<8x384xf32>
    %306 = arith.divf %304, %305 : vector<8x384xf32>
    %307 = vector.extract_strided_slice %300 {offsets = [0, 384], sizes = [8, 128], strides = [1, 1]} : vector<8x512xf32> to vector<8x128xf32>
    %308 = math.tanh %307 : vector<8x128xf32>
    %309 = vector.extract_strided_slice %306 {offsets = [0, 0], sizes = [8, 128], strides = [1, 1]} : vector<8x384xf32> to vector<8x128xf32>
    %310 = vector.extract_strided_slice %306 {offsets = [0, 128], sizes = [8, 128], strides = [1, 1]} : vector<8x384xf32> to vector<8x128xf32>
    %311 = vector.extract_strided_slice %306 {offsets = [0, 256], sizes = [8, 128], strides = [1, 1]} : vector<8x384xf32> to vector<8x128xf32>
    %312 = arith.mulf %310, %270 : vector<8x128xf32>
    %313 = arith.mulf %309, %308 : vector<8x128xf32>
    %314 = arith.addf %312, %313 : vector<8x128xf32>
    %315 = math.tanh %314 : vector<8x128xf32>
    %316 = arith.mulf %311, %315 : vector<8x128xf32>
    %c0_104 = arith.constant 0 : index
    %c0_105 = arith.constant 0 : index
    %317 = vector.load %arg3[%c0_104, %c0_105] : memref<128x512xf32, #tpu.memory_space<vmem>>, vector<128x512xf32>
    %cst_106 = arith.constant dense<0.000000e+00> : vector<8x512xf32>
    %318 = tpu.matmul %293, %317, %cst_106 {dimension_numbers = #tpu.dot_dimension_numbers<[1], [0], [0], [1], [0, 0, 1, 1], [], []>} : vector<8x128xf32>, vector<128x512xf32>, vector<8x512xf32> -> vector<8x512xf32>
    %c7 = arith.constant 7 : index
    %c0_107 = arith.constant 0 : index
    %c0_108 = arith.constant 0 : index
    %319 = vector.load %arg0[%c7, %c0_107, %c0_108] : memref<8x8x512xf32, #tpu.memory_space<vmem>>, vector<1x8x512xf32>
    %320 = vector.shape_cast %319 : vector<1x8x512xf32> to vector<8x512xf32>
    %321 = arith.addf %320, %318 : vector<8x512xf32>
    %322 = vector.extract_strided_slice %321 {offsets = [0, 0], sizes = [8, 384], strides = [1, 1]} : vector<8x512xf32> to vector<8x384xf32>
    %323 = arith.negf %322 : vector<8x384xf32>
    %324 = math.exp %323 : vector<8x384xf32>
    %cst_109 = arith.constant 1.000000e+00 : f32
    %325 = vector.broadcast %cst_109 : f32 to vector<8x384xf32>
    %326 = arith.addf %325, %324 : vector<8x384xf32>
    %327 = arith.divf %325, %326 : vector<8x384xf32>
    %328 = vector.extract_strided_slice %321 {offsets = [0, 384], sizes = [8, 128], strides = [1, 1]} : vector<8x512xf32> to vector<8x128xf32>
    %329 = math.tanh %328 : vector<8x128xf32>
    %330 = vector.extract_strided_slice %327 {offsets = [0, 0], sizes = [8, 128], strides = [1, 1]} : vector<8x384xf32> to vector<8x128xf32>
    %331 = vector.extract_strided_slice %327 {offsets = [0, 128], sizes = [8, 128], strides = [1, 1]} : vector<8x384xf32> to vector<8x128xf32>
    %332 = vector.extract_strided_slice %327 {offsets = [0, 256], sizes = [8, 128], strides = [1, 1]} : vector<8x384xf32> to vector<8x128xf32>
    %333 = arith.mulf %331, %291 : vector<8x128xf32>
    %334 = arith.mulf %330, %329 : vector<8x128xf32>
    %335 = arith.addf %333, %334 : vector<8x128xf32>
    %336 = math.tanh %335 : vector<8x128xf32>
    %337 = arith.mulf %332, %336 : vector<8x128xf32>
    %c0_110 = arith.constant 0 : index
    %c0_111 = arith.constant 0 : index
    %338 = vector.load %arg5[%c0_110, %c0_111] : memref<128x512xf32, #tpu.memory_space<vmem>>, vector<128x512xf32>
    %cst_112 = arith.constant dense<0.000000e+00> : vector<8x512xf32>
    %339 = tpu.matmul %316, %338, %cst_112 {dimension_numbers = #tpu.dot_dimension_numbers<[1], [0], [0], [1], [0, 0, 1, 1], [], []>} : vector<8x128xf32>, vector<128x512xf32>, vector<8x512xf32> -> vector<8x512xf32>
    %c0_113 = arith.constant 0 : index
    %c0_114 = arith.constant 0 : index
    %340 = vector.load %arg4[%c0_113, %c0_114] : memref<128x512xf32, #tpu.memory_space<vmem>>, vector<128x512xf32>
    %cst_115 = arith.constant dense<0.000000e+00> : vector<8x512xf32>
    %341 = tpu.matmul %337, %340, %cst_115 {dimension_numbers = #tpu.dot_dimension_numbers<[1], [0], [0], [1], [0, 0, 1, 1], [], []>} : vector<8x128xf32>, vector<128x512xf32>, vector<8x512xf32> -> vector<8x512xf32>
    %342 = arith.addf %341, %339 : vector<8x512xf32>
    %343 = vector.broadcast %0 : vector<1x512xf32> to vector<8x512xf32>
    %344 = arith.addf %342, %343 : vector<8x512xf32>
    %345 = vector.extract_strided_slice %344 {offsets = [0, 0], sizes = [8, 384], strides = [1, 1]} : vector<8x512xf32> to vector<8x384xf32>
    %346 = arith.negf %345 : vector<8x384xf32>
    %347 = math.exp %346 : vector<8x384xf32>
    %cst_116 = arith.constant 1.000000e+00 : f32
    %348 = vector.broadcast %cst_116 : f32 to vector<8x384xf32>
    %349 = arith.addf %348, %347 : vector<8x384xf32>
    %350 = arith.divf %348, %349 : vector<8x384xf32>
    %351 = vector.extract_strided_slice %344 {offsets = [0, 384], sizes = [8, 128], strides = [1, 1]} : vector<8x512xf32> to vector<8x128xf32>
    %352 = math.tanh %351 : vector<8x128xf32>
    %353 = vector.extract_strided_slice %350 {offsets = [0, 0], sizes = [8, 128], strides = [1, 1]} : vector<8x384xf32> to vector<8x128xf32>
    %354 = vector.extract_strided_slice %350 {offsets = [0, 128], sizes = [8, 128], strides = [1, 1]} : vector<8x384xf32> to vector<8x128xf32>
    %355 = vector.extract_strided_slice %350 {offsets = [0, 256], sizes = [8, 128], strides = [1, 1]} : vector<8x384xf32> to vector<8x128xf32>
    %356 = arith.mulf %354, %314 : vector<8x128xf32>
    %357 = arith.mulf %353, %352 : vector<8x128xf32>
    %358 = arith.addf %356, %357 : vector<8x128xf32>
    %359 = math.tanh %358 : vector<8x128xf32>
    %360 = arith.mulf %355, %359 : vector<8x128xf32>
    %c0_117 = arith.constant 0 : index
    %c0_118 = arith.constant 0 : index
    %c0_119 = arith.constant 0 : index
    %361 = vector.load %arg9[%c0_117, %c0_118, %c0_119] : memref<2x8x128xf32, #tpu.memory_space<vmem>>, vector<1x8x128xf32>
    %362 = vector.shape_cast %361 : vector<1x8x128xf32> to vector<8x128xf32>
    %363 = vector.shape_cast %337 : vector<8x128xf32> to vector<1x8x128xf32>
    tpu.vector_store %arg9[%c0_117, %c0_118, %c0_119], %363 {strides = array<i32>} : memref<2x8x128xf32, #tpu.memory_space<vmem>>, vector<1x8x128xf32>,
    %c0_120 = arith.constant 0 : index
    %c0_121 = arith.constant 0 : index
    %c0_122 = arith.constant 0 : index
    %364 = vector.load %arg10[%c0_120, %c0_121, %c0_122] : memref<2x8x128xf32, #tpu.memory_space<vmem>>, vector<1x8x128xf32>
    %365 = vector.shape_cast %364 : vector<1x8x128xf32> to vector<8x128xf32>
    %366 = vector.shape_cast %335 : vector<8x128xf32> to vector<1x8x128xf32>
    tpu.vector_store %arg10[%c0_120, %c0_121, %c0_122], %366 {strides = array<i32>} : memref<2x8x128xf32, #tpu.memory_space<vmem>>, vector<1x8x128xf32>,
    %c1_123 = arith.constant 1 : index
    %c0_124 = arith.constant 0 : index
    %c0_125 = arith.constant 0 : index
    %367 = vector.load %arg9[%c1_123, %c0_124, %c0_125] : memref<2x8x128xf32, #tpu.memory_space<vmem>>, vector<1x8x128xf32>
    %368 = vector.shape_cast %367 : vector<1x8x128xf32> to vector<8x128xf32>
    %369 = vector.shape_cast %360 : vector<8x128xf32> to vector<1x8x128xf32>
    tpu.vector_store %arg9[%c1_123, %c0_124, %c0_125], %369 {strides = array<i32>} : memref<2x8x128xf32, #tpu.memory_space<vmem>>, vector<1x8x128xf32>,
    %c1_126 = arith.constant 1 : index
    %c0_127 = arith.constant 0 : index
    %c0_128 = arith.constant 0 : index
    %370 = vector.load %arg10[%c1_126, %c0_127, %c0_128] : memref<2x8x128xf32, #tpu.memory_space<vmem>>, vector<1x8x128xf32>
    %371 = vector.shape_cast %370 : vector<1x8x128xf32> to vector<8x128xf32>
    %372 = vector.shape_cast %358 : vector<8x128xf32> to vector<1x8x128xf32>
    tpu.vector_store %arg10[%c1_126, %c0_127, %c0_128], %372 {strides = array<i32>} : memref<2x8x128xf32, #tpu.memory_space<vmem>>, vector<1x8x128xf32>,
    %c0_129 = arith.constant 0 : index
    %c0_130 = arith.constant 0 : index
    %373 = vector.load %arg7[%c0_129, %c0_130] : memref<128x128xf32, #tpu.memory_space<vmem>>, vector<128x128xf32>
    %cst_131 = arith.constant dense<0.000000e+00> : vector<8x128xf32>
    %374 = tpu.matmul %360, %373, %cst_131 {dimension_numbers = #tpu.dot_dimension_numbers<[1], [0], [0], [1], [0, 0, 1, 1], [], []>} : vector<8x128xf32>, vector<128x128xf32>, vector<8x128xf32> -> vector<8x128xf32>
    %c0_132 = arith.constant 0 : index
    %c0_133 = arith.constant 0 : index
    %375 = vector.load %arg8[%c0_132, %c0_133] : memref<1x128xf32, #tpu.memory_space<vmem>>, vector<1x128xf32>
    %376 = vector.broadcast %375 : vector<1x128xf32> to vector<8x128xf32>
    %377 = arith.addf %374, %376 : vector<8x128xf32>
    %c0_134 = arith.constant 0 : index
    %c0_135 = arith.constant 0 : index
    %378 = vector.load %arg11[%c0_134, %c0_135] : memref<8x128xf32, #tpu.memory_space<vmem>>, vector<8x128xf32>
    tpu.vector_store %arg11[%c0_134, %c0_135], %377 {strides = array<i32>} : memref<8x128xf32, #tpu.memory_space<vmem>>, vector<8x128xf32>,
    return
  }
}

</mosaic_0001>

<bundles_post_ra>
// kernel: lstm_model_forward.1
= control target key start
LH: loop header
LB: loop body
LE: loop exit
PB: predicated region body
PF: predicated region fallthrough
CT: control target
= control target key end

     0   :  { %17 = vsyncpa [#allocation3], 0  ;;  %s8168_s0 = inlined_call_operand.vmem [shape: f32[8,8,512], index: 0, kind: input, shape index: {}]   ;;  %s8169_s1 = inlined_call_operand.vmem [shape: f32[2,8,128], index: 1, kind: input, shape index: {}]   ;;  %s8170_s2 = inlined_call_operand.vmem [shape: f32[2,8,128], index: 2, kind: input, shape index: {}]   ;;  %s8171_s3 = inlined_call_operand.hbm [shape: f32[128,512], index: 3, kind: input, shape index: {}]   ;;  %s8172_s4 = inlined_call_operand.hbm [shape: f32[128,512], index: 4, kind: input, shape index: {}]   ;;  %s8173_s5 = inlined_call_operand.hbm [shape: f32[128,512], index: 5, kind: input, shape index: {}]   ;;  %s8174_s6 = inlined_call_operand.vmem [shape: f32[1,512], index: 6, kind: input, shape index: {}]   ;;  %s8175_s7 = inlined_call_operand.vmem [shape: f32[128,128], index: 7, kind: input, shape index: {}]   ;;  %s8176_s8 = inlined_call_operand.vmem [shape: f32[1,128], index: 8, kind: input, shape index: {}]   ;;  %s8177_s9 = inlined_call_operand.vmem [shape: f32[2,8,128], index: 9, kind: output, shape index: {0}]   ;;  %s8178_s10 = inlined_call_operand.vmem [shape: f32[2,8,128], index: 10, kind: output, shape index: {1}]   ;;  %s8179_s11 = inlined_call_operand.vmem [shape: f32[8,128], index: 11, kind: output, shape index: {2}]  }
   0x1   :  { %18 = vsyncpa [#allocation5], 0  ;;  %s42_s19 = sshll.u32 %s8172_s4, 4  ;;  %s4376_s20 = smov [#allocation4]   ;;  %s43_s19 = int_to_ptr.hbm [resolvable:$true] %s42_s19 }
   0x2   :  { %s44_s21 = sshll.u32 %s4376_s20, 4  ;;  %s29_s24 = sshll.u32 %s8171_s3, 4  ;;  %s45_s21 = int_to_ptr.vmem [resolvable:$true] %s44_s21  ;;  %s30_s24 = int_to_ptr.hbm [resolvable:$true] %s29_s24 }
   0x3   :  { %s4377_s25 = smov 512   ;;  %s4378_s26 = smov 32  }
   0x4   :  { %50 = dma.hbm_to_vmem [thread:$0]  %s43_s19, 8192, %s45_s21, [#allocation5], %s4377_s25, %s4377_s25, %s4378_s26  }
   0x5   :  { %s4379_s27 = smov [#allocation2]   ;;  %s55_s12 = sshll.u32 %s8173_s5, 4  ;;  %s56_s12 = int_to_ptr.hbm [resolvable:$true] %s55_s12 }
   0x6   :  { %s31_s28 = sshll.u32 %s4379_s27, 4  ;;  %s4380_s4 = smov [#allocation6]   ;;  %s32_s28 = int_to_ptr.vmem [resolvable:$true] %s31_s28 }
   0x7   :  { %37 = dma.hbm_to_vmem [thread:$0]  %s30_s24, 8192, %s32_s28, [#allocation3], %s4377_s25, %s4377_s25, %s4378_s26  }
   0x8   :  { %s57_s13 = sshll.u32 %s4380_s4, 4  ;;  %s58_s13 = int_to_ptr.vmem [resolvable:$true] %s57_s13 }
   0x9   :  { %63 = dma.hbm_to_vmem [thread:$0]  %s56_s12, 8192, %s58_s13, [#allocation5], %s4377_s25, %s4377_s25, %s4378_s26  }
   0xa   :  { %4372 = dma.done.wait [#allocation3], 8192  }
   0xb   :  { %4373 = vsyncadd [#allocation3], 4294959104 }
   0xc   :  { %4374 = dma.done.wait [#allocation5], 16384  }
   0xd   :  { %4375 = vsyncadd [#allocation5], 4294950912  ;;  %v4450_v0 = vld [vmem:[#allocation2 + $0x1e0] sm:$0xff]  ;;  %v4452_v1 = vld [vmem:[#allocation2 + $0x1e8] sm:$0xff] }
   0xe   :  { %v4454_v2 = vld [vmem:[#allocation2 + $0x1f0] sm:$0xff]  ;;  %153 = vmatpush.msra.mxu0 %v4450_v0  ;;  %173 = vmatpush.msra.mxu1 %v4452_v1  ;;  %v4458_v3 = vld [vmem:[#allocation2 + $0x1c0] sm:$0xff]  ;;  %v4460_v4 = vld [vmem:[#allocation2 + $0x1c8] sm:$0xff] }
   0xf   :  { %v4462_v5 = vld [vmem:[#allocation2 + $0x1d0] sm:$0xff]  ;;  %193 = vmatpush.msra.mxu2 %v4454_v2  ;;  %v4465_v6 = vld [vmem:[#allocation2 + $0x1a0] sm:$0xff]  ;;  %v4467_v7 = vld [vmem:[#allocation2 + $0x1a8] sm:$0xff] }
  0x10   :  { %154 = vmatpush.msra.mxu0 %v4458_v3  ;;  %174 = vmatpush.msra.mxu1 %v4460_v4  ;;  %v4471_v8 = vld [vmem:[#allocation2 + $0x1b0] sm:$0xff]  ;;  %v4474_v9 = vld [vmem:[#allocation2 + $0x180] sm:$0xff]  ;;  %v4476_v10 = vld [vmem:[#allocation2 + $0x188] sm:$0xff] }
  0x11   :  { %194 = vmatpush.msra.mxu2 %v4462_v5  ;;  %v4480_v11 = vld [vmem:[#allocation2 + $0x190] sm:$0xff]  ;;  %v4483_v12 = vld [vmem:[#allocation2 + $0x160] sm:$0xff]  ;;  %v4485_v13 = vld [vmem:[#allocation2 + $0x168] sm:$0xff] }
  0x12   :  { %155 = vmatpush.msra.mxu0 %v4465_v6  ;;  %175 = vmatpush.msra.mxu1 %v4467_v7  ;;  %v4489_v14 = vld [vmem:[#allocation2 + $0x170] sm:$0xff]  ;;  %v4492_v15 = vld [vmem:[#allocation2 + $0x140] sm:$0xff]  ;;  %v4494_v16 = vld [vmem:[#allocation2 + $0x148] sm:$0xff] }
  0x13   :  { %195 = vmatpush.msra.mxu2 %v4471_v8  ;;  %v4496_v17 = vld [vmem:[#allocation2 + $0x1f8] sm:$0xff]  ;;  %v4500_v18 = vld [vmem:[#allocation2 + $0x150] sm:$0xff]  ;;  %v4505_v20 = vld [vmem:[#allocation2 + $0x120] sm:$0xff] }
  0x14   :  { %156 = vmatpush.msra.mxu0 %v4474_v9  ;;  %176 = vmatpush.msra.mxu1 %v4476_v10  ;;  %v4502_v19 = vld [vmem:[#allocation2 + $0x1d8] sm:$0xff]  ;;  %v4507_v21 = vld [vmem:[#allocation2 + $0x128] sm:$0xff]  ;;  %v4512_v22 = vld [vmem:[#allocation2 + $0x130] sm:$0xff] }
  0x15   :  { %196 = vmatpush.msra.mxu2 %v4480_v11  ;;  %213 = vmatpush.msra.mxu3 %v4496_v17  ;;  %v4514_v23 = vld [vmem:[#allocation2 + $0x1b8] sm:$0xff]  ;;  %v4517_v24 = vld [vmem:[#allocation2 + $0x100] sm:$0xff]  ;;  %v4519_v25 = vld [vmem:[#allocation2 + $0x108] sm:$0xff] }
  0x16   :  { %157 = vmatpush.msra.mxu0 %v4483_v12  ;;  %177 = vmatpush.msra.mxu1 %v4485_v13  ;;  %v4524_v26 = vld [vmem:[#allocation2 + $0x110] sm:$0xff]  ;;  %v4526_v27 = vld [vmem:[#allocation2 + $0x198] sm:$0xff]  ;;  %v4529_v28 = vld [vmem:[#allocation2 + $0xe0] sm:$0xff] }
  0x17   :  { %197 = vmatpush.msra.mxu2 %v4489_v14  ;;  %214 = vmatpush.msra.mxu3 %v4502_v19  ;;  %v4531_v29 = vld [vmem:[#allocation2 + $0xe8] sm:$0xff]  ;;  %v4536_v30 = vld [vmem:[#allocation2 + $0xf0] sm:$0xff]  ;;  %v4538_v31 = vld [vmem:[#allocation2 + $0x178] sm:$0xff] }
  0x18   :  { %158 = vmatpush.msra.mxu0 %v4492_v15  ;;  %178 = vmatpush.msra.mxu1 %v4494_v16  ;;  %v4541_v32 = vld [vmem:[#allocation2 + $0xc0] sm:$0xff]  ;;  %v4543_v33 = vld [vmem:[#allocation2 + $0xc8] sm:$0xff]  ;;  %v4548_v34 = vld [vmem:[#allocation2 + $0xd0] sm:$0xff] }
  0x19   :  { %198 = vmatpush.msra.mxu2 %v4500_v18  ;;  %215 = vmatpush.msra.mxu3 %v4514_v23  ;;  %v4550_v35 = vld [vmem:[#allocation2 + $0x158] sm:$0xff]  ;;  %v4553_v36 = vld [vmem:[#allocation2 + $0xa0] sm:$0xff]  ;;  %v4555_v37 = vld [vmem:[#allocation2 + $0xa8] sm:$0xff] }
  0x1a   :  { %159 = vmatpush.msra.mxu0 %v4505_v20  ;;  %179 = vmatpush.msra.mxu1 %v4507_v21  ;;  %v4560_v38 = vld [vmem:[#allocation2 + $0xb0] sm:$0xff]  ;;  %v4562_v39 = vld [vmem:[#allocation2 + $0x138] sm:$0xff]  ;;  %v4565_v40 = vld [vmem:[#allocation2 + $0x80] sm:$0xff] }
  0x1b   :  { %199 = vmatpush.msra.mxu2 %v4512_v22  ;;  %216 = vmatpush.msra.mxu3 %v4526_v27  ;;  %v4567_v41 = vld [vmem:[#allocation2 + $0x88] sm:$0xff]  ;;  %v4572_v42 = vld [vmem:[#allocation2 + $0x90] sm:$0xff]  ;;  %v4574_v43 = vld [vmem:[#allocation2 + $0x118] sm:$0xff] }
  0x1c   :  { %160 = vmatpush.msra.mxu0 %v4517_v24  ;;  %180 = vmatpush.msra.mxu1 %v4519_v25  ;;  %v4577_v44 = vld [vmem:[#allocation2 + $0x60] sm:$0xff]  ;;  %v4579_v45 = vld [vmem:[#allocation2 + $0x68] sm:$0xff]  ;;  %v4584_v46 = vld [vmem:[#allocation2 + $0x70] sm:$0xff] }
  0x1d   :  { %200 = vmatpush.msra.mxu2 %v4524_v26  ;;  %217 = vmatpush.msra.mxu3 %v4538_v31  ;;  %v4586_v47 = vld [vmem:[#allocation2 + $0xf8] sm:$0xff]  ;;  %v4589_v48 = vld [vmem:[#allocation2 + $0x40] sm:$0xff]  ;;  %v4591_v49 = vld [vmem:[#allocation2 + $0x48] sm:$0xff] }
  0x1e   :  { %161 = vmatpush.msra.mxu0 %v4529_v28  ;;  %181 = vmatpush.msra.mxu1 %v4531_v29  ;;  %8801 = vst [vmem:[#allocation9_spill] sm:$0xff] %v4589_v48  ;;  %v4596_v50 = vld [vmem:[#allocation2 + $0x50] sm:$0xff]  ;;  %v4598_v51 = vld [vmem:[#allocation2 + $0xd8] sm:$0xff]  ;;  %v4601_v52 = vld [vmem:[#allocation2 + $0x20] sm:$0xff] }
  0x1f   :  { %201 = vmatpush.msra.mxu2 %v4536_v30  ;;  %218 = vmatpush.msra.mxu3 %v4550_v35  ;;  %8802 = vst [vmem:[#allocation10_spill] sm:$0xff] %v4591_v49  ;;  %v4603_v53 = vld [vmem:[#allocation2 + $0x28] sm:$0xff]  ;;  %v4608_v54 = vld [vmem:[#allocation2 + $0x30] sm:$0xff]  ;;  %v4610_v55 = vld [vmem:[#allocation2 + $0xb8] sm:$0xff] }
  0x20   :  { %162 = vmatpush.msra.mxu0 %v4541_v32  ;;  %182 = vmatpush.msra.mxu1 %v4543_v33  ;;  %8803 = vst [vmem:[#allocation11_spill] sm:$0xff] %v4596_v50  ;;  %v4613_v56 = vld [vmem:[#allocation2] sm:$0xff]  ;;  %v4615_v57 = vld [vmem:[#allocation2 + $0x8] sm:$0xff]  ;;  %v4620_v58 = vld [vmem:[#allocation2 + $0x10] sm:$0xff] }
  0x21   :  { %202 = vmatpush.msra.mxu2 %v4548_v34  ;;  %219 = vmatpush.msra.mxu3 %v4562_v39  ;;  %8804 = vst [vmem:[#allocation12_spill] sm:$0xff] %v4601_v52  ;;  %v83_v59 = vld [vmem:[%s8169_s1] sm:$0xff]  ;;  %v4629_v60 = vld [vmem:[#allocation2 + $0x98] sm:$0xff]  ;;  %v4634_v62 = vld [vmem:[#allocation6 + $0x1e8] sm:$0xff] }
  0x22   :  { %163 = vmatpush.msra.mxu0 %v4553_v36  ;;  %183 = vmatpush.msra.mxu1 %v4555_v37  ;;  %8805 = vst [vmem:[#allocation13_spill] sm:$0xff] %v4603_v53  ;;  %v4631_v61 = vld [vmem:[#allocation6 + $0x1e0] sm:$0xff]  ;;  %v4636_v63 = vld [vmem:[#allocation6 + $0x1f0] sm:$0xff] }
  0x23   :  { %203 = vmatpush.msra.mxu2 %v4560_v38  ;;  %220 = vmatpush.msra.mxu3 %v4574_v43  ;;  %8806 = vst [vmem:[#allocation14_spill] sm:$0xff] %v4608_v54 }
  0x24   :  { %164 = vmatpush.msra.mxu0 %v4565_v40  ;;  %184 = vmatpush.msra.mxu1 %v4567_v41  ;;  %8807 = vst [vmem:[#allocation15_spill] sm:$0xff] %v4613_v56 }
  0x25   :  { %204 = vmatpush.msra.mxu2 %v4572_v42  ;;  %221 = vmatpush.msra.mxu3 %v4586_v47  ;;  %8808 = vst [vmem:[#allocation16_spill] sm:$0xff] %v4615_v57 }
  0x26   :  { %165 = vmatpush.msra.mxu0 %v4577_v44  ;;  %185 = vmatpush.msra.mxu1 %v4579_v45  ;;  %8809 = vst [vmem:[#allocation17_spill] sm:$0xff] %v4620_v58 }
  0x27   :  { %205 = vmatpush.msra.mxu2 %v4584_v46  ;;  %222 = vmatpush.msra.mxu3 %v4598_v51  ;;  %8810 = vst [vmem:[#allocation18_spill] sm:$0xff] %v4631_v61 }
  0x28   :  { %166 = vmatpush.msra.mxu0 %v4589_v48  ;;  %186 = vmatpush.msra.mxu1 %v4591_v49  ;;  %8811 = vst [vmem:[#allocation19_spill] sm:$0xff] %v4634_v62  ;;  %v4658_v49 = vld [vmem:[#allocation6 + $0x1b0] sm:$0xff]  ;;  %v4664_v48 = vld [vmem:[#allocation6 + $0x180] sm:$0xff] }
  0x29   :  { %206 = vmatpush.msra.mxu2 %v4596_v50  ;;  %223 = vmatpush.msra.mxu3 %v4610_v55  ;;  %8812 = vst [vmem:[#allocation20_spill] sm:$0xff] %v4636_v63  ;;  %v4656_v50 = vld [vmem:[#allocation6 + $0x1a8] sm:$0xff] }
  0x2a   :  { %167 = vmatpush.msra.mxu0 %v4601_v52  ;;  %187 = vmatpush.msra.mxu1 %v4603_v53  ;;  %v4640_v53 = vld [vmem:[#allocation6 + $0x1c0] sm:$0xff]  ;;  %8818 = vst [vmem:[#allocation26_spill] sm:$0xff] %v4656_v50 }
  0x2b   :  { %207 = vmatpush.msra.mxu2 %v4608_v54  ;;  %v4638_v54 = vld [vmem:[#allocation2 + $0x78] sm:$0xff]  ;;  %8814 = vst [vmem:[#allocation22_spill] sm:$0xff] %v4640_v53  ;;  %224 = vmatpush.msra.mxu3 %v4629_v60  ;;  %v4652_v52 = vld [vmem:[#allocation6 + $0x1a0] sm:$0xff] }
  0x2c   :  { %168 = vmatpush.msra.mxu0 %v4613_v56  ;;  %188 = vmatpush.msra.mxu1 %v4615_v57  ;;  %8813 = vst [vmem:[#allocation21_spill] sm:$0xff] %v4638_v54  ;;  %v4644_v57 = vld [vmem:[#allocation6 + $0x1c8] sm:$0xff]  ;;  %v4646_v56 = vld [vmem:[#allocation6 + $0x1d0] sm:$0xff] }
  0x2d   :  { %208 = vmatpush.msra.mxu2 %v4620_v58  ;;  %169 = vmatmul.f32.vlgmr.msra.gmra.mxu0 %v83_v59  ;;  %8815 = vst [vmem:[#allocation23_spill] sm:$0xff] %v4644_v57  ;;  %v4648_v58 = vld [vmem:[#allocation2 + $0x58] sm:$0xff] }
  0x2e   :  { %189 = vmatmul.f32.vlgmr.msra.gmra.mxu1 %v83_v59  ;;  %209 = vmatmul.f32.vlgmr.msra.gmra.mxu2 %v83_v59  ;;  %8816 = vst [vmem:[#allocation24_spill] sm:$0xff] %v4646_v56 }
  0x2f   :  { %368 = vmatpush.msrb.mxu0 %v4631_v61  ;;  %388 = vmatpush.msrb.mxu1 %v4634_v62  ;;  %8817 = vst [vmem:[#allocation25_spill] sm:$0xff] %v4652_v52  ;;  %v4660_v61 = vld [vmem:[#allocation2 + $0x38] sm:$0xff]  ;;  %v4670_v62 = vld [vmem:[#allocation6 + $0x190] sm:$0xff] }
  0x30   :  { %408 = vmatpush.msrb.mxu2 %v4636_v63  ;;  %225 = vmatpush.msra.mxu3 %v4638_v54  ;;  %8819 = vst [vmem:[#allocation27_spill] sm:$0xff] %v4658_v49  ;;  %v4668_v63 = vld [vmem:[#allocation6 + $0x188] sm:$0xff]  ;;  %v4676_v54 = vld [vmem:[#allocation6 + $0x160] sm:$0xff] }
  0x31   :  { %369 = vmatpush.msrb.mxu0 %v4640_v53  ;;  %8820 = vst [vmem:[#allocation28_spill] sm:$0xff] %v4660_v61  ;;  %389 = vmatpush.msrb.mxu1 %v4644_v57  ;;  %v4672_v53 = vld [vmem:[#allocation2 + $0x18] sm:$0xff] }
  0x32   :  { %409 = vmatpush.msrb.mxu2 %v4646_v56  ;;  %8821 = vst [vmem:[#allocation29_spill] sm:$0xff] %v4664_v48  ;;  %226 = vmatpush.msra.mxu3 %v4648_v58  ;;  %v4680_v56 = vld [vmem:[#allocation6 + $0x168] sm:$0xff]  ;;  %v4682_v57 = vld [vmem:[#allocation6 + $0x1f8] sm:$0xff] }
  0x33   :  { %370 = vmatpush.msrb.mxu0 %v4652_v52  ;;  %8822 = vst [vmem:[#allocation30_spill] sm:$0xff] %v4668_v63  ;;  %390 = vmatpush.msrb.mxu1 %v4656_v50  ;;  %v4686_v52 = vld [vmem:[#allocation6 + $0x170] sm:$0xff]  ;;  %v4692_v50 = vld [vmem:[#allocation6 + $0x148] sm:$0xff] }
  0x34   :  { %8823 = vst [vmem:[#allocation31_spill] sm:$0xff] %v4670_v62  ;;  %410 = vmatpush.msrb.mxu2 %v4658_v49  ;;  %227 = vmatpush.msra.mxu3 %v4660_v61  ;;  %v4690_v49 = vld [vmem:[#allocation6 + $0x140] sm:$0xff]  ;;  %v4697_v61 = vld [vmem:[#allocation6 + $0x150] sm:$0xff] }
  0x35   :  { %8824 = vst [vmem:[#allocation32_spill] sm:$0xff] %v4672_v53  ;;  %371 = vmatpush.msrb.mxu0 %v4664_v48  ;;  %391 = vmatpush.msrb.mxu1 %v4668_v63  ;;  %v4694_v48 = vld [vmem:[#allocation6 + $0x1d8] sm:$0xff]  ;;  %v4703_v63 = vld [vmem:[#allocation6 + $0x128] sm:$0xff] }
  0x36   :  { %8825 = vst [vmem:[#allocation33_spill] sm:$0xff] %v4676_v54  ;;  %411 = vmatpush.msrb.mxu2 %v4670_v62  ;;  %228 = vmatpush.msra.mxu3 %v4672_v53  ;;  %v4701_v62 = vld [vmem:[#allocation6 + $0x120] sm:$0xff]  ;;  %v4721_v53 = vld [vmem:[#allocation6 + $0x110] sm:$0xff] }
  0x37   :  { %8826 = vst [vmem:[#allocation34_spill] sm:$0xff] %v4680_v56  ;;  %372 = vmatpush.msrb.mxu0 %v4676_v54  ;;  %229 = vmatmul.f32.vlgmr.msra.gmra.mxu3 %v83_v59  ;;  %v4705_v54 = vld [vmem:[#allocation6 + $0x1b8] sm:$0xff]  ;;  %v4709_v59 = vld [vmem:[#allocation6 + $0x130] sm:$0xff] }
  0x38   :  { %8827 = vst [vmem:[#allocation35_spill] sm:$0xff] %v4682_v57  ;;  %392 = vmatpush.msrb.mxu1 %v4680_v56  ;;  %428 = vmatpush.msrb.mxu3 %v4682_v57  ;;  %v4713_v56 = vld [vmem:[#allocation6 + $0x100] sm:$0xff]  ;;  %v4715_v57 = vld [vmem:[#allocation6 + $0x108] sm:$0xff] }
  0x39   :  { %8828 = vst [vmem:[#allocation36_spill] sm:$0xff] %v4686_v52  ;;  %412 = vmatpush.msrb.mxu2 %v4686_v52  ;;  %373 = vmatpush.msrb.mxu0 %v4690_v49  ;;  %v4717_v52 = vld [vmem:[#allocation6 + $0x198] sm:$0xff] }
  0x3a   :  { %8829 = vst [vmem:[#allocation37_spill] sm:$0xff] %v4690_v49  ;;  %393 = vmatpush.msrb.mxu1 %v4692_v50  ;;  %429 = vmatpush.msrb.mxu3 %v4694_v48  ;;  %v4727_v49 = vld [vmem:[#allocation6 + $0xe8] sm:$0xff] }
  0x3b   :  { %8830 = vst [vmem:[#allocation38_spill] sm:$0xff] %v4692_v50  ;;  %413 = vmatpush.msrb.mxu2 %v4697_v61  ;;  %374 = vmatpush.msrb.mxu0 %v4701_v62  ;;  %v4725_v50 = vld [vmem:[#allocation6 + $0xe0] sm:$0xff] }
  0x3c   :  { %8831 = vst [vmem:[#allocation39_spill] sm:$0xff] %v4694_v48  ;;  %394 = vmatpush.msrb.mxu1 %v4703_v63  ;;  %430 = vmatpush.msrb.mxu3 %v4705_v54  ;;  %v4733_v48 = vld [vmem:[#allocation6 + $0xf0] sm:$0xff] }
  0x3d   :  { %8832 = vst [vmem:[#allocation40_spill] sm:$0xff] %v4697_v61  ;;  %414 = vmatpush.msrb.mxu2 %v4709_v59  ;;  %v4729_v61 = vld [vmem:[#allocation6 + $0x178] sm:$0xff]  ;;  %375 = vmatpush.msrb.mxu0 %v4713_v56 }
  0x3e   :  { %8833 = vst [vmem:[#allocation41_spill] sm:$0xff] %v4701_v62  ;;  %395 = vmatpush.msrb.mxu1 %v4715_v57  ;;  %431 = vmatpush.msrb.mxu3 %v4717_v52  ;;  %v4739_v62 = vld [vmem:[#allocation6 + $0xc8] sm:$0xff] }
  0x3f   :  { %8834 = vst [vmem:[#allocation42_spill] sm:$0xff] %v4703_v63  ;;  %415 = vmatpush.msrb.mxu2 %v4721_v53  ;;  %v4737_v63 = vld [vmem:[#allocation6 + $0xc0] sm:$0xff]  ;;  %376 = vmatpush.msrb.mxu0 %v4725_v50 }
  0x40   :  { %8835 = vst [vmem:[#allocation43_spill] sm:$0xff] %v4705_v54  ;;  %396 = vmatpush.msrb.mxu1 %v4727_v49  ;;  %v4745_v54 = vld [vmem:[#allocation6 + $0xd0] sm:$0xff]  ;;  %432 = vmatpush.msrb.mxu3 %v4729_v61 }
  0x41   :  { %8836 = vst [vmem:[#allocation44_spill] sm:$0xff] %v4709_v59  ;;  %v4741_v59 = vld [vmem:[#allocation6 + $0x158] sm:$0xff]  ;;  %416 = vmatpush.msrb.mxu2 %v4733_v48  ;;  %377 = vmatpush.msrb.mxu0 %v4737_v63 }
  0x42   :  { %8837 = vst [vmem:[#allocation45_spill] sm:$0xff] %v4713_v56  ;;  %v4751_v56 = vld [vmem:[#allocation6 + $0xa8] sm:$0xff]  ;;  %397 = vmatpush.msrb.mxu1 %v4739_v62  ;;  %433 = vmatpush.msrb.mxu3 %v4741_v59 }
  0x43   :  { %8838 = vst [vmem:[#allocation46_spill] sm:$0xff] %v4715_v57  ;;  %v4749_v57 = vld [vmem:[#allocation6 + $0xa0] sm:$0xff]  ;;  %417 = vmatpush.msrb.mxu2 %v4745_v54 }
  0x44   :  { %8839 = vst [vmem:[#allocation47_spill] sm:$0xff] %v4717_v52  ;;  %v4757_v52 = vld [vmem:[#allocation6 + $0xb0] sm:$0xff]  ;;  %378 = vmatpush.msrb.mxu0 %v4749_v57  ;;  %398 = vmatpush.msrb.mxu1 %v4751_v56 }
  0x45   :  { %8840 = vst [vmem:[#allocation48_spill] sm:$0xff] %v4721_v53  ;;  %v4753_v53 = vld [vmem:[#allocation6 + $0x138] sm:$0xff]  ;;  %418 = vmatpush.msrb.mxu2 %v4757_v52 }
  0x46   :  { %8841 = vst [vmem:[#allocation49_spill] sm:$0xff] %v4725_v50  ;;  %v4763_v50 = vld [vmem:[#allocation6 + $0x88] sm:$0xff]  ;;  %434 = vmatpush.msrb.mxu3 %v4753_v53 }
  0x47   :  { %8842 = vst [vmem:[#allocation50_spill] sm:$0xff] %v4727_v49  ;;  %v4761_v49 = vld [vmem:[#allocation6 + $0x80] sm:$0xff]  ;;  %399 = vmatpush.msrb.mxu1 %v4763_v50 }
  0x48   :  { %8843 = vst [vmem:[#allocation51_spill] sm:$0xff] %v4729_v61  ;;  %v4769_v61 = vld [vmem:[#allocation6 + $0x90] sm:$0xff]  ;;  %379 = vmatpush.msrb.mxu0 %v4761_v49 }
  0x49   :  { %8844 = vst [vmem:[#allocation52_spill] sm:$0xff] %v4733_v48  ;;  %v4765_v48 = vld [vmem:[#allocation6 + $0x118] sm:$0xff]  ;;  %419 = vmatpush.msrb.mxu2 %v4769_v61 }
  0x4a   :  { %8845 = vst [vmem:[#allocation53_spill] sm:$0xff] %v4737_v63  ;;  %v4775_v63 = vld [vmem:[#allocation6 + $0x68] sm:$0xff]  ;;  %435 = vmatpush.msrb.mxu3 %v4765_v48 }
  0x4b   :  { %8846 = vst [vmem:[#allocation54_spill] sm:$0xff] %v4739_v62  ;;  %v4773_v62 = vld [vmem:[#allocation6 + $0x60] sm:$0xff]  ;;  %400 = vmatpush.msrb.mxu1 %v4775_v63 }
  0x4c   :  { %8847 = vst [vmem:[#allocation55_spill] sm:$0xff] %v4741_v59  ;;  %v4781_v59 = vld [vmem:[#allocation6 + $0x70] sm:$0xff]  ;;  %380 = vmatpush.msrb.mxu0 %v4773_v62 }
  0x4d   :  { %8848 = vst [vmem:[#allocation56_spill] sm:$0xff] %v4745_v54  ;;  %v4777_v54 = vld [vmem:[#allocation6 + $0xf8] sm:$0xff]  ;;  %420 = vmatpush.msrb.mxu2 %v4781_v59 }
  0x4e   :  { %8849 = vst [vmem:[#allocation57_spill] sm:$0xff] %v4749_v57  ;;  %v4787_v57 = vld [vmem:[#allocation6 + $0x48] sm:$0xff]  ;;  %436 = vmatpush.msrb.mxu3 %v4777_v54 }
  0x4f   :  { %8850 = vst [vmem:[#allocation58_spill] sm:$0xff] %v4751_v56  ;;  %v4785_v56 = vld [vmem:[#allocation6 + $0x40] sm:$0xff]  ;;  %401 = vmatpush.msrb.mxu1 %v4787_v57 }
  0x50   :  { %8851 = vst [vmem:[#allocation59_spill] sm:$0xff] %v4753_v53  ;;  %v4793_v53 = vld [vmem:[#allocation6 + $0x50] sm:$0xff]  ;;  %381 = vmatpush.msrb.mxu0 %v4785_v56 }
  0x51   :  { %8852 = vst [vmem:[#allocation60_spill] sm:$0xff] %v4757_v52  ;;  %v4789_v52 = vld [vmem:[#allocation6 + $0xd8] sm:$0xff]  ;;  %421 = vmatpush.msrb.mxu2 %v4793_v53 }
  0x52   :  { %8853 = vst [vmem:[#allocation61_spill] sm:$0xff] %v4761_v49  ;;  %v4799_v49 = vld [vmem:[#allocation6 + $0x28] sm:$0xff]  ;;  %437 = vmatpush.msrb.mxu3 %v4789_v52 }
  0x53   :  { %8854 = vst [vmem:[#allocation62_spill] sm:$0xff] %v4763_v50  ;;  %v4797_v50 = vld [vmem:[#allocation6 + $0x20] sm:$0xff]  ;;  %402 = vmatpush.msrb.mxu1 %v4799_v49 }
  0x54   :  { %8855 = vst [vmem:[#allocation63_spill] sm:$0xff] %v4765_v48  ;;  %v4805_v48 = vld [vmem:[#allocation6 + $0x30] sm:$0xff]  ;;  %382 = vmatpush.msrb.mxu0 %v4797_v50 }
  0x55   :  { %8856 = vst [vmem:[#allocation64_spill] sm:$0xff] %v4769_v61  ;;  %v4801_v61 = vld [vmem:[#allocation6 + $0xb8] sm:$0xff]  ;;  %422 = vmatpush.msrb.mxu2 %v4805_v48 }
  0x56   :  { %8857 = vst [vmem:[#allocation65_spill] sm:$0xff] %v4773_v62  ;;  %v4811_v62 = vld [vmem:[#allocation6 + $0x8] sm:$0xff]  ;;  %438 = vmatpush.msrb.mxu3 %v4801_v61 }
  0x57   :  { %8858 = vst [vmem:[#allocation66_spill] sm:$0xff] %v4775_v63  ;;  %v4809_v63 = vld [vmem:[#allocation6] sm:$0xff]  ;;  %403 = vmatpush.msrb.mxu1 %v4811_v62 }
  0x58   :  { %8859 = vst [vmem:[#allocation67_spill] sm:$0xff] %v4777_v54  ;;  %v4817_v54 = vld [vmem:[#allocation6 + $0x10] sm:$0xff]  ;;  %383 = vmatpush.msrb.mxu0 %v4809_v63 }
  0x59   :  { %8860 = vst [vmem:[#allocation68_spill] sm:$0xff] %v4781_v59  ;;  %v4813_v59 = vld [vmem:[#allocation6 + $0x98] sm:$0xff]  ;;  %423 = vmatpush.msrb.mxu2 %v4817_v54 }
  0x5a   :  { %8861 = vst [vmem:[#allocation69_spill] sm:$0xff] %v4785_v56  ;;  %v4823_v56 = vld [vmem:[#allocation4 + $0x1e8] sm:$0xff]  ;;  %439 = vmatpush.msrb.mxu3 %v4813_v59 }
  0x5b   :  { %8862 = vst [vmem:[#allocation70_spill] sm:$0xff] %v4787_v57  ;;  %v4821_v57 = vld [vmem:[#allocation4 + $0x1e0] sm:$0xff]  ;;  %532 = vmatpush.msra.mxu1 %v4823_v56 }
  0x5c   :  { %8863 = vst [vmem:[#allocation71_spill] sm:$0xff] %v4789_v52  ;;  %v4829_v52 = vld [vmem:[#allocation4 + $0x1f0] sm:$0xff]  ;;  %512 = vmatpush.msra.mxu0 %v4821_v57 }
  0x5d   :  { %8864 = vst [vmem:[#allocation72_spill] sm:$0xff] %v4793_v53  ;;  %v4825_v53 = vld [vmem:[#allocation6 + $0x78] sm:$0xff]  ;;  %552 = vmatpush.msra.mxu2 %v4829_v52 }
  0x5e   :  { %8865 = vst [vmem:[#allocation73_spill] sm:$0xff] %v4797_v50  ;;  %v4835_v50 = vld [vmem:[#allocation4 + $0x1c8] sm:$0xff]  ;;  %440 = vmatpush.msrb.mxu3 %v4825_v53 }
  0x5f   :  { %8866 = vst [vmem:[#allocation74_spill] sm:$0xff] %v4799_v49  ;;  %v4833_v49 = vld [vmem:[#allocation4 + $0x1c0] sm:$0xff]  ;;  %533 = vmatpush.msra.mxu1 %v4835_v50 }
  0x60   :  { %8867 = vst [vmem:[#allocation75_spill] sm:$0xff] %v4801_v61  ;;  %v4841_v61 = vld [vmem:[#allocation4 + $0x1d0] sm:$0xff]  ;;  %513 = vmatpush.msra.mxu0 %v4833_v49 }
  0x61   :  { %8868 = vst [vmem:[#allocation76_spill] sm:$0xff] %v4805_v48  ;;  %v4837_v48 = vld [vmem:[#allocation6 + $0x58] sm:$0xff]  ;;  %553 = vmatpush.msra.mxu2 %v4841_v61 }
  0x62   :  { %8869 = vst [vmem:[#allocation77_spill] sm:$0xff] %v4809_v63  ;;  %v4847_v63 = vld [vmem:[#allocation4 + $0x1a8] sm:$0xff]  ;;  %441 = vmatpush.msrb.mxu3 %v4837_v48 }
  0x63   :  { %8870 = vst [vmem:[#allocation78_spill] sm:$0xff] %v4811_v62  ;;  %v4845_v62 = vld [vmem:[#allocation4 + $0x1a0] sm:$0xff]  ;;  %534 = vmatpush.msra.mxu1 %v4847_v63 }
  0x64   :  { %8871 = vst [vmem:[#allocation79_spill] sm:$0xff] %v4813_v59  ;;  %v4853_v59 = vld [vmem:[#allocation4 + $0x1b0] sm:$0xff]  ;;  %514 = vmatpush.msra.mxu0 %v4845_v62 }
  0x65   :  { %8872 = vst [vmem:[#allocation80_spill] sm:$0xff] %v4817_v54  ;;  %v4849_v54 = vld [vmem:[#allocation6 + $0x38] sm:$0xff]  ;;  %554 = vmatpush.msra.mxu2 %v4853_v59 }
  0x66   :  { %8873 = vst [vmem:[#allocation81_spill] sm:$0xff] %v4821_v57  ;;  %v4859_v57 = vld [vmem:[#allocation4 + $0x188] sm:$0xff]  ;;  %442 = vmatpush.msrb.mxu3 %v4849_v54 }
  0x67   :  { %8874 = vst [vmem:[#allocation82_spill] sm:$0xff] %v4823_v56  ;;  %v4857_v56 = vld [vmem:[#allocation4 + $0x180] sm:$0xff]  ;;  %535 = vmatpush.msra.mxu1 %v4859_v57 }
  0x68   :  { %8875 = vst [vmem:[#allocation83_spill] sm:$0xff] %v4825_v53  ;;  %v4865_v53 = vld [vmem:[#allocation4 + $0x190] sm:$0xff]  ;;  %515 = vmatpush.msra.mxu0 %v4857_v56 }
  0x69   :  { %8876 = vst [vmem:[#allocation84_spill] sm:$0xff] %v4829_v52  ;;  %v4861_v52 = vld [vmem:[#allocation6 + $0x18] sm:$0xff]  ;;  %555 = vmatpush.msra.mxu2 %v4865_v53 }
  0x6a   :  { %8877 = vst [vmem:[#allocation85_spill] sm:$0xff] %v4833_v49  ;;  %v4871_v49 = vld [vmem:[#allocation4 + $0x160] sm:$0xff]  ;;  %443 = vmatpush.msrb.mxu3 %v4861_v52 }
  0x6b   :  { %8878 = vst [vmem:[#allocation86_spill] sm:$0xff] %v4835_v50  ;;  %v4868_v50 = vld [vmem:[#allocation4 + $0x1f8] sm:$0xff]  ;;  %516 = vmatpush.msra.mxu0 %v4871_v49 }
  0x6c   :  { %8879 = vst [vmem:[#allocation87_spill] sm:$0xff] %v4837_v48  ;;  %v4877_v48 = vld [vmem:[#allocation4 + $0x170] sm:$0xff]  ;;  %572 = vmatpush.msra.mxu3 %v4868_v50 }
  0x6d   :  { %8880 = vst [vmem:[#allocation88_spill] sm:$0xff] %v4841_v61  ;;  %v4875_v61 = vld [vmem:[#allocation4 + $0x168] sm:$0xff]  ;;  %556 = vmatpush.msra.mxu2 %v4877_v48 }
  0x6e   :  { %8881 = vst [vmem:[#allocation89_spill] sm:$0xff] %v4845_v62  ;;  %536 = vmatpush.msra.mxu1 %v4875_v61  ;;  %v4929_v62 = vld [vmem:[#allocation4 + $0x118] sm:$0xff] }
  0x6f   :  { %8882 = vst [vmem:[#allocation90_spill] sm:$0xff] %v4847_v63  ;;  %v4880_v63 = vld [vmem:[#allocation4 + $0x1d8] sm:$0xff] }
  0x70   :  { %8883 = vst [vmem:[#allocation91_spill] sm:$0xff] %v4853_v59  ;;  %v4885_v59 = vld [vmem:[#allocation4 + $0x1b8] sm:$0xff]  ;;  %573 = vmatpush.msra.mxu3 %v4880_v63 }
  0x71   :  { %8884 = vst [vmem:[#allocation92_spill] sm:$0xff] %v4857_v56  ;;  %v4893_v56 = vld [vmem:[#allocation4 + $0x178] sm:$0xff] }
  0x72   :  { %8885 = vst [vmem:[#allocation93_spill] sm:$0xff] %v4859_v57  ;;  %v4890_v57 = vld [vmem:[#allocation4 + $0x198] sm:$0xff]  ;;  %574 = vmatpush.msra.mxu3 %v4885_v59 }
  0x73   :  { %8886 = vst [vmem:[#allocation94_spill] sm:$0xff] %v4865_v53  ;;  %v4897_v53 = vld [vmem:[#allocation4 + $0x140] sm:$0xff] }
  0x74   :  { %8887 = vst [vmem:[#allocation95_spill] sm:$0xff] %v4871_v49  ;;  %575 = vmatpush.msra.mxu3 %v4890_v57  ;;  %v4899_v49 = vld [vmem:[#allocation4 + $0x148] sm:$0xff]  ;;  %517 = vmatpush.msra.mxu0 %v4897_v53 }
  0x75   :  { %8888 = vst [vmem:[#allocation96_spill] sm:$0xff] %v4875_v61  ;;  %537 = vmatpush.msra.mxu1 %v4899_v49  ;;  %v4905_v61 = vld [vmem:[#allocation4 + $0x158] sm:$0xff] }
  0x76   :  { %8889 = vst [vmem:[#allocation97_spill] sm:$0xff] %v4877_v48  ;;  %576 = vmatpush.msra.mxu3 %v4893_v56  ;;  %v4903_v48 = vld [vmem:[#allocation4 + $0x150] sm:$0xff] }
  0x77   :  { %8890 = vst [vmem:[#allocation98_spill] sm:$0xff] %v4885_v59  ;;  %557 = vmatpush.msra.mxu2 %v4903_v48  ;;  %v4909_v59 = vld [vmem:[#allocation4 + $0x120] sm:$0xff] }
  0x78   :  { %8891 = vst [vmem:[#allocation99_spill] sm:$0xff] %v4890_v57  ;;  %577 = vmatpush.msra.mxu3 %v4905_v61  ;;  %v4911_v57 = vld [vmem:[#allocation4 + $0x128] sm:$0xff]  ;;  %518 = vmatpush.msra.mxu0 %v4909_v59 }
  0x79   :  { %8892 = vst [vmem:[#allocation100_spill] sm:$0xff] %v4893_v56  ;;  %v4913_v56 = vld [vmem:[#allocation4 + $0x130] sm:$0xff]  ;;  %538 = vmatpush.msra.mxu1 %v4911_v57 }
  0x7a   :  { %8893 = vst [vmem:[#allocation101_spill] sm:$0xff] %v4897_v53  ;;  %v4917_v53 = vld [vmem:[#allocation4 + $0x138] sm:$0xff]  ;;  %558 = vmatpush.msra.mxu2 %v4913_v56 }
  0x7b   :  { %8894 = vst [vmem:[#allocation102_spill] sm:$0xff] %v4899_v49  ;;  %578 = vmatpush.msra.mxu3 %v4917_v53  ;;  %v4921_v49 = vld [vmem:[#allocation4 + $0x100] sm:$0xff] }
  0x7c   :  { %8895 = vst [vmem:[#allocation103_spill] sm:$0xff] %v4903_v48  ;;  %v4923_v48 = vld [vmem:[#allocation4 + $0x108] sm:$0xff]  ;;  %519 = vmatpush.msra.mxu0 %v4921_v49 }
  0x7d   :  { %8896 = vst [vmem:[#allocation104_spill] sm:$0xff] %v4905_v61  ;;  %v4925_v61 = vld [vmem:[#allocation4 + $0x110] sm:$0xff]  ;;  %539 = vmatpush.msra.mxu1 %v4923_v48  ;;  %579 = vmatpush.msra.mxu3 %v4929_v62 }
  0x7e   :  { %8897 = vst [vmem:[#allocation105_spill] sm:$0xff] %v4909_v59  ;;  %559 = vmatpush.msra.mxu2 %v4925_v61  ;;  %v4941_v59 = vld [vmem:[#allocation4 + $0xf8] sm:$0xff] }
  0x7f   :  { %8898 = vst [vmem:[#allocation106_spill] sm:$0xff] %v4911_v57  ;;  %v4933_v57 = vld [vmem:[#allocation4 + $0xe0] sm:$0xff]  ;;  %580 = vmatpush.msra.mxu3 %v4941_v59 }
  0x80   :  { %8899 = vst [vmem:[#allocation107_spill] sm:$0xff] %v4913_v56  ;;  %v4935_v56 = vld [vmem:[#allocation4 + $0xe8] sm:$0xff]  ;;  %520 = vmatpush.msra.mxu0 %v4933_v57 }
  0x81   :  { %8900 = vst [vmem:[#allocation108_spill] sm:$0xff] %v4917_v53  ;;  %v4937_v53 = vld [vmem:[#allocation4 + $0xf0] sm:$0xff]  ;;  %540 = vmatpush.msra.mxu1 %v4935_v56 }
  0x82   :  { %8901 = vst [vmem:[#allocation109_spill] sm:$0xff] %v4921_v49  ;;  %560 = vmatpush.msra.mxu2 %v4937_v53  ;;  %v4953_v49 = vld [vmem:[#allocation4 + $0xd8] sm:$0xff] }
  0x83   :  { %8902 = vst [vmem:[#allocation110_spill] sm:$0xff] %v4923_v48  ;;  %v4945_v48 = vld [vmem:[#allocation4 + $0xc0] sm:$0xff]  ;;  %581 = vmatpush.msra.mxu3 %v4953_v49 }
  0x84   :  { %8903 = vst [vmem:[#allocation111_spill] sm:$0xff] %v4925_v61  ;;  %v4947_v61 = vld [vmem:[#allocation4 + $0xc8] sm:$0xff]  ;;  %521 = vmatpush.msra.mxu0 %v4945_v48 }
  0x85   :  { %8904 = vst [vmem:[#allocation112_spill] sm:$0xff] %v4929_v62  ;;  %v4949_v62 = vld [vmem:[#allocation4 + $0xd0] sm:$0xff]  ;;  %541 = vmatpush.msra.mxu1 %v4947_v61 }
  0x86   :  { %8905 = vst [vmem:[#allocation113_spill] sm:$0xff] %v4933_v57  ;;  %561 = vmatpush.msra.mxu2 %v4949_v62  ;;  %v4965_v57 = vld [vmem:[#allocation4 + $0xb8] sm:$0xff] }
  0x87   :  { %8906 = vst [vmem:[#allocation114_spill] sm:$0xff] %v4935_v56  ;;  %v4957_v56 = vld [vmem:[#allocation4 + $0xa0] sm:$0xff]  ;;  %582 = vmatpush.msra.mxu3 %v4965_v57 }
  0x88   :  { %8907 = vst [vmem:[#allocation115_spill] sm:$0xff] %v4937_v53  ;;  %v4959_v53 = vld [vmem:[#allocation4 + $0xa8] sm:$0xff]  ;;  %522 = vmatpush.msra.mxu0 %v4957_v56 }
  0x89   :  { %8908 = vst [vmem:[#allocation116_spill] sm:$0xff] %v4941_v59  ;;  %v4961_v59 = vld [vmem:[#allocation4 + $0xb0] sm:$0xff]  ;;  %542 = vmatpush.msra.mxu1 %v4959_v53 }
  0x8a   :  { %8909 = vst [vmem:[#allocation117_spill] sm:$0xff] %v4945_v48  ;;  %562 = vmatpush.msra.mxu2 %v4961_v59  ;;  %v4977_v48 = vld [vmem:[#allocation4 + $0x98] sm:$0xff] }
  0x8b   :  { %8910 = vst [vmem:[#allocation118_spill] sm:$0xff] %v4947_v61  ;;  %v4969_v61 = vld [vmem:[#allocation4 + $0x80] sm:$0xff]  ;;  %583 = vmatpush.msra.mxu3 %v4977_v48 }
  0x8c   :  { %8911 = vst [vmem:[#allocation119_spill] sm:$0xff] %v4949_v62  ;;  %v4971_v62 = vld [vmem:[#allocation4 + $0x88] sm:$0xff]  ;;  %523 = vmatpush.msra.mxu0 %v4969_v61 }
  0x8d   :  { %8912 = vst [vmem:[#allocation120_spill] sm:$0xff] %v4953_v49  ;;  %v4973_v49 = vld [vmem:[#allocation4 + $0x90] sm:$0xff]  ;;  %543 = vmatpush.msra.mxu1 %v4971_v62 }
  0x8e   :  { %8913 = vst [vmem:[#allocation121_spill] sm:$0xff] %v4957_v56  ;;  %563 = vmatpush.msra.mxu2 %v4973_v49  ;;  %v4989_v56 = vld [vmem:[#allocation4 + $0x78] sm:$0xff] }
  0x8f   :  { %8914 = vst [vmem:[#allocation122_spill] sm:$0xff] %v4959_v53  ;;  %v4981_v53 = vld [vmem:[#allocation4 + $0x60] sm:$0xff]  ;;  %584 = vmatpush.msra.mxu3 %v4989_v56 }
  0x90   :  { %8915 = vst [vmem:[#allocation123_spill] sm:$0xff] %v4961_v59  ;;  %v4983_v59 = vld [vmem:[#allocation4 + $0x68] sm:$0xff]  ;;  %524 = vmatpush.msra.mxu0 %v4981_v53 }
  0x91   :  { %8916 = vst [vmem:[#allocation124_spill] sm:$0xff] %v4965_v57  ;;  %v4985_v57 = vld [vmem:[#allocation4 + $0x70] sm:$0xff]  ;;  %544 = vmatpush.msra.mxu1 %v4983_v59 }
  0x92   :  { %8917 = vst [vmem:[#allocation125_spill] sm:$0xff] %v4969_v61  ;;  %564 = vmatpush.msra.mxu2 %v4985_v57  ;;  %v5001_v61 = vld [vmem:[#allocation4 + $0x58] sm:$0xff] }
  0x93   :  { %8918 = vst [vmem:[#allocation126_spill] sm:$0xff] %v4971_v62  ;;  %v4993_v62 = vld [vmem:[#allocation4 + $0x40] sm:$0xff]  ;;  %585 = vmatpush.msra.mxu3 %v5001_v61 }
  0x94   :  { %8919 = vst [vmem:[#allocation127_spill] sm:$0xff] %v4973_v49  ;;  %v4995_v49 = vld [vmem:[#allocation4 + $0x48] sm:$0xff]  ;;  %525 = vmatpush.msra.mxu0 %v4993_v62 }
  0x95   :  { %8920 = vst [vmem:[#allocation128_spill] sm:$0xff] %v4977_v48  ;;  %v4997_v48 = vld [vmem:[#allocation4 + $0x50] sm:$0xff]  ;;  %545 = vmatpush.msra.mxu1 %v4995_v49 }
  0x96   :  { %8921 = vst [vmem:[#allocation129_spill] sm:$0xff] %v4981_v53  ;;  %565 = vmatpush.msra.mxu2 %v4997_v48  ;;  %v5013_v53 = vld [vmem:[#allocation4 + $0x38] sm:$0xff] }
  0x97   :  { %8922 = vst [vmem:[#allocation130_spill] sm:$0xff] %v4983_v59  ;;  %v5005_v59 = vld [vmem:[#allocation4 + $0x20] sm:$0xff]  ;;  %586 = vmatpush.msra.mxu3 %v5013_v53 }
  0x98   :  { %8923 = vst [vmem:[#allocation131_spill] sm:$0xff] %v4985_v57  ;;  %v5007_v57 = vld [vmem:[#allocation4 + $0x28] sm:$0xff]  ;;  %526 = vmatpush.msra.mxu0 %v5005_v59 }
  0x99   :  { %8924 = vst [vmem:[#allocation132_spill] sm:$0xff] %v4989_v56  ;;  %v5009_v56 = vld [vmem:[#allocation4 + $0x30] sm:$0xff]  ;;  %546 = vmatpush.msra.mxu1 %v5007_v57 }
  0x9a   :  { %8925 = vst [vmem:[#allocation133_spill] sm:$0xff] %v4993_v62  ;;  %566 = vmatpush.msra.mxu2 %v5009_v56  ;;  %v5025_v62 = vld [vmem:[#allocation4 + $0x18] sm:$0xff] }
  0x9b   :  { %8926 = vst [vmem:[#allocation134_spill] sm:$0xff] %v4995_v49  ;;  %v5017_v49 = vld [vmem:[#allocation4] sm:$0xff]  ;;  %587 = vmatpush.msra.mxu3 %v5025_v62 }
  0x9c   :  { %8927 = vst [vmem:[#allocation135_spill] sm:$0xff] %v4997_v48  ;;  %v5019_v48 = vld [vmem:[#allocation4 + $0x8] sm:$0xff]  ;;  %527 = vmatpush.msra.mxu0 %v5017_v49 }
  0x9d   :  { %8928 = vst [vmem:[#allocation136_spill] sm:$0xff] %v5001_v61  ;;  %v5021_v61 = vld [vmem:[#allocation4 + $0x10] sm:$0xff]  ;;  %547 = vmatpush.msra.mxu1 %v5019_v48 }
  0x9e   :  { %8929 = vst [vmem:[#allocation137_spill] sm:$0xff] %v5013_v53  ;;  %567 = vmatpush.msra.mxu2 %v5021_v61  ;;  %v3382_v53 = vld [vmem:[%s8169_s1 + $0x8] sm:$0xff] }
  0x9f   :  { %384 = vmatmul.f32.vlgmr.msrb.gmra.mxu0 %v3382_v53  ;;  %404 = vmatmul.f32.vlgmr.msrb.gmra.mxu1 %v3382_v53 }
  0xa0   :  { %424 = vmatmul.f32.vlgmr.msrb.gmra.mxu2 %v3382_v53  ;;  %444 = vmatmul.f32.vlgmr.msrb.gmra.mxu3 %v3382_v53 }
  0xa1   :  { %668 = vmatpush.msrb.mxu0 %v4450_v0  ;;  %688 = vmatpush.msrb.mxu1 %v4452_v1  ;;  %v233_v0 = vld [vmem:[%s8168_s0] sm:$0xff]  ;;  %v234_v1 = vld [vmem:[%s8168_s0 + $0x8] sm:$0xff] }
  0xa2   :  { %708 = vmatpush.msrb.mxu2 %v4454_v2  ;;  %728 = vmatpush.msrb.mxu3 %v4496_v17 }
  0xa3   :  { %669 = vmatpush.msrb.mxu0 %v4458_v3  ;;  %689 = vmatpush.msrb.mxu1 %v4460_v4 }
  0xa4   :  { %709 = vmatpush.msrb.mxu2 %v4462_v5  ;;  %729 = vmatpush.msrb.mxu3 %v4502_v19 }
  0xa5   :  { %670 = vmatpush.msrb.mxu0 %v4465_v6  ;;  %690 = vmatpush.msrb.mxu1 %v4467_v7 }
  0xa6   :  { %710 = vmatpush.msrb.mxu2 %v4471_v8  ;;  %730 = vmatpush.msrb.mxu3 %v4514_v23  ;;  %v235_v8 = vld [vmem:[%s8168_s0 + $0x10] sm:$0xff]  ;;  %v8932_v23 = vld [vmem:[#allocation10_spill] sm:$0xff] }
  0xa7   :  { %671 = vmatpush.msrb.mxu0 %v4474_v9  ;;  %691 = vmatpush.msrb.mxu1 %v4476_v10 }
  0xa8   :  { %711 = vmatpush.msrb.mxu2 %v4480_v11  ;;  %731 = vmatpush.msrb.mxu3 %v4526_v27 }
  0xa9   :  { %672 = vmatpush.msrb.mxu0 %v4483_v12  ;;  %692 = vmatpush.msrb.mxu1 %v4485_v13 }
  0xaa   :  { %v170_v2 = vpop.f32.mrf.mxu0  ;;  %712 = vmatpush.msrb.mxu2 %v4489_v14  ;;  %732 = vmatpush.msrb.mxu3 %v4538_v31  ;;  %v8936_v31 = vld [vmem:[#allocation14_spill] sm:$0xff] }
  0xab   :  { %v237_v3 = vadd.f32 %v233_v0, %v170_v2  ;;  %v190_v4 = vpop.f32.mrf.mxu1  ;;  %673 = vmatpush.msrb.mxu0 %v4492_v15  ;;  %693 = vmatpush.msrb.mxu1 %v4494_v16  ;;  %v236_v16 = vld [vmem:[%s8168_s0 + $0x18] sm:$0xff] }
  0xac   :  { %v238_v5 = vadd.f32 %v234_v1, %v190_v4  ;;  %713 = vmatpush.msrb.mxu2 %v4500_v18  ;;  %733 = vmatpush.msrb.mxu3 %v4550_v35  ;;  %v8939_v35 = vld [vmem:[#allocation16_spill] sm:$0xff] }
  0xad   :  { %v3384_v6 = vmul.f32 -1.442695, %v237_v3  ;;  %674 = vmatpush.msrb.mxu0 %v4505_v20  ;;  %694 = vmatpush.msrb.mxu1 %v4507_v21  ;;  %v8930_v20 = vld [vmem:[#allocation21_spill] sm:$0xff] }
  0xae   :  { %v3385_v7 = vmul.f32 -1.442695, %v238_v5  ;;  %714 = vmatpush.msrb.mxu2 %v4512_v22  ;;  %734 = vmatpush.msrb.mxu3 %v4562_v39  ;;  %v8931_v22 = vld [vmem:[#allocation9_spill] sm:$0xff]  ;;  %v8941_v39 = vld [vmem:[#allocation32_spill] sm:$0xff] }
  0xaf   :  { %3468 = vpow2.f32 %v3384_v6  ;;  %675 = vmatpush.msrb.mxu0 %v4517_v24  ;;  %695 = vmatpush.msrb.mxu1 %v4519_v25  ;;  %v8933_v25 = vld [vmem:[#allocation11_spill] sm:$0xff] }
  0xb0   :  { %3470 = vpow2.f32 %v3385_v7  ;;  %715 = vmatpush.msrb.mxu2 %v4524_v26  ;;  %735 = vmatpush.msrb.mxu3 %v4574_v43 }
  0xb1   :  { %v210_v9 = vpop.f32.mrf.mxu2  ;;  %676 = vmatpush.msrb.mxu0 %v4529_v28  ;;  %696 = vmatpush.msrb.mxu1 %v4531_v29  ;;  %v8934_v28 = vld [vmem:[#allocation12_spill] sm:$0xff]  ;;  %v8935_v29 = vld [vmem:[#allocation13_spill] sm:$0xff] }
  0xb2   :  { %v239_v10 = vadd.f32 %v235_v8, %v210_v9  ;;  %716 = vmatpush.msrb.mxu2 %v4536_v30  ;;  %736 = vmatpush.msrb.mxu3 %v4586_v47 }
  0xb3   :  { %677 = vmatpush.msrb.mxu0 %v4541_v32  ;;  %697 = vmatpush.msrb.mxu1 %v4543_v33  ;;  %v8937_v32 = vld [vmem:[#allocation28_spill] sm:$0xff] }
  0xb4   :  { %v3386_v11 = vmul.f32 -1.442695, %v239_v10  ;;  %717 = vmatpush.msrb.mxu2 %v4548_v34  ;;  %737 = vmatpush.msrb.mxu3 %v4598_v51  ;;  %v8938_v34 = vld [vmem:[#allocation15_spill] sm:$0xff] }
  0xb5   :  { %v3469_v12 = vpop.eup %3468  ;;  %678 = vmatpush.msrb.mxu0 %v4553_v36  ;;  %698 = vmatpush.msrb.mxu1 %v4555_v37 }
  0xb6   :  { %v3471_v13 = vpop.eup %3470  ;;  %v5079_v14 = vadd.f32 1.0, %v3469_v12  ;;  %3472 = vpow2.f32 %v3386_v11  ;;  %718 = vmatpush.msrb.mxu2 %v4560_v38  ;;  %738 = vmatpush.msrb.mxu3 %v4610_v55  ;;  %v8940_v38 = vld [vmem:[#allocation17_spill] sm:$0xff] }
  0xb7   :  { %v5083_v15 = vadd.f32 1.0, %v3471_v13  ;;  %679 = vmatpush.msrb.mxu0 %v4565_v40  ;;  %699 = vmatpush.msrb.mxu1 %v4567_v41 }
  0xb8   :  { %3474 = vrcp.f32 %v5079_v14  ;;  %719 = vmatpush.msrb.mxu2 %v4572_v42  ;;  %739 = vmatpush.msrb.mxu3 %v4629_v60  ;;  %v264_v37 = vand.u32 2147483648, %v5079_v14  ;;  %v262_v42 = vand.u32 2147483647, %v5079_v14  ;;  %vm258_vm2 = vweird.f32 %v5079_v14  ;;  %v86_v60 = vld [vmem:[%s8170_s2] sm:$0xff] }
  0xb9   :  { %3476 = vrcp.f32 %v5083_v15  ;;  %680 = vmatpush.msrb.mxu0 %v4577_v44  ;;  %700 = vmatpush.msrb.mxu1 %v4579_v45  ;;  %v279_v40 = vand.u32 2147483648, %v5083_v15  ;;  %v277_v44 = vand.u32 2147483647, %v5083_v15  ;;  %vm273_vm3 = vweird.f32 %v5083_v15 }
  0xba   :  { %v230_v17 = vpop.f32.mrf.mxu3  ;;  %720 = vmatpush.msrb.mxu2 %v4584_v46  ;;  %740 = vmatpush.msrb.mxu3 %v8930_v20  ;;  %v265_v53 = vor.u32 1.1754944e-38, %v264_v37  ;;  %vm263_vm6 = vcmp.eq.f32.partialorder %v262_v42, 8.507059e+37  ;;  %v8945_v20 = vld [vmem:[#allocation35_spill] sm:$0xff]  ;;  %v8962_v37 = vld [vmem:[#allocation37_spill] sm:$0xff]  ;;  %v8967_v42 = vld [vmem:[#allocation42_spill] sm:$0xff] }
  0xbb   :  { %v240_v19 = vadd.f32 %v236_v16, %v230_v17  ;;  %681 = vmatpush.msrb.mxu0 %v8931_v22  ;;  %701 = vmatpush.msrb.mxu1 %v8932_v23  ;;  %vm278_vm7 = vcmp.eq.f32.partialorder %v277_v44, 8.507059e+37  ;;  %v8942_v17 = vld [vmem:[#allocation18_spill] sm:$0xff]  ;;  %v8947_v22 = vld [vmem:[#allocation23_spill] sm:$0xff]  ;;  %v8948_v23 = vld [vmem:[#allocation24_spill] sm:$0xff] }
  0xbc   :  { %v3473_v18 = vpop.eup %3472  ;;  %721 = vmatpush.msrb.mxu2 %v8933_v25  ;;  %741 = vmatpush.msrb.mxu3 %v4648_v58  ;;  %v280_v58 = vor.u32 1.1754944e-38, %v279_v40  ;;  %v8950_v25 = vld [vmem:[#allocation25_spill] sm:$0xff]  ;;  %v8965_v40 = vld [vmem:[#allocation55_spill] sm:$0xff] }
  0xbd   :  { %v252_v21 = vadd.f32 1.0, %v3473_v18  ;;  %682 = vmatpush.msrb.mxu0 %v8934_v28  ;;  %702 = vmatpush.msrb.mxu1 %v8935_v29  ;;  %v8943_v18 = vld [vmem:[#allocation19_spill] sm:$0xff]  ;;  %v8954_v29 = vld [vmem:[#allocation29_spill] sm:$0xff] }
  0xbe   :  { %v3475_v24 = vpop.eup %3474  ;;  %722 = vmatpush.msrb.mxu2 %v8936_v31  ;;  %742 = vmatpush.msrb.mxu3 %v8937_v32  ;;  %v8953_v28 = vld [vmem:[#allocation43_spill] sm:$0xff] }
  0xbf   :  { %v3477_v26 = vpop.eup %3476  ;;  %v254_v27 = vmul.f32 %v3475_v24, %v5079_v14  ;;  %3478 = vrcp.f32 %v252_v21  ;;  %683 = vmatpush.msrb.mxu0 %v8938_v34  ;;  %703 = vmatpush.msrb.mxu1 %v8939_v35  ;;  %vm259_vm0 = vweird.f32 %v3475_v24  ;;  %v294_v10 = vand.u32 2147483648, %v252_v21  ;;  %v8956_v31 = vld [vmem:[#allocation31_spill] sm:$0xff]  ;;  %v8959_v34 = vld [vmem:[#allocation34_spill] sm:$0xff]  ;;  %v8960_v35 = vld [vmem:[#allocation36_spill] sm:$0xff] }
  0xc0   :  { %v269_v30 = vmul.f32 %v3477_v26, %v5083_v15  ;;  %3480 = vtanh.f32 %v240_v19  ;;  %723 = vmatpush.msrb.mxu2 %v8940_v38  ;;  %743 = vmatpush.msrb.mxu3 %v8941_v39  ;;  %vm274_vm1 = vweird.f32 %v3477_v26  ;;  %vm260_vm4 = vmor %vm258_vm2, %vm259_vm0  ;;  %vm288_vm9 = vweird.f32 %v252_v21  ;;  %v8944_v19 = vld [vmem:[#allocation20_spill] sm:$0xff]  ;;  %v8957_v32 = vld [vmem:[#allocation47_spill] sm:$0xff] }
  0xc1   :  { %v255_v33 = vsub.f32 1.0, %v254_v27  ;;  %vm275_vm5 = vmor %vm273_vm3, %vm274_vm1  ;;  %v292_v11 = vand.u32 2147483647, %v252_v21  ;;  %v295_v13 = vor.u32 1.1754944e-38, %v294_v10  ;;  %v8952_v27 = vld [vmem:[#allocation27_spill] sm:$0xff]  ;;  %v8963_v38 = vld [vmem:[#allocation38_spill] sm:$0xff] }
  0xc2   :  { %v270_v36 = vsub.f32 1.0, %v269_v30  ;;  %v8955_v30 = vld [vmem:[#allocation30_spill] sm:$0xff]  ;;  %v8964_v39 = vld [vmem:[#allocation40_spill] sm:$0xff]  ;;  %v8969_v44 = vld [vmem:[#allocation59_spill] sm:$0xff] }
  0xc3   :  { %v256_v41 = vmul.f32 %v3475_v24, %v255_v33  ;;  %vm293_vm11 = vcmp.eq.f32.partialorder %v292_v11, 8.507059e+37  ;;  %v8958_v33 = vld [vmem:[#allocation33_spill] sm:$0xff]  ;;  %v8987_v10 = vld [vmem:[#allocation62_spill] sm:$0xff]  ;;  %v8988_v11 = vld [vmem:[#allocation64_spill] sm:$0xff] }
  0xc4   :  { %v271_v43 = vmul.f32 %v3477_v26, %v270_v36  ;;  %v8961_v36 = vld [vmem:[#allocation51_spill] sm:$0xff] }
  0xc5   :  { %v3479_v45 = vpop.eup %3478  ;;  %v257_v46 = vadd.f32 %v3475_v24, %v256_v41  ;;  %v8966_v41 = vld [vmem:[#allocation41_spill] sm:$0xff] }
  0xc6   :  { %v3481_v47 = vpop.eup %3480  ;;  %v284_v51 = vmul.f32 %v3479_v45, %v252_v21  ;;  %v272_v55 = vadd.f32 %v3477_v26, %v271_v43  ;;  %vm289_vm8 = vweird.f32 %v3479_v45  ;;  %v8946_v21 = vld [vmem:[#allocation22_spill] sm:$0xff]  ;;  %v8968_v43 = vld [vmem:[#allocation44_spill] sm:$0xff] }
  0xc7   :  { %v261_v0 = vsel %vm260_vm4, %v3475_v24, %v257_v46  ;;  %vm290_vm10 = vmor %vm288_vm9, %vm289_vm8  ;;  %v8949_v24 = vld [vmem:[#allocation39_spill] sm:$0xff]  ;;  %v8971_v46 = vld [vmem:[#allocation46_spill] sm:$0xff] }
  0xc8   :  { %v285_v1 = vsub.f32 1.0, %v284_v51  ;;  %v266_v2 = vsel %vm263_vm6, %v265_v53, %v261_v0  ;;  %v276_v3 = vsel %vm275_vm5, %v3477_v26, %v272_v55  ;;  %v8951_v26 = vld [vmem:[#allocation26_spill] sm:$0xff]  ;;  %v8973_v51 = vld [vmem:[#allocation63_spill] sm:$0xff]  ;;  %v8974_v53 = vld [vmem:[#allocation49_spill] sm:$0xff] }
  0xc9   :  { %v281_v4 = vsel %vm278_vm7, %v280_v58, %v276_v3  ;;  %v300_v5 = vmul.f32 %v3481_v47, %v266_v2  ;;  %v8972_v47 = vld [vmem:[#allocation48_spill] sm:$0xff]  ;;  %v8975_v55 = vld [vmem:[#allocation50_spill] sm:$0xff]  ;;  %v8978_v0 = vld [vmem:[#allocation53_spill] sm:$0xff] }
  0xca   :  { %v286_v6 = vmul.f32 %v3479_v45, %v285_v1  ;;  %v299_v7 = vmul.f32 %v281_v4, %v86_v60  ;;  %v8976_v58 = vld [vmem:[#allocation52_spill] sm:$0xff]  ;;  %v8977_v60 = vld [vmem:[#allocation67_spill] sm:$0xff]  ;;  %v8979_v1 = vld [vmem:[#allocation54_spill] sm:$0xff] }
  0xcb   :  { %v8980_v2 = vld [vmem:[#allocation56_spill] sm:$0xff]  ;;  %v8981_v3 = vld [vmem:[#allocation71_spill] sm:$0xff]  ;;  %v8982_v4 = vld [vmem:[#allocation57_spill] sm:$0xff] }
  0xcc   :  { %v5125_v8 = vadd.f32 %v300_v5, %v299_v7  ;;  %v287_v9 = vadd.f32 %v3479_v45, %v286_v6  ;;  %v8983_v5 = vld [vmem:[#allocation58_spill] sm:$0xff]  ;;  %v8984_v6 = vld [vmem:[#allocation60_spill] sm:$0xff]  ;;  %v8985_v7 = vld [vmem:[#allocation75_spill] sm:$0xff] }
  0xce   :  { %3482 = vtanh.f32 %v5125_v8  ;;  %v291_v12 = vsel %vm290_vm10, %v3479_v45, %v287_v9  ;;  %v8970_v45 = vld [vmem:[#allocation45_spill] sm:$0xff] }
  0xcf   :  { %v296_v15 = vsel %vm293_vm11, %v295_v13, %v291_v12  ;;  %v8986_v9 = vld [vmem:[#allocation61_spill] sm:$0xff]  ;;  %v8989_v12 = vld [vmem:[#allocation79_spill] sm:$0xff] }
  0xd0   :  { %v8990_v13 = vld [vmem:[#allocation65_spill] sm:$0xff] }
  0xd4   :  { %v3483_v14 = vpop.eup %3482 }
  0xd5   :  { %v303_v16 = vmul.f32 %v3483_v14, %v296_v15  ;;  %v8991_v14 = vld [vmem:[#allocation66_spill] sm:$0xff]  ;;  %v8992_v15 = vld [vmem:[#allocation68_spill] sm:$0xff] }
  0xd7   :  { %528 = vmatmul.f32.vlgmr.msra.gmra.mxu0 %v303_v16  ;;  %548 = vmatmul.f32.vlgmr.msra.gmra.mxu1 %v303_v16 }
  0xd8   :  { %568 = vmatmul.f32.vlgmr.msra.gmra.mxu2 %v303_v16  ;;  %588 = vmatmul.f32.vlgmr.msra.gmra.mxu3 %v303_v16 }
  0xd9   :  { %820 = vmatpush.msra.mxu0 %v8942_v17  ;;  %840 = vmatpush.msra.mxu1 %v8943_v18  ;;  %v8994_v17 = vld [vmem:[#allocation69_spill] sm:$0xff]  ;;  %v8995_v18 = vld [vmem:[#allocation70_spill] sm:$0xff] }
  0xda   :  { %860 = vmatpush.msra.mxu2 %v8944_v19  ;;  %880 = vmatpush.msra.mxu3 %v8945_v20  ;;  %v8996_v19 = vld [vmem:[#allocation72_spill] sm:$0xff]  ;;  %v8997_v20 = vld [vmem:[#allocation87_spill] sm:$0xff] }
  0xdb   :  { %821 = vmatpush.msra.mxu0 %v8946_v21  ;;  %841 = vmatpush.msra.mxu1 %v8947_v22  ;;  %v8998_v21 = vld [vmem:[#allocation73_spill] sm:$0xff]  ;;  %v8999_v22 = vld [vmem:[#allocation74_spill] sm:$0xff] }
  0xdc   :  { %861 = vmatpush.msra.mxu2 %v8948_v23  ;;  %881 = vmatpush.msra.mxu3 %v8949_v24  ;;  %v9000_v23 = vld [vmem:[#allocation76_spill] sm:$0xff]  ;;  %v9001_v24 = vld [vmem:[#allocation77_spill] sm:$0xff] }
  0xdd   :  { %822 = vmatpush.msra.mxu0 %v8950_v25  ;;  %842 = vmatpush.msra.mxu1 %v8951_v26  ;;  %v9002_v25 = vld [vmem:[#allocation78_spill] sm:$0xff]  ;;  %v9003_v26 = vld [vmem:[#allocation80_spill] sm:$0xff] }
  0xde   :  { %862 = vmatpush.msra.mxu2 %v8952_v27  ;;  %882 = vmatpush.msra.mxu3 %v8953_v28  ;;  %v9004_v27 = vld [vmem:[#allocation81_spill] sm:$0xff]  ;;  %v9005_v28 = vld [vmem:[#allocation82_spill] sm:$0xff] }
  0xdf   :  { %684 = vmatmul.f32.vlgmr.msrb.gmra.mxu0 %v303_v16  ;;  %704 = vmatmul.f32.vlgmr.msrb.gmra.mxu1 %v303_v16 }
  0xe0   :  { %724 = vmatmul.f32.vlgmr.msrb.gmra.mxu2 %v303_v16  ;;  %744 = vmatmul.f32.vlgmr.msrb.gmra.mxu3 %v303_v16  ;;  %v8993_v16 = vld [vmem:[#allocation83_spill] sm:$0xff] }
  0xe1   :  { %823 = vmatpush.msra.mxu0 %v8954_v29  ;;  %843 = vmatpush.msra.mxu1 %v8955_v30  ;;  %v9006_v29 = vld [vmem:[#allocation84_spill] sm:$0xff]  ;;  %v9007_v30 = vld [vmem:[#allocation85_spill] sm:$0xff] }
  0xe2   :  { %863 = vmatpush.msra.mxu2 %v8956_v31  ;;  %883 = vmatpush.msra.mxu3 %v8957_v32  ;;  %v9008_v31 = vld [vmem:[#allocation86_spill] sm:$0xff]  ;;  %v9010_v32 = vld [vmem:[#allocation89_spill] sm:$0xff] }
  0xe3   :  { %824 = vmatpush.msra.mxu0 %v8958_v33  ;;  %844 = vmatpush.msra.mxu1 %v8959_v34  ;;  %v9011_v33 = vld [vmem:[#allocation90_spill] sm:$0xff] }
  0xe4   :  { %864 = vmatpush.msra.mxu2 %v8960_v35  ;;  %884 = vmatpush.msra.mxu3 %v8961_v36  ;;  %v9013_v34 = vld [vmem:[#allocation98_spill] sm:$0xff]  ;;  %v9014_v35 = vld [vmem:[#allocation92_spill] sm:$0xff]  ;;  %v9015_v36 = vld [vmem:[#allocation93_spill] sm:$0xff] }
  0xe5   :  { %825 = vmatpush.msra.mxu0 %v8962_v37  ;;  %845 = vmatpush.msra.mxu1 %v8963_v38  ;;  %v9017_v37 = vld [vmem:[#allocation99_spill] sm:$0xff] }
  0xe6   :  { %865 = vmatpush.msra.mxu2 %v8964_v39  ;;  %885 = vmatpush.msra.mxu3 %v8965_v40  ;;  %v9018_v38 = vld [vmem:[#allocation95_spill] sm:$0xff]  ;;  %v9019_v39 = vld [vmem:[#allocation96_spill] sm:$0xff] }
  0xe7   :  { %826 = vmatpush.msra.mxu0 %v8966_v41  ;;  %846 = vmatpush.msra.mxu1 %v8967_v42  ;;  %v9021_v40 = vld [vmem:[#allocation100_spill] sm:$0xff]  ;;  %v9022_v41 = vld [vmem:[#allocation101_spill] sm:$0xff]  ;;  %v9023_v42 = vld [vmem:[#allocation102_spill] sm:$0xff] }
  0xe8   :  { %866 = vmatpush.msra.mxu2 %v8968_v43  ;;  %886 = vmatpush.msra.mxu3 %v8969_v44  ;;  %v9024_v43 = vld [vmem:[#allocation103_spill] sm:$0xff]  ;;  %v9025_v44 = vld [vmem:[#allocation104_spill] sm:$0xff] }
  0xe9   :  { %827 = vmatpush.msra.mxu0 %v8970_v45  ;;  %847 = vmatpush.msra.mxu1 %v8971_v46  ;;  %v9026_v45 = vld [vmem:[#allocation105_spill] sm:$0xff]  ;;  %v9027_v46 = vld [vmem:[#allocation106_spill] sm:$0xff] }
  0xea   :  { %867 = vmatpush.msra.mxu2 %v8972_v47  ;;  %887 = vmatpush.msra.mxu3 %v8973_v51  ;;  %v9028_v47 = vld [vmem:[#allocation107_spill] sm:$0xff]  ;;  %v9029_v51 = vld [vmem:[#allocation108_spill] sm:$0xff] }
  0xeb   :  { %828 = vmatpush.msra.mxu0 %v8974_v53  ;;  %848 = vmatpush.msra.mxu1 %v8975_v55  ;;  %v9030_v53 = vld [vmem:[#allocation109_spill] sm:$0xff]  ;;  %v9031_v55 = vld [vmem:[#allocation110_spill] sm:$0xff] }
  0xec   :  { %868 = vmatpush.msra.mxu2 %v8976_v58  ;;  %888 = vmatpush.msra.mxu3 %v8977_v60  ;;  %v9032_v58 = vld [vmem:[#allocation111_spill] sm:$0xff]  ;;  %v9033_v60 = vld [vmem:[#allocation112_spill] sm:$0xff] }
  0xed   :  { %829 = vmatpush.msra.mxu0 %v8978_v0  ;;  %849 = vmatpush.msra.mxu1 %v8979_v1  ;;  %v9034_v0 = vld [vmem:[#allocation113_spill] sm:$0xff]  ;;  %v9035_v1 = vld [vmem:[#allocation114_spill] sm:$0xff] }
  0xee   :  { %869 = vmatpush.msra.mxu2 %v8980_v2  ;;  %889 = vmatpush.msra.mxu3 %v8981_v3  ;;  %v9036_v2 = vld [vmem:[#allocation115_spill] sm:$0xff]  ;;  %v9037_v3 = vld [vmem:[#allocation116_spill] sm:$0xff] }
  0xef   :  { %830 = vmatpush.msra.mxu0 %v8982_v4  ;;  %850 = vmatpush.msra.mxu1 %v8983_v5  ;;  %v9038_v4 = vld [vmem:[#allocation117_spill] sm:$0xff]  ;;  %v9039_v5 = vld [vmem:[#allocation118_spill] sm:$0xff] }
  0xf0   :  { %870 = vmatpush.msra.mxu2 %v8984_v6  ;;  %890 = vmatpush.msra.mxu3 %v8985_v7  ;;  %v9040_v6 = vld [vmem:[#allocation119_spill] sm:$0xff]  ;;  %v9041_v7 = vld [vmem:[#allocation120_spill] sm:$0xff] }
  0xf1   :  { %831 = vmatpush.msra.mxu0 %v8986_v9  ;;  %851 = vmatpush.msra.mxu1 %v8987_v10  ;;  %v9042_v9 = vld [vmem:[#allocation121_spill] sm:$0xff]  ;;  %v9043_v10 = vld [vmem:[#allocation122_spill] sm:$0xff] }
  0xf2   :  { %871 = vmatpush.msra.mxu2 %v8988_v11  ;;  %891 = vmatpush.msra.mxu3 %v8989_v12  ;;  %v9044_v11 = vld [vmem:[#allocation123_spill] sm:$0xff]  ;;  %v9045_v12 = vld [vmem:[#allocation124_spill] sm:$0xff] }
  0xf3   :  { %832 = vmatpush.msra.mxu0 %v8990_v13  ;;  %852 = vmatpush.msra.mxu1 %v8991_v14  ;;  %v9046_v13 = vld [vmem:[#allocation125_spill] sm:$0xff]  ;;  %v9047_v14 = vld [vmem:[#allocation126_spill] sm:$0xff] }
  0xf4   :  { %872 = vmatpush.msra.mxu2 %v8992_v15  ;;  %892 = vmatpush.msra.mxu3 %v8993_v16  ;;  %v9048_v15 = vld [vmem:[#allocation127_spill] sm:$0xff]  ;;  %v9049_v16 = vld [vmem:[#allocation128_spill] sm:$0xff] }
  0xf5   :  { %833 = vmatpush.msra.mxu0 %v8994_v17  ;;  %853 = vmatpush.msra.mxu1 %v8995_v18  ;;  %v9050_v17 = vld [vmem:[#allocation129_spill] sm:$0xff]  ;;  %v9051_v18 = vld [vmem:[#allocation130_spill] sm:$0xff] }
  0xf6   :  { %873 = vmatpush.msra.mxu2 %v8996_v19  ;;  %893 = vmatpush.msra.mxu3 %v8997_v20  ;;  %v9052_v19 = vld [vmem:[#allocation131_spill] sm:$0xff]  ;;  %v9053_v20 = vld [vmem:[#allocation132_spill] sm:$0xff] }
  0xf7   :  { %834 = vmatpush.msra.mxu0 %v8998_v21  ;;  %854 = vmatpush.msra.mxu1 %v8999_v22  ;;  %v9054_v21 = vld [vmem:[#allocation133_spill] sm:$0xff]  ;;  %v9055_v22 = vld [vmem:[#allocation134_spill] sm:$0xff] }
  0xf8   :  { %874 = vmatpush.msra.mxu2 %v9000_v23  ;;  %894 = vmatpush.msra.mxu3 %v4849_v54  ;;  %v9009_v54 = vld [vmem:[#allocation88_spill] sm:$0xff]  ;;  %v9056_v23 = vld [vmem:[#allocation135_spill] sm:$0xff] }
  0xf9   :  { %835 = vmatpush.msra.mxu0 %v9001_v24  ;;  %855 = vmatpush.msra.mxu1 %v9002_v25  ;;  %v9057_v24 = vld [vmem:[#allocation136_spill] sm:$0xff]  ;;  %v9058_v25 = vld [vmem:[#allocation137_spill] sm:$0xff] }
  0xfa   :  { %875 = vmatpush.msra.mxu2 %v9003_v26  ;;  %895 = vmatpush.msra.mxu3 %v4861_v52  ;;  %v9012_v52 = vld [vmem:[#allocation91_spill] sm:$0xff] }
  0xfb   :  { %900 = vmatpush.msrb.mxu0 %v9004_v27  ;;  %920 = vmatpush.msrb.mxu1 %v9005_v28 }
  0xfc   :  { %940 = vmatpush.msrb.mxu2 %v9006_v29  ;;  %960 = vmatpush.msrb.mxu3 %v4868_v50  ;;  %v9016_v50 = vld [vmem:[#allocation94_spill] sm:$0xff] }
  0xfd   :  { %901 = vmatpush.msrb.mxu0 %v9007_v30  ;;  %921 = vmatpush.msrb.mxu1 %v9008_v31 }
  0xfe   :  { %941 = vmatpush.msrb.mxu2 %v9009_v54  ;;  %961 = vmatpush.msrb.mxu3 %v4880_v63  ;;  %v9020_v63 = vld [vmem:[#allocation97_spill] sm:$0xff] }
  0xff   :  { %902 = vmatpush.msrb.mxu0 %v9010_v32  ;;  %922 = vmatpush.msrb.mxu1 %v9011_v33 }
 0x100   :  { %942 = vmatpush.msrb.mxu2 %v9012_v52  ;;  %962 = vmatpush.msrb.mxu3 %v9013_v34  ;;  %v3390_v52 = vld [vmem:[%s8168_s0 + $0x20] sm:$0xff]  ;;  %v3391_v34 = vld [vmem:[%s8168_s0 + $0x28] sm:$0xff] }
 0x101   :  { %903 = vmatpush.msrb.mxu0 %v9014_v35  ;;  %923 = vmatpush.msrb.mxu1 %v9015_v36 }
 0x102   :  { %943 = vmatpush.msrb.mxu2 %v9016_v50  ;;  %963 = vmatpush.msrb.mxu3 %v9017_v37 }
 0x103   :  { %904 = vmatpush.msrb.mxu0 %v9018_v38  ;;  %924 = vmatpush.msrb.mxu1 %v9019_v39 }
 0x104   :  { %944 = vmatpush.msrb.mxu2 %v9020_v63  ;;  %964 = vmatpush.msrb.mxu3 %v9021_v40 }
 0x105   :  { %905 = vmatpush.msrb.mxu0 %v9022_v41  ;;  %925 = vmatpush.msrb.mxu1 %v9023_v42 }
 0x106   :  { %945 = vmatpush.msrb.mxu2 %v9024_v43  ;;  %965 = vmatpush.msrb.mxu3 %v9025_v44 }
 0x107   :  { %906 = vmatpush.msrb.mxu0 %v9026_v45  ;;  %926 = vmatpush.msrb.mxu1 %v9027_v46 }
 0x108   :  { %946 = vmatpush.msrb.mxu2 %v9028_v47  ;;  %966 = vmatpush.msrb.mxu3 %v9029_v51 }
 0x109   :  { %907 = vmatpush.msrb.mxu0 %v9030_v53  ;;  %927 = vmatpush.msrb.mxu1 %v9031_v55 }
 0x10a   :  { %947 = vmatpush.msrb.mxu2 %v9032_v58  ;;  %967 = vmatpush.msrb.mxu3 %v9033_v60  ;;  %v3392_v58 = vld [vmem:[%s8168_s0 + $0x30] sm:$0xff] }
 0x10b   :  { %908 = vmatpush.msrb.mxu0 %v9034_v0  ;;  %928 = vmatpush.msrb.mxu1 %v9035_v1 }
 0x10c   :  { %948 = vmatpush.msrb.mxu2 %v9036_v2  ;;  %968 = vmatpush.msrb.mxu3 %v9037_v3 }
 0x10d   :  { %909 = vmatpush.msrb.mxu0 %v9038_v4  ;;  %929 = vmatpush.msrb.mxu1 %v9039_v5 }
 0x10e   :  { %949 = vmatpush.msrb.mxu2 %v9040_v6  ;;  %969 = vmatpush.msrb.mxu3 %v9041_v7 }
 0x10f   :  { %910 = vmatpush.msrb.mxu0 %v9042_v9  ;;  %930 = vmatpush.msrb.mxu1 %v9043_v10  ;;  %v3393_v9 = vld [vmem:[%s8168_s0 + $0x38] sm:$0xff] }
 0x110   :  { %950 = vmatpush.msrb.mxu2 %v9044_v11  ;;  %970 = vmatpush.msrb.mxu3 %v9045_v12 }
 0x111   :  { %911 = vmatpush.msrb.mxu0 %v9046_v13  ;;  %931 = vmatpush.msrb.mxu1 %v9047_v14 }
 0x112   :  { %951 = vmatpush.msrb.mxu2 %v9048_v15  ;;  %971 = vmatpush.msrb.mxu3 %v9049_v16 }
 0x113   :  { %912 = vmatpush.msrb.mxu0 %v9050_v17  ;;  %932 = vmatpush.msrb.mxu1 %v9051_v18 }
 0x114   :  { %952 = vmatpush.msrb.mxu2 %v9052_v19  ;;  %972 = vmatpush.msrb.mxu3 %v9053_v20 }
 0x115   :  { %913 = vmatpush.msrb.mxu0 %v9054_v21  ;;  %933 = vmatpush.msrb.mxu1 %v9055_v22 }
 0x116   :  { %953 = vmatpush.msrb.mxu2 %v9056_v23  ;;  %973 = vmatpush.msrb.mxu3 %v9057_v24 }
 0x117   :  { %914 = vmatpush.msrb.mxu0 %v5005_v59  ;;  %934 = vmatpush.msrb.mxu1 %v5007_v57  ;;  %v82_v59 = vld [vmem:[%s8174_s6] sm:$0xf] }
 0x118   :  { %954 = vmatpush.msrb.mxu2 %v5009_v56  ;;  %974 = vmatpush.msrb.mxu3 %v9058_v25  ;;  %v5259_v29 = vperm.slane %v82_v59, 0  ;;  %v5261_v56 = vperm.slane %v82_v59, 1  ;;  %v5265_v33 = vperm.slane %v82_v59, 2  ;;  %v5274_v46 = vperm.slane %v82_v59, 3 }
 0x119   :  { %915 = vmatpush.msrb.mxu0 %v5017_v49  ;;  %935 = vmatpush.msrb.mxu1 %v5019_v48 }
 0x11a   :  { %955 = vmatpush.msrb.mxu2 %v5021_v61  ;;  %975 = vmatpush.msrb.mxu3 %v5025_v62  ;;  %9059 = vst [vmem:[#allocation21_spill] sm:$0xff] %v5259_v29 }
 0x11b   :  { %9060 = vst [vmem:[#allocation9_spill] sm:$0xff] %v5261_v56 }
 0x11c   :  { %v385_v26 = vpop.f32.mrf.mxu0  ;;  %v405_v27 = vpop.f32.mrf.mxu1  ;;  %9061 = vst [vmem:[#allocation10_spill] sm:$0xff] %v5265_v33 }
 0x11d   :  { %9062 = vst [vmem:[#allocation11_spill] sm:$0xff] %v5274_v46 }
 0x123   :  { %v425_v28 = vpop.f32.mrf.mxu2  ;;  %v445_v57 = vpop.f32.mrf.mxu3 }
 0x154   :  { %v529_v30 = vpop.f32.mrf.mxu0  ;;  %v549_v49 = vpop.f32.mrf.mxu1 }
 0x155   :  { %v530_v31 = vadd.f32 %v529_v30, %v385_v26  ;;  %v550_v48 = vadd.f32 %v549_v49, %v405_v27 }
 0x157   :  { %v601_v61 = vadd.f32 %v5259_v29, %v530_v31  ;;  %v602_v62 = vadd.f32 %v5261_v56, %v550_v48 }
 0x159   :  { %v3387_v54 = vmul.f32 -1.442695, %v601_v61  ;;  %v3388_v32 = vmul.f32 -1.442695, %v602_v62 }
 0x15b   :  { %3484 = vpow2.f32 %v3387_v54  ;;  %v569_v35 = vpop.f32.mrf.mxu2  ;;  %v589_v40 = vpop.f32.mrf.mxu3 }
 0x15c   :  { %3486 = vpow2.f32 %v3388_v32  ;;  %v570_v36 = vadd.f32 %v569_v35, %v425_v28  ;;  %v685_v50 = vpop.f32.mrf.mxu0  ;;  %v705_v37 = vpop.f32.mrf.mxu1  ;;  %v590_v45 = vadd.f32 %v589_v40, %v445_v57 }
 0x15d   :  { %v753_v38 = vadd.f32 %v3390_v52, %v685_v50  ;;  %v754_v39 = vadd.f32 %v3391_v34, %v705_v37  ;;  %v3383_v52 = vld [vmem:[%s8170_s2 + $0x8] sm:$0xff] }
 0x15e   :  { %v603_v63 = vadd.f32 %v5265_v33, %v570_v36  ;;  %v604_v60 = vadd.f32 %v5274_v46, %v590_v45 }
 0x15f   :  { %v3394_v41 = vmul.f32 -1.442695, %v753_v38  ;;  %v3395_v42 = vmul.f32 -1.442695, %v754_v39 }
 0x160   :  { %v3389_v43 = vmul.f32 -1.442695, %v603_v63 }
 0x161   :  { %v3485_v44 = vpop.eup %3484  ;;  %3488 = vpow2.f32 %v3394_v41 }
 0x162   :  { %v3487_v47 = vpop.eup %3486  ;;  %v614_v51 = vadd.f32 1.0, %v3485_v44  ;;  %3490 = vpow2.f32 %v3389_v43 }
 0x163   :  { %v615_v53 = vadd.f32 1.0, %v3487_v47  ;;  %3492 = vpow2.f32 %v3395_v42  ;;  %v725_v55 = vpop.f32.mrf.mxu2  ;;  %v745_v7 = vpop.f32.mrf.mxu3 }
 0x164   :  { %3494 = vrcp.f32 %v614_v51  ;;  %v755_v0 = vadd.f32 %v3392_v58, %v725_v55  ;;  %v626_v11 = vand.u32 2147483647, %v614_v51  ;;  %v628_v16 = vand.u32 2147483648, %v614_v51 }
 0x165   :  { %3496 = vrcp.f32 %v615_v53  ;;  %v643_v15 = vand.u32 2147483648, %v615_v53  ;;  %v641_v18 = vand.u32 2147483647, %v615_v53  ;;  %v756_v19 = vadd.f32 %v3393_v9, %v745_v7 }
 0x166   :  { %3498 = vtanh.f32 %v604_v60  ;;  %v3396_v6 = vmul.f32 -1.442695, %v755_v0  ;;  %vm637_vm12 = vweird.f32 %v615_v53  ;;  %vm622_vm13 = vweird.f32 %v614_v51 }
 0x167   :  { %v3489_v1 = vpop.eup %3488  ;;  %vm5292_vm14 = vcmp.eq.f32.partialorder %v626_v11, 8.507059e+37  ;;  %v644_v24 = vor.u32 1.1754944e-38, %v643_v15  ;;  %v629_v26 = vor.u32 1.1754944e-38, %v628_v16  ;;  %vm5296_vm1 = vcmp.eq.f32.partialorder %v641_v18, 8.507059e+37 }
 0x168   :  { %v3491_v2 = vpop.eup %3490  ;;  %v5280_v3 = vadd.f32 1.0, %v3489_v1 }
 0x169   :  { %v3493_v4 = vpop.eup %3492  ;;  %v5282_v5 = vadd.f32 1.0, %v3491_v2 }
 0x16a   :  { %v3495_v10 = vpop.eup %3494  ;;  %3500 = vrcp.f32 %v5280_v3  ;;  %v5288_v12 = vadd.f32 1.0, %v3493_v4  ;;  %vm774_vm2 = vweird.f32 %v5280_v3  ;;  %v778_v31 = vand.u32 2147483647, %v5280_v3 }
 0x16b   :  { %v3497_v13 = vpop.eup %3496  ;;  %v618_v14 = vmul.f32 %v3495_v10, %v614_v51  ;;  %3502 = vrcp.f32 %v5282_v5  ;;  %vm623_vm15 = vweird.f32 %v3495_v10  ;;  %v780_v54 = vand.u32 2147483648, %v5280_v3 }
 0x16c   :  { %v633_v17 = vmul.f32 %v3497_v13, %v615_v53  ;;  %3504 = vrcp.f32 %v5288_v12  ;;  %v3499_v23 = vpop.eup %3498  ;;  %vm638_vm0 = vweird.f32 %v3497_v13  ;;  %vm624_vm3 = vmor %vm622_vm13, %vm623_vm15  ;;  %vm789_vm4 = vweird.f32 %v5288_v12 }
 0x16d   :  { %v619_v20 = vsub.f32 1.0, %v618_v14  ;;  %3506 = vpow2.f32 %v3396_v6  ;;  %vm639_vm5 = vmor %vm637_vm12, %vm638_vm0  ;;  %v795_v45 = vand.u32 2147483648, %v5288_v12  ;;  %v793_v47 = vand.u32 2147483647, %v5288_v12 }
 0x16e   :  { %v634_v21 = vsub.f32 1.0, %v633_v17  ;;  %3508 = vtanh.f32 %v756_v19  ;;  %vm779_vm9 = vcmp.eq.f32.partialorder %v778_v31, 8.507059e+37  ;;  %v781_v60 = vor.u32 1.1754944e-38, %v780_v54  ;;  %v5383_v54 = vld [vmem:[#allocation2 + $0x1a8] sm:$0xff] }
 0x16f   :  { %v620_v25 = vmul.f32 %v3495_v10, %v619_v20  ;;  %vm652_vm10 = vweird.f32 %v5282_v5  ;;  %v796_v4 = vor.u32 1.1754944e-38, %v795_v45  ;;  %vm794_vm13 = vcmp.eq.f32.partialorder %v793_v47, 8.507059e+37  ;;  %v5431_v45 = vld [vmem:[#allocation2 + $0x158] sm:$0xff]  ;;  %v5434_v47 = vld [vmem:[#allocation2 + $0x120] sm:$0xff] }
 0x170   :  { %v3501_v27 = vpop.eup %3500  ;;  %v635_v59 = vmul.f32 %v3497_v13, %v634_v21 }
 0x171   :  { %v5300_v57 = vpop.eup %3502  ;;  %v621_v30 = vadd.f32 %v3495_v10, %v620_v25  ;;  %v770_v49 = vmul.f32 %v3501_v27, %v5280_v3  ;;  %vm775_vm6 = vweird.f32 %v3501_v27  ;;  %v658_v3 = vand.u32 2147483648, %v5282_v5  ;;  %v5353_v25 = vld [vmem:[#allocation2 + $0x1e8] sm:$0xff] }
 0x172   :  { %v3505_v48 = vpop.eup %3504  ;;  %v648_v61 = vmul.f32 %v5300_v57, %v5282_v5  ;;  %v636_v62 = vadd.f32 %v3497_v13, %v635_v59  ;;  %vm776_vm8 = vmor %vm774_vm2, %vm775_vm6  ;;  %vm653_vm11 = vweird.f32 %v5300_v57  ;;  %v5363_v59 = vld [vmem:[#allocation2 + $0x1f8] sm:$0xff] }
 0x173   :  { %v3507_v32 = vpop.eup %3506  ;;  %v625_v34 = vsel %vm624_vm3, %v3495_v10, %v621_v30  ;;  %v771_v35 = vsub.f32 1.0, %v770_v49  ;;  %v785_v36 = vmul.f32 %v3505_v48, %v5288_v12  ;;  %vm790_vm7 = vweird.f32 %v3505_v48  ;;  %v5371_v30 = vld [vmem:[#allocation2 + $0x1c8] sm:$0xff] }
 0x174   :  { %v649_v50 = vsub.f32 1.0, %v648_v61  ;;  %v630_v37 = vsel %vm5292_vm14, %v629_v26, %v625_v34  ;;  %v640_v38 = vsel %vm639_vm5, %v3497_v13, %v636_v62  ;;  %v5318_v39 = vadd.f32 1.0, %v3507_v32  ;;  %v3509_v43 = vpop.eup %3508  ;;  %vm791_vm12 = vmor %vm789_vm4, %vm790_vm7  ;;  %v5377_v61 = vld [vmem:[#allocation2 + $0x1d8] sm:$0xff]  ;;  %v5380_v62 = vld [vmem:[#allocation2 + $0x1a0] sm:$0xff] }
 0x175   :  { %v645_v63 = vsel %vm5296_vm1, %v644_v24, %v640_v38  ;;  %v664_v40 = vmul.f32 %v3499_v23, %v630_v37  ;;  %v786_v41 = vsub.f32 1.0, %v785_v36  ;;  %v772_v42 = vmul.f32 %v3501_v27, %v771_v35  ;;  %vm654_vm14 = vmor %vm652_vm10, %vm653_vm11  ;;  %v5350_v24 = vld [vmem:[#allocation2 + $0x1e0] sm:$0xff]  ;;  %v5389_v34 = vld [vmem:[#allocation2 + $0x1b8] sm:$0xff] }
 0x176   :  { %v663_v44 = vmul.f32 %v3383_v52, %v645_v63  ;;  %3510 = vrcp.f32 %v5318_v39  ;;  %v650_v55 = vmul.f32 %v5300_v57, %v649_v50  ;;  %v656_v10 = vand.u32 2147483647, %v5282_v5  ;;  %v5386_v52 = vld [vmem:[#allocation2 + $0x1b0] sm:$0xff]  ;;  %v5394_v36 = vld [vmem:[#allocation2 + $0x180] sm:$0xff]  ;;  %v5397_v50 = vld [vmem:[#allocation2 + $0x188] sm:$0xff] }
 0x177   :  { %v787_v51 = vmul.f32 %v3505_v48, %v786_v41  ;;  %v773_v53 = vadd.f32 %v3501_v27, %v772_v42  ;;  %v659_v16 = vor.u32 1.1754944e-38, %v658_v3  ;;  %v810_v5 = vand.u32 2147483648, %v5318_v39  ;;  %v5400_v37 = vld [vmem:[#allocation2 + $0x190] sm:$0xff]  ;;  %v5403_v38 = vld [vmem:[#allocation2 + $0x198] sm:$0xff]  ;;  %v5413_v63 = vld [vmem:[#allocation2 + $0x168] sm:$0xff] }
 0x178   :  { %v5326_v58 = vadd.f32 %v664_v40, %v663_v44  ;;  %v651_v2 = vadd.f32 %v5300_v57, %v650_v55  ;;  %vm657_vm15 = vcmp.eq.f32.partialorder %v656_v10, 8.507059e+37  ;;  %vm804_vm1 = vweird.f32 %v5318_v39  ;;  %v5416_v40 = vld [vmem:[#allocation2 + $0x170] sm:$0xff]  ;;  %v5419_v41 = vld [vmem:[#allocation2 + $0x178] sm:$0xff]  ;;  %v5422_v42 = vld [vmem:[#allocation2 + $0x140] sm:$0xff] }
 0x179   :  { %v777_v0 = vsel %vm776_vm8, %v3501_v27, %v773_v53  ;;  %v788_v1 = vadd.f32 %v3505_v48, %v787_v51  ;;  %v5360_v27 = vld [vmem:[#allocation2 + $0x1f0] sm:$0xff]  ;;  %v811_v31 = vor.u32 1.1754944e-38, %v810_v5  ;;  %v5437_v51 = vld [vmem:[#allocation2 + $0x128] sm:$0xff]  ;;  %v5443_v55 = vld [vmem:[#allocation2 + $0x138] sm:$0xff] }
 0x17a   :  { %3512 = vtanh.f32 %v5326_v58  ;;  %v782_v6 = vsel %vm779_vm9, %v781_v60, %v777_v0  ;;  %v655_v12 = vsel %vm654_vm14, %v5300_v57, %v651_v2  ;;  %v5368_v57 = vld [vmem:[#allocation2 + $0x1c0] sm:$0xff]  ;;  %v5428_v44 = vld [vmem:[#allocation2 + $0x150] sm:$0xff]  ;;  %v5449_v0 = vld [vmem:[#allocation2 + $0x108] sm:$0xff] }
 0x17b   :  { %v792_v7 = vsel %vm791_vm12, %v3505_v48, %v788_v1  ;;  %v816_v9 = vmul.f32 %v3509_v43, %v782_v6  ;;  %v660_v20 = vsel %vm657_vm15, %v659_v16, %v655_v12  ;;  %v5374_v48 = vld [vmem:[#allocation2 + $0x1d0] sm:$0xff]  ;;  %v5425_v43 = vld [vmem:[#allocation2 + $0x148] sm:$0xff]  ;;  %v5446_v60 = vld [vmem:[#allocation2 + $0x100] sm:$0xff] }
 0x17c   :  { %v3511_v11 = vpop.eup %3510  ;;  %v797_v13 = vsel %vm794_vm13, %v796_v4, %v792_v7  ;;  %v5440_v53 = vld [vmem:[#allocation2 + $0x130] sm:$0xff]  ;;  %v5455_v2 = vld [vmem:[#allocation2 + $0x118] sm:$0xff]  ;;  %v5458_v4 = vld [vmem:[#allocation2 + $0xe0] sm:$0xff] }
 0x17d   :  { %v800_v14 = vmul.f32 %v3511_v11, %v5318_v39  ;;  %v815_v15 = vmul.f32 %v797_v13, %v5125_v8  ;;  %vm805_vm0 = vweird.f32 %v3511_v11  ;;  %v808_v8 = vand.u32 2147483647, %v5318_v39  ;;  %v5410_v39 = vld [vmem:[#allocation2 + $0x160] sm:$0xff]  ;;  %v5452_v1 = vld [vmem:[#allocation2 + $0x110] sm:$0xff]  ;;  %v5461_v6 = vld [vmem:[#allocation2 + $0xe8] sm:$0xff] }
 0x17e   :  { %vm5356_vm2 = vmor %vm804_vm1, %vm805_vm0  ;;  %v5464_v3 = vld [vmem:[#allocation2 + $0xf0] sm:$0xff]  ;;  %v5467_v7 = vld [vmem:[#allocation2 + $0xf8] sm:$0xff] }
 0x17f   :  { %v801_v17 = vsub.f32 1.0, %v800_v14  ;;  %v5344_v18 = vadd.f32 %v816_v9, %v815_v15  ;;  %vm809_vm3 = vcmp.eq.f32.partialorder %v808_v8, 8.507059e+37  ;;  %9069 = vst [vmem:[#allocation12_spill] sm:$0xff] %v5464_v3  ;;  %v5470_v9 = vld [vmem:[#allocation2 + $0xc0] sm:$0xff]  ;;  %v5473_v10 = vld [vmem:[#allocation2 + $0xc8] sm:$0xff]  ;;  %v5479_v13 = vld [vmem:[#allocation2 + $0xd8] sm:$0xff] }
 0x180   :  { %v3513_v19 = vpop.eup %3512  ;;  %9070 = vst [vmem:[#allocation13_spill] sm:$0xff] %v5467_v7  ;;  %v5482_v14 = vld [vmem:[#allocation2 + $0xa0] sm:$0xff]  ;;  %v5485_v15 = vld [vmem:[#allocation2 + $0xa8] sm:$0xff]  ;;  %v5488_v12 = vld [vmem:[#allocation2 + $0xb0] sm:$0xff] }
 0x181   :  { %v802_v21 = vmul.f32 %v3511_v11, %v801_v17  ;;  %v667_v22 = vmul.f32 %v3513_v19, %v660_v20  ;;  %3514 = vtanh.f32 %v5344_v18  ;;  %9071 = vst [vmem:[#allocation14_spill] sm:$0xff] %v5470_v9  ;;  %v5491_v16 = vld [vmem:[#allocation2 + $0xb8] sm:$0xff]  ;;  %v5494_v17 = vld [vmem:[#allocation2 + $0x80] sm:$0xff]  ;;  %v5497_v19 = vld [vmem:[#allocation2 + $0x88] sm:$0xff] }
 0x182   :  { %9072 = vst [vmem:[#allocation28_spill] sm:$0xff] %v5473_v10  ;;  %v5500_v20 = vld [vmem:[#allocation2 + $0x90] sm:$0xff]  ;;  %v5515_v8 = vld [vmem:[#allocation2 + $0x78] sm:$0xff]  ;;  %v5518_v26 = vld [vmem:[#allocation2 + $0x40] sm:$0xff] }
 0x183   :  { %v803_v23 = vadd.f32 %v3511_v11, %v802_v21  ;;  %836 = vmatmul.f32.vlgmr.msra.gmra.mxu0 %v667_v22  ;;  %856 = vmatmul.f32.vlgmr.msra.gmra.mxu1 %v667_v22  ;;  %9074 = vst [vmem:[#allocation16_spill] sm:$0xff] %v5479_v13  ;;  %v5503_v21 = vld [vmem:[#allocation2 + $0x98] sm:$0xff]  ;;  %v5512_v5 = vld [vmem:[#allocation2 + $0x70] sm:$0xff] }
 0x184   :  { %876 = vmatmul.f32.vlgmr.msra.gmra.mxu2 %v667_v22  ;;  %896 = vmatmul.f32.vlgmr.msra.gmra.mxu3 %v667_v22  ;;  %9075 = vst [vmem:[#allocation17_spill] sm:$0xff] %v5482_v14  ;;  %v5506_v22 = vld [vmem:[#allocation2 + $0x60] sm:$0xff] }
 0x185   :  { %1047 = vmatpush.msra.mxu0 %v5350_v24  ;;  %1067 = vmatpush.msra.mxu1 %v5353_v25  ;;  %v807_v28 = vsel %vm5356_vm2, %v3511_v11, %v803_v23  ;;  %v5476_v11 = vld [vmem:[#allocation2 + $0xd0] sm:$0xff]  ;;  %9076 = vst [vmem:[#allocation32_spill] sm:$0xff] %v5485_v15  ;;  %v5509_v23 = vld [vmem:[#allocation2 + $0x68] sm:$0xff] }
 0x186   :  { %1087 = vmatpush.msra.mxu2 %v5360_v27  ;;  %1107 = vmatpush.msra.mxu3 %v5363_v59  ;;  %v812_v32 = vsel %vm809_vm3, %v811_v31, %v807_v28  ;;  %9073 = vst [vmem:[#allocation15_spill] sm:$0xff] %v5476_v11  ;;  %v5521_v28 = vld [vmem:[#allocation2 + $0x48] sm:$0xff]  ;;  %v5527_v31 = vld [vmem:[#allocation2 + $0x58] sm:$0xff] }
 0x187   :  { %1048 = vmatpush.msra.mxu0 %v5368_v57  ;;  %1068 = vmatpush.msra.mxu1 %v5371_v30  ;;  %v3515_v49 = vpop.eup %3514  ;;  %9077 = vst [vmem:[#allocation18_spill] sm:$0xff] %v5488_v12 }
 0x188   :  { %1088 = vmatpush.msra.mxu2 %v5374_v48  ;;  %1108 = vmatpush.msra.mxu3 %v5377_v61  ;;  %v5392_v35 = vmul.f32 %v3515_v49, %v812_v32  ;;  %9078 = vst [vmem:[#allocation19_spill] sm:$0xff] %v5491_v16  ;;  %v5524_v49 = vld [vmem:[#allocation2 + $0x50] sm:$0xff]  ;;  %v5530_v32 = vld [vmem:[#allocation2 + $0x20] sm:$0xff] }
 0x189   :  { %1049 = vmatpush.msra.mxu0 %v5380_v62  ;;  %1069 = vmatpush.msra.mxu1 %v5383_v54  ;;  %9079 = vst [vmem:[#allocation20_spill] sm:$0xff] %v5494_v17 }
 0x18a   :  { %1089 = vmatpush.msra.mxu2 %v5386_v52  ;;  %1109 = vmatpush.msra.mxu3 %v5389_v34  ;;  %9080 = vst [vmem:[#allocation35_spill] sm:$0xff] %v5497_v19 }
 0x18b   :  { %1050 = vmatpush.msra.mxu0 %v5394_v36  ;;  %1070 = vmatpush.msra.mxu1 %v5397_v50  ;;  %9081 = vst [vmem:[#allocation22_spill] sm:$0xff] %v5500_v20 }
 0x18c   :  { %1090 = vmatpush.msra.mxu2 %v5400_v37  ;;  %1110 = vmatpush.msra.mxu3 %v5403_v38  ;;  %9082 = vst [vmem:[#allocation23_spill] sm:$0xff] %v5503_v21 }
 0x18d   :  { %916 = vmatmul.f32.vlgmr.msrb.gmra.mxu0 %v5392_v35  ;;  %936 = vmatmul.f32.vlgmr.msrb.gmra.mxu1 %v5392_v35  ;;  %9083 = vst [vmem:[#allocation24_spill] sm:$0xff] %v5506_v22 }
 0x18e   :  { %956 = vmatmul.f32.vlgmr.msrb.gmra.mxu2 %v5392_v35  ;;  %976 = vmatmul.f32.vlgmr.msrb.gmra.mxu3 %v5392_v35  ;;  %9084 = vst [vmem:[#allocation39_spill] sm:$0xff] %v5509_v23 }
 0x18f   :  { %1051 = vmatpush.msra.mxu0 %v5410_v39  ;;  %1071 = vmatpush.msra.mxu1 %v5413_v63  ;;  %9085 = vst [vmem:[#allocation25_spill] sm:$0xff] %v5512_v5 }
 0x190   :  { %1091 = vmatpush.msra.mxu2 %v5416_v40  ;;  %1111 = vmatpush.msra.mxu3 %v5419_v41  ;;  %9086 = vst [vmem:[#allocation26_spill] sm:$0xff] %v5515_v8 }
 0x191   :  { %1052 = vmatpush.msra.mxu0 %v5422_v42  ;;  %1072 = vmatpush.msra.mxu1 %v5425_v43  ;;  %9087 = vst [vmem:[#allocation27_spill] sm:$0xff] %v5518_v26 }
 0x192   :  { %1092 = vmatpush.msra.mxu2 %v5428_v44  ;;  %1112 = vmatpush.msra.mxu3 %v5431_v45  ;;  %9088 = vst [vmem:[#allocation43_spill] sm:$0xff] %v5521_v28 }
 0x193   :  { %1053 = vmatpush.msra.mxu0 %v5434_v47  ;;  %1073 = vmatpush.msra.mxu1 %v5437_v51  ;;  %9089 = vst [vmem:[#allocation29_spill] sm:$0xff] %v5524_v49 }
 0x194   :  { %1093 = vmatpush.msra.mxu2 %v5440_v53  ;;  %1113 = vmatpush.msra.mxu3 %v5443_v55  ;;  %9090 = vst [vmem:[#allocation30_spill] sm:$0xff] %v5527_v31 }
 0x195   :  { %1054 = vmatpush.msra.mxu0 %v5446_v60  ;;  %1074 = vmatpush.msra.mxu1 %v5449_v0  ;;  %9091 = vst [vmem:[#allocation31_spill] sm:$0xff] %v5530_v32 }
 0x196   :  { %1094 = vmatpush.msra.mxu2 %v5452_v1  ;;  %1114 = vmatpush.msra.mxu3 %v5455_v2 }
 0x197   :  { %1055 = vmatpush.msra.mxu0 %v5458_v4  ;;  %1075 = vmatpush.msra.mxu1 %v5461_v6 }
 0x198   :  { %1095 = vmatpush.msra.mxu2 %v5464_v3  ;;  %1115 = vmatpush.msra.mxu3 %v5467_v7 }
 0x199   :  { %1056 = vmatpush.msra.mxu0 %v5470_v9  ;;  %1076 = vmatpush.msra.mxu1 %v5473_v10 }
 0x19a   :  { %1096 = vmatpush.msra.mxu2 %v5476_v11  ;;  %1116 = vmatpush.msra.mxu3 %v5479_v13 }
 0x19b   :  { %1057 = vmatpush.msra.mxu0 %v5482_v14  ;;  %1077 = vmatpush.msra.mxu1 %v5485_v15 }
 0x19c   :  { %1097 = vmatpush.msra.mxu2 %v5488_v12  ;;  %1117 = vmatpush.msra.mxu3 %v5491_v16 }
 0x19d   :  { %1058 = vmatpush.msra.mxu0 %v5494_v17  ;;  %1078 = vmatpush.msra.mxu1 %v5497_v19 }
 0x19e   :  { %1098 = vmatpush.msra.mxu2 %v5500_v20  ;;  %1118 = vmatpush.msra.mxu3 %v5503_v21 }
 0x19f   :  { %1059 = vmatpush.msra.mxu0 %v5506_v22  ;;  %1079 = vmatpush.msra.mxu1 %v5509_v23 }
 0x1a0   :  { %1099 = vmatpush.msra.mxu2 %v5512_v5  ;;  %1119 = vmatpush.msra.mxu3 %v5515_v8  ;;  %v5533_v8 = vld [vmem:[#allocation2 + $0x28] sm:$0xff] }
 0x1a1   :  { %1060 = vmatpush.msra.mxu0 %v5518_v26  ;;  %1080 = vmatpush.msra.mxu1 %v5521_v28  ;;  %9092 = vst [vmem:[#allocation47_spill] sm:$0xff] %v5533_v8  ;;  %v5536_v26 = vld [vmem:[#allocation2 + $0x30] sm:$0xff]  ;;  %v5539_v28 = vld [vmem:[#allocation2 + $0x38] sm:$0xff] }
 0x1a2   :  { %1100 = vmatpush.msra.mxu2 %v5524_v49  ;;  %1120 = vmatpush.msra.mxu3 %v5527_v31  ;;  %9093 = vst [vmem:[#allocation33_spill] sm:$0xff] %v5536_v26  ;;  %v5542_v49 = vld [vmem:[#allocation2] sm:$0xff]  ;;  %v5545_v31 = vld [vmem:[#allocation2 + $0x8] sm:$0xff] }
 0x1a3   :  { %1061 = vmatpush.msra.mxu0 %v5530_v32  ;;  %1081 = vmatpush.msra.mxu1 %v5533_v8  ;;  %9094 = vst [vmem:[#allocation34_spill] sm:$0xff] %v5539_v28  ;;  %v5548_v32 = vld [vmem:[#allocation2 + $0x10] sm:$0xff]  ;;  %v5551_v8 = vld [vmem:[#allocation2 + $0x18] sm:$0xff] }
 0x1a4   :  { %1101 = vmatpush.msra.mxu2 %v5536_v26  ;;  %1121 = vmatpush.msra.mxu3 %v5539_v28  ;;  %9095 = vst [vmem:[#allocation36_spill] sm:$0xff] %v5542_v49  ;;  %v5570_v28 = vld [vmem:[#allocation6 + $0x1c0] sm:$0xff] }
 0x1a5   :  { %1062 = vmatpush.msra.mxu0 %v5542_v49  ;;  %9096 = vst [vmem:[#allocation51_spill] sm:$0xff] %v5545_v31  ;;  %1082 = vmatpush.msra.mxu1 %v5545_v31  ;;  %v5558_v49 = vld [vmem:[#allocation6 + $0x1e0] sm:$0xff]  ;;  %v5561_v31 = vld [vmem:[#allocation6 + $0x1e8] sm:$0xff] }
 0x1a6   :  { %9097 = vst [vmem:[#allocation37_spill] sm:$0xff] %v5548_v32  ;;  %1102 = vmatpush.msra.mxu2 %v5548_v32  ;;  %1122 = vmatpush.msra.mxu3 %v5551_v8  ;;  %v5564_v32 = vld [vmem:[#allocation6 + $0x1f0] sm:$0xff] }
 0x1a7   :  { %9098 = vst [vmem:[#allocation38_spill] sm:$0xff] %v5551_v8  ;;  %1063 = vmatmul.f32.vlgmr.msra.gmra.mxu0 %v5392_v35  ;;  %1083 = vmatmul.f32.vlgmr.msra.gmra.mxu1 %v5392_v35  ;;  %v5567_v8 = vld [vmem:[#allocation6 + $0x1f8] sm:$0xff] }
 0x1a8   :  { %1103 = vmatmul.f32.vlgmr.msra.gmra.mxu2 %v5392_v35  ;;  %1123 = vmatmul.f32.vlgmr.msra.gmra.mxu3 %v5392_v35  ;;  %9099 = vst [vmem:[#allocation40_spill] sm:$0xff] %v5558_v49  ;;  %v5573_v35 = vld [vmem:[#allocation6 + $0x1c8] sm:$0xff] }
 0x1a9   :  { %1199 = vmatpush.msrb.mxu0 %v5558_v49  ;;  %9100 = vst [vmem:[#allocation55_spill] sm:$0xff] %v5561_v31  ;;  %1219 = vmatpush.msrb.mxu1 %v5561_v31  ;;  %v5576_v49 = vld [vmem:[#allocation6 + $0x1d0] sm:$0xff]  ;;  %v5579_v31 = vld [vmem:[#allocation6 + $0x1d8] sm:$0xff] }
 0x1aa   :  { %9101 = vst [vmem:[#allocation41_spill] sm:$0xff] %v5564_v32  ;;  %1239 = vmatpush.msrb.mxu2 %v5564_v32  ;;  %1259 = vmatpush.msrb.mxu3 %v5567_v8  ;;  %v5582_v32 = vld [vmem:[#allocation6 + $0x1a0] sm:$0xff] }
 0x1ab   :  { %9102 = vst [vmem:[#allocation42_spill] sm:$0xff] %v5567_v8  ;;  %1200 = vmatpush.msrb.mxu0 %v5570_v28  ;;  %1220 = vmatpush.msrb.mxu1 %v5573_v35  ;;  %v5585_v8 = vld [vmem:[#allocation6 + $0x1a8] sm:$0xff] }
 0x1ac   :  { %9103 = vst [vmem:[#allocation44_spill] sm:$0xff] %v5570_v28  ;;  %1240 = vmatpush.msrb.mxu2 %v5576_v49  ;;  %1260 = vmatpush.msrb.mxu3 %v5579_v31  ;;  %v5588_v28 = vld [vmem:[#allocation6 + $0x1b0] sm:$0xff] }
 0x1ad   :  { %9104 = vst [vmem:[#allocation59_spill] sm:$0xff] %v5573_v35  ;;  %1201 = vmatpush.msrb.mxu0 %v5582_v32  ;;  %1221 = vmatpush.msrb.mxu1 %v5585_v8  ;;  %v5591_v35 = vld [vmem:[#allocation6 + $0x1b8] sm:$0xff] }
 0x1ae   :  { %9105 = vst [vmem:[#allocation45_spill] sm:$0xff] %v5576_v49  ;;  %1241 = vmatpush.msrb.mxu2 %v5588_v28  ;;  %1261 = vmatpush.msrb.mxu3 %v5591_v35  ;;  %v5594_v49 = vld [vmem:[#allocation6 + $0x180] sm:$0xff] }
 0x1af   :  { %9106 = vst [vmem:[#allocation46_spill] sm:$0xff] %v5579_v31  ;;  %1202 = vmatpush.msrb.mxu0 %v5594_v49  ;;  %v5597_v31 = vld [vmem:[#allocation6 + $0x188] sm:$0xff] }
 0x1b0   :  { %9107 = vst [vmem:[#allocation48_spill] sm:$0xff] %v5582_v32  ;;  %1222 = vmatpush.msrb.mxu1 %v5597_v31  ;;  %v5600_v32 = vld [vmem:[#allocation6 + $0x190] sm:$0xff] }
 0x1b1   :  { %9108 = vst [vmem:[#allocation63_spill] sm:$0xff] %v5585_v8  ;;  %1242 = vmatpush.msrb.mxu2 %v5600_v32  ;;  %v5603_v8 = vld [vmem:[#allocation6 + $0x198] sm:$0xff] }
 0x1b2   :  { %9109 = vst [vmem:[#allocation49_spill] sm:$0xff] %v5588_v28  ;;  %1262 = vmatpush.msrb.mxu3 %v5603_v8  ;;  %v5606_v28 = vld [vmem:[#allocation6 + $0x160] sm:$0xff] }
 0x1b3   :  { %9110 = vst [vmem:[#allocation50_spill] sm:$0xff] %v5591_v35  ;;  %1203 = vmatpush.msrb.mxu0 %v5606_v28  ;;  %v5609_v35 = vld [vmem:[#allocation6 + $0x168] sm:$0xff] }
 0x1b4   :  { %9111 = vst [vmem:[#allocation52_spill] sm:$0xff] %v5594_v49  ;;  %1223 = vmatpush.msrb.mxu1 %v5609_v35  ;;  %v5612_v49 = vld [vmem:[#allocation6 + $0x170] sm:$0xff] }
 0x1b5   :  { %9112 = vst [vmem:[#allocation67_spill] sm:$0xff] %v5597_v31  ;;  %1243 = vmatpush.msrb.mxu2 %v5612_v49  ;;  %v5615_v31 = vld [vmem:[#allocation6 + $0x178] sm:$0xff] }
 0x1b6   :  { %9113 = vst [vmem:[#allocation53_spill] sm:$0xff] %v5600_v32  ;;  %1263 = vmatpush.msrb.mxu3 %v5615_v31  ;;  %v5618_v32 = vld [vmem:[#allocation6 + $0x140] sm:$0xff] }
 0x1b7   :  { %9114 = vst [vmem:[#allocation54_spill] sm:$0xff] %v5603_v8  ;;  %1204 = vmatpush.msrb.mxu0 %v5618_v32  ;;  %v5621_v8 = vld [vmem:[#allocation6 + $0x148] sm:$0xff] }
 0x1b8   :  { %9115 = vst [vmem:[#allocation56_spill] sm:$0xff] %v5606_v28  ;;  %1224 = vmatpush.msrb.mxu1 %v5621_v8  ;;  %v5624_v28 = vld [vmem:[#allocation6 + $0x150] sm:$0xff] }
 0x1b9   :  { %9116 = vst [vmem:[#allocation71_spill] sm:$0xff] %v5609_v35  ;;  %1244 = vmatpush.msrb.mxu2 %v5624_v28  ;;  %v5627_v35 = vld [vmem:[#allocation6 + $0x158] sm:$0xff] }
 0x1ba   :  { %9117 = vst [vmem:[#allocation57_spill] sm:$0xff] %v5612_v49  ;;  %1264 = vmatpush.msrb.mxu3 %v5627_v35  ;;  %v5630_v49 = vld [vmem:[#allocation6 + $0x120] sm:$0xff] }
 0x1bb   :  { %9118 = vst [vmem:[#allocation58_spill] sm:$0xff] %v5615_v31  ;;  %1205 = vmatpush.msrb.mxu0 %v5630_v49  ;;  %v5633_v31 = vld [vmem:[#allocation6 + $0x128] sm:$0xff] }
 0x1bc   :  { %9119 = vst [vmem:[#allocation60_spill] sm:$0xff] %v5618_v32  ;;  %1225 = vmatpush.msrb.mxu1 %v5633_v31  ;;  %v5636_v32 = vld [vmem:[#allocation6 + $0x130] sm:$0xff] }
 0x1bd   :  { %9120 = vst [vmem:[#allocation75_spill] sm:$0xff] %v5621_v8  ;;  %1245 = vmatpush.msrb.mxu2 %v5636_v32  ;;  %v5639_v8 = vld [vmem:[#allocation6 + $0x138] sm:$0xff] }
 0x1be   :  { %9121 = vst [vmem:[#allocation61_spill] sm:$0xff] %v5624_v28  ;;  %1265 = vmatpush.msrb.mxu3 %v5639_v8  ;;  %v5642_v28 = vld [vmem:[#allocation6 + $0x100] sm:$0xff] }
 0x1bf   :  { %9122 = vst [vmem:[#allocation62_spill] sm:$0xff] %v5627_v35  ;;  %1206 = vmatpush.msrb.mxu0 %v5642_v28  ;;  %v5645_v35 = vld [vmem:[#allocation6 + $0x108] sm:$0xff] }
 0x1c0   :  { %9123 = vst [vmem:[#allocation64_spill] sm:$0xff] %v5630_v49  ;;  %1226 = vmatpush.msrb.mxu1 %v5645_v35  ;;  %v5648_v49 = vld [vmem:[#allocation6 + $0x110] sm:$0xff] }
 0x1c1   :  { %9124 = vst [vmem:[#allocation79_spill] sm:$0xff] %v5633_v31  ;;  %1246 = vmatpush.msrb.mxu2 %v5648_v49  ;;  %v5651_v31 = vld [vmem:[#allocation6 + $0x118] sm:$0xff] }
 0x1c2   :  { %9125 = vst [vmem:[#allocation65_spill] sm:$0xff] %v5636_v32  ;;  %1266 = vmatpush.msrb.mxu3 %v5651_v31  ;;  %v5654_v32 = vld [vmem:[#allocation6 + $0xe0] sm:$0xff] }
 0x1c3   :  { %9126 = vst [vmem:[#allocation66_spill] sm:$0xff] %v5639_v8  ;;  %1207 = vmatpush.msrb.mxu0 %v5654_v32  ;;  %v5657_v8 = vld [vmem:[#allocation6 + $0xe8] sm:$0xff] }
 0x1c4   :  { %9127 = vst [vmem:[#allocation68_spill] sm:$0xff] %v5642_v28  ;;  %1227 = vmatpush.msrb.mxu1 %v5657_v8  ;;  %v5660_v28 = vld [vmem:[#allocation6 + $0xf0] sm:$0xff] }
 0x1c5   :  { %9128 = vst [vmem:[#allocation83_spill] sm:$0xff] %v5645_v35  ;;  %1247 = vmatpush.msrb.mxu2 %v5660_v28  ;;  %v5663_v35 = vld [vmem:[#allocation6 + $0xf8] sm:$0xff] }
 0x1c6   :  { %9129 = vst [vmem:[#allocation69_spill] sm:$0xff] %v5648_v49  ;;  %1267 = vmatpush.msrb.mxu3 %v5663_v35  ;;  %v5666_v49 = vld [vmem:[#allocation6 + $0xc0] sm:$0xff] }
 0x1c7   :  { %9130 = vst [vmem:[#allocation70_spill] sm:$0xff] %v5651_v31  ;;  %1208 = vmatpush.msrb.mxu0 %v5666_v49  ;;  %v5669_v31 = vld [vmem:[#allocation6 + $0xc8] sm:$0xff] }
 0x1c8   :  { %9131 = vst [vmem:[#allocation72_spill] sm:$0xff] %v5654_v32  ;;  %1228 = vmatpush.msrb.mxu1 %v5669_v31  ;;  %v5672_v32 = vld [vmem:[#allocation6 + $0xd0] sm:$0xff] }
 0x1c9   :  { %9132 = vst [vmem:[#allocation87_spill] sm:$0xff] %v5657_v8  ;;  %1248 = vmatpush.msrb.mxu2 %v5672_v32  ;;  %v5675_v8 = vld [vmem:[#allocation6 + $0xd8] sm:$0xff] }
 0x1ca   :  { %9133 = vst [vmem:[#allocation73_spill] sm:$0xff] %v5660_v28  ;;  %1268 = vmatpush.msrb.mxu3 %v5675_v8  ;;  %v5678_v28 = vld [vmem:[#allocation6 + $0xa0] sm:$0xff] }
 0x1cb   :  { %9134 = vst [vmem:[#allocation74_spill] sm:$0xff] %v5663_v35  ;;  %1209 = vmatpush.msrb.mxu0 %v5678_v28  ;;  %v5681_v35 = vld [vmem:[#allocation6 + $0xa8] sm:$0xff] }
 0x1cc   :  { %9135 = vst [vmem:[#allocation76_spill] sm:$0xff] %v5666_v49  ;;  %1229 = vmatpush.msrb.mxu1 %v5681_v35  ;;  %v5684_v49 = vld [vmem:[#allocation6 + $0xb0] sm:$0xff] }
 0x1cd   :  { %9136 = vst [vmem:[#allocation77_spill] sm:$0xff] %v5669_v31  ;;  %1249 = vmatpush.msrb.mxu2 %v5684_v49  ;;  %v5687_v31 = vld [vmem:[#allocation6 + $0xb8] sm:$0xff] }
 0x1ce   :  { %9137 = vst [vmem:[#allocation78_spill] sm:$0xff] %v5672_v32  ;;  %1269 = vmatpush.msrb.mxu3 %v5687_v31  ;;  %v5690_v32 = vld [vmem:[#allocation6 + $0x80] sm:$0xff] }
 0x1cf   :  { %9138 = vst [vmem:[#allocation80_spill] sm:$0xff] %v5675_v8  ;;  %1210 = vmatpush.msrb.mxu0 %v5690_v32  ;;  %v5693_v8 = vld [vmem:[#allocation6 + $0x88] sm:$0xff] }
 0x1d0   :  { %9139 = vst [vmem:[#allocation81_spill] sm:$0xff] %v5678_v28  ;;  %1230 = vmatpush.msrb.mxu1 %v5693_v8  ;;  %v5696_v28 = vld [vmem:[#allocation6 + $0x90] sm:$0xff] }
 0x1d1   :  { %9140 = vst [vmem:[#allocation82_spill] sm:$0xff] %v5681_v35  ;;  %1250 = vmatpush.msrb.mxu2 %v5696_v28  ;;  %v5699_v35 = vld [vmem:[#allocation6 + $0x98] sm:$0xff] }
 0x1d2   :  { %9141 = vst [vmem:[#allocation84_spill] sm:$0xff] %v5684_v49  ;;  %1270 = vmatpush.msrb.mxu3 %v5699_v35  ;;  %v5702_v49 = vld [vmem:[#allocation6 + $0x60] sm:$0xff] }
 0x1d3   :  { %9142 = vst [vmem:[#allocation85_spill] sm:$0xff] %v5687_v31  ;;  %1211 = vmatpush.msrb.mxu0 %v5702_v49  ;;  %v5705_v31 = vld [vmem:[#allocation6 + $0x68] sm:$0xff] }
 0x1d4   :  { %9143 = vst [vmem:[#allocation86_spill] sm:$0xff] %v5690_v32  ;;  %1231 = vmatpush.msrb.mxu1 %v5705_v31  ;;  %v5708_v32 = vld [vmem:[#allocation6 + $0x70] sm:$0xff] }
 0x1d5   :  { %9144 = vst [vmem:[#allocation88_spill] sm:$0xff] %v5693_v8  ;;  %1251 = vmatpush.msrb.mxu2 %v5708_v32  ;;  %v5711_v8 = vld [vmem:[#allocation6 + $0x78] sm:$0xff] }
 0x1d6   :  { %9145 = vst [vmem:[#allocation89_spill] sm:$0xff] %v5696_v28  ;;  %1271 = vmatpush.msrb.mxu3 %v5711_v8  ;;  %v5714_v28 = vld [vmem:[#allocation6 + $0x40] sm:$0xff] }
 0x1d7   :  { %9146 = vst [vmem:[#allocation90_spill] sm:$0xff] %v5699_v35  ;;  %1212 = vmatpush.msrb.mxu0 %v5714_v28  ;;  %v5717_v35 = vld [vmem:[#allocation6 + $0x48] sm:$0xff] }
 0x1d8   :  { %9147 = vst [vmem:[#allocation91_spill] sm:$0xff] %v5702_v49  ;;  %1232 = vmatpush.msrb.mxu1 %v5717_v35  ;;  %v5720_v49 = vld [vmem:[#allocation6 + $0x50] sm:$0xff] }
 0x1d9   :  { %9148 = vst [vmem:[#allocation98_spill] sm:$0xff] %v5705_v31  ;;  %1252 = vmatpush.msrb.mxu2 %v5720_v49  ;;  %v5723_v31 = vld [vmem:[#allocation6 + $0x58] sm:$0xff] }
 0x1da   :  { %9149 = vst [vmem:[#allocation92_spill] sm:$0xff] %v5708_v32  ;;  %1272 = vmatpush.msrb.mxu3 %v5723_v31  ;;  %v5726_v32 = vld [vmem:[#allocation6 + $0x20] sm:$0xff] }
 0x1db   :  { %9150 = vst [vmem:[#allocation93_spill] sm:$0xff] %v5711_v8  ;;  %1213 = vmatpush.msrb.mxu0 %v5726_v32  ;;  %v5729_v8 = vld [vmem:[#allocation6 + $0x28] sm:$0xff] }
 0x1dc   :  { %9151 = vst [vmem:[#allocation94_spill] sm:$0xff] %v5714_v28  ;;  %1233 = vmatpush.msrb.mxu1 %v5729_v8  ;;  %v5732_v28 = vld [vmem:[#allocation6 + $0x30] sm:$0xff] }
 0x1dd   :  { %9152 = vst [vmem:[#allocation99_spill] sm:$0xff] %v5717_v35  ;;  %1253 = vmatpush.msrb.mxu2 %v5732_v28  ;;  %v5735_v35 = vld [vmem:[#allocation6 + $0x38] sm:$0xff] }
 0x1de   :  { %9153 = vst [vmem:[#allocation95_spill] sm:$0xff] %v5720_v49  ;;  %1273 = vmatpush.msrb.mxu3 %v5735_v35  ;;  %v5738_v49 = vld [vmem:[#allocation6] sm:$0xff] }
 0x1df   :  { %9154 = vst [vmem:[#allocation96_spill] sm:$0xff] %v5723_v31  ;;  %1214 = vmatpush.msrb.mxu0 %v5738_v49  ;;  %v5741_v31 = vld [vmem:[#allocation6 + $0x8] sm:$0xff] }
 0x1e0   :  { %9155 = vst [vmem:[#allocation97_spill] sm:$0xff] %v5726_v32  ;;  %1234 = vmatpush.msrb.mxu1 %v5741_v31  ;;  %v5744_v32 = vld [vmem:[#allocation6 + $0x10] sm:$0xff] }
 0x1e1   :  { %9156 = vst [vmem:[#allocation100_spill] sm:$0xff] %v5729_v8  ;;  %1254 = vmatpush.msrb.mxu2 %v5744_v32  ;;  %v5747_v8 = vld [vmem:[#allocation6 + $0x18] sm:$0xff] }
 0x1e2   :  { %9157 = vst [vmem:[#allocation101_spill] sm:$0xff] %v5732_v28  ;;  %1274 = vmatpush.msrb.mxu3 %v5747_v8  ;;  %v5750_v28 = vld [vmem:[#allocation4 + $0x1e0] sm:$0xff] }
 0x1e3   :  { %9158 = vst [vmem:[#allocation102_spill] sm:$0xff] %v5735_v35  ;;  %1279 = vmatpush.msra.mxu0 %v5750_v28  ;;  %v5753_v35 = vld [vmem:[#allocation4 + $0x1e8] sm:$0xff] }
 0x1e4   :  { %9159 = vst [vmem:[#allocation103_spill] sm:$0xff] %v5738_v49  ;;  %1299 = vmatpush.msra.mxu1 %v5753_v35  ;;  %v5756_v49 = vld [vmem:[#allocation4 + $0x1f0] sm:$0xff] }
 0x1e5   :  { %9160 = vst [vmem:[#allocation104_spill] sm:$0xff] %v5741_v31  ;;  %1319 = vmatpush.msra.mxu2 %v5756_v49  ;;  %v5759_v31 = vld [vmem:[#allocation4 + $0x1f8] sm:$0xff] }
 0x1e6   :  { %9161 = vst [vmem:[#allocation105_spill] sm:$0xff] %v5744_v32  ;;  %1339 = vmatpush.msra.mxu3 %v5759_v31  ;;  %v5762_v32 = vld [vmem:[#allocation4 + $0x1c0] sm:$0xff] }
 0x1e7   :  { %9162 = vst [vmem:[#allocation106_spill] sm:$0xff] %v5747_v8  ;;  %1280 = vmatpush.msra.mxu0 %v5762_v32  ;;  %v5765_v8 = vld [vmem:[#allocation4 + $0x1c8] sm:$0xff] }
 0x1e8   :  { %9163 = vst [vmem:[#allocation107_spill] sm:$0xff] %v5750_v28  ;;  %1300 = vmatpush.msra.mxu1 %v5765_v8  ;;  %v5768_v28 = vld [vmem:[#allocation4 + $0x1d0] sm:$0xff] }
 0x1e9   :  { %9164 = vst [vmem:[#allocation108_spill] sm:$0xff] %v5753_v35  ;;  %1320 = vmatpush.msra.mxu2 %v5768_v28  ;;  %v5771_v35 = vld [vmem:[#allocation4 + $0x1d8] sm:$0xff] }
 0x1ea   :  { %9165 = vst [vmem:[#allocation109_spill] sm:$0xff] %v5756_v49  ;;  %1340 = vmatpush.msra.mxu3 %v5771_v35  ;;  %v5774_v49 = vld [vmem:[#allocation4 + $0x1a0] sm:$0xff] }
 0x1eb   :  { %9166 = vst [vmem:[#allocation110_spill] sm:$0xff] %v5759_v31  ;;  %1281 = vmatpush.msra.mxu0 %v5774_v49  ;;  %v5777_v31 = vld [vmem:[#allocation4 + $0x1a8] sm:$0xff] }
 0x1ec   :  { %9167 = vst [vmem:[#allocation111_spill] sm:$0xff] %v5762_v32  ;;  %1301 = vmatpush.msra.mxu1 %v5777_v31  ;;  %v5780_v32 = vld [vmem:[#allocation4 + $0x1b0] sm:$0xff] }
 0x1ed   :  { %9168 = vst [vmem:[#allocation112_spill] sm:$0xff] %v5765_v8  ;;  %1321 = vmatpush.msra.mxu2 %v5780_v32  ;;  %v5783_v8 = vld [vmem:[#allocation4 + $0x1b8] sm:$0xff] }
 0x1ee   :  { %9169 = vst [vmem:[#allocation113_spill] sm:$0xff] %v5768_v28  ;;  %1341 = vmatpush.msra.mxu3 %v5783_v8  ;;  %v5786_v28 = vld [vmem:[#allocation4 + $0x180] sm:$0xff] }
 0x1ef   :  { %9170 = vst [vmem:[#allocation114_spill] sm:$0xff] %v5771_v35  ;;  %1282 = vmatpush.msra.mxu0 %v5786_v28  ;;  %v5789_v35 = vld [vmem:[#allocation4 + $0x188] sm:$0xff] }
 0x1f0   :  { %9171 = vst [vmem:[#allocation115_spill] sm:$0xff] %v5774_v49  ;;  %1302 = vmatpush.msra.mxu1 %v5789_v35  ;;  %v5792_v49 = vld [vmem:[#allocation4 + $0x190] sm:$0xff] }
 0x1f1   :  { %9172 = vst [vmem:[#allocation116_spill] sm:$0xff] %v5777_v31  ;;  %1322 = vmatpush.msra.mxu2 %v5792_v49  ;;  %v5795_v31 = vld [vmem:[#allocation4 + $0x198] sm:$0xff] }
 0x1f2   :  { %9173 = vst [vmem:[#allocation117_spill] sm:$0xff] %v5780_v32  ;;  %1342 = vmatpush.msra.mxu3 %v5795_v31  ;;  %v5798_v32 = vld [vmem:[#allocation4 + $0x160] sm:$0xff] }
 0x1f3   :  { %9174 = vst [vmem:[#allocation118_spill] sm:$0xff] %v5783_v8  ;;  %1283 = vmatpush.msra.mxu0 %v5798_v32  ;;  %v5801_v8 = vld [vmem:[#allocation4 + $0x168] sm:$0xff] }
 0x1f4   :  { %9175 = vst [vmem:[#allocation119_spill] sm:$0xff] %v5786_v28  ;;  %1303 = vmatpush.msra.mxu1 %v5801_v8  ;;  %v5804_v28 = vld [vmem:[#allocation4 + $0x170] sm:$0xff] }
 0x1f5   :  { %9176 = vst [vmem:[#allocation120_spill] sm:$0xff] %v5789_v35  ;;  %1323 = vmatpush.msra.mxu2 %v5804_v28  ;;  %v5807_v35 = vld [vmem:[#allocation4 + $0x178] sm:$0xff] }
 0x1f6   :  { %9177 = vst [vmem:[#allocation121_spill] sm:$0xff] %v5792_v49  ;;  %1343 = vmatpush.msra.mxu3 %v5807_v35  ;;  %v5810_v49 = vld [vmem:[#allocation4 + $0x140] sm:$0xff] }
 0x1f7   :  { %9178 = vst [vmem:[#allocation122_spill] sm:$0xff] %v5795_v31  ;;  %1284 = vmatpush.msra.mxu0 %v5810_v49  ;;  %v5813_v31 = vld [vmem:[#allocation4 + $0x148] sm:$0xff] }
 0x1f8   :  { %9179 = vst [vmem:[#allocation123_spill] sm:$0xff] %v5798_v32  ;;  %1304 = vmatpush.msra.mxu1 %v5813_v31  ;;  %v5816_v32 = vld [vmem:[#allocation4 + $0x150] sm:$0xff] }
 0x1f9   :  { %9180 = vst [vmem:[#allocation124_spill] sm:$0xff] %v5801_v8  ;;  %1324 = vmatpush.msra.mxu2 %v5816_v32  ;;  %v5819_v8 = vld [vmem:[#allocation4 + $0x158] sm:$0xff] }
 0x1fa   :  { %9181 = vst [vmem:[#allocation125_spill] sm:$0xff] %v5804_v28  ;;  %1344 = vmatpush.msra.mxu3 %v5819_v8  ;;  %v5822_v28 = vld [vmem:[#allocation4 + $0x120] sm:$0xff] }
 0x1fb   :  { %9182 = vst [vmem:[#allocation126_spill] sm:$0xff] %v5807_v35  ;;  %1285 = vmatpush.msra.mxu0 %v5822_v28  ;;  %v5825_v35 = vld [vmem:[#allocation4 + $0x128] sm:$0xff] }
 0x1fc   :  { %9183 = vst [vmem:[#allocation127_spill] sm:$0xff] %v5810_v49  ;;  %1305 = vmatpush.msra.mxu1 %v5825_v35  ;;  %v5828_v49 = vld [vmem:[#allocation4 + $0x130] sm:$0xff] }
 0x1fd   :  { %9184 = vst [vmem:[#allocation128_spill] sm:$0xff] %v5813_v31  ;;  %1325 = vmatpush.msra.mxu2 %v5828_v49  ;;  %v5831_v31 = vld [vmem:[#allocation4 + $0x138] sm:$0xff] }
 0x1fe   :  { %9185 = vst [vmem:[#allocation129_spill] sm:$0xff] %v5816_v32  ;;  %1345 = vmatpush.msra.mxu3 %v5831_v31  ;;  %v5834_v32 = vld [vmem:[#allocation4 + $0x100] sm:$0xff] }
 0x1ff   :  { %9186 = vst [vmem:[#allocation130_spill] sm:$0xff] %v5819_v8  ;;  %1286 = vmatpush.msra.mxu0 %v5834_v32  ;;  %v5837_v8 = vld [vmem:[#allocation4 + $0x108] sm:$0xff] }
 0x200   :  { %9187 = vst [vmem:[#allocation131_spill] sm:$0xff] %v5822_v28  ;;  %1306 = vmatpush.msra.mxu1 %v5837_v8  ;;  %v5840_v28 = vld [vmem:[#allocation4 + $0x110] sm:$0xff]  ;;  %v857_v26 = vpop.f32.mrf.mxu1 }
 0x201   :  { %9188 = vst [vmem:[#allocation132_spill] sm:$0xff] %v5825_v35  ;;  %1326 = vmatpush.msra.mxu2 %v5840_v28  ;;  %v5843_v35 = vld [vmem:[#allocation4 + $0x118] sm:$0xff] }
 0x202   :  { %9189 = vst [vmem:[#allocation133_spill] sm:$0xff] %v5828_v49  ;;  %1346 = vmatpush.msra.mxu3 %v5843_v35  ;;  %v5846_v49 = vld [vmem:[#allocation4 + $0xe0] sm:$0xff] }
 0x203   :  { %9190 = vst [vmem:[#allocation134_spill] sm:$0xff] %v5831_v31  ;;  %1287 = vmatpush.msra.mxu0 %v5846_v49  ;;  %v5849_v31 = vld [vmem:[#allocation4 + $0xe8] sm:$0xff] }
 0x204   :  { %9191 = vst [vmem:[#allocation135_spill] sm:$0xff] %v5834_v32  ;;  %1307 = vmatpush.msra.mxu1 %v5849_v31  ;;  %v5852_v32 = vld [vmem:[#allocation4 + $0xf0] sm:$0xff] }
 0x205   :  { %9192 = vst [vmem:[#allocation136_spill] sm:$0xff] %v5837_v8  ;;  %1327 = vmatpush.msra.mxu2 %v5852_v32  ;;  %v5855_v8 = vld [vmem:[#allocation4 + $0xf8] sm:$0xff] }
 0x206   :  { %9193 = vst [vmem:[#allocation137_spill] sm:$0xff] %v5840_v28  ;;  %1347 = vmatpush.msra.mxu3 %v5855_v8  ;;  %v5858_v28 = vld [vmem:[#allocation4 + $0xc0] sm:$0xff] }
 0x207   :  { %9194 = vst [vmem:[#allocation138_spill] sm:$0xff] %v5843_v35  ;;  %1288 = vmatpush.msra.mxu0 %v5858_v28  ;;  %v5861_v35 = vld [vmem:[#allocation4 + $0xc8] sm:$0xff]  ;;  %v877_v5 = vpop.f32.mrf.mxu2 }
 0x208   :  { %9195 = vst [vmem:[#allocation139_spill] sm:$0xff] %v5846_v49  ;;  %1308 = vmatpush.msra.mxu1 %v5861_v35  ;;  %v5864_v49 = vld [vmem:[#allocation4 + $0xd0] sm:$0xff] }
 0x209   :  { %9196 = vst [vmem:[#allocation140_spill] sm:$0xff] %v5849_v31  ;;  %1328 = vmatpush.msra.mxu2 %v5864_v49  ;;  %v5867_v31 = vld [vmem:[#allocation4 + $0xd8] sm:$0xff] }
 0x20a   :  { %9197 = vst [vmem:[#allocation141_spill] sm:$0xff] %v5852_v32  ;;  %1348 = vmatpush.msra.mxu3 %v5867_v31  ;;  %v5870_v32 = vld [vmem:[#allocation4 + $0xa0] sm:$0xff]  ;;  %v937_v23 = vpop.f32.mrf.mxu1 }
 0x20b   :  { %9198 = vst [vmem:[#allocation142_spill] sm:$0xff] %v5855_v8  ;;  %1289 = vmatpush.msra.mxu0 %v5870_v32  ;;  %v5873_v8 = vld [vmem:[#allocation4 + $0xa8] sm:$0xff]  ;;  %v938_v21 = vadd.f32 %v937_v23, %v857_v26 }
 0x20c   :  { %9199 = vst [vmem:[#allocation143_spill] sm:$0xff] %v5858_v28  ;;  %1309 = vmatpush.msra.mxu1 %v5873_v8  ;;  %v5876_v28 = vld [vmem:[#allocation4 + $0xb0] sm:$0xff] }
 0x20d   :  { %9200 = vst [vmem:[#allocation144_spill] sm:$0xff] %v5861_v35  ;;  %1329 = vmatpush.msra.mxu2 %v5876_v28  ;;  %v5879_v35 = vld [vmem:[#allocation4 + $0xb8] sm:$0xff]  ;;  %v981_v20 = vadd.f32 %v938_v21, %v5261_v56 }
 0x20e   :  { %9201 = vst [vmem:[#allocation145_spill] sm:$0xff] %v5864_v49  ;;  %1349 = vmatpush.msra.mxu3 %v5879_v35  ;;  %v5882_v49 = vld [vmem:[#allocation4 + $0x80] sm:$0xff] }
 0x20f   :  { %9202 = vst [vmem:[#allocation146_spill] sm:$0xff] %v5867_v31  ;;  %1290 = vmatpush.msra.mxu0 %v5882_v49  ;;  %v5885_v31 = vld [vmem:[#allocation4 + $0x88] sm:$0xff]  ;;  %v3398_v17 = vmul.f32 -1.442695, %v981_v20 }
 0x210   :  { %9203 = vst [vmem:[#allocation147_spill] sm:$0xff] %v5870_v32  ;;  %1310 = vmatpush.msra.mxu1 %v5885_v31  ;;  %v5888_v32 = vld [vmem:[#allocation4 + $0x90] sm:$0xff] }
 0x211   :  { %9204 = vst [vmem:[#allocation148_spill] sm:$0xff] %v5873_v8  ;;  %1330 = vmatpush.msra.mxu2 %v5888_v32  ;;  %v5891_v8 = vld [vmem:[#allocation4 + $0x98] sm:$0xff] }
 0x212   :  { %9205 = vst [vmem:[#allocation149_spill] sm:$0xff] %v5876_v28  ;;  %1350 = vmatpush.msra.mxu3 %v5891_v8  ;;  %v5894_v28 = vld [vmem:[#allocation4 + $0x60] sm:$0xff] }
 0x213   :  { %9206 = vst [vmem:[#allocation150_spill] sm:$0xff] %v5879_v35  ;;  %1291 = vmatpush.msra.mxu0 %v5894_v28  ;;  %v5897_v35 = vld [vmem:[#allocation4 + $0x68] sm:$0xff] }
 0x214   :  { %9207 = vst [vmem:[#allocation151_spill] sm:$0xff] %v5882_v49  ;;  %1311 = vmatpush.msra.mxu1 %v5897_v35  ;;  %v5900_v49 = vld [vmem:[#allocation4 + $0x70] sm:$0xff] }
 0x215   :  { %9208 = vst [vmem:[#allocation152_spill] sm:$0xff] %v5885_v31  ;;  %1331 = vmatpush.msra.mxu2 %v5900_v49  ;;  %v5903_v31 = vld [vmem:[#allocation4 + $0x78] sm:$0xff] }
 0x216   :  { %9209 = vst [vmem:[#allocation153_spill] sm:$0xff] %v5888_v32  ;;  %1351 = vmatpush.msra.mxu3 %v5903_v31  ;;  %v5906_v32 = vld [vmem:[#allocation4 + $0x40] sm:$0xff] }
 0x217   :  { %9210 = vst [vmem:[#allocation154_spill] sm:$0xff] %v5891_v8  ;;  %1292 = vmatpush.msra.mxu0 %v5906_v32  ;;  %v5909_v8 = vld [vmem:[#allocation4 + $0x48] sm:$0xff] }
 0x218   :  { %9211 = vst [vmem:[#allocation155_spill] sm:$0xff] %v5894_v28  ;;  %1312 = vmatpush.msra.mxu1 %v5909_v8  ;;  %v5912_v28 = vld [vmem:[#allocation4 + $0x50] sm:$0xff] }
 0x219   :  { %9212 = vst [vmem:[#allocation156_spill] sm:$0xff] %v5897_v35  ;;  %1332 = vmatpush.msra.mxu2 %v5912_v28  ;;  %v5915_v35 = vld [vmem:[#allocation4 + $0x58] sm:$0xff] }
 0x21a   :  { %9213 = vst [vmem:[#allocation157_spill] sm:$0xff] %v5900_v49  ;;  %1352 = vmatpush.msra.mxu3 %v5915_v35  ;;  %v5918_v49 = vld [vmem:[#allocation4 + $0x20] sm:$0xff] }
 0x21b   :  { %9214 = vst [vmem:[#allocation158_spill] sm:$0xff] %v5903_v31  ;;  %1293 = vmatpush.msra.mxu0 %v5918_v49  ;;  %v5921_v31 = vld [vmem:[#allocation4 + $0x28] sm:$0xff] }
 0x21c   :  { %9215 = vst [vmem:[#allocation159_spill] sm:$0xff] %v5906_v32  ;;  %1313 = vmatpush.msra.mxu1 %v5921_v31  ;;  %v5924_v32 = vld [vmem:[#allocation4 + $0x30] sm:$0xff] }
 0x21d   :  { %9216 = vst [vmem:[#allocation160_spill] sm:$0xff] %v5909_v8  ;;  %1333 = vmatpush.msra.mxu2 %v5924_v32  ;;  %v5927_v8 = vld [vmem:[#allocation4 + $0x38] sm:$0xff] }
 0x21e   :  { %9217 = vst [vmem:[#allocation161_spill] sm:$0xff] %v5912_v28  ;;  %1353 = vmatpush.msra.mxu3 %v5927_v8  ;;  %v5930_v28 = vld [vmem:[#allocation4] sm:$0xff] }
 0x21f   :  { %9218 = vst [vmem:[#allocation162_spill] sm:$0xff] %v5915_v35  ;;  %1294 = vmatpush.msra.mxu0 %v5930_v28  ;;  %v5933_v35 = vld [vmem:[#allocation4 + $0x8] sm:$0xff] }
 0x220   :  { %9219 = vst [vmem:[#allocation163_spill] sm:$0xff] %v5918_v49  ;;  %1314 = vmatpush.msra.mxu1 %v5933_v35  ;;  %v5936_v49 = vld [vmem:[#allocation4 + $0x10] sm:$0xff] }
 0x221   :  { %9220 = vst [vmem:[#allocation164_spill] sm:$0xff] %v5921_v31  ;;  %1334 = vmatpush.msra.mxu2 %v5936_v49  ;;  %v5939_v31 = vld [vmem:[#allocation4 + $0x18] sm:$0xff] }
 0x222   :  { %9221 = vst [vmem:[#allocation165_spill] sm:$0xff] %v5924_v32  ;;  %1354 = vmatpush.msra.mxu3 %v5939_v31  ;;  %v837_v32 = vpop.f32.mrf.mxu0 }
 0x223   :  { %9222 = vst [vmem:[#allocation166_spill] sm:$0xff] %v5927_v8 }
 0x224   :  { %9223 = vst [vmem:[#allocation167_spill] sm:$0xff] %v5930_v28 }
 0x225   :  { %9224 = vst [vmem:[#allocation168_spill] sm:$0xff] %v5933_v35  ;;  %v897_v35 = vpop.f32.mrf.mxu3 }
 0x226   :  { %9225 = vst [vmem:[#allocation169_spill] sm:$0xff] %v5936_v49  ;;  %v957_v49 = vpop.f32.mrf.mxu2 }
 0x227   :  { %9226 = vst [vmem:[#allocation170_spill] sm:$0xff] %v5939_v31  ;;  %v958_v16 = vadd.f32 %v957_v49, %v877_v5 }
 0x229   :  { %v982_v31 = vadd.f32 %v958_v16, %v5265_v33 }
 0x22a   :  { %v917_v8 = vpop.f32.mrf.mxu0 }
 0x22b   :  { %v918_v22 = vadd.f32 %v917_v8, %v837_v32  ;;  %v3399_v12 = vmul.f32 -1.442695, %v982_v31 }
 0x22d   :  { %v980_v28 = vadd.f32 %v918_v22, %v5259_v29  ;;  %v977_v8 = vpop.f32.mrf.mxu3 }
 0x22e   :  { %v978_v22 = vadd.f32 %v977_v8, %v897_v35 }
 0x22f   :  { %v3397_v19 = vmul.f32 -1.442695, %v980_v28 }
 0x231   :  { %3516 = vpow2.f32 %v3397_v19  ;;  %v983_v19 = vadd.f32 %v978_v22, %v5274_v46  ;;  %v1084_v22 = vpop.f32.mrf.mxu1 }
 0x232   :  { %3518 = vpow2.f32 %v3398_v17  ;;  %v1064_v8 = vpop.f32.mrf.mxu0 }
 0x233   :  { %3520 = vpow2.f32 %v3399_v12 }
 0x237   :  { %v3517_v15 = vpop.eup %3516 }
 0x238   :  { %v3519_v14 = vpop.eup %3518  ;;  %v993_v13 = vadd.f32 1.0, %v3517_v15  ;;  %v3400_v15 = vld [vmem:[%s8168_s0 + $0x40] sm:$0xff] }
 0x239   :  { %v994_v23 = vadd.f32 1.0, %v3519_v14  ;;  %v3521_v21 = vpop.eup %3520  ;;  %v3401_v14 = vld [vmem:[%s8168_s0 + $0x48] sm:$0xff]  ;;  %v1132_v46 = vadd.f32 %v3400_v15, %v1064_v8 }
 0x23a   :  { %3522 = vrcp.f32 %v993_v13  ;;  %v5945_v26 = vadd.f32 1.0, %v3521_v21  ;;  %v1005_v28 = vand.u32 2147483647, %v993_v13  ;;  %v1007_v32 = vand.u32 2147483648, %v993_v13 }
 0x23b   :  { %3524 = vrcp.f32 %v994_v23  ;;  %v1022_v31 = vand.u32 2147483648, %v994_v23  ;;  %v1020_v35 = vand.u32 2147483647, %v994_v23  ;;  %v1133_v33 = vadd.f32 %v3401_v14, %v1084_v22  ;;  %v1124_v22 = vpop.f32.mrf.mxu3 }
 0x23c   :  { %3526 = vrcp.f32 %v5945_v26  ;;  %vm1001_vm6 = vweird.f32 %v993_v13  ;;  %vm1016_vm7 = vweird.f32 %v994_v23  ;;  %v3404_v10 = vmul.f32 -1.442695, %v1132_v46 }
 0x23d   :  { %3528 = vtanh.f32 %v983_v19  ;;  %vm1006_vm9 = vcmp.eq.f32.partialorder %v1005_v28, 8.507059e+37  ;;  %vm1021_vm11 = vcmp.eq.f32.partialorder %v1020_v35, 8.507059e+37  ;;  %vm1031_vm13 = vweird.f32 %v5945_v26 }
 0x23e   :  { %3530 = vpow2.f32 %v3404_v10 }
 0x240   :  { %v3523_v20 = vpop.eup %3522 }
 0x241   :  { %v3525_v17 = vpop.eup %3524  ;;  %v997_v5 = vmul.f32 %v3523_v20, %v993_v13  ;;  %vm1002_vm4 = vweird.f32 %v3523_v20  ;;  %v3402_v13 = vld [vmem:[%s8168_s0 + $0x50] sm:$0xff] }
 0x242   :  { %v1012_v16 = vmul.f32 %v3525_v17, %v994_v23  ;;  %vm1017_vm5 = vweird.f32 %v3525_v17  ;;  %v3527_v29 = vpop.eup %3526  ;;  %vm1003_vm8 = vmor %vm1001_vm6, %vm1002_vm4 }
 0x243   :  { %v998_v12 = vsub.f32 1.0, %v997_v5  ;;  %v3405_v5 = vmul.f32 -1.442695, %v1133_v33  ;;  %v1027_v19 = vmul.f32 %v3527_v29, %v5945_v26  ;;  %v3529_v7 = vpop.eup %3528  ;;  %vm1018_vm10 = vmor %vm1016_vm7, %vm1017_vm5  ;;  %vm1032_vm12 = vweird.f32 %v3527_v29 }
 0x244   :  { %v1013_v49 = vsub.f32 1.0, %v1012_v16  ;;  %v1008_v16 = vor.u32 1.1754944e-38, %v1007_v32  ;;  %vm1033_vm14 = vmor %vm1031_vm13, %vm1032_vm12 }
 0x245   :  { %v999_v21 = vmul.f32 %v3523_v20, %v998_v12  ;;  %v1023_v12 = vor.u32 1.1754944e-38, %v1022_v31  ;;  %v1028_v23 = vsub.f32 1.0, %v1027_v19  ;;  %3532 = vpow2.f32 %v3405_v5 }
 0x246   :  { %v1014_v56 = vmul.f32 %v3525_v17, %v1013_v49  ;;  %v1104_v49 = vpop.f32.mrf.mxu2 }
 0x247   :  { %v1000_v11 = vadd.f32 %v3523_v20, %v999_v21  ;;  %v1029_v32 = vmul.f32 %v3527_v29, %v1028_v23  ;;  %v3403_v21 = vld [vmem:[%s8168_s0 + $0x58] sm:$0xff] }
 0x248   :  { %v1015_v9 = vadd.f32 %v3525_v17, %v1014_v56  ;;  %v1134_v56 = vadd.f32 %v3402_v13, %v1104_v49 }
 0x249   :  { %v1004_v3 = vsel %vm1003_vm8, %v3523_v20, %v1000_v11  ;;  %v3531_v20 = vpop.eup %3530  ;;  %v1030_v10 = vadd.f32 %v3527_v29, %v1029_v32 }
 0x24a   :  { %v1009_v15 = vsel %vm1006_vm9, %v1008_v16, %v1004_v3  ;;  %v1019_v46 = vsel %vm1018_vm10, %v3525_v17, %v1015_v9  ;;  %v3406_v11 = vmul.f32 -1.442695, %v1134_v56  ;;  %v5963_v35 = vadd.f32 1.0, %v3531_v20 }
 0x24b   :  { %v1024_v33 = vsel %vm1021_vm11, %v1023_v12, %v1019_v46  ;;  %v1043_v14 = vmul.f32 %v3529_v7, %v1009_v15  ;;  %v3533_v31 = vpop.eup %3532  ;;  %v1037_v3 = vand.u32 2147483648, %v5945_v26  ;;  %v1034_v7 = vsel %vm1033_vm14, %v3527_v29, %v1030_v10 }
 0x24c   :  { %v1042_v28 = vmul.f32 %v1024_v33, %v5326_v58  ;;  %v5966_v9 = vadd.f32 1.0, %v3533_v31  ;;  %v1035_v58 = vand.u32 2147483647, %v5945_v26  ;;  %v1135_v26 = vadd.f32 %v3403_v21, %v1124_v22  ;;  %v9246_v22 = vld [vmem:[#allocation43_spill] sm:$0xff]  ;;  %v9247_v21 = vld [vmem:[#allocation29_spill] sm:$0xff] }
 0x24d   :  { %v1038_v17 = vor.u32 1.1754944e-38, %v1037_v3  ;;  %v1159_v49 = vand.u32 2147483648, %v5963_v35  ;;  %v1157_v32 = vand.u32 2147483647, %v5963_v35  ;;  %vm1153_vm2 = vweird.f32 %v5963_v35  ;;  %v9241_v3 = vld [vmem:[#allocation24_spill] sm:$0xff] }
 0x24e   :  { %v5960_v8 = vadd.f32 %v1043_v14, %v1042_v28  ;;  %vm1036_vm15 = vcmp.eq.f32.partialorder %v1035_v58, 8.507059e+37  ;;  %v1174_v28 = vand.u32 2147483648, %v5966_v9  ;;  %vm1168_vm3 = vweird.f32 %v5966_v9  ;;  %v9243_v58 = vld [vmem:[#allocation25_spill] sm:$0xff] }
 0x24f   :  { %v1039_v19 = vsel %vm1036_vm15, %v1038_v17, %v1034_v7  ;;  %vm1158_vm6 = vcmp.eq.f32.partialorder %v1157_v32, 8.507059e+37  ;;  %v9244_v7 = vld [vmem:[#allocation26_spill] sm:$0xff]  ;;  %v9245_v17 = vld [vmem:[#allocation27_spill] sm:$0xff]  ;;  %v9263_v32 = vld [vmem:[#allocation45_spill] sm:$0xff] }
 0x250   :  { %3534 = vtanh.f32 %v5960_v8 }
 0x251   :  { %3536 = vpow2.f32 %v3406_v11 }
 0x252   :  { %3538 = vrcp.f32 %v5963_v35 }
 0x253   :  { %3540 = vrcp.f32 %v5966_v9 }
 0x256   :  { %v3535_v5 = vpop.eup %3534 }
 0x257   :  { %v3537_v16 = vpop.eup %3536  ;;  %v1046_v12 = vmul.f32 %v3535_v5, %v1039_v19  ;;  %v9248_v5 = vld [vmem:[#allocation30_spill] sm:$0xff]  ;;  %v9249_v19 = vld [vmem:[#allocation31_spill] sm:$0xff] }
 0x258   :  { %v3539_v13 = vpop.eup %3538  ;;  %v5975_v23 = vadd.f32 1.0, %v3537_v16  ;;  %v9250_v16 = vld [vmem:[#allocation47_spill] sm:$0xff] }
 0x259   :  { %v3541_v15 = vpop.eup %3540  ;;  %v1149_v46 = vmul.f32 %v3539_v13, %v5963_v35  ;;  %1215 = vmatmul.f32.vlgmr.msrb.gmra.mxu0 %v1046_v12  ;;  %1235 = vmatmul.f32.vlgmr.msrb.gmra.mxu1 %v1046_v12  ;;  %vm1154_vm0 = vweird.f32 %v3539_v13  ;;  %v9240_v35 = vld [vmem:[#allocation23_spill] sm:$0xff] }
 0x25a   :  { %v1164_v29 = vmul.f32 %v3541_v15, %v5966_v9  ;;  %3542 = vrcp.f32 %v5975_v23  ;;  %1255 = vmatmul.f32.vlgmr.msrb.gmra.mxu2 %v1046_v12  ;;  %1275 = vmatmul.f32.vlgmr.msrb.gmra.mxu3 %v1046_v12  ;;  %vm1169_vm1 = vweird.f32 %v3541_v15  ;;  %vm1155_vm4 = vmor %vm1153_vm2, %vm1154_vm0  ;;  %vm1183_vm9 = vweird.f32 %v5975_v23  ;;  %v9251_v12 = vld [vmem:[#allocation33_spill] sm:$0xff] }
 0x25b   :  { %v1150_v33 = vsub.f32 1.0, %v1149_v46  ;;  %1426 = vmatpush.msrb.mxu0 %v5350_v24  ;;  %1446 = vmatpush.msrb.mxu1 %v5353_v25  ;;  %3544 = vtanh.f32 %v1135_v26  ;;  %v1172_v25 = vand.u32 2147483647, %v5966_v9  ;;  %vm1170_vm5 = vmor %vm1168_vm3, %vm1169_vm1  ;;  %v9242_v9 = vld [vmem:[#allocation39_spill] sm:$0xff]  ;;  %v9256_v46 = vld [vmem:[#allocation38_spill] sm:$0xff] }
 0x25c   :  { %v1165_v14 = vsub.f32 1.0, %v1164_v29  ;;  %1466 = vmatpush.msrb.mxu2 %v5360_v27  ;;  %1486 = vmatpush.msrb.mxu3 %v5363_v59  ;;  %v9254_v26 = vld [vmem:[#allocation51_spill] sm:$0xff]  ;;  %v9257_v29 = vld [vmem:[#allocation40_spill] sm:$0xff] }
 0x25d   :  { %v1151_v56 = vmul.f32 %v3539_v13, %v1150_v33  ;;  %1427 = vmatpush.msrb.mxu0 %v5368_v57  ;;  %1447 = vmatpush.msrb.mxu1 %v5371_v30  ;;  %v1160_v57 = vor.u32 1.1754944e-38, %v1159_v49  ;;  %vm1173_vm7 = vcmp.eq.f32.partialorder %v1172_v25, 8.507059e+37  ;;  %v9258_v33 = vld [vmem:[#allocation55_spill] sm:$0xff]  ;;  %v9260_v49 = vld [vmem:[#allocation42_spill] sm:$0xff]  ;;  %v9265_v25 = vld [vmem:[#allocation48_spill] sm:$0xff] }
 0x25e   :  { %v1166_v24 = vmul.f32 %v3541_v15, %v1165_v14  ;;  %1467 = vmatpush.msrb.mxu2 %v5374_v48  ;;  %1487 = vmatpush.msrb.mxu3 %v5377_v61  ;;  %v1175_v48 = vor.u32 1.1754944e-38, %v1174_v28  ;;  %v9259_v14 = vld [vmem:[#allocation41_spill] sm:$0xff]  ;;  %v9261_v28 = vld [vmem:[#allocation44_spill] sm:$0xff] }
 0x25f   :  { %v1152_v27 = vadd.f32 %v3539_v13, %v1151_v56  ;;  %1428 = vmatpush.msrb.mxu0 %v5380_v62  ;;  %1448 = vmatpush.msrb.mxu1 %v5383_v54  ;;  %v9262_v56 = vld [vmem:[#allocation59_spill] sm:$0xff] }
 0x260   :  { %v3543_v59 = vpop.eup %3542  ;;  %v1167_v30 = vadd.f32 %v3541_v15, %v1166_v24  ;;  %1468 = vmatpush.msrb.mxu2 %v5386_v52  ;;  %1488 = vmatpush.msrb.mxu3 %v5389_v34  ;;  %v9264_v24 = vld [vmem:[#allocation46_spill] sm:$0xff] }
 0x261   :  { %v1179_v61 = vmul.f32 %v3543_v59, %v5975_v23  ;;  %v1156_v11 = vsel %vm1155_vm4, %v3539_v13, %v1152_v27  ;;  %1429 = vmatpush.msrb.mxu0 %v5394_v36  ;;  %1449 = vmatpush.msrb.mxu1 %v5397_v50  ;;  %v3545_v62 = vpop.eup %3544  ;;  %vm1184_vm8 = vweird.f32 %v3543_v59  ;;  %v9252_v13 = vld [vmem:[#allocation34_spill] sm:$0xff]  ;;  %v9266_v27 = vld [vmem:[#allocation63_spill] sm:$0xff] }
 0x262   :  { %v1161_v54 = vsel %vm1158_vm6, %v1160_v57, %v1156_v11  ;;  %v1171_v20 = vsel %vm1170_vm5, %v3541_v15, %v1167_v30  ;;  %1469 = vmatpush.msrb.mxu2 %v5400_v37  ;;  %1489 = vmatpush.msrb.mxu3 %v5403_v38  ;;  %v1187_v38 = vand.u32 2147483647, %v5975_v23  ;;  %vm1185_vm10 = vmor %vm1183_vm9, %vm1184_vm8  ;;  %v9255_v15 = vld [vmem:[#allocation37_spill] sm:$0xff]  ;;  %v9268_v57 = vld [vmem:[#allocation50_spill] sm:$0xff] }
 0x263   :  { %v1180_v52 = vsub.f32 1.0, %v1179_v61  ;;  %v1176_v34 = vsel %vm1173_vm7, %v1175_v48, %v1171_v20  ;;  %v1195_v10 = vmul.f32 %v3545_v62, %v1161_v54  ;;  %1430 = vmatpush.msrb.mxu0 %v5410_v39  ;;  %1450 = vmatpush.msrb.mxu1 %v5413_v63  ;;  %v9269_v30 = vld [vmem:[#allocation52_spill] sm:$0xff]  ;;  %v9270_v48 = vld [vmem:[#allocation67_spill] sm:$0xff]  ;;  %v9271_v61 = vld [vmem:[#allocation53_spill] sm:$0xff] }
 0x264   :  { %v1194_v31 = vmul.f32 %v1176_v34, %v5344_v18  ;;  %1470 = vmatpush.msrb.mxu2 %v5416_v40  ;;  %1490 = vmatpush.msrb.mxu3 %v5419_v41  ;;  %v1189_v18 = vand.u32 2147483648, %v5975_v23  ;;  %v9227_v40 = vld [vmem:[#allocation12_spill] sm:$0xff]  ;;  %v9228_v41 = vld [vmem:[#allocation13_spill] sm:$0xff]  ;;  %vm1188_vm11 = vcmp.eq.f32.partialorder %v1187_v38, 8.507059e+37  ;;  %v9272_v11 = vld [vmem:[#allocation54_spill] sm:$0xff] }
 0x265   :  { %v1181_v36 = vmul.f32 %v3543_v59, %v1180_v52  ;;  %1431 = vmatpush.msrb.mxu0 %v5422_v42  ;;  %1451 = vmatpush.msrb.mxu1 %v5425_v43  ;;  %v9229_v42 = vld [vmem:[#allocation14_spill] sm:$0xff]  ;;  %v9230_v43 = vld [vmem:[#allocation28_spill] sm:$0xff]  ;;  %v9274_v54 = vld [vmem:[#allocation71_spill] sm:$0xff] }
 0x266   :  { %v6012_v50 = vadd.f32 %v1195_v10, %v1194_v31  ;;  %1471 = vmatpush.msrb.mxu2 %v5428_v44  ;;  %1491 = vmatpush.msrb.mxu3 %v5431_v45  ;;  %v1190_v63 = vor.u32 1.1754944e-38, %v1189_v18  ;;  %v9253_v23 = vld [vmem:[#allocation36_spill] sm:$0xff]  ;;  %v9275_v20 = vld [vmem:[#allocation57_spill] sm:$0xff]  ;;  %v9276_v52 = vld [vmem:[#allocation58_spill] sm:$0xff] }
 0x267   :  { %v1182_v37 = vadd.f32 %v3543_v59, %v1181_v36  ;;  %1432 = vmatpush.msrb.mxu0 %v5434_v47  ;;  %1452 = vmatpush.msrb.mxu1 %v5437_v51  ;;  %v9231_v47 = vld [vmem:[#allocation15_spill] sm:$0xff]  ;;  %v9232_v51 = vld [vmem:[#allocation16_spill] sm:$0xff]  ;;  %v9279_v31 = vld [vmem:[#allocation61_spill] sm:$0xff] }
 0x268   :  { %3546 = vtanh.f32 %v6012_v50  ;;  %1472 = vmatpush.msrb.mxu2 %v5440_v53  ;;  %1492 = vmatpush.msrb.mxu3 %v5443_v55  ;;  %v9233_v55 = vld [vmem:[#allocation17_spill] sm:$0xff]  ;;  %v9273_v62 = vld [vmem:[#allocation56_spill] sm:$0xff]  ;;  %v9278_v10 = vld [vmem:[#allocation75_spill] sm:$0xff] }
 0x269   :  { %1433 = vmatpush.msrb.mxu0 %v5446_v60  ;;  %1453 = vmatpush.msrb.mxu1 %v5449_v0  ;;  %v1186_v39 = vsel %vm1185_vm10, %v3543_v59, %v1182_v37  ;;  %v9234_v60 = vld [vmem:[#allocation32_spill] sm:$0xff]  ;;  %v9235_v0 = vld [vmem:[#allocation18_spill] sm:$0xff]  ;;  %v9267_v59 = vld [vmem:[#allocation49_spill] sm:$0xff] }
 0x26a   :  { %1473 = vmatpush.msrb.mxu2 %v5452_v1  ;;  %1493 = vmatpush.msrb.mxu3 %v5455_v2  ;;  %v1191_v45 = vsel %vm1188_vm11, %v1190_v63, %v1186_v39  ;;  %v9236_v1 = vld [vmem:[#allocation19_spill] sm:$0xff]  ;;  %v9237_v2 = vld [vmem:[#allocation20_spill] sm:$0xff]  ;;  %v9280_v36 = vld [vmem:[#allocation62_spill] sm:$0xff] }
 0x26b   :  { %1434 = vmatpush.msrb.mxu0 %v5458_v4  ;;  %1454 = vmatpush.msrb.mxu1 %v5461_v6  ;;  %v9238_v4 = vld [vmem:[#allocation35_spill] sm:$0xff]  ;;  %v9239_v6 = vld [vmem:[#allocation22_spill] sm:$0xff]  ;;  %v9277_v34 = vld [vmem:[#allocation60_spill] sm:$0xff] }
 0x26c   :  { %1474 = vmatpush.msrb.mxu2 %v9227_v40  ;;  %1494 = vmatpush.msrb.mxu3 %v9228_v41  ;;  %v9281_v37 = vld [vmem:[#allocation64_spill] sm:$0xff]  ;;  %v9282_v18 = vld [vmem:[#allocation79_spill] sm:$0xff]  ;;  %v9283_v38 = vld [vmem:[#allocation65_spill] sm:$0xff] }
 0x26d   :  { %1435 = vmatpush.msrb.mxu0 %v9229_v42  ;;  %1455 = vmatpush.msrb.mxu1 %v9230_v43  ;;  %v9284_v39 = vld [vmem:[#allocation66_spill] sm:$0xff]  ;;  %v9285_v63 = vld [vmem:[#allocation68_spill] sm:$0xff]  ;;  %v9286_v40 = vld [vmem:[#allocation83_spill] sm:$0xff] }
 0x26e   :  { %v3547_v44 = vpop.eup %3546  ;;  %1475 = vmatpush.msrb.mxu2 %v9231_v47  ;;  %1495 = vmatpush.msrb.mxu3 %v9232_v51  ;;  %v9287_v41 = vld [vmem:[#allocation69_spill] sm:$0xff]  ;;  %v9288_v42 = vld [vmem:[#allocation70_spill] sm:$0xff]  ;;  %v9289_v43 = vld [vmem:[#allocation72_spill] sm:$0xff] }
 0x26f   :  { %v1198_v53 = vmul.f32 %v3547_v44, %v1191_v45  ;;  %1436 = vmatpush.msrb.mxu0 %v9233_v55  ;;  %1456 = vmatpush.msrb.mxu1 %v9234_v60  ;;  %v9290_v44 = vld [vmem:[#allocation87_spill] sm:$0xff]  ;;  %v9291_v45 = vld [vmem:[#allocation73_spill] sm:$0xff]  ;;  %v9292_v47 = vld [vmem:[#allocation74_spill] sm:$0xff] }
 0x270   :  { %1476 = vmatpush.msrb.mxu2 %v9235_v0  ;;  %1496 = vmatpush.msrb.mxu3 %v9236_v1  ;;  %v9293_v51 = vld [vmem:[#allocation76_spill] sm:$0xff]  ;;  %v9295_v55 = vld [vmem:[#allocation78_spill] sm:$0xff]  ;;  %v9297_v0 = vld [vmem:[#allocation81_spill] sm:$0xff] }
 0x271   :  { %1295 = vmatmul.f32.vlgmr.msra.gmra.mxu0 %v1198_v53  ;;  %1315 = vmatmul.f32.vlgmr.msra.gmra.mxu1 %v1198_v53  ;;  %v9296_v60 = vld [vmem:[#allocation80_spill] sm:$0xff]  ;;  %v9298_v1 = vld [vmem:[#allocation82_spill] sm:$0xff] }
 0x272   :  { %1335 = vmatmul.f32.vlgmr.msra.gmra.mxu2 %v1198_v53  ;;  %1355 = vmatmul.f32.vlgmr.msra.gmra.mxu3 %v1198_v53 }
 0x273   :  { %1437 = vmatpush.msrb.mxu0 %v9237_v2  ;;  %1457 = vmatpush.msrb.mxu1 %v9238_v4  ;;  %v9299_v2 = vld [vmem:[#allocation84_spill] sm:$0xff]  ;;  %v9300_v4 = vld [vmem:[#allocation85_spill] sm:$0xff] }
 0x274   :  { %1477 = vmatpush.msrb.mxu2 %v9239_v6  ;;  %1497 = vmatpush.msrb.mxu3 %v9240_v35  ;;  %v9301_v6 = vld [vmem:[#allocation86_spill] sm:$0xff]  ;;  %v9302_v35 = vld [vmem:[#allocation88_spill] sm:$0xff] }
 0x275   :  { %1438 = vmatpush.msrb.mxu0 %v9241_v3  ;;  %1458 = vmatpush.msrb.mxu1 %v9242_v9  ;;  %v9303_v3 = vld [vmem:[#allocation89_spill] sm:$0xff]  ;;  %v9304_v9 = vld [vmem:[#allocation90_spill] sm:$0xff] }
 0x276   :  { %1478 = vmatpush.msrb.mxu2 %v9243_v58  ;;  %1498 = vmatpush.msrb.mxu3 %v9244_v7  ;;  %v9305_v58 = vld [vmem:[#allocation91_spill] sm:$0xff]  ;;  %v9306_v7 = vld [vmem:[#allocation98_spill] sm:$0xff] }
 0x277   :  { %1439 = vmatpush.msrb.mxu0 %v9245_v17  ;;  %1459 = vmatpush.msrb.mxu1 %v9246_v22  ;;  %v9307_v17 = vld [vmem:[#allocation92_spill] sm:$0xff]  ;;  %v9308_v22 = vld [vmem:[#allocation93_spill] sm:$0xff] }
 0x278   :  { %1479 = vmatpush.msrb.mxu2 %v9247_v21  ;;  %1499 = vmatpush.msrb.mxu3 %v9248_v5  ;;  %v9309_v21 = vld [vmem:[#allocation94_spill] sm:$0xff]  ;;  %v9310_v5 = vld [vmem:[#allocation99_spill] sm:$0xff] }
 0x279   :  { %1440 = vmatpush.msrb.mxu0 %v9249_v19  ;;  %1460 = vmatpush.msrb.mxu1 %v9250_v16  ;;  %v9311_v19 = vld [vmem:[#allocation95_spill] sm:$0xff]  ;;  %v9312_v16 = vld [vmem:[#allocation96_spill] sm:$0xff] }
 0x27a   :  { %1480 = vmatpush.msrb.mxu2 %v9251_v12  ;;  %1500 = vmatpush.msrb.mxu3 %v9252_v13  ;;  %v9313_v12 = vld [vmem:[#allocation97_spill] sm:$0xff]  ;;  %v9314_v13 = vld [vmem:[#allocation100_spill] sm:$0xff] }
 0x27b   :  { %1441 = vmatpush.msrb.mxu0 %v9253_v23  ;;  %1461 = vmatpush.msrb.mxu1 %v9254_v26  ;;  %v9315_v23 = vld [vmem:[#allocation101_spill] sm:$0xff]  ;;  %v9316_v26 = vld [vmem:[#allocation102_spill] sm:$0xff] }
 0x27c   :  { %1481 = vmatpush.msrb.mxu2 %v9255_v15  ;;  %1501 = vmatpush.msrb.mxu3 %v9256_v46  ;;  %v9317_v15 = vld [vmem:[#allocation103_spill] sm:$0xff]  ;;  %v9318_v46 = vld [vmem:[#allocation104_spill] sm:$0xff] }
 0x27d   :  { %1442 = vmatmul.f32.vlgmr.msrb.gmra.mxu0 %v1198_v53  ;;  %1462 = vmatmul.f32.vlgmr.msrb.gmra.mxu1 %v1198_v53 }
 0x27e   :  { %1482 = vmatmul.f32.vlgmr.msrb.gmra.mxu2 %v1198_v53  ;;  %1502 = vmatmul.f32.vlgmr.msrb.gmra.mxu3 %v1198_v53  ;;  %v9294_v53 = vld [vmem:[#allocation77_spill] sm:$0xff] }
 0x27f   :  { %1578 = vmatpush.msra.mxu0 %v9257_v29  ;;  %1598 = vmatpush.msra.mxu1 %v9258_v33  ;;  %v9319_v29 = vld [vmem:[#allocation105_spill] sm:$0xff]  ;;  %v9320_v33 = vld [vmem:[#allocation106_spill] sm:$0xff] }
 0x280   :  { %1618 = vmatpush.msra.mxu2 %v9259_v14  ;;  %1638 = vmatpush.msra.mxu3 %v9260_v49  ;;  %v9321_v14 = vld [vmem:[#allocation107_spill] sm:$0xff]  ;;  %v9322_v49 = vld [vmem:[#allocation108_spill] sm:$0xff] }
 0x281   :  { %1579 = vmatpush.msra.mxu0 %v9261_v28  ;;  %1599 = vmatpush.msra.mxu1 %v9262_v56  ;;  %v9323_v28 = vld [vmem:[#allocation109_spill] sm:$0xff]  ;;  %v9324_v56 = vld [vmem:[#allocation110_spill] sm:$0xff] }
 0x282   :  { %1619 = vmatpush.msra.mxu2 %v9263_v32  ;;  %1639 = vmatpush.msra.mxu3 %v9264_v24  ;;  %v9325_v32 = vld [vmem:[#allocation111_spill] sm:$0xff]  ;;  %v9326_v24 = vld [vmem:[#allocation112_spill] sm:$0xff] }
 0x283   :  { %1580 = vmatpush.msra.mxu0 %v9265_v25  ;;  %1600 = vmatpush.msra.mxu1 %v9266_v27  ;;  %v9327_v25 = vld [vmem:[#allocation113_spill] sm:$0xff]  ;;  %v9328_v27 = vld [vmem:[#allocation114_spill] sm:$0xff] }
 0x284   :  { %1620 = vmatpush.msra.mxu2 %v9267_v59  ;;  %1640 = vmatpush.msra.mxu3 %v9268_v57  ;;  %v9329_v59 = vld [vmem:[#allocation115_spill] sm:$0xff]  ;;  %v9330_v57 = vld [vmem:[#allocation116_spill] sm:$0xff] }
 0x285   :  { %1581 = vmatpush.msra.mxu0 %v9269_v30  ;;  %1601 = vmatpush.msra.mxu1 %v9270_v48  ;;  %v9331_v30 = vld [vmem:[#allocation117_spill] sm:$0xff]  ;;  %v9332_v48 = vld [vmem:[#allocation118_spill] sm:$0xff] }
 0x286   :  { %1621 = vmatpush.msra.mxu2 %v9271_v61  ;;  %1641 = vmatpush.msra.mxu3 %v9272_v11  ;;  %v9333_v61 = vld [vmem:[#allocation119_spill] sm:$0xff]  ;;  %v9334_v11 = vld [vmem:[#allocation120_spill] sm:$0xff] }
 0x287   :  { %1582 = vmatpush.msra.mxu0 %v9273_v62  ;;  %1602 = vmatpush.msra.mxu1 %v9274_v54  ;;  %v9335_v62 = vld [vmem:[#allocation121_spill] sm:$0xff]  ;;  %v9336_v54 = vld [vmem:[#allocation122_spill] sm:$0xff] }
 0x288   :  { %1622 = vmatpush.msra.mxu2 %v9275_v20  ;;  %1642 = vmatpush.msra.mxu3 %v9276_v52  ;;  %v9337_v20 = vld [vmem:[#allocation123_spill] sm:$0xff]  ;;  %v9338_v52 = vld [vmem:[#allocation124_spill] sm:$0xff] }
 0x289   :  { %1583 = vmatpush.msra.mxu0 %v9277_v34  ;;  %1603 = vmatpush.msra.mxu1 %v9278_v10  ;;  %v9339_v34 = vld [vmem:[#allocation125_spill] sm:$0xff]  ;;  %v9340_v10 = vld [vmem:[#allocation126_spill] sm:$0xff] }
 0x28a   :  { %1623 = vmatpush.msra.mxu2 %v9279_v31  ;;  %1643 = vmatpush.msra.mxu3 %v9280_v36  ;;  %v9341_v31 = vld [vmem:[#allocation127_spill] sm:$0xff]  ;;  %v9342_v36 = vld [vmem:[#allocation128_spill] sm:$0xff] }
 0x28b   :  { %1584 = vmatpush.msra.mxu0 %v9281_v37  ;;  %1604 = vmatpush.msra.mxu1 %v9282_v18  ;;  %v9343_v37 = vld [vmem:[#allocation129_spill] sm:$0xff]  ;;  %v9344_v18 = vld [vmem:[#allocation130_spill] sm:$0xff] }
 0x28c   :  { %1624 = vmatpush.msra.mxu2 %v9283_v38  ;;  %1644 = vmatpush.msra.mxu3 %v9284_v39  ;;  %v9345_v38 = vld [vmem:[#allocation131_spill] sm:$0xff]  ;;  %v9346_v39 = vld [vmem:[#allocation132_spill] sm:$0xff] }
 0x28d   :  { %1585 = vmatpush.msra.mxu0 %v9285_v63  ;;  %1605 = vmatpush.msra.mxu1 %v9286_v40  ;;  %v9347_v63 = vld [vmem:[#allocation133_spill] sm:$0xff]  ;;  %v9348_v40 = vld [vmem:[#allocation134_spill] sm:$0xff] }
 0x28e   :  { %1625 = vmatpush.msra.mxu2 %v9287_v41  ;;  %1645 = vmatpush.msra.mxu3 %v9288_v42  ;;  %v9349_v41 = vld [vmem:[#allocation135_spill] sm:$0xff]  ;;  %v9350_v42 = vld [vmem:[#allocation136_spill] sm:$0xff] }
 0x28f   :  { %1586 = vmatpush.msra.mxu0 %v9289_v43  ;;  %1606 = vmatpush.msra.mxu1 %v9290_v44  ;;  %v9351_v43 = vld [vmem:[#allocation137_spill] sm:$0xff]  ;;  %v9352_v44 = vld [vmem:[#allocation138_spill] sm:$0xff] }
 0x290   :  { %1626 = vmatpush.msra.mxu2 %v9291_v45  ;;  %1646 = vmatpush.msra.mxu3 %v9292_v47  ;;  %v9353_v45 = vld [vmem:[#allocation139_spill] sm:$0xff]  ;;  %v9354_v47 = vld [vmem:[#allocation140_spill] sm:$0xff] }
 0x291   :  { %1587 = vmatpush.msra.mxu0 %v9293_v51  ;;  %1607 = vmatpush.msra.mxu1 %v9294_v53  ;;  %v9355_v51 = vld [vmem:[#allocation141_spill] sm:$0xff]  ;;  %v9356_v53 = vld [vmem:[#allocation142_spill] sm:$0xff] }
 0x292   :  { %1627 = vmatpush.msra.mxu2 %v9295_v55  ;;  %1647 = vmatpush.msra.mxu3 %v9296_v60  ;;  %v9357_v55 = vld [vmem:[#allocation143_spill] sm:$0xff]  ;;  %v9358_v60 = vld [vmem:[#allocation144_spill] sm:$0xff] }
 0x293   :  { %1588 = vmatpush.msra.mxu0 %v9297_v0  ;;  %1608 = vmatpush.msra.mxu1 %v9298_v1  ;;  %v9359_v0 = vld [vmem:[#allocation145_spill] sm:$0xff]  ;;  %v9360_v1 = vld [vmem:[#allocation146_spill] sm:$0xff] }
 0x294   :  { %1628 = vmatpush.msra.mxu2 %v9299_v2  ;;  %1648 = vmatpush.msra.mxu3 %v9300_v4  ;;  %v9361_v2 = vld [vmem:[#allocation147_spill] sm:$0xff]  ;;  %v9362_v4 = vld [vmem:[#allocation148_spill] sm:$0xff] }
 0x295   :  { %1589 = vmatpush.msra.mxu0 %v9301_v6  ;;  %1609 = vmatpush.msra.mxu1 %v9302_v35  ;;  %v9363_v6 = vld [vmem:[#allocation149_spill] sm:$0xff]  ;;  %v9364_v35 = vld [vmem:[#allocation150_spill] sm:$0xff] }
 0x296   :  { %1629 = vmatpush.msra.mxu2 %v9303_v3  ;;  %1649 = vmatpush.msra.mxu3 %v9304_v9  ;;  %v9365_v3 = vld [vmem:[#allocation151_spill] sm:$0xff]  ;;  %v9366_v9 = vld [vmem:[#allocation152_spill] sm:$0xff] }
 0x297   :  { %1590 = vmatpush.msra.mxu0 %v9305_v58  ;;  %1610 = vmatpush.msra.mxu1 %v9306_v7  ;;  %v9367_v58 = vld [vmem:[#allocation153_spill] sm:$0xff]  ;;  %v9368_v7 = vld [vmem:[#allocation154_spill] sm:$0xff] }
 0x298   :  { %1630 = vmatpush.msra.mxu2 %v9307_v17  ;;  %1650 = vmatpush.msra.mxu3 %v9308_v22  ;;  %v9369_v17 = vld [vmem:[#allocation155_spill] sm:$0xff]  ;;  %v9370_v22 = vld [vmem:[#allocation156_spill] sm:$0xff] }
 0x299   :  { %1591 = vmatpush.msra.mxu0 %v9309_v21  ;;  %1611 = vmatpush.msra.mxu1 %v9310_v5  ;;  %v9371_v21 = vld [vmem:[#allocation157_spill] sm:$0xff]  ;;  %v9372_v5 = vld [vmem:[#allocation158_spill] sm:$0xff] }
 0x29a   :  { %1631 = vmatpush.msra.mxu2 %v9311_v19  ;;  %1651 = vmatpush.msra.mxu3 %v9312_v16  ;;  %v9373_v19 = vld [vmem:[#allocation159_spill] sm:$0xff]  ;;  %v9374_v16 = vld [vmem:[#allocation160_spill] sm:$0xff] }
 0x29b   :  { %1592 = vmatpush.msra.mxu0 %v9313_v12  ;;  %1612 = vmatpush.msra.mxu1 %v9314_v13  ;;  %v9375_v12 = vld [vmem:[#allocation161_spill] sm:$0xff]  ;;  %v9376_v13 = vld [vmem:[#allocation162_spill] sm:$0xff] }
 0x29c   :  { %1632 = vmatpush.msra.mxu2 %v9315_v23  ;;  %1652 = vmatpush.msra.mxu3 %v9316_v26  ;;  %v9377_v23 = vld [vmem:[#allocation163_spill] sm:$0xff]  ;;  %v9378_v26 = vld [vmem:[#allocation164_spill] sm:$0xff] }
 0x29d   :  { %1593 = vmatpush.msra.mxu0 %v9317_v15  ;;  %1613 = vmatpush.msra.mxu1 %v9318_v46  ;;  %v9379_v15 = vld [vmem:[#allocation165_spill] sm:$0xff]  ;;  %v9380_v46 = vld [vmem:[#allocation166_spill] sm:$0xff] }
 0x29e   :  { %1633 = vmatpush.msra.mxu2 %v9319_v29  ;;  %1653 = vmatpush.msra.mxu3 %v9320_v33  ;;  %v9381_v29 = vld [vmem:[#allocation167_spill] sm:$0xff]  ;;  %v9382_v33 = vld [vmem:[#allocation168_spill] sm:$0xff] }
 0x29f   :  { %1658 = vmatpush.msrb.mxu0 %v9321_v14  ;;  %1678 = vmatpush.msrb.mxu1 %v9322_v49  ;;  %v9383_v14 = vld [vmem:[#allocation169_spill] sm:$0xff]  ;;  %v9384_v49 = vld [vmem:[#allocation170_spill] sm:$0xff] }
 0x2a0   :  { %1698 = vmatpush.msrb.mxu2 %v9323_v28  ;;  %1718 = vmatpush.msrb.mxu3 %v9324_v56 }
 0x2a1   :  { %1659 = vmatpush.msrb.mxu0 %v9325_v32  ;;  %1679 = vmatpush.msrb.mxu1 %v9326_v24 }
 0x2a2   :  { %1699 = vmatpush.msrb.mxu2 %v9327_v25  ;;  %1719 = vmatpush.msrb.mxu3 %v9328_v27 }
 0x2a3   :  { %1660 = vmatpush.msrb.mxu0 %v9329_v59  ;;  %1680 = vmatpush.msrb.mxu1 %v9330_v57  ;;  %v9385_v57 = vld [vmem:[#allocation21_spill] sm:$0xff] }
 0x2a4   :  { %1700 = vmatpush.msrb.mxu2 %v9331_v30  ;;  %1720 = vmatpush.msrb.mxu3 %v9332_v48  ;;  %v9386_v48 = vld [vmem:[#allocation9_spill] sm:$0xff] }
 0x2a5   :  { %1661 = vmatpush.msrb.mxu0 %v9333_v61  ;;  %1681 = vmatpush.msrb.mxu1 %v9334_v11 }
 0x2a6   :  { %1701 = vmatpush.msrb.mxu2 %v9335_v62  ;;  %1721 = vmatpush.msrb.mxu3 %v9336_v54 }
 0x2a7   :  { %1662 = vmatpush.msrb.mxu0 %v9337_v20  ;;  %1682 = vmatpush.msrb.mxu1 %v9338_v52 }
 0x2a8   :  { %1702 = vmatpush.msrb.mxu2 %v9339_v34  ;;  %1722 = vmatpush.msrb.mxu3 %v9340_v10  ;;  %v9387_v34 = vld [vmem:[#allocation10_spill] sm:$0xff] }
 0x2a9   :  { %1663 = vmatpush.msrb.mxu0 %v9341_v31  ;;  %1683 = vmatpush.msrb.mxu1 %v9342_v36  ;;  %v3410_v31 = vld [vmem:[%s8168_s0 + $0x60] sm:$0xff]  ;;  %v3411_v36 = vld [vmem:[%s8168_s0 + $0x68] sm:$0xff] }
 0x2aa   :  { %1703 = vmatpush.msrb.mxu2 %v9343_v37  ;;  %1723 = vmatpush.msrb.mxu3 %v9344_v18 }
 0x2ab   :  { %1664 = vmatpush.msrb.mxu0 %v9345_v38  ;;  %1684 = vmatpush.msrb.mxu1 %v9346_v39 }
 0x2ac   :  { %1704 = vmatpush.msrb.mxu2 %v9347_v63  ;;  %1724 = vmatpush.msrb.mxu3 %v9348_v40 }
 0x2ad   :  { %1665 = vmatpush.msrb.mxu0 %v9349_v41  ;;  %1685 = vmatpush.msrb.mxu1 %v9350_v42 }
 0x2ae   :  { %1705 = vmatpush.msrb.mxu2 %v9351_v43  ;;  %1725 = vmatpush.msrb.mxu3 %v9352_v44 }
 0x2af   :  { %1666 = vmatpush.msrb.mxu0 %v9353_v45  ;;  %1686 = vmatpush.msrb.mxu1 %v9354_v47 }
 0x2b0   :  { %1706 = vmatpush.msrb.mxu2 %v9355_v51  ;;  %1726 = vmatpush.msrb.mxu3 %v9356_v53  ;;  %v3412_v53 = vld [vmem:[%s8168_s0 + $0x70] sm:$0xff] }
 0x2b1   :  { %1667 = vmatpush.msrb.mxu0 %v9357_v55  ;;  %1687 = vmatpush.msrb.mxu1 %v9358_v60 }
 0x2b2   :  { %1707 = vmatpush.msrb.mxu2 %v9359_v0  ;;  %1727 = vmatpush.msrb.mxu3 %v9360_v1 }
 0x2b3   :  { %1668 = vmatpush.msrb.mxu0 %v9361_v2  ;;  %1688 = vmatpush.msrb.mxu1 %v9362_v4  ;;  %v9388_v2 = vld [vmem:[#allocation11_spill] sm:$0xff] }
 0x2b4   :  { %1708 = vmatpush.msrb.mxu2 %v9363_v6  ;;  %1728 = vmatpush.msrb.mxu3 %v9364_v35 }
 0x2b5   :  { %1669 = vmatpush.msrb.mxu0 %v9365_v3  ;;  %1689 = vmatpush.msrb.mxu1 %v9366_v9 }
 0x2b6   :  { %1709 = vmatpush.msrb.mxu2 %v9367_v58  ;;  %1729 = vmatpush.msrb.mxu3 %v9368_v7 }
 0x2b7   :  { %1670 = vmatpush.msrb.mxu0 %v9369_v17  ;;  %1690 = vmatpush.msrb.mxu1 %v9370_v22 }
 0x2b8   :  { %1710 = vmatpush.msrb.mxu2 %v9371_v21  ;;  %1730 = vmatpush.msrb.mxu3 %v9372_v5 }
 0x2b9   :  { %1671 = vmatpush.msrb.mxu0 %v9373_v19  ;;  %1691 = vmatpush.msrb.mxu1 %v9374_v16 }
 0x2ba   :  { %1711 = vmatpush.msrb.mxu2 %v9375_v12  ;;  %1731 = vmatpush.msrb.mxu3 %v9376_v13 }
 0x2bb   :  { %1672 = vmatpush.msrb.mxu0 %v9377_v23  ;;  %1692 = vmatpush.msrb.mxu1 %v9378_v26 }
 0x2bc   :  { %1712 = vmatpush.msrb.mxu2 %v9379_v15  ;;  %1732 = vmatpush.msrb.mxu3 %v9380_v46 }
 0x2bd   :  { %1673 = vmatpush.msrb.mxu0 %v9381_v29  ;;  %1693 = vmatpush.msrb.mxu1 %v9382_v33  ;;  %v3413_v29 = vld [vmem:[%s8168_s0 + $0x78] sm:$0xff] }
 0x2be   :  { %1713 = vmatpush.msrb.mxu2 %v9383_v14  ;;  %1733 = vmatpush.msrb.mxu3 %v9384_v49 }
 0x2d6   :  { %v1216_v28 = vpop.f32.mrf.mxu0  ;;  %v1236_v56 = vpop.f32.mrf.mxu1 }
 0x2dd   :  { %v1256_v32 = vpop.f32.mrf.mxu2  ;;  %v1276_v54 = vpop.f32.mrf.mxu3 }
 0x2ee   :  { %v1296_v24 = vpop.f32.mrf.mxu0  ;;  %v1316_v25 = vpop.f32.mrf.mxu1 }
 0x2ef   :  { %v1297_v27 = vadd.f32 %v1296_v24, %v1216_v28  ;;  %v1317_v59 = vadd.f32 %v1316_v25, %v1236_v56 }
 0x2f1   :  { %v1359_v30 = vadd.f32 %v1297_v27, %v9385_v57  ;;  %v1360_v61 = vadd.f32 %v1317_v59, %v9386_v48 }
 0x2f3   :  { %v3407_v11 = vmul.f32 -1.442695, %v1359_v30  ;;  %v3408_v62 = vmul.f32 -1.442695, %v1360_v61 }
 0x2f5   :  { %3548 = vpow2.f32 %v3407_v11  ;;  %v1336_v20 = vpop.f32.mrf.mxu2  ;;  %v1356_v43 = vpop.f32.mrf.mxu3 }
 0x2f6   :  { %3550 = vpow2.f32 %v3408_v62  ;;  %v1337_v52 = vadd.f32 %v1336_v20, %v1256_v32  ;;  %v1357_v51 = vadd.f32 %v1356_v43, %v1276_v54 }
 0x2f8   :  { %v1361_v10 = vadd.f32 %v1337_v52, %v9387_v34  ;;  %v1362_v4 = vadd.f32 %v1357_v51, %v9388_v2 }
 0x2fa   :  { %v3409_v37 = vmul.f32 -1.442695, %v1361_v10  ;;  %v1443_v18 = vpop.f32.mrf.mxu0  ;;  %v1463_v38 = vpop.f32.mrf.mxu1 }
 0x2fb   :  { %v3549_v39 = vpop.eup %3548  ;;  %v1511_v63 = vadd.f32 %v3410_v31, %v1443_v18  ;;  %v1512_v40 = vadd.f32 %v3411_v36, %v1463_v38 }
 0x2fc   :  { %v3551_v41 = vpop.eup %3550  ;;  %v1372_v42 = vadd.f32 1.0, %v3549_v39  ;;  %3552 = vpow2.f32 %v3409_v37 }
 0x2fd   :  { %v1373_v44 = vadd.f32 1.0, %v3551_v41  ;;  %v3414_v45 = vmul.f32 -1.442695, %v1511_v63  ;;  %v3415_v47 = vmul.f32 -1.442695, %v1512_v40 }
 0x2fe   :  { %3554 = vrcp.f32 %v1372_v42  ;;  %v1384_v19 = vand.u32 2147483647, %v1372_v42  ;;  %v1386_v16 = vand.u32 2147483648, %v1372_v42  ;;  %vm1380_vm15 = vweird.f32 %v1372_v42 }
 0x2ff   :  { %3556 = vrcp.f32 %v1373_v44  ;;  %v1401_v13 = vand.u32 2147483648, %v1373_v44  ;;  %v1399_v15 = vand.u32 2147483647, %v1373_v44  ;;  %vm1395_vm14 = vweird.f32 %v1373_v44 }
 0x300   :  { %3558 = vpow2.f32 %v3414_v45  ;;  %vm1385_vm1 = vcmp.eq.f32.partialorder %v1384_v19, 8.507059e+37  ;;  %v1387_v56 = vor.u32 1.1754944e-38, %v1386_v16 }
 0x301   :  { %3560 = vpow2.f32 %v3415_v47  ;;  %v1483_v55 = vpop.f32.mrf.mxu2  ;;  %v1503_v46 = vpop.f32.mrf.mxu3  ;;  %v1402_v25 = vor.u32 1.1754944e-38, %v1401_v13  ;;  %vm1400_vm3 = vcmp.eq.f32.partialorder %v1399_v15, 8.507059e+37 }
 0x302   :  { %v3553_v60 = vpop.eup %3552  ;;  %v1513_v0 = vadd.f32 %v3412_v53, %v1483_v55  ;;  %v1514_v30 = vadd.f32 %v3413_v29, %v1503_v46  ;;  %v6260_v29 = vld [vmem:[#allocation2 + $0x1e0] sm:$0xff] }
 0x303   :  { %v6200_v1 = vadd.f32 1.0, %v3553_v60 }
 0x304   :  { %v3555_v6 = vpop.eup %3554  ;;  %v3416_v35 = vmul.f32 -1.442695, %v1513_v0  ;;  %v6370_v0 = vld [vmem:[#allocation2 + $0x118] sm:$0xff] }
 0x305   :  { %v3557_v3 = vpop.eup %3556  ;;  %v1376_v9 = vmul.f32 %v3555_v6, %v1372_v42  ;;  %3562 = vrcp.f32 %v6200_v1  ;;  %vm1381_vm12 = vweird.f32 %v3555_v6  ;;  %vm1410_vm4 = vweird.f32 %v6200_v1 }
 0x306   :  { %v3559_v58 = vpop.eup %3558  ;;  %v1391_v7 = vmul.f32 %v3557_v3, %v1373_v44  ;;  %3564 = vpow2.f32 %v3416_v35  ;;  %vm1396_vm13 = vweird.f32 %v3557_v3  ;;  %vm1382_vm0 = vmor %vm1380_vm15, %vm1381_vm12  ;;  %v1416_v40 = vand.u32 2147483648, %v6200_v1 }
 0x307   :  { %v3561_v17 = vpop.eup %3560  ;;  %v1377_v22 = vsub.f32 1.0, %v1376_v9  ;;  %3566 = vtanh.f32 %v1362_v4  ;;  %v6204_v21 = vadd.f32 1.0, %v3559_v58  ;;  %vm1397_vm2 = vmor %vm1395_vm14, %vm1396_vm13  ;;  %v1414_v53 = vand.u32 2147483647, %v6200_v1 }
 0x308   :  { %v1392_v5 = vsub.f32 1.0, %v1391_v7  ;;  %v6206_v12 = vadd.f32 1.0, %v3561_v17  ;;  %v1417_v17 = vor.u32 1.1754944e-38, %v1416_v40  ;;  %v6334_v40 = vld [vmem:[#allocation2 + $0x178] sm:$0xff] }
 0x309   :  { %v1378_v23 = vmul.f32 %v3555_v6, %v1377_v22  ;;  %3568 = vrcp.f32 %v6204_v21  ;;  %v1536_v63 = vand.u32 2147483647, %v6204_v21  ;;  %v1538_v42 = vand.u32 2147483648, %v6204_v21 }
 0x30a   :  { %v1393_v26 = vmul.f32 %v3557_v3, %v1392_v5  ;;  %3570 = vrcp.f32 %v6206_v12  ;;  %v1553_v43 = vand.u32 2147483648, %v6206_v12  ;;  %v1551_v51 = vand.u32 2147483647, %v6206_v12 }
 0x30b   :  { %v6213_v33 = vpop.eup %3562  ;;  %v1379_v14 = vadd.f32 %v3555_v6, %v1378_v23  ;;  %vm1547_vm8 = vweird.f32 %v6206_v12  ;;  %vm1532_vm9 = vweird.f32 %v6204_v21  ;;  %vm1537_vm12 = vcmp.eq.f32.partialorder %v1536_v63, 8.507059e+37  ;;  %v6331_v63 = vld [vmem:[#allocation2 + $0x170] sm:$0xff] }
 0x30c   :  { %v3565_v49 = vpop.eup %3564  ;;  %v1406_v28 = vmul.f32 %v6213_v33, %v6200_v1  ;;  %v1394_v32 = vadd.f32 %v3557_v3, %v1393_v26  ;;  %vm1411_vm5 = vweird.f32 %v6213_v33  ;;  %v1554_v9 = vor.u32 1.1754944e-38, %v1553_v43  ;;  %v6346_v43 = vld [vmem:[#allocation2 + $0x158] sm:$0xff] }
 0x30d   :  { %v3567_v24 = vpop.eup %3566  ;;  %v1383_v27 = vsel %vm1382_vm0, %v3555_v6, %v1379_v14  ;;  %v6218_v59 = vadd.f32 1.0, %v3565_v49  ;;  %vm6245_vm10 = vmor %vm1410_vm4, %vm1411_vm5  ;;  %v1539_v6 = vor.u32 1.1754944e-38, %v1538_v42  ;;  %vm1552_vm14 = vcmp.eq.f32.partialorder %v1551_v51, 8.507059e+37  ;;  %v6268_v14 = vld [vmem:[#allocation2 + $0x1f0] sm:$0xff]  ;;  %v6271_v49 = vld [vmem:[#allocation2 + $0x1f8] sm:$0xff] }
 0x30e   :  { %v1407_v61 = vsub.f32 1.0, %v1406_v28  ;;  %v1388_v11 = vsel %vm1385_vm1, %v1387_v56, %v1383_v27  ;;  %v1398_v62 = vsel %vm1397_vm2, %v3557_v3, %v1394_v32  ;;  %vm1415_vm15 = vcmp.eq.f32.partialorder %v1414_v53, 8.507059e+37  ;;  %v6280_v56 = vld [vmem:[#allocation2 + $0x1c0] sm:$0xff]  ;;  %v6283_v32 = vld [vmem:[#allocation2 + $0x1c8] sm:$0xff]  ;;  %v6292_v27 = vld [vmem:[#allocation2 + $0x1d8] sm:$0xff] }
 0x30f   :  { %v3569_v54 = vpop.eup %3568  ;;  %v1403_v20 = vsel %vm1400_vm3, %v1402_v25, %v1398_v62  ;;  %v1422_v52 = vmul.f32 %v3567_v24, %v1388_v11  ;;  %3572 = vrcp.f32 %v6218_v59  ;;  %v1568_v46 = vand.u32 2147483648, %v6218_v59  ;;  %v6289_v25 = vld [vmem:[#allocation2 + $0x1d0] sm:$0xff]  ;;  %v6304_v62 = vld [vmem:[#allocation2 + $0x1b8] sm:$0xff]  ;;  %v6340_v42 = vld [vmem:[#allocation2 + $0x148] sm:$0xff] }
 0x310   :  { %v3571_v10 = vpop.eup %3570  ;;  %v1421_v31 = vmul.f32 %v1403_v20, %v5960_v8  ;;  %v1528_v36 = vmul.f32 %v3569_v54, %v6204_v21  ;;  %3574 = vtanh.f32 %v1514_v30  ;;  %v1408_v18 = vmul.f32 %v6213_v33, %v1407_v61  ;;  %v6295_v30 = vld [vmem:[#allocation2 + $0x1a0] sm:$0xff]  ;;  %v6298_v61 = vld [vmem:[#allocation2 + $0x1a8] sm:$0xff]  ;;  %v6301_v11 = vld [vmem:[#allocation2 + $0x1b0] sm:$0xff] }
 0x311   :  { %v1543_v37 = vmul.f32 %v3571_v10, %v6206_v12  ;;  %vm1533_vm6 = vweird.f32 %v3569_v54  ;;  %vm1548_vm7 = vweird.f32 %v3571_v10  ;;  %vm1562_vm1 = vweird.f32 %v6218_v59  ;;  %v6358_v51 = vld [vmem:[#allocation2 + $0x138] sm:$0xff]  ;;  %v6361_v53 = vld [vmem:[#allocation2 + $0x100] sm:$0xff] }
 0x312   :  { %v6226_v38 = vadd.f32 %v1422_v52, %v1421_v31  ;;  %v1529_v39 = vsub.f32 1.0, %v1528_v36  ;;  %v1409_v8 = vadd.f32 %v6213_v33, %v1408_v18  ;;  %vm1534_vm11 = vmor %vm1532_vm9, %vm1533_vm6  ;;  %v6307_v52 = vld [vmem:[#allocation2 + $0x180] sm:$0xff]  ;;  %v6315_v36 = vld [vmem:[#allocation2 + $0x190] sm:$0xff] }
 0x313   :  { %v1544_v41 = vsub.f32 1.0, %v1543_v37  ;;  %vm1549_vm13 = vmor %vm1547_vm8, %vm1548_vm7  ;;  %v6318_v37 = vld [vmem:[#allocation2 + $0x198] sm:$0xff]  ;;  %v6321_v18 = vld [vmem:[#allocation2 + $0x160] sm:$0xff] }
 0x314   :  { %3576 = vtanh.f32 %v6226_v38  ;;  %v1530_v44 = vmul.f32 %v3569_v54, %v1529_v39  ;;  %v1413_v3 = vsel %vm6245_vm10, %v6213_v33, %v1409_v8  ;;  %v1566_v33 = vand.u32 2147483647, %v6218_v59  ;;  %v6324_v39 = vld [vmem:[#allocation2 + $0x168] sm:$0xff]  ;;  %v6343_v8 = vld [vmem:[#allocation2 + $0x150] sm:$0xff]  ;;  %v6433_v28 = vld [vmem:[#allocation2 + $0x40] sm:$0xff] }
 0x315   :  { %v6235_v45 = vpop.eup %3572  ;;  %v1545_v47 = vmul.f32 %v3571_v10, %v1544_v41  ;;  %v1418_v12 = vsel %vm1415_vm15, %v1417_v17, %v1413_v3  ;;  %v6337_v41 = vld [vmem:[#allocation2 + $0x140] sm:$0xff]  ;;  %v6382_v3 = vld [vmem:[#allocation2 + $0xf8] sm:$0xff]  ;;  %9412 = vst [vmem:[#allocation43_spill] sm:$0xff] %v6433_v28 }
 0x316   :  { %v1558_v55 = vmul.f32 %v6235_v45, %v6218_v59  ;;  %v1531_v60 = vadd.f32 %v3569_v54, %v1530_v44  ;;  %v3575_v4 = vpop.eup %3574  ;;  %vm1563_vm0 = vweird.f32 %v6235_v45  ;;  %v1569_v59 = vor.u32 1.1754944e-38, %v1568_v46  ;;  %v6349_v44 = vld [vmem:[#allocation2 + $0x120] sm:$0xff]  ;;  %9395 = vst [vmem:[#allocation14_spill] sm:$0xff] %v6382_v3  ;;  %v6394_v17 = vld [vmem:[#allocation2 + $0xd8] sm:$0xff]  ;;  %v6427_v46 = vld [vmem:[#allocation2 + $0x70] sm:$0xff] }
 0x317   :  { %v1546_v35 = vadd.f32 %v3571_v10, %v1545_v47  ;;  %vm6276_vm2 = vmor %vm1562_vm1, %vm1563_vm0  ;;  %vm1567_vm3 = vcmp.eq.f32.partialorder %v1566_v33, 8.507059e+37  ;;  %v6355_v47 = vld [vmem:[#allocation2 + $0x130] sm:$0xff]  ;;  %9399 = vst [vmem:[#allocation17_spill] sm:$0xff] %v6394_v17  ;;  %v6430_v33 = vld [vmem:[#allocation2 + $0x78] sm:$0xff] }
 0x318   :  { %v1559_v58 = vsub.f32 1.0, %v1558_v55  ;;  %v1535_v7 = vsel %vm1534_vm11, %v3569_v54, %v1531_v60  ;;  %v6364_v55 = vld [vmem:[#allocation2 + $0x108] sm:$0xff]  ;;  %v6367_v60 = vld [vmem:[#allocation2 + $0x110] sm:$0xff]  ;;  %9410 = vst [vmem:[#allocation26_spill] sm:$0xff] %v6427_v46 }
 0x319   :  { %v1540_v22 = vsel %vm1537_vm12, %v1539_v6, %v1535_v7  ;;  %v1550_v1 = vsel %vm1549_vm13, %v3571_v10, %v1546_v35  ;;  %v6310_v10 = vld [vmem:[#allocation2 + $0x188] sm:$0xff]  ;;  %v6379_v35 = vld [vmem:[#allocation2 + $0xf0] sm:$0xff]  ;;  %9411 = vst [vmem:[#allocation27_spill] sm:$0xff] %v6430_v33 }
 0x31a   :  { %v3577_v21 = vpop.eup %3576  ;;  %v1560_v5 = vmul.f32 %v6235_v45, %v1559_v58  ;;  %v1555_v19 = vsel %vm1552_vm14, %v1554_v9, %v1550_v1  ;;  %v1574_v16 = vmul.f32 %v3575_v4, %v1540_v22  ;;  %v6373_v4 = vld [vmem:[#allocation2 + $0xe0] sm:$0xff]  ;;  %v6376_v6 = vld [vmem:[#allocation2 + $0xe8] sm:$0xff]  ;;  %9394 = vst [vmem:[#allocation13_spill] sm:$0xff] %v6379_v35  ;;  %v6391_v7 = vld [vmem:[#allocation2 + $0xd0] sm:$0xff] }
 0x31b   :  { %v1573_v13 = vmul.f32 %v1555_v19, %v6012_v50  ;;  %v1425_v23 = vmul.f32 %v3577_v21, %v1418_v12  ;;  %v6263_v50 = vld [vmem:[#allocation2 + $0x1e8] sm:$0xff]  ;;  %9393 = vst [vmem:[#allocation12_spill] sm:$0xff] %v6376_v6  ;;  %v6385_v9 = vld [vmem:[#allocation2 + $0xc0] sm:$0xff]  ;;  %v6403_v21 = vld [vmem:[#allocation2 + $0xb0] sm:$0xff] }
 0x31c   :  { %v1561_v15 = vadd.f32 %v6235_v45, %v1560_v5  ;;  %9396 = vst [vmem:[#allocation28_spill] sm:$0xff] %v6385_v9  ;;  %v6388_v58 = vld [vmem:[#allocation2 + $0xc8] sm:$0xff]  ;;  %v6397_v22 = vld [vmem:[#allocation2 + $0xa0] sm:$0xff]  ;;  %v6406_v5 = vld [vmem:[#allocation2 + $0xb8] sm:$0xff] }
 0x31d   :  { %v6254_v26 = vadd.f32 %v1574_v16, %v1573_v13  ;;  %1594 = vmatmul.f32.vlgmr.msra.gmra.mxu0 %v1425_v23  ;;  %1614 = vmatmul.f32.vlgmr.msra.gmra.mxu1 %v1425_v23  ;;  %9397 = vst [vmem:[#allocation15_spill] sm:$0xff] %v6388_v58  ;;  %v6400_v1 = vld [vmem:[#allocation2 + $0xa8] sm:$0xff]  ;;  %v6409_v19 = vld [vmem:[#allocation2 + $0x80] sm:$0xff]  ;;  %v6415_v12 = vld [vmem:[#allocation2 + $0x90] sm:$0xff] }
 0x31e   :  { %1634 = vmatmul.f32.vlgmr.msra.gmra.mxu2 %v1425_v23  ;;  %1654 = vmatmul.f32.vlgmr.msra.gmra.mxu3 %v1425_v23  ;;  %v1565_v24 = vsel %vm6276_vm2, %v6235_v45, %v1561_v15  ;;  %v6352_v45 = vld [vmem:[#allocation2 + $0x128] sm:$0xff]  ;;  %9398 = vst [vmem:[#allocation16_spill] sm:$0xff] %v6391_v7  ;;  %v6418_v13 = vld [vmem:[#allocation2 + $0x98] sm:$0xff]  ;;  %v6421_v23 = vld [vmem:[#allocation2 + $0x60] sm:$0xff] }
 0x31f   :  { %3578 = vtanh.f32 %v6254_v26  ;;  %1805 = vmatpush.msra.mxu0 %v6260_v29  ;;  %1825 = vmatpush.msra.mxu1 %v6263_v50  ;;  %v1570_v20 = vsel %vm1567_vm3, %v1569_v59, %v1565_v24  ;;  %9400 = vst [vmem:[#allocation32_spill] sm:$0xff] %v6397_v22  ;;  %v6412_v16 = vld [vmem:[#allocation2 + $0x88] sm:$0xff]  ;;  %v6439_v59 = vld [vmem:[#allocation2 + $0x50] sm:$0xff] }
 0x320   :  { %1845 = vmatpush.msra.mxu2 %v6268_v14  ;;  %1865 = vmatpush.msra.mxu3 %v6271_v49  ;;  %9401 = vst [vmem:[#allocation18_spill] sm:$0xff] %v6400_v1  ;;  %v6424_v15 = vld [vmem:[#allocation2 + $0x68] sm:$0xff] }
 0x321   :  { %1806 = vmatpush.msra.mxu0 %v6280_v56  ;;  %1826 = vmatpush.msra.mxu1 %v6283_v32  ;;  %9402 = vst [vmem:[#allocation19_spill] sm:$0xff] %v6403_v21  ;;  %v6436_v24 = vld [vmem:[#allocation2 + $0x48] sm:$0xff] }
 0x322   :  { %1846 = vmatpush.msra.mxu2 %v6289_v25  ;;  %1866 = vmatpush.msra.mxu3 %v6292_v27  ;;  %9403 = vst [vmem:[#allocation20_spill] sm:$0xff] %v6406_v5 }
 0x323   :  { %1807 = vmatpush.msra.mxu0 %v6295_v30  ;;  %1827 = vmatpush.msra.mxu1 %v6298_v61  ;;  %9404 = vst [vmem:[#allocation35_spill] sm:$0xff] %v6409_v19 }
 0x324   :  { %1847 = vmatpush.msra.mxu2 %v6301_v11  ;;  %1867 = vmatpush.msra.mxu3 %v6304_v62  ;;  %9405 = vst [vmem:[#allocation22_spill] sm:$0xff] %v6412_v16 }
 0x325   :  { %v3579_v54 = vpop.eup %3578  ;;  %1808 = vmatpush.msra.mxu0 %v6307_v52  ;;  %1828 = vmatpush.msra.mxu1 %v6310_v10  ;;  %9406 = vst [vmem:[#allocation23_spill] sm:$0xff] %v6415_v12 }
 0x326   :  { %v6313_v31 = vmul.f32 %v3579_v54, %v1570_v20  ;;  %1848 = vmatpush.msra.mxu2 %v6315_v36  ;;  %1868 = vmatpush.msra.mxu3 %v6318_v37  ;;  %9407 = vst [vmem:[#allocation24_spill] sm:$0xff] %v6418_v13  ;;  %v6442_v54 = vld [vmem:[#allocation2 + $0x58] sm:$0xff]  ;;  %v6445_v20 = vld [vmem:[#allocation2 + $0x20] sm:$0xff] }
 0x327   :  { %1809 = vmatpush.msra.mxu0 %v6321_v18  ;;  %1829 = vmatpush.msra.mxu1 %v6324_v39  ;;  %9408 = vst [vmem:[#allocation39_spill] sm:$0xff] %v6421_v23 }
 0x328   :  { %1674 = vmatmul.f32.vlgmr.msrb.gmra.mxu0 %v6313_v31  ;;  %1694 = vmatmul.f32.vlgmr.msrb.gmra.mxu1 %v6313_v31  ;;  %9409 = vst [vmem:[#allocation25_spill] sm:$0xff] %v6424_v15 }
 0x329   :  { %1714 = vmatmul.f32.vlgmr.msrb.gmra.mxu2 %v6313_v31  ;;  %1734 = vmatmul.f32.vlgmr.msrb.gmra.mxu3 %v6313_v31  ;;  %9413 = vst [vmem:[#allocation29_spill] sm:$0xff] %v6436_v24 }
 0x32a   :  { %1849 = vmatpush.msra.mxu2 %v6331_v63  ;;  %1869 = vmatpush.msra.mxu3 %v6334_v40  ;;  %9414 = vst [vmem:[#allocation30_spill] sm:$0xff] %v6439_v59 }
 0x32b   :  { %1810 = vmatpush.msra.mxu0 %v6337_v41  ;;  %1830 = vmatpush.msra.mxu1 %v6340_v42  ;;  %9415 = vst [vmem:[#allocation31_spill] sm:$0xff] %v6442_v54 }
 0x32c   :  { %1850 = vmatpush.msra.mxu2 %v6343_v8  ;;  %1870 = vmatpush.msra.mxu3 %v6346_v43  ;;  %9416 = vst [vmem:[#allocation47_spill] sm:$0xff] %v6445_v20 }
 0x32d   :  { %1811 = vmatpush.msra.mxu0 %v6349_v44  ;;  %1831 = vmatpush.msra.mxu1 %v6352_v45 }
 0x32e   :  { %1851 = vmatpush.msra.mxu2 %v6355_v47  ;;  %1871 = vmatpush.msra.mxu3 %v6358_v51 }
 0x32f   :  { %1812 = vmatpush.msra.mxu0 %v6361_v53  ;;  %1832 = vmatpush.msra.mxu1 %v6364_v55 }
 0x330   :  { %1852 = vmatpush.msra.mxu2 %v6367_v60  ;;  %1872 = vmatpush.msra.mxu3 %v6370_v0 }
 0x331   :  { %1813 = vmatpush.msra.mxu0 %v6373_v4  ;;  %1833 = vmatpush.msra.mxu1 %v6376_v6 }
 0x332   :  { %1853 = vmatpush.msra.mxu2 %v6379_v35  ;;  %1873 = vmatpush.msra.mxu3 %v6382_v3 }
 0x333   :  { %1814 = vmatpush.msra.mxu0 %v6385_v9  ;;  %1834 = vmatpush.msra.mxu1 %v6388_v58 }
 0x334   :  { %1854 = vmatpush.msra.mxu2 %v6391_v7  ;;  %1874 = vmatpush.msra.mxu3 %v6394_v17 }
 0x335   :  { %1815 = vmatpush.msra.mxu0 %v6397_v22  ;;  %1835 = vmatpush.msra.mxu1 %v6400_v1 }
 0x336   :  { %1855 = vmatpush.msra.mxu2 %v6403_v21  ;;  %1875 = vmatpush.msra.mxu3 %v6406_v5 }
 0x337   :  { %1816 = vmatpush.msra.mxu0 %v6409_v19  ;;  %1836 = vmatpush.msra.mxu1 %v6412_v16 }
 0x338   :  { %1856 = vmatpush.msra.mxu2 %v6415_v12  ;;  %1876 = vmatpush.msra.mxu3 %v6418_v13 }
 0x339   :  { %1817 = vmatpush.msra.mxu0 %v6421_v23  ;;  %1837 = vmatpush.msra.mxu1 %v6424_v15 }
 0x33a   :  { %1857 = vmatpush.msra.mxu2 %v6427_v46  ;;  %1877 = vmatpush.msra.mxu3 %v6430_v33  ;;  %v6448_v33 = vld [vmem:[#allocation2 + $0x28] sm:$0xff] }
 0x33b   :  { %1818 = vmatpush.msra.mxu0 %v6433_v28  ;;  %1838 = vmatpush.msra.mxu1 %v6436_v24  ;;  %9417 = vst [vmem:[#allocation33_spill] sm:$0xff] %v6448_v33  ;;  %v6451_v28 = vld [vmem:[#allocation2 + $0x30] sm:$0xff]  ;;  %v6454_v24 = vld [vmem:[#allocation2 + $0x38] sm:$0xff] }
 0x33c   :  { %1858 = vmatpush.msra.mxu2 %v6439_v59  ;;  %1878 = vmatpush.msra.mxu3 %v6442_v54  ;;  %9418 = vst [vmem:[#allocation34_spill] sm:$0xff] %v6451_v28  ;;  %v6457_v59 = vld [vmem:[#allocation2] sm:$0xff]  ;;  %v6460_v54 = vld [vmem:[#allocation2 + $0x8] sm:$0xff] }
 0x33d   :  { %1819 = vmatpush.msra.mxu0 %v6445_v20  ;;  %1839 = vmatpush.msra.mxu1 %v6448_v33  ;;  %9419 = vst [vmem:[#allocation36_spill] sm:$0xff] %v6454_v24  ;;  %v6463_v20 = vld [vmem:[#allocation2 + $0x10] sm:$0xff]  ;;  %v6466_v33 = vld [vmem:[#allocation2 + $0x18] sm:$0xff] }
 0x33e   :  { %1859 = vmatpush.msra.mxu2 %v6451_v28  ;;  %1879 = vmatpush.msra.mxu3 %v6454_v24  ;;  %9420 = vst [vmem:[#allocation51_spill] sm:$0xff] %v6457_v59  ;;  %v6485_v24 = vld [vmem:[#allocation6 + $0x1c0] sm:$0xff] }
 0x33f   :  { %1820 = vmatpush.msra.mxu0 %v6457_v59  ;;  %9421 = vst [vmem:[#allocation37_spill] sm:$0xff] %v6460_v54  ;;  %1840 = vmatpush.msra.mxu1 %v6460_v54  ;;  %v6473_v59 = vld [vmem:[#allocation6 + $0x1e0] sm:$0xff]  ;;  %v6476_v54 = vld [vmem:[#allocation6 + $0x1e8] sm:$0xff] }
 0x340   :  { %9422 = vst [vmem:[#allocation38_spill] sm:$0xff] %v6463_v20  ;;  %1860 = vmatpush.msra.mxu2 %v6463_v20  ;;  %1880 = vmatpush.msra.mxu3 %v6466_v33  ;;  %v6479_v20 = vld [vmem:[#allocation6 + $0x1f0] sm:$0xff] }
 0x341   :  { %9423 = vst [vmem:[#allocation40_spill] sm:$0xff] %v6466_v33  ;;  %1821 = vmatmul.f32.vlgmr.msra.gmra.mxu0 %v6313_v31  ;;  %1841 = vmatmul.f32.vlgmr.msra.gmra.mxu1 %v6313_v31  ;;  %v6482_v33 = vld [vmem:[#allocation6 + $0x1f8] sm:$0xff] }
 0x342   :  { %1861 = vmatmul.f32.vlgmr.msra.gmra.mxu2 %v6313_v31  ;;  %1881 = vmatmul.f32.vlgmr.msra.gmra.mxu3 %v6313_v31  ;;  %9424 = vst [vmem:[#allocation55_spill] sm:$0xff] %v6473_v59  ;;  %v6488_v31 = vld [vmem:[#allocation6 + $0x1c8] sm:$0xff] }
 0x343   :  { %1957 = vmatpush.msrb.mxu0 %v6473_v59  ;;  %9425 = vst [vmem:[#allocation41_spill] sm:$0xff] %v6476_v54  ;;  %1977 = vmatpush.msrb.mxu1 %v6476_v54  ;;  %v6491_v59 = vld [vmem:[#allocation6 + $0x1d0] sm:$0xff]  ;;  %v6494_v54 = vld [vmem:[#allocation6 + $0x1d8] sm:$0xff] }
 0x344   :  { %9426 = vst [vmem:[#allocation42_spill] sm:$0xff] %v6479_v20  ;;  %1997 = vmatpush.msrb.mxu2 %v6479_v20  ;;  %2017 = vmatpush.msrb.mxu3 %v6482_v33  ;;  %v6497_v20 = vld [vmem:[#allocation6 + $0x1a0] sm:$0xff] }
 0x345   :  { %9427 = vst [vmem:[#allocation44_spill] sm:$0xff] %v6482_v33  ;;  %1958 = vmatpush.msrb.mxu0 %v6485_v24  ;;  %1978 = vmatpush.msrb.mxu1 %v6488_v31  ;;  %v6500_v33 = vld [vmem:[#allocation6 + $0x1a8] sm:$0xff] }
 0x346   :  { %9428 = vst [vmem:[#allocation59_spill] sm:$0xff] %v6485_v24  ;;  %1998 = vmatpush.msrb.mxu2 %v6491_v59  ;;  %2018 = vmatpush.msrb.mxu3 %v6494_v54  ;;  %v6503_v24 = vld [vmem:[#allocation6 + $0x1b0] sm:$0xff] }
 0x347   :  { %9429 = vst [vmem:[#allocation45_spill] sm:$0xff] %v6488_v31  ;;  %1959 = vmatpush.msrb.mxu0 %v6497_v20  ;;  %1979 = vmatpush.msrb.mxu1 %v6500_v33  ;;  %v6506_v31 = vld [vmem:[#allocation6 + $0x1b8] sm:$0xff] }
 0x348   :  { %9430 = vst [vmem:[#allocation46_spill] sm:$0xff] %v6491_v59  ;;  %1999 = vmatpush.msrb.mxu2 %v6503_v24  ;;  %2019 = vmatpush.msrb.mxu3 %v6506_v31  ;;  %v6509_v59 = vld [vmem:[#allocation6 + $0x180] sm:$0xff] }
 0x349   :  { %9431 = vst [vmem:[#allocation48_spill] sm:$0xff] %v6494_v54  ;;  %1960 = vmatpush.msrb.mxu0 %v6509_v59  ;;  %v6512_v54 = vld [vmem:[#allocation6 + $0x188] sm:$0xff] }
 0x34a   :  { %9432 = vst [vmem:[#allocation63_spill] sm:$0xff] %v6497_v20  ;;  %1980 = vmatpush.msrb.mxu1 %v6512_v54  ;;  %v6515_v20 = vld [vmem:[#allocation6 + $0x190] sm:$0xff] }
 0x34b   :  { %9433 = vst [vmem:[#allocation49_spill] sm:$0xff] %v6500_v33  ;;  %2000 = vmatpush.msrb.mxu2 %v6515_v20  ;;  %v6518_v33 = vld [vmem:[#allocation6 + $0x198] sm:$0xff] }
 0x34c   :  { %9434 = vst [vmem:[#allocation50_spill] sm:$0xff] %v6503_v24  ;;  %2020 = vmatpush.msrb.mxu3 %v6518_v33  ;;  %v6521_v24 = vld [vmem:[#allocation6 + $0x160] sm:$0xff] }
 0x34d   :  { %9435 = vst [vmem:[#allocation52_spill] sm:$0xff] %v6506_v31  ;;  %1961 = vmatpush.msrb.mxu0 %v6521_v24  ;;  %v6524_v31 = vld [vmem:[#allocation6 + $0x168] sm:$0xff] }
 0x34e   :  { %9436 = vst [vmem:[#allocation67_spill] sm:$0xff] %v6509_v59  ;;  %1981 = vmatpush.msrb.mxu1 %v6524_v31  ;;  %v6527_v59 = vld [vmem:[#allocation6 + $0x170] sm:$0xff] }
 0x34f   :  { %9437 = vst [vmem:[#allocation53_spill] sm:$0xff] %v6512_v54  ;;  %2001 = vmatpush.msrb.mxu2 %v6527_v59  ;;  %v6530_v54 = vld [vmem:[#allocation6 + $0x178] sm:$0xff] }
 0x350   :  { %9438 = vst [vmem:[#allocation54_spill] sm:$0xff] %v6515_v20  ;;  %2021 = vmatpush.msrb.mxu3 %v6530_v54  ;;  %v6533_v20 = vld [vmem:[#allocation6 + $0x140] sm:$0xff] }
 0x351   :  { %9439 = vst [vmem:[#allocation56_spill] sm:$0xff] %v6518_v33  ;;  %1962 = vmatpush.msrb.mxu0 %v6533_v20  ;;  %v6536_v33 = vld [vmem:[#allocation6 + $0x148] sm:$0xff] }
 0x352   :  { %9440 = vst [vmem:[#allocation71_spill] sm:$0xff] %v6521_v24  ;;  %1982 = vmatpush.msrb.mxu1 %v6536_v33  ;;  %v6539_v24 = vld [vmem:[#allocation6 + $0x150] sm:$0xff] }
 0x353   :  { %9441 = vst [vmem:[#allocation57_spill] sm:$0xff] %v6524_v31  ;;  %2002 = vmatpush.msrb.mxu2 %v6539_v24  ;;  %v6542_v31 = vld [vmem:[#allocation6 + $0x158] sm:$0xff] }
 0x354   :  { %9442 = vst [vmem:[#allocation58_spill] sm:$0xff] %v6527_v59  ;;  %2022 = vmatpush.msrb.mxu3 %v6542_v31  ;;  %v6545_v59 = vld [vmem:[#allocation6 + $0x120] sm:$0xff] }
 0x355   :  { %9443 = vst [vmem:[#allocation60_spill] sm:$0xff] %v6530_v54  ;;  %1963 = vmatpush.msrb.mxu0 %v6545_v59  ;;  %v6548_v54 = vld [vmem:[#allocation6 + $0x128] sm:$0xff] }
 0x356   :  { %9444 = vst [vmem:[#allocation75_spill] sm:$0xff] %v6533_v20  ;;  %1983 = vmatpush.msrb.mxu1 %v6548_v54  ;;  %v6551_v20 = vld [vmem:[#allocation6 + $0x130] sm:$0xff] }
 0x357   :  { %9445 = vst [vmem:[#allocation61_spill] sm:$0xff] %v6536_v33  ;;  %2003 = vmatpush.msrb.mxu2 %v6551_v20  ;;  %v6554_v33 = vld [vmem:[#allocation6 + $0x138] sm:$0xff] }
 0x358   :  { %9446 = vst [vmem:[#allocation62_spill] sm:$0xff] %v6539_v24  ;;  %2023 = vmatpush.msrb.mxu3 %v6554_v33  ;;  %v6557_v24 = vld [vmem:[#allocation6 + $0x100] sm:$0xff] }
 0x359   :  { %9447 = vst [vmem:[#allocation64_spill] sm:$0xff] %v6542_v31  ;;  %1964 = vmatpush.msrb.mxu0 %v6557_v24  ;;  %v6560_v31 = vld [vmem:[#allocation6 + $0x108] sm:$0xff] }
 0x35a   :  { %9448 = vst [vmem:[#allocation79_spill] sm:$0xff] %v6545_v59  ;;  %1984 = vmatpush.msrb.mxu1 %v6560_v31  ;;  %v6563_v59 = vld [vmem:[#allocation6 + $0x110] sm:$0xff] }
 0x35b   :  { %9449 = vst [vmem:[#allocation65_spill] sm:$0xff] %v6548_v54  ;;  %2004 = vmatpush.msrb.mxu2 %v6563_v59  ;;  %v6566_v54 = vld [vmem:[#allocation6 + $0x118] sm:$0xff] }
 0x35c   :  { %9450 = vst [vmem:[#allocation66_spill] sm:$0xff] %v6551_v20  ;;  %2024 = vmatpush.msrb.mxu3 %v6566_v54  ;;  %v6569_v20 = vld [vmem:[#allocation6 + $0xe0] sm:$0xff] }
 0x35d   :  { %9451 = vst [vmem:[#allocation68_spill] sm:$0xff] %v6554_v33  ;;  %1965 = vmatpush.msrb.mxu0 %v6569_v20  ;;  %v6572_v33 = vld [vmem:[#allocation6 + $0xe8] sm:$0xff] }
 0x35e   :  { %9452 = vst [vmem:[#allocation83_spill] sm:$0xff] %v6557_v24  ;;  %1985 = vmatpush.msrb.mxu1 %v6572_v33  ;;  %v6575_v24 = vld [vmem:[#allocation6 + $0xf0] sm:$0xff] }
 0x35f   :  { %9453 = vst [vmem:[#allocation69_spill] sm:$0xff] %v6560_v31  ;;  %2005 = vmatpush.msrb.mxu2 %v6575_v24  ;;  %v6578_v31 = vld [vmem:[#allocation6 + $0xf8] sm:$0xff] }
 0x360   :  { %9454 = vst [vmem:[#allocation70_spill] sm:$0xff] %v6563_v59  ;;  %2025 = vmatpush.msrb.mxu3 %v6578_v31  ;;  %v6581_v59 = vld [vmem:[#allocation6 + $0xc0] sm:$0xff] }
 0x361   :  { %9455 = vst [vmem:[#allocation72_spill] sm:$0xff] %v6566_v54  ;;  %1966 = vmatpush.msrb.mxu0 %v6581_v59  ;;  %v6584_v54 = vld [vmem:[#allocation6 + $0xc8] sm:$0xff] }
 0x362   :  { %9456 = vst [vmem:[#allocation87_spill] sm:$0xff] %v6569_v20  ;;  %1986 = vmatpush.msrb.mxu1 %v6584_v54  ;;  %v6587_v20 = vld [vmem:[#allocation6 + $0xd0] sm:$0xff] }
 0x363   :  { %9457 = vst [vmem:[#allocation73_spill] sm:$0xff] %v6572_v33  ;;  %2006 = vmatpush.msrb.mxu2 %v6587_v20  ;;  %v6590_v33 = vld [vmem:[#allocation6 + $0xd8] sm:$0xff] }
 0x364   :  { %9458 = vst [vmem:[#allocation74_spill] sm:$0xff] %v6575_v24  ;;  %2026 = vmatpush.msrb.mxu3 %v6590_v33  ;;  %v6593_v24 = vld [vmem:[#allocation6 + $0xa0] sm:$0xff] }
 0x365   :  { %9459 = vst [vmem:[#allocation76_spill] sm:$0xff] %v6578_v31  ;;  %1967 = vmatpush.msrb.mxu0 %v6593_v24  ;;  %v6596_v31 = vld [vmem:[#allocation6 + $0xa8] sm:$0xff] }
 0x366   :  { %9460 = vst [vmem:[#allocation77_spill] sm:$0xff] %v6581_v59  ;;  %1987 = vmatpush.msrb.mxu1 %v6596_v31  ;;  %v6599_v59 = vld [vmem:[#allocation6 + $0xb0] sm:$0xff] }
 0x367   :  { %9461 = vst [vmem:[#allocation78_spill] sm:$0xff] %v6584_v54  ;;  %2007 = vmatpush.msrb.mxu2 %v6599_v59  ;;  %v6602_v54 = vld [vmem:[#allocation6 + $0xb8] sm:$0xff] }
 0x368   :  { %9462 = vst [vmem:[#allocation80_spill] sm:$0xff] %v6587_v20  ;;  %2027 = vmatpush.msrb.mxu3 %v6602_v54  ;;  %v6605_v20 = vld [vmem:[#allocation6 + $0x80] sm:$0xff] }
 0x369   :  { %9463 = vst [vmem:[#allocation81_spill] sm:$0xff] %v6590_v33  ;;  %1968 = vmatpush.msrb.mxu0 %v6605_v20  ;;  %v6608_v33 = vld [vmem:[#allocation6 + $0x88] sm:$0xff] }
 0x36a   :  { %9464 = vst [vmem:[#allocation82_spill] sm:$0xff] %v6593_v24  ;;  %1988 = vmatpush.msrb.mxu1 %v6608_v33  ;;  %v6611_v24 = vld [vmem:[#allocation6 + $0x90] sm:$0xff] }
 0x36b   :  { %9465 = vst [vmem:[#allocation84_spill] sm:$0xff] %v6596_v31  ;;  %2008 = vmatpush.msrb.mxu2 %v6611_v24  ;;  %v6614_v31 = vld [vmem:[#allocation6 + $0x98] sm:$0xff] }
 0x36c   :  { %9466 = vst [vmem:[#allocation85_spill] sm:$0xff] %v6599_v59  ;;  %2028 = vmatpush.msrb.mxu3 %v6614_v31  ;;  %v6617_v59 = vld [vmem:[#allocation6 + $0x60] sm:$0xff] }
 0x36d   :  { %9467 = vst [vmem:[#allocation86_spill] sm:$0xff] %v6602_v54  ;;  %1969 = vmatpush.msrb.mxu0 %v6617_v59  ;;  %v6620_v54 = vld [vmem:[#allocation6 + $0x68] sm:$0xff] }
 0x36e   :  { %9468 = vst [vmem:[#allocation88_spill] sm:$0xff] %v6605_v20  ;;  %1989 = vmatpush.msrb.mxu1 %v6620_v54  ;;  %v6623_v20 = vld [vmem:[#allocation6 + $0x70] sm:$0xff] }
 0x36f   :  { %9469 = vst [vmem:[#allocation89_spill] sm:$0xff] %v6608_v33  ;;  %2009 = vmatpush.msrb.mxu2 %v6623_v20  ;;  %v6626_v33 = vld [vmem:[#allocation6 + $0x78] sm:$0xff] }
 0x370   :  { %9470 = vst [vmem:[#allocation90_spill] sm:$0xff] %v6611_v24  ;;  %2029 = vmatpush.msrb.mxu3 %v6626_v33  ;;  %v6629_v24 = vld [vmem:[#allocation6 + $0x40] sm:$0xff] }
 0x371   :  { %9471 = vst [vmem:[#allocation91_spill] sm:$0xff] %v6614_v31  ;;  %1970 = vmatpush.msrb.mxu0 %v6629_v24  ;;  %v6632_v31 = vld [vmem:[#allocation6 + $0x48] sm:$0xff] }
 0x372   :  { %9472 = vst [vmem:[#allocation98_spill] sm:$0xff] %v6617_v59  ;;  %1990 = vmatpush.msrb.mxu1 %v6632_v31  ;;  %v6635_v59 = vld [vmem:[#allocation6 + $0x50] sm:$0xff] }
 0x373   :  { %9473 = vst [vmem:[#allocation92_spill] sm:$0xff] %v6620_v54  ;;  %2010 = vmatpush.msrb.mxu2 %v6635_v59  ;;  %v6638_v54 = vld [vmem:[#allocation6 + $0x58] sm:$0xff] }
 0x374   :  { %9474 = vst [vmem:[#allocation93_spill] sm:$0xff] %v6623_v20  ;;  %2030 = vmatpush.msrb.mxu3 %v6638_v54  ;;  %v6641_v20 = vld [vmem:[#allocation6 + $0x20] sm:$0xff] }
 0x375   :  { %9475 = vst [vmem:[#allocation94_spill] sm:$0xff] %v6626_v33  ;;  %1971 = vmatpush.msrb.mxu0 %v6641_v20  ;;  %v6644_v33 = vld [vmem:[#allocation6 + $0x28] sm:$0xff] }
 0x376   :  { %9476 = vst [vmem:[#allocation99_spill] sm:$0xff] %v6629_v24  ;;  %1991 = vmatpush.msrb.mxu1 %v6644_v33  ;;  %v6647_v24 = vld [vmem:[#allocation6 + $0x30] sm:$0xff] }
 0x377   :  { %9477 = vst [vmem:[#allocation95_spill] sm:$0xff] %v6632_v31  ;;  %2011 = vmatpush.msrb.mxu2 %v6647_v24  ;;  %v6650_v31 = vld [vmem:[#allocation6 + $0x38] sm:$0xff] }
 0x378   :  { %9478 = vst [vmem:[#allocation96_spill] sm:$0xff] %v6635_v59  ;;  %2031 = vmatpush.msrb.mxu3 %v6650_v31  ;;  %v6653_v59 = vld [vmem:[#allocation6] sm:$0xff] }
 0x379   :  { %9479 = vst [vmem:[#allocation97_spill] sm:$0xff] %v6638_v54  ;;  %1972 = vmatpush.msrb.mxu0 %v6653_v59  ;;  %v6656_v54 = vld [vmem:[#allocation6 + $0x8] sm:$0xff] }
 0x37a   :  { %9480 = vst [vmem:[#allocation100_spill] sm:$0xff] %v6641_v20  ;;  %1992 = vmatpush.msrb.mxu1 %v6656_v54  ;;  %v6659_v20 = vld [vmem:[#allocation6 + $0x10] sm:$0xff] }
 0x37b   :  { %9481 = vst [vmem:[#allocation101_spill] sm:$0xff] %v6644_v33  ;;  %2012 = vmatpush.msrb.mxu2 %v6659_v20  ;;  %v6662_v33 = vld [vmem:[#allocation6 + $0x18] sm:$0xff] }
 0x37c   :  { %9482 = vst [vmem:[#allocation102_spill] sm:$0xff] %v6647_v24  ;;  %2032 = vmatpush.msrb.mxu3 %v6662_v33  ;;  %v6665_v24 = vld [vmem:[#allocation4 + $0x1e0] sm:$0xff] }
 0x37d   :  { %9483 = vst [vmem:[#allocation103_spill] sm:$0xff] %v6650_v31  ;;  %2037 = vmatpush.msra.mxu0 %v6665_v24  ;;  %v6668_v31 = vld [vmem:[#allocation4 + $0x1e8] sm:$0xff] }
 0x37e   :  { %9484 = vst [vmem:[#allocation104_spill] sm:$0xff] %v6653_v59  ;;  %2057 = vmatpush.msra.mxu1 %v6668_v31  ;;  %v6671_v59 = vld [vmem:[#allocation4 + $0x1f0] sm:$0xff] }
 0x37f   :  { %9485 = vst [vmem:[#allocation105_spill] sm:$0xff] %v6656_v54  ;;  %2077 = vmatpush.msra.mxu2 %v6671_v59  ;;  %v6674_v54 = vld [vmem:[#allocation4 + $0x1f8] sm:$0xff] }
 0x380   :  { %9486 = vst [vmem:[#allocation106_spill] sm:$0xff] %v6659_v20  ;;  %2097 = vmatpush.msra.mxu3 %v6674_v54  ;;  %v6677_v20 = vld [vmem:[#allocation4 + $0x1c0] sm:$0xff] }
 0x381   :  { %9487 = vst [vmem:[#allocation107_spill] sm:$0xff] %v6662_v33  ;;  %2038 = vmatpush.msra.mxu0 %v6677_v20  ;;  %v6680_v33 = vld [vmem:[#allocation4 + $0x1c8] sm:$0xff] }
 0x382   :  { %9488 = vst [vmem:[#allocation108_spill] sm:$0xff] %v6665_v24  ;;  %2058 = vmatpush.msra.mxu1 %v6680_v33  ;;  %v6683_v24 = vld [vmem:[#allocation4 + $0x1d0] sm:$0xff] }
 0x383   :  { %9489 = vst [vmem:[#allocation109_spill] sm:$0xff] %v6668_v31  ;;  %2078 = vmatpush.msra.mxu2 %v6683_v24  ;;  %v6686_v31 = vld [vmem:[#allocation4 + $0x1d8] sm:$0xff] }
 0x384   :  { %9490 = vst [vmem:[#allocation110_spill] sm:$0xff] %v6671_v59  ;;  %2098 = vmatpush.msra.mxu3 %v6686_v31  ;;  %v6689_v59 = vld [vmem:[#allocation4 + $0x1a0] sm:$0xff] }
 0x385   :  { %9491 = vst [vmem:[#allocation111_spill] sm:$0xff] %v6674_v54  ;;  %2039 = vmatpush.msra.mxu0 %v6689_v59  ;;  %v6692_v54 = vld [vmem:[#allocation4 + $0x1a8] sm:$0xff] }
 0x386   :  { %9492 = vst [vmem:[#allocation112_spill] sm:$0xff] %v6677_v20  ;;  %2059 = vmatpush.msra.mxu1 %v6692_v54  ;;  %v6695_v20 = vld [vmem:[#allocation4 + $0x1b0] sm:$0xff] }
 0x387   :  { %9493 = vst [vmem:[#allocation113_spill] sm:$0xff] %v6680_v33  ;;  %2079 = vmatpush.msra.mxu2 %v6695_v20  ;;  %v6698_v33 = vld [vmem:[#allocation4 + $0x1b8] sm:$0xff] }
 0x388   :  { %9494 = vst [vmem:[#allocation114_spill] sm:$0xff] %v6683_v24  ;;  %2099 = vmatpush.msra.mxu3 %v6698_v33  ;;  %v6701_v24 = vld [vmem:[#allocation4 + $0x180] sm:$0xff] }
 0x389   :  { %9495 = vst [vmem:[#allocation115_spill] sm:$0xff] %v6686_v31  ;;  %2040 = vmatpush.msra.mxu0 %v6701_v24  ;;  %v6704_v31 = vld [vmem:[#allocation4 + $0x188] sm:$0xff] }
 0x38a   :  { %9496 = vst [vmem:[#allocation116_spill] sm:$0xff] %v6689_v59  ;;  %2060 = vmatpush.msra.mxu1 %v6704_v31  ;;  %v6707_v59 = vld [vmem:[#allocation4 + $0x190] sm:$0xff] }
 0x38b   :  { %9497 = vst [vmem:[#allocation117_spill] sm:$0xff] %v6692_v54  ;;  %2080 = vmatpush.msra.mxu2 %v6707_v59  ;;  %v6710_v54 = vld [vmem:[#allocation4 + $0x198] sm:$0xff] }
 0x38c   :  { %9498 = vst [vmem:[#allocation118_spill] sm:$0xff] %v6695_v20  ;;  %2100 = vmatpush.msra.mxu3 %v6710_v54  ;;  %v6713_v20 = vld [vmem:[#allocation4 + $0x160] sm:$0xff] }
 0x38d   :  { %9499 = vst [vmem:[#allocation119_spill] sm:$0xff] %v6698_v33  ;;  %2041 = vmatpush.msra.mxu0 %v6713_v20  ;;  %v6716_v33 = vld [vmem:[#allocation4 + $0x168] sm:$0xff] }
 0x38e   :  { %9500 = vst [vmem:[#allocation120_spill] sm:$0xff] %v6701_v24  ;;  %2061 = vmatpush.msra.mxu1 %v6716_v33  ;;  %v6719_v24 = vld [vmem:[#allocation4 + $0x170] sm:$0xff] }
 0x38f   :  { %9501 = vst [vmem:[#allocation121_spill] sm:$0xff] %v6704_v31  ;;  %2081 = vmatpush.msra.mxu2 %v6719_v24  ;;  %v6722_v31 = vld [vmem:[#allocation4 + $0x178] sm:$0xff] }
 0x390   :  { %9502 = vst [vmem:[#allocation122_spill] sm:$0xff] %v6707_v59  ;;  %2101 = vmatpush.msra.mxu3 %v6722_v31  ;;  %v6725_v59 = vld [vmem:[#allocation4 + $0x140] sm:$0xff] }
 0x391   :  { %9503 = vst [vmem:[#allocation123_spill] sm:$0xff] %v6710_v54  ;;  %2042 = vmatpush.msra.mxu0 %v6725_v59  ;;  %v6728_v54 = vld [vmem:[#allocation4 + $0x148] sm:$0xff] }
 0x392   :  { %9504 = vst [vmem:[#allocation124_spill] sm:$0xff] %v6713_v20  ;;  %2062 = vmatpush.msra.mxu1 %v6728_v54  ;;  %v6731_v20 = vld [vmem:[#allocation4 + $0x150] sm:$0xff] }
 0x393   :  { %9505 = vst [vmem:[#allocation125_spill] sm:$0xff] %v6716_v33  ;;  %2082 = vmatpush.msra.mxu2 %v6731_v20  ;;  %v6734_v33 = vld [vmem:[#allocation4 + $0x158] sm:$0xff] }
 0x394   :  { %9506 = vst [vmem:[#allocation126_spill] sm:$0xff] %v6719_v24  ;;  %2102 = vmatpush.msra.mxu3 %v6734_v33  ;;  %v6737_v24 = vld [vmem:[#allocation4 + $0x120] sm:$0xff] }
 0x395   :  { %9507 = vst [vmem:[#allocation127_spill] sm:$0xff] %v6722_v31  ;;  %2043 = vmatpush.msra.mxu0 %v6737_v24  ;;  %v6740_v31 = vld [vmem:[#allocation4 + $0x128] sm:$0xff] }
 0x396   :  { %9508 = vst [vmem:[#allocation128_spill] sm:$0xff] %v6725_v59  ;;  %2063 = vmatpush.msra.mxu1 %v6740_v31  ;;  %v6743_v59 = vld [vmem:[#allocation4 + $0x130] sm:$0xff] }
 0x397   :  { %9509 = vst [vmem:[#allocation129_spill] sm:$0xff] %v6728_v54  ;;  %2083 = vmatpush.msra.mxu2 %v6743_v59  ;;  %v6746_v54 = vld [vmem:[#allocation4 + $0x138] sm:$0xff] }
 0x398   :  { %9510 = vst [vmem:[#allocation130_spill] sm:$0xff] %v6731_v20  ;;  %2103 = vmatpush.msra.mxu3 %v6746_v54  ;;  %v6749_v20 = vld [vmem:[#allocation4 + $0x100] sm:$0xff] }
 0x399   :  { %9511 = vst [vmem:[#allocation131_spill] sm:$0xff] %v6734_v33  ;;  %2044 = vmatpush.msra.mxu0 %v6749_v20  ;;  %v6752_v33 = vld [vmem:[#allocation4 + $0x108] sm:$0xff] }
 0x39a   :  { %9512 = vst [vmem:[#allocation132_spill] sm:$0xff] %v6737_v24  ;;  %2064 = vmatpush.msra.mxu1 %v6752_v33  ;;  %v6755_v24 = vld [vmem:[#allocation4 + $0x110] sm:$0xff]  ;;  %v1615_v28 = vpop.f32.mrf.mxu1 }
 0x39b   :  { %9513 = vst [vmem:[#allocation133_spill] sm:$0xff] %v6740_v31  ;;  %2084 = vmatpush.msra.mxu2 %v6755_v24  ;;  %v6758_v31 = vld [vmem:[#allocation4 + $0x118] sm:$0xff] }
 0x39c   :  { %9514 = vst [vmem:[#allocation134_spill] sm:$0xff] %v6743_v59  ;;  %2104 = vmatpush.msra.mxu3 %v6758_v31  ;;  %v6761_v59 = vld [vmem:[#allocation4 + $0xe0] sm:$0xff] }
 0x39d   :  { %9515 = vst [vmem:[#allocation135_spill] sm:$0xff] %v6746_v54  ;;  %2045 = vmatpush.msra.mxu0 %v6761_v59  ;;  %v6764_v54 = vld [vmem:[#allocation4 + $0xe8] sm:$0xff] }
 0x39e   :  { %9516 = vst [vmem:[#allocation136_spill] sm:$0xff] %v6749_v20  ;;  %2065 = vmatpush.msra.mxu1 %v6764_v54  ;;  %v6767_v20 = vld [vmem:[#allocation4 + $0xf0] sm:$0xff] }
 0x39f   :  { %9517 = vst [vmem:[#allocation137_spill] sm:$0xff] %v6752_v33  ;;  %2085 = vmatpush.msra.mxu2 %v6767_v20  ;;  %v6770_v33 = vld [vmem:[#allocation4 + $0xf8] sm:$0xff] }
 0x3a0   :  { %9518 = vst [vmem:[#allocation138_spill] sm:$0xff] %v6755_v24  ;;  %2105 = vmatpush.msra.mxu3 %v6770_v33  ;;  %v6773_v24 = vld [vmem:[#allocation4 + $0xc0] sm:$0xff] }
 0x3a1   :  { %9519 = vst [vmem:[#allocation139_spill] sm:$0xff] %v6758_v31  ;;  %2046 = vmatpush.msra.mxu0 %v6773_v24  ;;  %v6776_v31 = vld [vmem:[#allocation4 + $0xc8] sm:$0xff]  ;;  %v1635_v46 = vpop.f32.mrf.mxu2 }
 0x3a2   :  { %9520 = vst [vmem:[#allocation140_spill] sm:$0xff] %v6761_v59  ;;  %2066 = vmatpush.msra.mxu1 %v6776_v31  ;;  %v6779_v59 = vld [vmem:[#allocation4 + $0xd0] sm:$0xff] }
 0x3a3   :  { %9521 = vst [vmem:[#allocation141_spill] sm:$0xff] %v6764_v54  ;;  %2086 = vmatpush.msra.mxu2 %v6779_v59  ;;  %v6782_v54 = vld [vmem:[#allocation4 + $0xd8] sm:$0xff] }
 0x3a4   :  { %9522 = vst [vmem:[#allocation142_spill] sm:$0xff] %v6767_v20  ;;  %2106 = vmatpush.msra.mxu3 %v6782_v54  ;;  %v6785_v20 = vld [vmem:[#allocation4 + $0xa0] sm:$0xff] }
 0x3a5   :  { %9523 = vst [vmem:[#allocation143_spill] sm:$0xff] %v6770_v33  ;;  %2047 = vmatpush.msra.mxu0 %v6785_v20  ;;  %v6788_v33 = vld [vmem:[#allocation4 + $0xa8] sm:$0xff]  ;;  %v1695_v15 = vpop.f32.mrf.mxu1 }
 0x3a6   :  { %9524 = vst [vmem:[#allocation144_spill] sm:$0xff] %v6773_v24  ;;  %2067 = vmatpush.msra.mxu1 %v6788_v33  ;;  %v6791_v24 = vld [vmem:[#allocation4 + $0xb0] sm:$0xff]  ;;  %v1696_v13 = vadd.f32 %v1695_v15, %v1615_v28 }
 0x3a7   :  { %9525 = vst [vmem:[#allocation145_spill] sm:$0xff] %v6776_v31  ;;  %2087 = vmatpush.msra.mxu2 %v6791_v24  ;;  %v6794_v31 = vld [vmem:[#allocation4 + $0xb8] sm:$0xff] }
 0x3a8   :  { %9526 = vst [vmem:[#allocation146_spill] sm:$0xff] %v6779_v59  ;;  %2107 = vmatpush.msra.mxu3 %v6794_v31  ;;  %v6797_v59 = vld [vmem:[#allocation4 + $0x80] sm:$0xff]  ;;  %v1739_v12 = vadd.f32 %v1696_v13, %v9386_v48 }
 0x3a9   :  { %9527 = vst [vmem:[#allocation147_spill] sm:$0xff] %v6782_v54  ;;  %2048 = vmatpush.msra.mxu0 %v6797_v59  ;;  %v6800_v54 = vld [vmem:[#allocation4 + $0x88] sm:$0xff] }
 0x3aa   :  { %9528 = vst [vmem:[#allocation148_spill] sm:$0xff] %v6785_v20  ;;  %2068 = vmatpush.msra.mxu1 %v6800_v54  ;;  %v6803_v20 = vld [vmem:[#allocation4 + $0x90] sm:$0xff]  ;;  %v3418_v19 = vmul.f32 -1.442695, %v1739_v12 }
 0x3ab   :  { %9529 = vst [vmem:[#allocation149_spill] sm:$0xff] %v6788_v33  ;;  %2088 = vmatpush.msra.mxu2 %v6803_v20  ;;  %v6806_v33 = vld [vmem:[#allocation4 + $0x98] sm:$0xff] }
 0x3ac   :  { %9530 = vst [vmem:[#allocation150_spill] sm:$0xff] %v6791_v24  ;;  %2108 = vmatpush.msra.mxu3 %v6806_v33  ;;  %v6809_v24 = vld [vmem:[#allocation4 + $0x60] sm:$0xff] }
 0x3ad   :  { %9531 = vst [vmem:[#allocation151_spill] sm:$0xff] %v6794_v31  ;;  %2049 = vmatpush.msra.mxu0 %v6809_v24  ;;  %v6812_v31 = vld [vmem:[#allocation4 + $0x68] sm:$0xff] }
 0x3ae   :  { %9532 = vst [vmem:[#allocation152_spill] sm:$0xff] %v6797_v59  ;;  %2069 = vmatpush.msra.mxu1 %v6812_v31  ;;  %v6815_v59 = vld [vmem:[#allocation4 + $0x70] sm:$0xff] }
 0x3af   :  { %9533 = vst [vmem:[#allocation153_spill] sm:$0xff] %v6800_v54  ;;  %2089 = vmatpush.msra.mxu2 %v6815_v59  ;;  %v6818_v54 = vld [vmem:[#allocation4 + $0x78] sm:$0xff] }
 0x3b0   :  { %9534 = vst [vmem:[#allocation154_spill] sm:$0xff] %v6803_v20  ;;  %2109 = vmatpush.msra.mxu3 %v6818_v54  ;;  %v6821_v20 = vld [vmem:[#allocation4 + $0x40] sm:$0xff] }
 0x3b1   :  { %9535 = vst [vmem:[#allocation155_spill] sm:$0xff] %v6806_v33  ;;  %2050 = vmatpush.msra.mxu0 %v6821_v20  ;;  %v6824_v33 = vld [vmem:[#allocation4 + $0x48] sm:$0xff] }
 0x3b2   :  { %9536 = vst [vmem:[#allocation156_spill] sm:$0xff] %v6809_v24  ;;  %2070 = vmatpush.msra.mxu1 %v6824_v33  ;;  %v6827_v24 = vld [vmem:[#allocation4 + $0x50] sm:$0xff] }
 0x3b3   :  { %9537 = vst [vmem:[#allocation157_spill] sm:$0xff] %v6812_v31  ;;  %2090 = vmatpush.msra.mxu2 %v6827_v24  ;;  %v6830_v31 = vld [vmem:[#allocation4 + $0x58] sm:$0xff] }
 0x3b4   :  { %9538 = vst [vmem:[#allocation158_spill] sm:$0xff] %v6815_v59  ;;  %2110 = vmatpush.msra.mxu3 %v6830_v31  ;;  %v6833_v59 = vld [vmem:[#allocation4 + $0x20] sm:$0xff] }
 0x3b5   :  { %9539 = vst [vmem:[#allocation159_spill] sm:$0xff] %v6818_v54  ;;  %2051 = vmatpush.msra.mxu0 %v6833_v59  ;;  %v6836_v54 = vld [vmem:[#allocation4 + $0x28] sm:$0xff] }
 0x3b6   :  { %9540 = vst [vmem:[#allocation160_spill] sm:$0xff] %v6821_v20  ;;  %2071 = vmatpush.msra.mxu1 %v6836_v54  ;;  %v6839_v20 = vld [vmem:[#allocation4 + $0x30] sm:$0xff] }
 0x3b7   :  { %9541 = vst [vmem:[#allocation161_spill] sm:$0xff] %v6824_v33  ;;  %2091 = vmatpush.msra.mxu2 %v6839_v20  ;;  %v6842_v33 = vld [vmem:[#allocation4 + $0x38] sm:$0xff] }
 0x3b8   :  { %9542 = vst [vmem:[#allocation162_spill] sm:$0xff] %v6827_v24  ;;  %2111 = vmatpush.msra.mxu3 %v6842_v33  ;;  %v6845_v24 = vld [vmem:[#allocation4] sm:$0xff] }
 0x3b9   :  { %9543 = vst [vmem:[#allocation163_spill] sm:$0xff] %v6830_v31  ;;  %2052 = vmatpush.msra.mxu0 %v6845_v24  ;;  %v6848_v31 = vld [vmem:[#allocation4 + $0x8] sm:$0xff] }
 0x3ba   :  { %9544 = vst [vmem:[#allocation164_spill] sm:$0xff] %v6833_v59  ;;  %2072 = vmatpush.msra.mxu1 %v6848_v31  ;;  %v6851_v59 = vld [vmem:[#allocation4 + $0x10] sm:$0xff] }
 0x3bb   :  { %9545 = vst [vmem:[#allocation165_spill] sm:$0xff] %v6836_v54  ;;  %2092 = vmatpush.msra.mxu2 %v6851_v59  ;;  %v6854_v54 = vld [vmem:[#allocation4 + $0x18] sm:$0xff] }
 0x3bc   :  { %9546 = vst [vmem:[#allocation166_spill] sm:$0xff] %v6839_v20  ;;  %2112 = vmatpush.msra.mxu3 %v6854_v54  ;;  %v1595_v20 = vpop.f32.mrf.mxu0 }
 0x3bd   :  { %9547 = vst [vmem:[#allocation167_spill] sm:$0xff] %v6842_v33 }
 0x3be   :  { %9548 = vst [vmem:[#allocation168_spill] sm:$0xff] %v6845_v24 }
 0x3bf   :  { %9549 = vst [vmem:[#allocation169_spill] sm:$0xff] %v6848_v31  ;;  %v1655_v31 = vpop.f32.mrf.mxu3 }
 0x3c0   :  { %9550 = vst [vmem:[#allocation170_spill] sm:$0xff] %v6851_v59  ;;  %v1715_v59 = vpop.f32.mrf.mxu2 }
 0x3c1   :  { %9551 = vst [vmem:[#allocation171_spill] sm:$0xff] %v6854_v54  ;;  %v1716_v5 = vadd.f32 %v1715_v59, %v1635_v46 }
 0x3c3   :  { %v1740_v54 = vadd.f32 %v1716_v5, %v9387_v34 }
 0x3c4   :  { %v1675_v33 = vpop.f32.mrf.mxu0 }
 0x3c5   :  { %v1676_v23 = vadd.f32 %v1675_v33, %v1595_v20  ;;  %v3419_v21 = vmul.f32 -1.442695, %v1740_v54  ;;  %v1842_v54 = vpop.f32.mrf.mxu1 }
 0x3c7   :  { %v1738_v24 = vadd.f32 %v1676_v23, %v9385_v57  ;;  %v1735_v33 = vpop.f32.mrf.mxu3 }
 0x3c8   :  { %v1736_v23 = vadd.f32 %v1735_v33, %v1655_v31 }
 0x3c9   :  { %v3417_v16 = vmul.f32 -1.442695, %v1738_v24 }
 0x3cb   :  { %3580 = vpow2.f32 %v3417_v16  ;;  %v1741_v16 = vadd.f32 %v1736_v23, %v9388_v2 }
 0x3cc   :  { %3582 = vpow2.f32 %v3418_v19  ;;  %v1822_v59 = vpop.f32.mrf.mxu0 }
 0x3cd   :  { %3584 = vpow2.f32 %v3419_v21 }
 0x3d1   :  { %v3581_v1 = vpop.eup %3580 }
 0x3d2   :  { %v3583_v22 = vpop.eup %3582  ;;  %v1751_v17 = vadd.f32 1.0, %v3581_v1  ;;  %v3420_v1 = vld [vmem:[%s8168_s0 + $0x80] sm:$0xff] }
 0x3d3   :  { %v1752_v15 = vadd.f32 1.0, %v3583_v22  ;;  %v3585_v13 = vpop.eup %3584  ;;  %v3421_v22 = vld [vmem:[%s8168_s0 + $0x88] sm:$0xff]  ;;  %v1890_v33 = vadd.f32 %v3420_v1, %v1822_v59  ;;  %v3422_v1 = vld [vmem:[%s8168_s0 + $0x90] sm:$0xff] }
 0x3d4   :  { %3586 = vrcp.f32 %v1751_v17  ;;  %v6860_v28 = vadd.f32 1.0, %v3585_v13  ;;  %v1763_v24 = vand.u32 2147483647, %v1751_v17  ;;  %v1765_v31 = vand.u32 2147483648, %v1751_v17 }
 0x3d5   :  { %3588 = vrcp.f32 %v1752_v15  ;;  %v1891_v23 = vadd.f32 %v3421_v22, %v1842_v54  ;;  %v1780_v13 = vand.u32 2147483648, %v1752_v15  ;;  %v1778_v34 = vand.u32 2147483647, %v1752_v15 }
 0x3d6   :  { %3590 = vrcp.f32 %v6860_v28  ;;  %v3424_v57 = vmul.f32 -1.442695, %v1890_v33  ;;  %vm1774_vm6 = vweird.f32 %v1752_v15  ;;  %vm1759_vm7 = vweird.f32 %v1751_v17 }
 0x3d7   :  { %3592 = vtanh.f32 %v1741_v16  ;;  %v3425_v7 = vmul.f32 -1.442695, %v1891_v23  ;;  %vm1764_vm10 = vcmp.eq.f32.partialorder %v1763_v24, 8.507059e+37  ;;  %vm1779_vm11 = vcmp.eq.f32.partialorder %v1778_v34, 8.507059e+37 }
 0x3d8   :  { %3594 = vpow2.f32 %v3424_v57  ;;  %vm1789_vm13 = vweird.f32 %v6860_v28 }
 0x3d9   :  { %3596 = vpow2.f32 %v3425_v7  ;;  %v1795_v7 = vand.u32 2147483648, %v6860_v28 }
 0x3da   :  { %v3587_v12 = vpop.eup %3586 }
 0x3db   :  { %v3589_v19 = vpop.eup %3588  ;;  %v1755_v46 = vmul.f32 %v3587_v12, %v1751_v17  ;;  %vm1760_vm4 = vweird.f32 %v3587_v12  ;;  %v1862_v17 = vpop.f32.mrf.mxu2  ;;  %v1796_v24 = vor.u32 1.1754944e-38, %v1795_v7  ;;  %v9567_v7 = vld [vmem:[#allocation39_spill] sm:$0xff] }
 0x3dc   :  { %v1770_v21 = vmul.f32 %v3589_v19, %v1752_v15  ;;  %vm1775_vm5 = vweird.f32 %v3589_v19  ;;  %v3591_v58 = vpop.eup %3590  ;;  %vm1761_vm8 = vmor %vm1759_vm7, %vm1760_vm4 }
 0x3dd   :  { %v1756_v5 = vsub.f32 1.0, %v1755_v46  ;;  %v1785_v16 = vmul.f32 %v3591_v58, %v6860_v28  ;;  %v1766_v46 = vor.u32 1.1754944e-38, %v1765_v31  ;;  %v3593_v22 = vpop.eup %3592  ;;  %vm1776_vm9 = vmor %vm1774_vm6, %vm1775_vm5  ;;  %v1892_v31 = vadd.f32 %v3422_v1, %v1862_v17 }
 0x3de   :  { %v1771_v20 = vsub.f32 1.0, %v1770_v21  ;;  %v3595_v3 = vpop.eup %3594  ;;  %vm1790_vm12 = vweird.f32 %v3591_v58 }
 0x3df   :  { %v1757_v2 = vmul.f32 %v3587_v12, %v1756_v5  ;;  %v1781_v5 = vor.u32 1.1754944e-38, %v1780_v13  ;;  %v1786_v54 = vsub.f32 1.0, %v1785_v16  ;;  %v3426_v23 = vmul.f32 -1.442695, %v1892_v31  ;;  %v3597_v6 = vpop.eup %3596  ;;  %vm1791_vm14 = vmor %vm1789_vm13, %vm1790_vm12 }
 0x3e0   :  { %v1772_v48 = vmul.f32 %v3589_v19, %v1771_v20  ;;  %v6877_v13 = vadd.f32 1.0, %v3595_v3  ;;  %v6880_v34 = vadd.f32 1.0, %v3597_v6 }
 0x3e1   :  { %v1758_v9 = vadd.f32 %v3587_v12, %v1757_v2  ;;  %3598 = vpow2.f32 %v3426_v23 }
 0x3e2   :  { %v1773_v21 = vadd.f32 %v3589_v19, %v1772_v48  ;;  %v1787_v48 = vmul.f32 %v3591_v58, %v1786_v54  ;;  %v1932_v17 = vand.u32 2147483648, %v6880_v34  ;;  %vm1911_vm2 = vweird.f32 %v6877_v13 }
 0x3e3   :  { %v1762_v59 = vsel %vm1761_vm8, %v3587_v12, %v1758_v9  ;;  %v1882_v12 = vpop.f32.mrf.mxu3  ;;  %vm1926_vm3 = vweird.f32 %v6880_v34 }
 0x3e4   :  { %v1767_v15 = vsel %vm1764_vm10, %v1766_v46, %v1762_v59  ;;  %v1777_v2 = vsel %vm1776_vm9, %v3589_v19, %v1773_v21  ;;  %v1788_v9 = vadd.f32 %v3591_v58, %v1787_v48  ;;  %v3423_v19 = vld [vmem:[%s8168_s0 + $0x98] sm:$0xff] }
 0x3e5   :  { %v1782_v20 = vsel %vm1779_vm11, %v1781_v5, %v1777_v2  ;;  %v1801_v33 = vmul.f32 %v3593_v22, %v1767_v15  ;;  %v1893_v22 = vadd.f32 %v3423_v19, %v1882_v12  ;;  %v1917_v2 = vand.u32 2147483648, %v6877_v13  ;;  %v9570_v12 = vld [vmem:[#allocation27_spill] sm:$0xff] }
 0x3e6   :  { %v1800_v57 = vmul.f32 %v1782_v20, %v6226_v38  ;;  %v1793_v38 = vand.u32 2147483647, %v6860_v28  ;;  %v1792_v3 = vsel %vm1791_vm14, %v3591_v58, %v1788_v9  ;;  %v9571_v19 = vld [vmem:[#allocation43_spill] sm:$0xff] }
 0x3e7   :  { %v3599_v6 = vpop.eup %3598 }
 0x3e8   :  { %v6875_v35 = vadd.f32 %v1801_v33, %v1800_v57  ;;  %vm1794_vm15 = vcmp.eq.f32.partialorder %v1793_v38, 8.507059e+37  ;;  %v6890_v46 = vadd.f32 1.0, %v3599_v6  ;;  %v1915_v33 = vand.u32 2147483647, %v6877_v13  ;;  %v9568_v38 = vld [vmem:[#allocation25_spill] sm:$0xff]  ;;  %v9573_v6 = vld [vmem:[#allocation30_spill] sm:$0xff] }
 0x3e9   :  { %v1797_v21 = vsel %vm1794_vm15, %v1796_v24, %v1792_v3  ;;  %v1930_v57 = vand.u32 2147483647, %v6880_v34  ;;  %v9569_v3 = vld [vmem:[#allocation26_spill] sm:$0xff]  ;;  %v9572_v24 = vld [vmem:[#allocation29_spill] sm:$0xff] }
 0x3ea   :  { %3600 = vtanh.f32 %v6875_v35  ;;  %vm1916_vm6 = vcmp.eq.f32.partialorder %v1915_v33, 8.507059e+37  ;;  %vm1941_vm9 = vweird.f32 %v6890_v46  ;;  %v9588_v33 = vld [vmem:[#allocation45_spill] sm:$0xff] }
 0x3eb   :  { %3602 = vrcp.f32 %v6877_v13  ;;  %vm1931_vm7 = vcmp.eq.f32.partialorder %v1930_v57, 8.507059e+37  ;;  %v9590_v57 = vld [vmem:[#allocation48_spill] sm:$0xff] }
 0x3ec   :  { %3604 = vrcp.f32 %v6880_v34 }
 0x3ed   :  { %3606 = vrcp.f32 %v6890_v46 }
 0x3ee   :  { %3608 = vtanh.f32 %v1893_v22  ;;  %v9578_v22 = vld [vmem:[#allocation36_spill] sm:$0xff] }
 0x3f0   :  { %v3601_v16 = vpop.eup %3600 }
 0x3f1   :  { %v3603_v1 = vpop.eup %3602  ;;  %v1804_v5 = vmul.f32 %v3601_v16, %v1797_v21  ;;  %v9574_v16 = vld [vmem:[#allocation31_spill] sm:$0xff]  ;;  %v9576_v21 = vld [vmem:[#allocation33_spill] sm:$0xff] }
 0x3f2   :  { %v3605_v28 = vpop.eup %3604  ;;  %v1907_v59 = vmul.f32 %v3603_v1, %v6877_v13  ;;  %vm1912_vm0 = vweird.f32 %v3603_v1 }
 0x3f3   :  { %v1922_v58 = vmul.f32 %v3605_v28, %v6880_v34  ;;  %1973 = vmatmul.f32.vlgmr.msrb.gmra.mxu0 %v1804_v5  ;;  %1993 = vmatmul.f32.vlgmr.msrb.gmra.mxu1 %v1804_v5  ;;  %vm1927_vm1 = vweird.f32 %v3605_v28  ;;  %vm1913_vm4 = vmor %vm1911_vm2, %vm1912_vm0  ;;  %v9566_v34 = vld [vmem:[#allocation24_spill] sm:$0xff] }
 0x3f4   :  { %v1908_v54 = vsub.f32 1.0, %v1907_v59  ;;  %2013 = vmatmul.f32.vlgmr.msrb.gmra.mxu2 %v1804_v5  ;;  %2033 = vmatmul.f32.vlgmr.msrb.gmra.mxu3 %v1804_v5  ;;  %vm1928_vm5 = vmor %vm1926_vm3, %vm1927_vm1  ;;  %v9579_v5 = vld [vmem:[#allocation51_spill] sm:$0xff]  ;;  %v9581_v59 = vld [vmem:[#allocation38_spill] sm:$0xff] }
 0x3f5   :  { %v1923_v15 = vsub.f32 1.0, %v1922_v58  ;;  %2184 = vmatpush.msrb.mxu0 %v6260_v29  ;;  %2204 = vmatpush.msrb.mxu1 %v6263_v50  ;;  %v6905_v29 = vpop.eup %3606  ;;  %v9582_v58 = vld [vmem:[#allocation40_spill] sm:$0xff] }
 0x3f6   :  { %v1909_v20 = vmul.f32 %v3603_v1, %v1908_v54  ;;  %2224 = vmatpush.msrb.mxu2 %v6268_v14  ;;  %2244 = vmatpush.msrb.mxu3 %v6271_v49  ;;  %v1937_v14 = vmul.f32 %v6905_v29, %v6890_v46  ;;  %v1918_v49 = vor.u32 1.1754944e-38, %v1917_v2  ;;  %vm1942_vm8 = vweird.f32 %v6905_v29  ;;  %v9583_v54 = vld [vmem:[#allocation55_spill] sm:$0xff]  ;;  %v9585_v2 = vld [vmem:[#allocation42_spill] sm:$0xff] }
 0x3f7   :  { %v1924_v31 = vmul.f32 %v3605_v28, %v1923_v15  ;;  %2185 = vmatpush.msrb.mxu0 %v6280_v56  ;;  %2205 = vmatpush.msrb.mxu1 %v6283_v32  ;;  %v1933_v32 = vor.u32 1.1754944e-38, %v1932_v17  ;;  %vm1943_vm10 = vmor %vm1941_vm9, %vm1942_vm8  ;;  %v9584_v15 = vld [vmem:[#allocation41_spill] sm:$0xff]  ;;  %v9586_v17 = vld [vmem:[#allocation44_spill] sm:$0xff] }
 0x3f8   :  { %v1910_v50 = vadd.f32 %v3603_v1, %v1909_v20  ;;  %2225 = vmatpush.msrb.mxu2 %v6289_v25  ;;  %2245 = vmatpush.msrb.mxu3 %v6292_v27  ;;  %v3609_v25 = vpop.eup %3608  ;;  %v1938_v27 = vsub.f32 1.0, %v1937_v14  ;;  %v9587_v20 = vld [vmem:[#allocation59_spill] sm:$0xff]  ;;  %v9593_v14 = vld [vmem:[#allocation50_spill] sm:$0xff] }
 0x3f9   :  { %v1925_v56 = vadd.f32 %v3605_v28, %v1924_v31  ;;  %2186 = vmatpush.msrb.mxu0 %v6295_v30  ;;  %2206 = vmatpush.msrb.mxu1 %v6298_v61  ;;  %v9589_v31 = vld [vmem:[#allocation46_spill] sm:$0xff] }
 0x3fa   :  { %v1914_v48 = vsel %vm1913_vm4, %v3603_v1, %v1910_v50  ;;  %2226 = vmatpush.msrb.mxu2 %v6301_v11  ;;  %2246 = vmatpush.msrb.mxu3 %v6304_v62  ;;  %v1939_v9 = vmul.f32 %v6905_v29, %v1938_v27  ;;  %v9577_v1 = vld [vmem:[#allocation34_spill] sm:$0xff]  ;;  %v9592_v50 = vld [vmem:[#allocation49_spill] sm:$0xff]  ;;  %v9599_v27 = vld [vmem:[#allocation71_spill] sm:$0xff] }
 0x3fb   :  { %v1919_v23 = vsel %vm1916_vm6, %v1918_v49, %v1914_v48  ;;  %v1929_v13 = vsel %vm1928_vm5, %v3605_v28, %v1925_v56  ;;  %2187 = vmatpush.msrb.mxu0 %v6307_v52  ;;  %2207 = vmatpush.msrb.mxu1 %v6310_v10  ;;  %v1945_v10 = vand.u32 2147483647, %v6890_v46  ;;  %v9580_v28 = vld [vmem:[#allocation37_spill] sm:$0xff]  ;;  %v9594_v49 = vld [vmem:[#allocation52_spill] sm:$0xff]  ;;  %v9595_v56 = vld [vmem:[#allocation67_spill] sm:$0xff] }
 0x3fc   :  { %v1934_v30 = vsel %vm1931_vm7, %v1933_v32, %v1929_v13  ;;  %v1953_v61 = vmul.f32 %v3609_v25, %v1919_v23  ;;  %2227 = vmatpush.msrb.mxu2 %v6315_v36  ;;  %2247 = vmatpush.msrb.mxu3 %v6318_v37  ;;  %v1940_v52 = vadd.f32 %v6905_v29, %v1939_v9  ;;  %v9596_v32 = vld [vmem:[#allocation53_spill] sm:$0xff]  ;;  %v9597_v48 = vld [vmem:[#allocation54_spill] sm:$0xff]  ;;  %v9598_v25 = vld [vmem:[#allocation56_spill] sm:$0xff] }
 0x3fd   :  { %v1952_v11 = vmul.f32 %v1934_v30, %v6254_v26  ;;  %2188 = vmatpush.msrb.mxu0 %v6321_v18  ;;  %2208 = vmatpush.msrb.mxu1 %v6324_v39  ;;  %v1947_v26 = vand.u32 2147483648, %v6890_v46  ;;  %v9552_v18 = vld [vmem:[#allocation12_spill] sm:$0xff]  ;;  %vm1946_vm11 = vcmp.eq.f32.partialorder %v1945_v10, 8.507059e+37  ;;  %v9553_v39 = vld [vmem:[#allocation13_spill] sm:$0xff]  ;;  %v9575_v46 = vld [vmem:[#allocation47_spill] sm:$0xff] }
 0x3fe   :  { %2228 = vmatpush.msrb.mxu2 %v6331_v63  ;;  %2248 = vmatpush.msrb.mxu3 %v6334_v40  ;;  %v1944_v36 = vsel %vm1943_vm10, %v6905_v29, %v1940_v52  ;;  %v9554_v63 = vld [vmem:[#allocation14_spill] sm:$0xff]  ;;  %v9591_v29 = vld [vmem:[#allocation63_spill] sm:$0xff]  ;;  %v9600_v23 = vld [vmem:[#allocation57_spill] sm:$0xff] }
 0x3ff   :  { %v6929_v62 = vadd.f32 %v1953_v61, %v1952_v11  ;;  %2189 = vmatpush.msrb.mxu0 %v6337_v41  ;;  %2209 = vmatpush.msrb.mxu1 %v6340_v42  ;;  %v1948_v37 = vor.u32 1.1754944e-38, %v1947_v26  ;;  %v9555_v42 = vld [vmem:[#allocation28_spill] sm:$0xff]  ;;  %v9601_v13 = vld [vmem:[#allocation58_spill] sm:$0xff]  ;;  %v9603_v61 = vld [vmem:[#allocation75_spill] sm:$0xff] }
 0x400   :  { %2229 = vmatpush.msrb.mxu2 %v6343_v8  ;;  %2249 = vmatpush.msrb.mxu3 %v6346_v43  ;;  %v9556_v8 = vld [vmem:[#allocation15_spill] sm:$0xff]  ;;  %v9602_v30 = vld [vmem:[#allocation60_spill] sm:$0xff]  ;;  %v9604_v9 = vld [vmem:[#allocation61_spill] sm:$0xff] }
 0x401   :  { %3610 = vtanh.f32 %v6929_v62  ;;  %2190 = vmatpush.msrb.mxu0 %v6349_v44  ;;  %2210 = vmatpush.msrb.mxu1 %v6352_v45  ;;  %v1949_v41 = vsel %vm1946_vm11, %v1948_v37, %v1944_v36  ;;  %v9557_v44 = vld [vmem:[#allocation16_spill] sm:$0xff]  ;;  %v9558_v45 = vld [vmem:[#allocation17_spill] sm:$0xff]  ;;  %v9605_v11 = vld [vmem:[#allocation62_spill] sm:$0xff] }
 0x402   :  { %2230 = vmatpush.msrb.mxu2 %v6355_v47  ;;  %2250 = vmatpush.msrb.mxu3 %v6358_v51  ;;  %v9559_v47 = vld [vmem:[#allocation32_spill] sm:$0xff]  ;;  %v9560_v51 = vld [vmem:[#allocation18_spill] sm:$0xff]  ;;  %v9607_v26 = vld [vmem:[#allocation79_spill] sm:$0xff] }
 0x403   :  { %2191 = vmatpush.msrb.mxu0 %v6361_v53  ;;  %2211 = vmatpush.msrb.mxu1 %v6364_v55  ;;  %v9561_v53 = vld [vmem:[#allocation19_spill] sm:$0xff]  ;;  %v9562_v55 = vld [vmem:[#allocation20_spill] sm:$0xff]  ;;  %v9608_v10 = vld [vmem:[#allocation65_spill] sm:$0xff] }
 0x404   :  { %2231 = vmatpush.msrb.mxu2 %v6367_v60  ;;  %2251 = vmatpush.msrb.mxu3 %v6370_v0  ;;  %v9563_v60 = vld [vmem:[#allocation35_spill] sm:$0xff]  ;;  %v9564_v0 = vld [vmem:[#allocation22_spill] sm:$0xff]  ;;  %v9606_v52 = vld [vmem:[#allocation64_spill] sm:$0xff] }
 0x405   :  { %2192 = vmatpush.msrb.mxu0 %v6373_v4  ;;  %2212 = vmatpush.msrb.mxu1 %v9552_v18  ;;  %v9565_v4 = vld [vmem:[#allocation23_spill] sm:$0xff]  ;;  %v9609_v36 = vld [vmem:[#allocation66_spill] sm:$0xff]  ;;  %v9610_v37 = vld [vmem:[#allocation68_spill] sm:$0xff] }
 0x406   :  { %2232 = vmatpush.msrb.mxu2 %v9553_v39  ;;  %2252 = vmatpush.msrb.mxu3 %v9554_v63  ;;  %v9611_v18 = vld [vmem:[#allocation83_spill] sm:$0xff]  ;;  %v9612_v39 = vld [vmem:[#allocation69_spill] sm:$0xff]  ;;  %v9613_v63 = vld [vmem:[#allocation70_spill] sm:$0xff] }
 0x407   :  { %v3611_v40 = vpop.eup %3610  ;;  %2193 = vmatpush.msrb.mxu0 %v9555_v42  ;;  %2213 = vmatpush.msrb.mxu1 %v9556_v8  ;;  %v9616_v42 = vld [vmem:[#allocation73_spill] sm:$0xff]  ;;  %v9617_v8 = vld [vmem:[#allocation74_spill] sm:$0xff] }
 0x408   :  { %v1956_v43 = vmul.f32 %v3611_v40, %v1949_v41  ;;  %2233 = vmatpush.msrb.mxu2 %v9557_v44  ;;  %2253 = vmatpush.msrb.mxu3 %v9558_v45  ;;  %v9614_v40 = vld [vmem:[#allocation72_spill] sm:$0xff]  ;;  %v9615_v41 = vld [vmem:[#allocation87_spill] sm:$0xff]  ;;  %v9619_v44 = vld [vmem:[#allocation77_spill] sm:$0xff] }
 0x409   :  { %2194 = vmatpush.msrb.mxu0 %v9559_v47  ;;  %2214 = vmatpush.msrb.mxu1 %v9560_v51  ;;  %v9620_v45 = vld [vmem:[#allocation78_spill] sm:$0xff]  ;;  %v9621_v47 = vld [vmem:[#allocation80_spill] sm:$0xff]  ;;  %v9622_v51 = vld [vmem:[#allocation81_spill] sm:$0xff] }
 0x40a   :  { %2234 = vmatpush.msrb.mxu2 %v9561_v53  ;;  %2254 = vmatpush.msrb.mxu3 %v9562_v55  ;;  %v9623_v53 = vld [vmem:[#allocation82_spill] sm:$0xff]  ;;  %v9624_v55 = vld [vmem:[#allocation84_spill] sm:$0xff] }
 0x40b   :  { %2053 = vmatmul.f32.vlgmr.msra.gmra.mxu0 %v1956_v43  ;;  %2073 = vmatmul.f32.vlgmr.msra.gmra.mxu1 %v1956_v43 }
 0x40c   :  { %2093 = vmatmul.f32.vlgmr.msra.gmra.mxu2 %v1956_v43  ;;  %2113 = vmatmul.f32.vlgmr.msra.gmra.mxu3 %v1956_v43 }
 0x40d   :  { %2195 = vmatpush.msrb.mxu0 %v9563_v60  ;;  %2215 = vmatpush.msrb.mxu1 %v9564_v0  ;;  %v9625_v60 = vld [vmem:[#allocation85_spill] sm:$0xff]  ;;  %v9626_v0 = vld [vmem:[#allocation86_spill] sm:$0xff] }
 0x40e   :  { %2235 = vmatpush.msrb.mxu2 %v9565_v4  ;;  %2255 = vmatpush.msrb.mxu3 %v9566_v34  ;;  %v9627_v4 = vld [vmem:[#allocation88_spill] sm:$0xff]  ;;  %v9628_v34 = vld [vmem:[#allocation89_spill] sm:$0xff] }
 0x40f   :  { %2196 = vmatpush.msrb.mxu0 %v9567_v7  ;;  %2216 = vmatpush.msrb.mxu1 %v9568_v38  ;;  %v9629_v7 = vld [vmem:[#allocation90_spill] sm:$0xff]  ;;  %v9630_v38 = vld [vmem:[#allocation91_spill] sm:$0xff] }
 0x410   :  { %2236 = vmatpush.msrb.mxu2 %v9569_v3  ;;  %2256 = vmatpush.msrb.mxu3 %v9570_v12  ;;  %v9631_v3 = vld [vmem:[#allocation98_spill] sm:$0xff]  ;;  %v9632_v12 = vld [vmem:[#allocation92_spill] sm:$0xff] }
 0x411   :  { %2197 = vmatpush.msrb.mxu0 %v9571_v19  ;;  %2217 = vmatpush.msrb.mxu1 %v9572_v24  ;;  %v9633_v19 = vld [vmem:[#allocation93_spill] sm:$0xff]  ;;  %v9634_v24 = vld [vmem:[#allocation94_spill] sm:$0xff] }
 0x412   :  { %2237 = vmatpush.msrb.mxu2 %v9573_v6  ;;  %2257 = vmatpush.msrb.mxu3 %v9574_v16  ;;  %v9635_v6 = vld [vmem:[#allocation99_spill] sm:$0xff] }
 0x413   :  { %2198 = vmatpush.msrb.mxu0 %v9575_v46  ;;  %2218 = vmatpush.msrb.mxu1 %v9576_v21  ;;  %v9636_v16 = vld [vmem:[#allocation95_spill] sm:$0xff]  ;;  %v9637_v46 = vld [vmem:[#allocation96_spill] sm:$0xff]  ;;  %v9638_v21 = vld [vmem:[#allocation97_spill] sm:$0xff] }
 0x414   :  { %2238 = vmatpush.msrb.mxu2 %v9577_v1  ;;  %2258 = vmatpush.msrb.mxu3 %v9578_v22  ;;  %v9639_v1 = vld [vmem:[#allocation100_spill] sm:$0xff]  ;;  %v9640_v22 = vld [vmem:[#allocation101_spill] sm:$0xff] }
 0x415   :  { %2199 = vmatpush.msrb.mxu0 %v9579_v5  ;;  %2219 = vmatpush.msrb.mxu1 %v9580_v28  ;;  %v9641_v5 = vld [vmem:[#allocation102_spill] sm:$0xff]  ;;  %v9642_v28 = vld [vmem:[#allocation103_spill] sm:$0xff] }
 0x416   :  { %2239 = vmatpush.msrb.mxu2 %v9581_v59  ;;  %2259 = vmatpush.msrb.mxu3 %v9582_v58  ;;  %v9643_v59 = vld [vmem:[#allocation104_spill] sm:$0xff]  ;;  %v9644_v58 = vld [vmem:[#allocation105_spill] sm:$0xff] }
 0x417   :  { %2200 = vmatmul.f32.vlgmr.msrb.gmra.mxu0 %v1956_v43  ;;  %2220 = vmatmul.f32.vlgmr.msrb.gmra.mxu1 %v1956_v43 }
 0x418   :  { %2240 = vmatmul.f32.vlgmr.msrb.gmra.mxu2 %v1956_v43  ;;  %2260 = vmatmul.f32.vlgmr.msrb.gmra.mxu3 %v1956_v43  ;;  %v9618_v43 = vld [vmem:[#allocation76_spill] sm:$0xff] }
 0x419   :  { %2336 = vmatpush.msra.mxu0 %v9583_v54  ;;  %2356 = vmatpush.msra.mxu1 %v9584_v15  ;;  %v9645_v54 = vld [vmem:[#allocation106_spill] sm:$0xff]  ;;  %v9646_v15 = vld [vmem:[#allocation107_spill] sm:$0xff] }
 0x41a   :  { %2376 = vmatpush.msra.mxu2 %v9585_v2  ;;  %2396 = vmatpush.msra.mxu3 %v9586_v17  ;;  %v9647_v2 = vld [vmem:[#allocation108_spill] sm:$0xff]  ;;  %v9648_v17 = vld [vmem:[#allocation109_spill] sm:$0xff] }
 0x41b   :  { %2337 = vmatpush.msra.mxu0 %v9587_v20  ;;  %2357 = vmatpush.msra.mxu1 %v9588_v33  ;;  %v9649_v20 = vld [vmem:[#allocation110_spill] sm:$0xff]  ;;  %v9650_v33 = vld [vmem:[#allocation111_spill] sm:$0xff] }
 0x41c   :  { %2377 = vmatpush.msra.mxu2 %v9589_v31  ;;  %2397 = vmatpush.msra.mxu3 %v9590_v57  ;;  %v9651_v31 = vld [vmem:[#allocation112_spill] sm:$0xff]  ;;  %v9652_v57 = vld [vmem:[#allocation113_spill] sm:$0xff] }
 0x41d   :  { %2338 = vmatpush.msra.mxu0 %v9591_v29  ;;  %2358 = vmatpush.msra.mxu1 %v9592_v50  ;;  %v9653_v29 = vld [vmem:[#allocation114_spill] sm:$0xff]  ;;  %v9654_v50 = vld [vmem:[#allocation115_spill] sm:$0xff] }
 0x41e   :  { %2378 = vmatpush.msra.mxu2 %v9593_v14  ;;  %2398 = vmatpush.msra.mxu3 %v9594_v49  ;;  %v9655_v14 = vld [vmem:[#allocation116_spill] sm:$0xff]  ;;  %v9656_v49 = vld [vmem:[#allocation117_spill] sm:$0xff] }
 0x41f   :  { %2339 = vmatpush.msra.mxu0 %v9595_v56  ;;  %2359 = vmatpush.msra.mxu1 %v9596_v32  ;;  %v9657_v56 = vld [vmem:[#allocation118_spill] sm:$0xff]  ;;  %v9658_v32 = vld [vmem:[#allocation119_spill] sm:$0xff] }
 0x420   :  { %2379 = vmatpush.msra.mxu2 %v9597_v48  ;;  %2399 = vmatpush.msra.mxu3 %v9598_v25  ;;  %v9659_v48 = vld [vmem:[#allocation120_spill] sm:$0xff]  ;;  %v9660_v25 = vld [vmem:[#allocation121_spill] sm:$0xff] }
 0x421   :  { %2340 = vmatpush.msra.mxu0 %v9599_v27  ;;  %2360 = vmatpush.msra.mxu1 %v9600_v23  ;;  %v9661_v27 = vld [vmem:[#allocation122_spill] sm:$0xff]  ;;  %v9662_v23 = vld [vmem:[#allocation123_spill] sm:$0xff] }
 0x422   :  { %2380 = vmatpush.msra.mxu2 %v9601_v13  ;;  %2400 = vmatpush.msra.mxu3 %v9602_v30  ;;  %v9663_v13 = vld [vmem:[#allocation124_spill] sm:$0xff]  ;;  %v9664_v30 = vld [vmem:[#allocation125_spill] sm:$0xff] }
 0x423   :  { %2341 = vmatpush.msra.mxu0 %v9603_v61  ;;  %2361 = vmatpush.msra.mxu1 %v9604_v9  ;;  %v9665_v61 = vld [vmem:[#allocation126_spill] sm:$0xff]  ;;  %v9666_v9 = vld [vmem:[#allocation127_spill] sm:$0xff] }
 0x424   :  { %2381 = vmatpush.msra.mxu2 %v9605_v11  ;;  %2401 = vmatpush.msra.mxu3 %v9606_v52  ;;  %v9667_v11 = vld [vmem:[#allocation128_spill] sm:$0xff]  ;;  %v9668_v52 = vld [vmem:[#allocation129_spill] sm:$0xff] }
 0x425   :  { %2342 = vmatpush.msra.mxu0 %v9607_v26  ;;  %2362 = vmatpush.msra.mxu1 %v9608_v10  ;;  %v9669_v26 = vld [vmem:[#allocation130_spill] sm:$0xff]  ;;  %v9670_v10 = vld [vmem:[#allocation131_spill] sm:$0xff] }
 0x426   :  { %2382 = vmatpush.msra.mxu2 %v9609_v36  ;;  %2402 = vmatpush.msra.mxu3 %v9610_v37  ;;  %v9671_v36 = vld [vmem:[#allocation132_spill] sm:$0xff]  ;;  %v9672_v37 = vld [vmem:[#allocation133_spill] sm:$0xff] }
 0x427   :  { %2343 = vmatpush.msra.mxu0 %v9611_v18  ;;  %2363 = vmatpush.msra.mxu1 %v9612_v39  ;;  %v9673_v18 = vld [vmem:[#allocation134_spill] sm:$0xff]  ;;  %v9674_v39 = vld [vmem:[#allocation135_spill] sm:$0xff] }
 0x428   :  { %2383 = vmatpush.msra.mxu2 %v9613_v63  ;;  %2403 = vmatpush.msra.mxu3 %v9614_v40  ;;  %v9675_v63 = vld [vmem:[#allocation136_spill] sm:$0xff]  ;;  %v9676_v40 = vld [vmem:[#allocation137_spill] sm:$0xff] }
 0x429   :  { %2344 = vmatpush.msra.mxu0 %v9615_v41  ;;  %2364 = vmatpush.msra.mxu1 %v9616_v42  ;;  %v9677_v41 = vld [vmem:[#allocation138_spill] sm:$0xff]  ;;  %v9678_v42 = vld [vmem:[#allocation139_spill] sm:$0xff] }
 0x42a   :  { %2384 = vmatpush.msra.mxu2 %v9617_v8  ;;  %2404 = vmatpush.msra.mxu3 %v9618_v43  ;;  %v9679_v8 = vld [vmem:[#allocation140_spill] sm:$0xff]  ;;  %v9680_v43 = vld [vmem:[#allocation141_spill] sm:$0xff] }
 0x42b   :  { %2345 = vmatpush.msra.mxu0 %v9619_v44  ;;  %2365 = vmatpush.msra.mxu1 %v9620_v45  ;;  %v9681_v44 = vld [vmem:[#allocation142_spill] sm:$0xff]  ;;  %v9682_v45 = vld [vmem:[#allocation143_spill] sm:$0xff] }
 0x42c   :  { %2385 = vmatpush.msra.mxu2 %v9621_v47  ;;  %2405 = vmatpush.msra.mxu3 %v9622_v51  ;;  %v9683_v47 = vld [vmem:[#allocation144_spill] sm:$0xff]  ;;  %v9684_v51 = vld [vmem:[#allocation145_spill] sm:$0xff] }
 0x42d   :  { %2346 = vmatpush.msra.mxu0 %v9623_v53  ;;  %2366 = vmatpush.msra.mxu1 %v9624_v55  ;;  %v9685_v53 = vld [vmem:[#allocation146_spill] sm:$0xff]  ;;  %v9686_v55 = vld [vmem:[#allocation147_spill] sm:$0xff] }
 0x42e   :  { %2386 = vmatpush.msra.mxu2 %v9625_v60  ;;  %2406 = vmatpush.msra.mxu3 %v9626_v0  ;;  %v9687_v60 = vld [vmem:[#allocation148_spill] sm:$0xff]  ;;  %v9688_v0 = vld [vmem:[#allocation149_spill] sm:$0xff] }
 0x42f   :  { %2347 = vmatpush.msra.mxu0 %v9627_v4  ;;  %2367 = vmatpush.msra.mxu1 %v9628_v34  ;;  %v9689_v4 = vld [vmem:[#allocation150_spill] sm:$0xff]  ;;  %v9690_v34 = vld [vmem:[#allocation151_spill] sm:$0xff] }
 0x430   :  { %2387 = vmatpush.msra.mxu2 %v9629_v7  ;;  %2407 = vmatpush.msra.mxu3 %v9630_v38  ;;  %v9691_v7 = vld [vmem:[#allocation152_spill] sm:$0xff]  ;;  %v9692_v38 = vld [vmem:[#allocation153_spill] sm:$0xff] }
 0x431   :  { %2348 = vmatpush.msra.mxu0 %v9631_v3  ;;  %2368 = vmatpush.msra.mxu1 %v9632_v12  ;;  %v9693_v3 = vld [vmem:[#allocation154_spill] sm:$0xff]  ;;  %v9694_v12 = vld [vmem:[#allocation155_spill] sm:$0xff] }
 0x432   :  { %2388 = vmatpush.msra.mxu2 %v9633_v19  ;;  %2408 = vmatpush.msra.mxu3 %v9634_v24  ;;  %v9695_v19 = vld [vmem:[#allocation156_spill] sm:$0xff]  ;;  %v9696_v24 = vld [vmem:[#allocation157_spill] sm:$0xff] }
 0x433   :  { %2349 = vmatpush.msra.mxu0 %v9635_v6  ;;  %2369 = vmatpush.msra.mxu1 %v9636_v16  ;;  %v9697_v6 = vld [vmem:[#allocation158_spill] sm:$0xff]  ;;  %v9698_v16 = vld [vmem:[#allocation159_spill] sm:$0xff] }
 0x434   :  { %2389 = vmatpush.msra.mxu2 %v9637_v46  ;;  %2409 = vmatpush.msra.mxu3 %v9638_v21  ;;  %v9699_v46 = vld [vmem:[#allocation160_spill] sm:$0xff]  ;;  %v9700_v21 = vld [vmem:[#allocation161_spill] sm:$0xff] }
 0x435   :  { %2350 = vmatpush.msra.mxu0 %v9639_v1  ;;  %2370 = vmatpush.msra.mxu1 %v9640_v22  ;;  %v9701_v1 = vld [vmem:[#allocation162_spill] sm:$0xff]  ;;  %v9702_v22 = vld [vmem:[#allocation163_spill] sm:$0xff] }
 0x436   :  { %2390 = vmatpush.msra.mxu2 %v9641_v5  ;;  %2410 = vmatpush.msra.mxu3 %v9642_v28  ;;  %v9703_v5 = vld [vmem:[#allocation164_spill] sm:$0xff]  ;;  %v9704_v28 = vld [vmem:[#allocation165_spill] sm:$0xff] }
 0x437   :  { %2351 = vmatpush.msra.mxu0 %v9643_v59  ;;  %2371 = vmatpush.msra.mxu1 %v9644_v58  ;;  %v9705_v59 = vld [vmem:[#allocation166_spill] sm:$0xff]  ;;  %v9706_v58 = vld [vmem:[#allocation167_spill] sm:$0xff] }
 0x438   :  { %2391 = vmatpush.msra.mxu2 %v9645_v54  ;;  %2411 = vmatpush.msra.mxu3 %v9646_v15  ;;  %v9707_v54 = vld [vmem:[#allocation168_spill] sm:$0xff]  ;;  %v9708_v15 = vld [vmem:[#allocation169_spill] sm:$0xff] }
 0x439   :  { %2416 = vmatpush.msrb.mxu0 %v9647_v2  ;;  %2436 = vmatpush.msrb.mxu1 %v9648_v17  ;;  %v9709_v2 = vld [vmem:[#allocation170_spill] sm:$0xff]  ;;  %v9710_v17 = vld [vmem:[#allocation171_spill] sm:$0xff] }
 0x43a   :  { %2456 = vmatpush.msrb.mxu2 %v9649_v20  ;;  %2476 = vmatpush.msrb.mxu3 %v9650_v33 }
 0x43b   :  { %2417 = vmatpush.msrb.mxu0 %v9651_v31  ;;  %2437 = vmatpush.msrb.mxu1 %v9652_v57 }
 0x43c   :  { %2457 = vmatpush.msrb.mxu2 %v9653_v29  ;;  %2477 = vmatpush.msrb.mxu3 %v9654_v50 }
 0x43d   :  { %2418 = vmatpush.msrb.mxu0 %v9655_v14  ;;  %2438 = vmatpush.msrb.mxu1 %v9656_v49  ;;  %v9711_v49 = vld [vmem:[#allocation21_spill] sm:$0xff] }
 0x43e   :  { %2458 = vmatpush.msrb.mxu2 %v9657_v56  ;;  %2478 = vmatpush.msrb.mxu3 %v9658_v32  ;;  %v9712_v32 = vld [vmem:[#allocation9_spill] sm:$0xff] }
 0x43f   :  { %2419 = vmatpush.msrb.mxu0 %v9659_v48  ;;  %2439 = vmatpush.msrb.mxu1 %v9660_v25 }
 0x440   :  { %2459 = vmatpush.msrb.mxu2 %v9661_v27  ;;  %2479 = vmatpush.msrb.mxu3 %v9662_v23 }
 0x441   :  { %2420 = vmatpush.msrb.mxu0 %v9663_v13  ;;  %2440 = vmatpush.msrb.mxu1 %v9664_v30 }
 0x442   :  { %2460 = vmatpush.msrb.mxu2 %v9665_v61  ;;  %2480 = vmatpush.msrb.mxu3 %v9666_v9  ;;  %v9713_v61 = vld [vmem:[#allocation10_spill] sm:$0xff] }
 0x443   :  { %2421 = vmatpush.msrb.mxu0 %v9667_v11  ;;  %2441 = vmatpush.msrb.mxu1 %v9668_v52  ;;  %v3430_v11 = vld [vmem:[%s8168_s0 + $0xa0] sm:$0xff]  ;;  %v3431_v52 = vld [vmem:[%s8168_s0 + $0xa8] sm:$0xff] }
 0x444   :  { %2461 = vmatpush.msrb.mxu2 %v9669_v26  ;;  %2481 = vmatpush.msrb.mxu3 %v9670_v10 }
 0x445   :  { %2422 = vmatpush.msrb.mxu0 %v9671_v36  ;;  %2442 = vmatpush.msrb.mxu1 %v9672_v37 }
 0x446   :  { %2462 = vmatpush.msrb.mxu2 %v9673_v18  ;;  %2482 = vmatpush.msrb.mxu3 %v9674_v39 }
 0x447   :  { %2423 = vmatpush.msrb.mxu0 %v9675_v63  ;;  %2443 = vmatpush.msrb.mxu1 %v9676_v40 }
 0x448   :  { %2463 = vmatpush.msrb.mxu2 %v9677_v41  ;;  %2483 = vmatpush.msrb.mxu3 %v9678_v42 }
 0x449   :  { %2424 = vmatpush.msrb.mxu0 %v9679_v8  ;;  %2444 = vmatpush.msrb.mxu1 %v9680_v43 }
 0x44a   :  { %2464 = vmatpush.msrb.mxu2 %v9681_v44  ;;  %2484 = vmatpush.msrb.mxu3 %v9682_v45  ;;  %v3432_v45 = vld [vmem:[%s8168_s0 + $0xb0] sm:$0xff] }
 0x44b   :  { %2425 = vmatpush.msrb.mxu0 %v9683_v47  ;;  %2445 = vmatpush.msrb.mxu1 %v9684_v51 }
 0x44c   :  { %2465 = vmatpush.msrb.mxu2 %v9685_v53  ;;  %2485 = vmatpush.msrb.mxu3 %v9686_v55 }
 0x44d   :  { %2426 = vmatpush.msrb.mxu0 %v9687_v60  ;;  %2446 = vmatpush.msrb.mxu1 %v9688_v0  ;;  %v9714_v60 = vld [vmem:[#allocation11_spill] sm:$0xff] }
 0x44e   :  { %2466 = vmatpush.msrb.mxu2 %v9689_v4  ;;  %2486 = vmatpush.msrb.mxu3 %v9690_v34 }
 0x44f   :  { %2427 = vmatpush.msrb.mxu0 %v9691_v7  ;;  %2447 = vmatpush.msrb.mxu1 %v9692_v38 }
 0x450   :  { %2467 = vmatpush.msrb.mxu2 %v9693_v3  ;;  %2487 = vmatpush.msrb.mxu3 %v9694_v12 }
 0x451   :  { %2428 = vmatpush.msrb.mxu0 %v9695_v19  ;;  %2448 = vmatpush.msrb.mxu1 %v9696_v24 }
 0x452   :  { %2468 = vmatpush.msrb.mxu2 %v9697_v6  ;;  %2488 = vmatpush.msrb.mxu3 %v9698_v16 }
 0x453   :  { %2429 = vmatpush.msrb.mxu0 %v9699_v46  ;;  %2449 = vmatpush.msrb.mxu1 %v9700_v21 }
 0x454   :  { %2469 = vmatpush.msrb.mxu2 %v9701_v1  ;;  %2489 = vmatpush.msrb.mxu3 %v9702_v22 }
 0x455   :  { %2430 = vmatpush.msrb.mxu0 %v9703_v5  ;;  %2450 = vmatpush.msrb.mxu1 %v9704_v28 }
 0x456   :  { %2470 = vmatpush.msrb.mxu2 %v9705_v59  ;;  %2490 = vmatpush.msrb.mxu3 %v9706_v58 }
 0x457   :  { %2431 = vmatpush.msrb.mxu0 %v9707_v54  ;;  %2451 = vmatpush.msrb.mxu1 %v9708_v15  ;;  %v3433_v54 = vld [vmem:[%s8168_s0 + $0xb8] sm:$0xff] }
 0x458   :  { %2471 = vmatpush.msrb.mxu2 %v9709_v2  ;;  %2491 = vmatpush.msrb.mxu3 %v9710_v17 }
 0x470   :  { %v1974_v20 = vpop.f32.mrf.mxu0  ;;  %v1994_v33 = vpop.f32.mrf.mxu1 }
 0x477   :  { %v2014_v31 = vpop.f32.mrf.mxu2  ;;  %v2034_v23 = vpop.f32.mrf.mxu3 }
 0x488   :  { %v2054_v57 = vpop.f32.mrf.mxu0  ;;  %v2074_v29 = vpop.f32.mrf.mxu1 }
 0x489   :  { %v2055_v50 = vadd.f32 %v2054_v57, %v1974_v20  ;;  %v2075_v14 = vadd.f32 %v2074_v29, %v1994_v33 }
 0x48b   :  { %v2117_v56 = vadd.f32 %v2055_v50, %v9711_v49  ;;  %v2118_v48 = vadd.f32 %v2075_v14, %v9712_v32 }
 0x48d   :  { %v3427_v25 = vmul.f32 -1.442695, %v2117_v56  ;;  %v3428_v27 = vmul.f32 -1.442695, %v2118_v48 }
 0x48f   :  { %3612 = vpow2.f32 %v3427_v25  ;;  %v2094_v13 = vpop.f32.mrf.mxu2  ;;  %v2114_v41 = vpop.f32.mrf.mxu3 }
 0x490   :  { %3614 = vpow2.f32 %v3428_v27  ;;  %v2095_v30 = vadd.f32 %v2094_v13, %v2014_v31  ;;  %v2115_v44 = vadd.f32 %v2114_v41, %v2034_v23 }
 0x492   :  { %v2119_v9 = vadd.f32 %v2095_v30, %v9713_v61  ;;  %v2120_v0 = vadd.f32 %v2115_v44, %v9714_v60 }
 0x494   :  { %v3429_v26 = vmul.f32 -1.442695, %v2119_v9  ;;  %v2201_v10 = vpop.f32.mrf.mxu0  ;;  %v2221_v36 = vpop.f32.mrf.mxu1 }
 0x495   :  { %v3613_v37 = vpop.eup %3612  ;;  %v2269_v18 = vadd.f32 %v3430_v11, %v2201_v10  ;;  %v2270_v39 = vadd.f32 %v3431_v52, %v2221_v36 }
 0x496   :  { %v3615_v63 = vpop.eup %3614  ;;  %v2130_v40 = vadd.f32 1.0, %v3613_v37  ;;  %3616 = vpow2.f32 %v3429_v26 }
 0x497   :  { %v2131_v42 = vadd.f32 1.0, %v3615_v63  ;;  %v3434_v8 = vmul.f32 -1.442695, %v2269_v18  ;;  %v3435_v43 = vmul.f32 -1.442695, %v2270_v39 }
 0x498   :  { %3618 = vrcp.f32 %v2130_v40  ;;  %v2142_v46 = vand.u32 2147483647, %v2130_v40  ;;  %v2144_v21 = vand.u32 2147483648, %v2130_v40  ;;  %vm2138_vm15 = vweird.f32 %v2130_v40 }
 0x499   :  { %3620 = vrcp.f32 %v2131_v42  ;;  %v2159_v22 = vand.u32 2147483648, %v2131_v42  ;;  %v2157_v59 = vand.u32 2147483647, %v2131_v42  ;;  %vm2153_vm14 = vweird.f32 %v2131_v42 }
 0x49a   :  { %3622 = vpow2.f32 %v3434_v8  ;;  %vm2143_vm1 = vcmp.eq.f32.partialorder %v2142_v46, 8.507059e+37  ;;  %v2145_v33 = vor.u32 1.1754944e-38, %v2144_v21 }
 0x49b   :  { %3624 = vpow2.f32 %v3435_v43  ;;  %v2241_v47 = vpop.f32.mrf.mxu2  ;;  %v2261_v58 = vpop.f32.mrf.mxu3  ;;  %v2160_v29 = vor.u32 1.1754944e-38, %v2159_v22  ;;  %vm2158_vm3 = vcmp.eq.f32.partialorder %v2157_v59, 8.507059e+37 }
 0x49c   :  { %v3617_v51 = vpop.eup %3616  ;;  %v2271_v53 = vadd.f32 %v3432_v45, %v2241_v47  ;;  %v2272_v56 = vadd.f32 %v3433_v54, %v2261_v58  ;;  %v7182_v54 = vld [vmem:[#allocation2 + $0x1e0] sm:$0xff] }
 0x49d   :  { %v7122_v55 = vadd.f32 1.0, %v3617_v51 }
 0x49e   :  { %v3619_v4 = vpop.eup %3618  ;;  %v3436_v34 = vmul.f32 -1.442695, %v2271_v53  ;;  %v7292_v53 = vld [vmem:[#allocation2 + $0x118] sm:$0xff] }
 0x49f   :  { %v3621_v7 = vpop.eup %3620  ;;  %v2134_v38 = vmul.f32 %v3619_v4, %v2130_v40  ;;  %3626 = vrcp.f32 %v7122_v55  ;;  %vm2139_vm12 = vweird.f32 %v3619_v4  ;;  %vm2168_vm4 = vweird.f32 %v7122_v55 }
 0x4a0   :  { %v3623_v3 = vpop.eup %3622  ;;  %v2149_v12 = vmul.f32 %v3621_v7, %v2131_v42  ;;  %3628 = vpow2.f32 %v3436_v34  ;;  %vm2154_vm13 = vweird.f32 %v3621_v7  ;;  %vm2140_vm0 = vmor %vm2138_vm15, %vm2139_vm12  ;;  %v2174_v39 = vand.u32 2147483648, %v7122_v55 }
 0x4a1   :  { %v3625_v19 = vpop.eup %3624  ;;  %v2135_v24 = vsub.f32 1.0, %v2134_v38  ;;  %3630 = vtanh.f32 %v2120_v0  ;;  %v7126_v6 = vadd.f32 1.0, %v3623_v3  ;;  %vm2155_vm2 = vmor %vm2153_vm14, %vm2154_vm13  ;;  %v2172_v45 = vand.u32 2147483647, %v7122_v55 }
 0x4a2   :  { %v2150_v16 = vsub.f32 1.0, %v2149_v12  ;;  %v7128_v1 = vadd.f32 1.0, %v3625_v19  ;;  %v2175_v19 = vor.u32 1.1754944e-38, %v2174_v39  ;;  %v7256_v39 = vld [vmem:[#allocation2 + $0x178] sm:$0xff] }
 0x4a3   :  { %v2136_v5 = vmul.f32 %v3619_v4, %v2135_v24  ;;  %3632 = vrcp.f32 %v7126_v6  ;;  %v2294_v18 = vand.u32 2147483647, %v7126_v6  ;;  %v2296_v40 = vand.u32 2147483648, %v7126_v6 }
 0x4a4   :  { %v2151_v28 = vmul.f32 %v3621_v7, %v2150_v16  ;;  %3634 = vrcp.f32 %v7128_v1  ;;  %v2311_v41 = vand.u32 2147483648, %v7128_v1  ;;  %v2309_v44 = vand.u32 2147483647, %v7128_v1 }
 0x4a5   :  { %v7135_v15 = vpop.eup %3626  ;;  %v2137_v2 = vadd.f32 %v3619_v4, %v2136_v5  ;;  %vm2305_vm8 = vweird.f32 %v7128_v1  ;;  %vm2290_vm9 = vweird.f32 %v7126_v6  ;;  %vm2295_vm12 = vcmp.eq.f32.partialorder %v2294_v18, 8.507059e+37  ;;  %v7253_v18 = vld [vmem:[#allocation2 + $0x170] sm:$0xff] }
 0x4a6   :  { %v3629_v17 = vpop.eup %3628  ;;  %v2164_v20 = vmul.f32 %v7135_v15, %v7122_v55  ;;  %v2152_v31 = vadd.f32 %v3621_v7, %v2151_v28  ;;  %vm2169_vm5 = vweird.f32 %v7135_v15  ;;  %v2312_v38 = vor.u32 1.1754944e-38, %v2311_v41  ;;  %v7268_v41 = vld [vmem:[#allocation2 + $0x158] sm:$0xff] }
 0x4a7   :  { %v3631_v57 = vpop.eup %3630  ;;  %v2141_v50 = vsel %vm2140_vm0, %v3619_v4, %v2137_v2  ;;  %v7140_v14 = vadd.f32 1.0, %v3629_v17  ;;  %vm7167_vm10 = vmor %vm2168_vm4, %vm2169_vm5  ;;  %v2297_v4 = vor.u32 1.1754944e-38, %v2296_v40  ;;  %vm2310_vm14 = vcmp.eq.f32.partialorder %v2309_v44, 8.507059e+37  ;;  %v7190_v2 = vld [vmem:[#allocation2 + $0x1f0] sm:$0xff]  ;;  %v7193_v17 = vld [vmem:[#allocation2 + $0x1f8] sm:$0xff] }
 0x4a8   :  { %v2165_v48 = vsub.f32 1.0, %v2164_v20  ;;  %v2146_v25 = vsel %vm2143_vm1, %v2145_v33, %v2141_v50  ;;  %v2156_v27 = vsel %vm2155_vm2, %v3621_v7, %v2152_v31  ;;  %vm2173_vm15 = vcmp.eq.f32.partialorder %v2172_v45, 8.507059e+37  ;;  %v7202_v33 = vld [vmem:[#allocation2 + $0x1c0] sm:$0xff]  ;;  %v7205_v31 = vld [vmem:[#allocation2 + $0x1c8] sm:$0xff]  ;;  %v7214_v50 = vld [vmem:[#allocation2 + $0x1d8] sm:$0xff] }
 0x4a9   :  { %v3633_v23 = vpop.eup %3632  ;;  %v2161_v13 = vsel %vm2158_vm3, %v2160_v29, %v2156_v27  ;;  %v2180_v30 = vmul.f32 %v3631_v57, %v2146_v25  ;;  %3636 = vrcp.f32 %v7140_v14  ;;  %v2326_v58 = vand.u32 2147483648, %v7140_v14  ;;  %v7211_v29 = vld [vmem:[#allocation2 + $0x1d0] sm:$0xff]  ;;  %v7226_v27 = vld [vmem:[#allocation2 + $0x1b8] sm:$0xff]  ;;  %v7262_v40 = vld [vmem:[#allocation2 + $0x148] sm:$0xff] }
 0x4aa   :  { %v3635_v9 = vpop.eup %3634  ;;  %v2179_v11 = vmul.f32 %v2161_v13, %v6875_v35  ;;  %v2286_v52 = vmul.f32 %v3633_v23, %v7126_v6  ;;  %3638 = vtanh.f32 %v2272_v56  ;;  %v2166_v10 = vmul.f32 %v7135_v15, %v2165_v48  ;;  %v7217_v56 = vld [vmem:[#allocation2 + $0x1a0] sm:$0xff]  ;;  %v7220_v48 = vld [vmem:[#allocation2 + $0x1a8] sm:$0xff]  ;;  %v7223_v25 = vld [vmem:[#allocation2 + $0x1b0] sm:$0xff] }
 0x4ab   :  { %v2301_v26 = vmul.f32 %v3635_v9, %v7128_v1  ;;  %vm2291_vm6 = vweird.f32 %v3633_v23  ;;  %vm2306_vm7 = vweird.f32 %v3635_v9  ;;  %vm2320_vm1 = vweird.f32 %v7140_v14  ;;  %v7280_v44 = vld [vmem:[#allocation2 + $0x138] sm:$0xff]  ;;  %v7283_v45 = vld [vmem:[#allocation2 + $0x100] sm:$0xff] }
 0x4ac   :  { %v7148_v36 = vadd.f32 %v2180_v30, %v2179_v11  ;;  %v2287_v37 = vsub.f32 1.0, %v2286_v52  ;;  %v2167_v35 = vadd.f32 %v7135_v15, %v2166_v10  ;;  %vm2292_vm11 = vmor %vm2290_vm9, %vm2291_vm6  ;;  %v7229_v30 = vld [vmem:[#allocation2 + $0x180] sm:$0xff]  ;;  %v7237_v52 = vld [vmem:[#allocation2 + $0x190] sm:$0xff] }
 0x4ad   :  { %v2302_v63 = vsub.f32 1.0, %v2301_v26  ;;  %vm2307_vm13 = vmor %vm2305_vm8, %vm2306_vm7  ;;  %v7240_v26 = vld [vmem:[#allocation2 + $0x198] sm:$0xff]  ;;  %v7243_v10 = vld [vmem:[#allocation2 + $0x160] sm:$0xff] }
 0x4ae   :  { %3640 = vtanh.f32 %v7148_v36  ;;  %v2288_v42 = vmul.f32 %v3633_v23, %v2287_v37  ;;  %v2171_v7 = vsel %vm7167_vm10, %v7135_v15, %v2167_v35  ;;  %v2324_v15 = vand.u32 2147483647, %v7140_v14  ;;  %v7246_v37 = vld [vmem:[#allocation2 + $0x168] sm:$0xff]  ;;  %v7265_v35 = vld [vmem:[#allocation2 + $0x150] sm:$0xff]  ;;  %v7355_v20 = vld [vmem:[#allocation2 + $0x40] sm:$0xff] }
 0x4af   :  { %v7157_v8 = vpop.eup %3636  ;;  %v2303_v43 = vmul.f32 %v3635_v9, %v2302_v63  ;;  %v2176_v1 = vsel %vm2173_vm15, %v2175_v19, %v2171_v7  ;;  %v7259_v63 = vld [vmem:[#allocation2 + $0x140] sm:$0xff]  ;;  %v7304_v7 = vld [vmem:[#allocation2 + $0xf8] sm:$0xff]  ;;  %9738 = vst [vmem:[#allocation43_spill] sm:$0xff] %v7355_v20 }
 0x4b0   :  { %v2316_v47 = vmul.f32 %v7157_v8, %v7140_v14  ;;  %v2289_v51 = vadd.f32 %v3633_v23, %v2288_v42  ;;  %v3639_v0 = vpop.eup %3638  ;;  %vm2321_vm0 = vweird.f32 %v7157_v8  ;;  %v2327_v14 = vor.u32 1.1754944e-38, %v2326_v58  ;;  %v7271_v42 = vld [vmem:[#allocation2 + $0x120] sm:$0xff]  ;;  %9721 = vst [vmem:[#allocation14_spill] sm:$0xff] %v7304_v7  ;;  %v7316_v19 = vld [vmem:[#allocation2 + $0xd8] sm:$0xff]  ;;  %v7349_v58 = vld [vmem:[#allocation2 + $0x70] sm:$0xff] }
 0x4b1   :  { %v2304_v34 = vadd.f32 %v3635_v9, %v2303_v43  ;;  %vm7198_vm2 = vmor %vm2320_vm1, %vm2321_vm0  ;;  %vm2325_vm3 = vcmp.eq.f32.partialorder %v2324_v15, 8.507059e+37  ;;  %v7277_v43 = vld [vmem:[#allocation2 + $0x130] sm:$0xff]  ;;  %9725 = vst [vmem:[#allocation17_spill] sm:$0xff] %v7316_v19  ;;  %v7352_v15 = vld [vmem:[#allocation2 + $0x78] sm:$0xff] }
 0x4b2   :  { %v2317_v3 = vsub.f32 1.0, %v2316_v47  ;;  %v2293_v12 = vsel %vm2292_vm11, %v3633_v23, %v2289_v51  ;;  %v7286_v47 = vld [vmem:[#allocation2 + $0x108] sm:$0xff]  ;;  %v7289_v51 = vld [vmem:[#allocation2 + $0x110] sm:$0xff]  ;;  %9736 = vst [vmem:[#allocation26_spill] sm:$0xff] %v7349_v58 }
 0x4b3   :  { %v2298_v24 = vsel %vm2295_vm12, %v2297_v4, %v2293_v12  ;;  %v2308_v55 = vsel %vm2307_vm13, %v3635_v9, %v2304_v34  ;;  %v7232_v9 = vld [vmem:[#allocation2 + $0x188] sm:$0xff]  ;;  %v7301_v34 = vld [vmem:[#allocation2 + $0xf0] sm:$0xff]  ;;  %9737 = vst [vmem:[#allocation27_spill] sm:$0xff] %v7352_v15 }
 0x4b4   :  { %v3641_v6 = vpop.eup %3640  ;;  %v2318_v16 = vmul.f32 %v7157_v8, %v2317_v3  ;;  %v2313_v46 = vsel %vm2310_vm14, %v2312_v38, %v2308_v55  ;;  %v2332_v21 = vmul.f32 %v3639_v0, %v2298_v24  ;;  %v7295_v0 = vld [vmem:[#allocation2 + $0xe0] sm:$0xff]  ;;  %v7298_v4 = vld [vmem:[#allocation2 + $0xe8] sm:$0xff]  ;;  %9720 = vst [vmem:[#allocation13_spill] sm:$0xff] %v7301_v34  ;;  %v7313_v12 = vld [vmem:[#allocation2 + $0xd0] sm:$0xff] }
 0x4b5   :  { %v2331_v22 = vmul.f32 %v2313_v46, %v6929_v62  ;;  %v2183_v5 = vmul.f32 %v3641_v6, %v2176_v1  ;;  %v7185_v62 = vld [vmem:[#allocation2 + $0x1e8] sm:$0xff]  ;;  %9719 = vst [vmem:[#allocation12_spill] sm:$0xff] %v7298_v4  ;;  %v7307_v38 = vld [vmem:[#allocation2 + $0xc0] sm:$0xff]  ;;  %v7325_v6 = vld [vmem:[#allocation2 + $0xb0] sm:$0xff] }
 0x4b6   :  { %v2319_v59 = vadd.f32 %v7157_v8, %v2318_v16  ;;  %9722 = vst [vmem:[#allocation28_spill] sm:$0xff] %v7307_v38  ;;  %v7310_v3 = vld [vmem:[#allocation2 + $0xc8] sm:$0xff]  ;;  %v7319_v24 = vld [vmem:[#allocation2 + $0xa0] sm:$0xff]  ;;  %v7328_v16 = vld [vmem:[#allocation2 + $0xb8] sm:$0xff] }
 0x4b7   :  { %v7176_v28 = vadd.f32 %v2332_v21, %v2331_v22  ;;  %2352 = vmatmul.f32.vlgmr.msra.gmra.mxu0 %v2183_v5  ;;  %2372 = vmatmul.f32.vlgmr.msra.gmra.mxu1 %v2183_v5  ;;  %9723 = vst [vmem:[#allocation15_spill] sm:$0xff] %v7310_v3  ;;  %v7322_v55 = vld [vmem:[#allocation2 + $0xa8] sm:$0xff]  ;;  %v7331_v46 = vld [vmem:[#allocation2 + $0x80] sm:$0xff]  ;;  %v7337_v1 = vld [vmem:[#allocation2 + $0x90] sm:$0xff] }
 0x4b8   :  { %2392 = vmatmul.f32.vlgmr.msra.gmra.mxu2 %v2183_v5  ;;  %2412 = vmatmul.f32.vlgmr.msra.gmra.mxu3 %v2183_v5  ;;  %v2323_v57 = vsel %vm7198_vm2, %v7157_v8, %v2319_v59  ;;  %v7274_v8 = vld [vmem:[#allocation2 + $0x128] sm:$0xff]  ;;  %9724 = vst [vmem:[#allocation16_spill] sm:$0xff] %v7313_v12  ;;  %v7340_v22 = vld [vmem:[#allocation2 + $0x98] sm:$0xff]  ;;  %v7343_v5 = vld [vmem:[#allocation2 + $0x60] sm:$0xff] }
 0x4b9   :  { %3642 = vtanh.f32 %v7176_v28  ;;  %2563 = vmatpush.msra.mxu0 %v7182_v54  ;;  %2583 = vmatpush.msra.mxu1 %v7185_v62  ;;  %v2328_v13 = vsel %vm2325_vm3, %v2327_v14, %v2323_v57  ;;  %9726 = vst [vmem:[#allocation32_spill] sm:$0xff] %v7319_v24  ;;  %v7334_v21 = vld [vmem:[#allocation2 + $0x88] sm:$0xff]  ;;  %v7361_v14 = vld [vmem:[#allocation2 + $0x50] sm:$0xff] }
 0x4ba   :  { %2603 = vmatpush.msra.mxu2 %v7190_v2  ;;  %2623 = vmatpush.msra.mxu3 %v7193_v17  ;;  %9727 = vst [vmem:[#allocation18_spill] sm:$0xff] %v7322_v55  ;;  %v7346_v59 = vld [vmem:[#allocation2 + $0x68] sm:$0xff] }
 0x4bb   :  { %2564 = vmatpush.msra.mxu0 %v7202_v33  ;;  %2584 = vmatpush.msra.mxu1 %v7205_v31  ;;  %9728 = vst [vmem:[#allocation19_spill] sm:$0xff] %v7325_v6  ;;  %v7358_v57 = vld [vmem:[#allocation2 + $0x48] sm:$0xff] }
 0x4bc   :  { %2604 = vmatpush.msra.mxu2 %v7211_v29  ;;  %2624 = vmatpush.msra.mxu3 %v7214_v50  ;;  %9729 = vst [vmem:[#allocation20_spill] sm:$0xff] %v7328_v16 }
 0x4bd   :  { %2565 = vmatpush.msra.mxu0 %v7217_v56  ;;  %2585 = vmatpush.msra.mxu1 %v7220_v48  ;;  %9730 = vst [vmem:[#allocation35_spill] sm:$0xff] %v7331_v46 }
 0x4be   :  { %2605 = vmatpush.msra.mxu2 %v7223_v25  ;;  %2625 = vmatpush.msra.mxu3 %v7226_v27  ;;  %9731 = vst [vmem:[#allocation22_spill] sm:$0xff] %v7334_v21 }
 0x4bf   :  { %v3643_v23 = vpop.eup %3642  ;;  %2566 = vmatpush.msra.mxu0 %v7229_v30  ;;  %2586 = vmatpush.msra.mxu1 %v7232_v9  ;;  %9732 = vst [vmem:[#allocation23_spill] sm:$0xff] %v7337_v1 }
 0x4c0   :  { %v7235_v11 = vmul.f32 %v3643_v23, %v2328_v13  ;;  %2606 = vmatpush.msra.mxu2 %v7237_v52  ;;  %2626 = vmatpush.msra.mxu3 %v7240_v26  ;;  %9733 = vst [vmem:[#allocation24_spill] sm:$0xff] %v7340_v22  ;;  %v7364_v23 = vld [vmem:[#allocation2 + $0x58] sm:$0xff]  ;;  %v7367_v13 = vld [vmem:[#allocation2 + $0x20] sm:$0xff] }
 0x4c1   :  { %2567 = vmatpush.msra.mxu0 %v7243_v10  ;;  %2587 = vmatpush.msra.mxu1 %v7246_v37  ;;  %9734 = vst [vmem:[#allocation39_spill] sm:$0xff] %v7343_v5 }
 0x4c2   :  { %2432 = vmatmul.f32.vlgmr.msrb.gmra.mxu0 %v7235_v11  ;;  %2452 = vmatmul.f32.vlgmr.msrb.gmra.mxu1 %v7235_v11  ;;  %9735 = vst [vmem:[#allocation25_spill] sm:$0xff] %v7346_v59 }
 0x4c3   :  { %2472 = vmatmul.f32.vlgmr.msrb.gmra.mxu2 %v7235_v11  ;;  %2492 = vmatmul.f32.vlgmr.msrb.gmra.mxu3 %v7235_v11  ;;  %9739 = vst [vmem:[#allocation29_spill] sm:$0xff] %v7358_v57 }
 0x4c4   :  { %2607 = vmatpush.msra.mxu2 %v7253_v18  ;;  %2627 = vmatpush.msra.mxu3 %v7256_v39  ;;  %9740 = vst [vmem:[#allocation30_spill] sm:$0xff] %v7361_v14 }
 0x4c5   :  { %2568 = vmatpush.msra.mxu0 %v7259_v63  ;;  %2588 = vmatpush.msra.mxu1 %v7262_v40  ;;  %9741 = vst [vmem:[#allocation31_spill] sm:$0xff] %v7364_v23 }
 0x4c6   :  { %2608 = vmatpush.msra.mxu2 %v7265_v35  ;;  %2628 = vmatpush.msra.mxu3 %v7268_v41  ;;  %9742 = vst [vmem:[#allocation47_spill] sm:$0xff] %v7367_v13 }
 0x4c7   :  { %2569 = vmatpush.msra.mxu0 %v7271_v42  ;;  %2589 = vmatpush.msra.mxu1 %v7274_v8 }
 0x4c8   :  { %2609 = vmatpush.msra.mxu2 %v7277_v43  ;;  %2629 = vmatpush.msra.mxu3 %v7280_v44 }
 0x4c9   :  { %2570 = vmatpush.msra.mxu0 %v7283_v45  ;;  %2590 = vmatpush.msra.mxu1 %v7286_v47 }
 0x4ca   :  { %2610 = vmatpush.msra.mxu2 %v7289_v51  ;;  %2630 = vmatpush.msra.mxu3 %v7292_v53 }
 0x4cb   :  { %2571 = vmatpush.msra.mxu0 %v7295_v0  ;;  %2591 = vmatpush.msra.mxu1 %v7298_v4 }
 0x4cc   :  { %2611 = vmatpush.msra.mxu2 %v7301_v34  ;;  %2631 = vmatpush.msra.mxu3 %v7304_v7 }
 0x4cd   :  { %2572 = vmatpush.msra.mxu0 %v7307_v38  ;;  %2592 = vmatpush.msra.mxu1 %v7310_v3 }
 0x4ce   :  { %2612 = vmatpush.msra.mxu2 %v7313_v12  ;;  %2632 = vmatpush.msra.mxu3 %v7316_v19 }
 0x4cf   :  { %2573 = vmatpush.msra.mxu0 %v7319_v24  ;;  %2593 = vmatpush.msra.mxu1 %v7322_v55 }
 0x4d0   :  { %2613 = vmatpush.msra.mxu2 %v7325_v6  ;;  %2633 = vmatpush.msra.mxu3 %v7328_v16 }
 0x4d1   :  { %2574 = vmatpush.msra.mxu0 %v7331_v46  ;;  %2594 = vmatpush.msra.mxu1 %v7334_v21 }
 0x4d2   :  { %2614 = vmatpush.msra.mxu2 %v7337_v1  ;;  %2634 = vmatpush.msra.mxu3 %v7340_v22 }
 0x4d3   :  { %2575 = vmatpush.msra.mxu0 %v7343_v5  ;;  %2595 = vmatpush.msra.mxu1 %v7346_v59 }
 0x4d4   :  { %2615 = vmatpush.msra.mxu2 %v7349_v58  ;;  %2635 = vmatpush.msra.mxu3 %v7352_v15  ;;  %v7370_v15 = vld [vmem:[#allocation2 + $0x28] sm:$0xff] }
 0x4d5   :  { %2576 = vmatpush.msra.mxu0 %v7355_v20  ;;  %2596 = vmatpush.msra.mxu1 %v7358_v57  ;;  %9743 = vst [vmem:[#allocation33_spill] sm:$0xff] %v7370_v15  ;;  %v7373_v20 = vld [vmem:[#allocation2 + $0x30] sm:$0xff]  ;;  %v7376_v57 = vld [vmem:[#allocation2 + $0x38] sm:$0xff] }
 0x4d6   :  { %2616 = vmatpush.msra.mxu2 %v7361_v14  ;;  %2636 = vmatpush.msra.mxu3 %v7364_v23  ;;  %9744 = vst [vmem:[#allocation34_spill] sm:$0xff] %v7373_v20  ;;  %v7379_v14 = vld [vmem:[#allocation2] sm:$0xff]  ;;  %v7382_v23 = vld [vmem:[#allocation2 + $0x8] sm:$0xff] }
 0x4d7   :  { %2577 = vmatpush.msra.mxu0 %v7367_v13  ;;  %2597 = vmatpush.msra.mxu1 %v7370_v15  ;;  %9745 = vst [vmem:[#allocation36_spill] sm:$0xff] %v7376_v57  ;;  %v7385_v13 = vld [vmem:[#allocation2 + $0x10] sm:$0xff]  ;;  %v7388_v15 = vld [vmem:[#allocation2 + $0x18] sm:$0xff] }
 0x4d8   :  { %2617 = vmatpush.msra.mxu2 %v7373_v20  ;;  %2637 = vmatpush.msra.mxu3 %v7376_v57  ;;  %9746 = vst [vmem:[#allocation51_spill] sm:$0xff] %v7379_v14  ;;  %v7407_v57 = vld [vmem:[#allocation6 + $0x1c0] sm:$0xff] }
 0x4d9   :  { %2578 = vmatpush.msra.mxu0 %v7379_v14  ;;  %9747 = vst [vmem:[#allocation37_spill] sm:$0xff] %v7382_v23  ;;  %2598 = vmatpush.msra.mxu1 %v7382_v23  ;;  %v7395_v14 = vld [vmem:[#allocation6 + $0x1e0] sm:$0xff]  ;;  %v7398_v23 = vld [vmem:[#allocation6 + $0x1e8] sm:$0xff] }
 0x4da   :  { %9748 = vst [vmem:[#allocation38_spill] sm:$0xff] %v7385_v13  ;;  %2618 = vmatpush.msra.mxu2 %v7385_v13  ;;  %2638 = vmatpush.msra.mxu3 %v7388_v15  ;;  %v7401_v13 = vld [vmem:[#allocation6 + $0x1f0] sm:$0xff] }
 0x4db   :  { %9749 = vst [vmem:[#allocation40_spill] sm:$0xff] %v7388_v15  ;;  %2579 = vmatmul.f32.vlgmr.msra.gmra.mxu0 %v7235_v11  ;;  %2599 = vmatmul.f32.vlgmr.msra.gmra.mxu1 %v7235_v11  ;;  %v7404_v15 = vld [vmem:[#allocation6 + $0x1f8] sm:$0xff] }
 0x4dc   :  { %2619 = vmatmul.f32.vlgmr.msra.gmra.mxu2 %v7235_v11  ;;  %2639 = vmatmul.f32.vlgmr.msra.gmra.mxu3 %v7235_v11  ;;  %9750 = vst [vmem:[#allocation55_spill] sm:$0xff] %v7395_v14  ;;  %v7410_v11 = vld [vmem:[#allocation6 + $0x1c8] sm:$0xff] }
 0x4dd   :  { %2715 = vmatpush.msrb.mxu0 %v7395_v14  ;;  %9751 = vst [vmem:[#allocation41_spill] sm:$0xff] %v7398_v23  ;;  %2735 = vmatpush.msrb.mxu1 %v7398_v23  ;;  %v7413_v14 = vld [vmem:[#allocation6 + $0x1d0] sm:$0xff]  ;;  %v7416_v23 = vld [vmem:[#allocation6 + $0x1d8] sm:$0xff] }
 0x4de   :  { %9752 = vst [vmem:[#allocation42_spill] sm:$0xff] %v7401_v13  ;;  %2755 = vmatpush.msrb.mxu2 %v7401_v13  ;;  %2775 = vmatpush.msrb.mxu3 %v7404_v15  ;;  %v7419_v13 = vld [vmem:[#allocation6 + $0x1a0] sm:$0xff] }
 0x4df   :  { %9753 = vst [vmem:[#allocation44_spill] sm:$0xff] %v7404_v15  ;;  %2716 = vmatpush.msrb.mxu0 %v7407_v57  ;;  %2736 = vmatpush.msrb.mxu1 %v7410_v11  ;;  %v7422_v15 = vld [vmem:[#allocation6 + $0x1a8] sm:$0xff] }
 0x4e0   :  { %9754 = vst [vmem:[#allocation59_spill] sm:$0xff] %v7407_v57  ;;  %2756 = vmatpush.msrb.mxu2 %v7413_v14  ;;  %2776 = vmatpush.msrb.mxu3 %v7416_v23  ;;  %v7425_v57 = vld [vmem:[#allocation6 + $0x1b0] sm:$0xff] }
 0x4e1   :  { %9755 = vst [vmem:[#allocation45_spill] sm:$0xff] %v7410_v11  ;;  %2717 = vmatpush.msrb.mxu0 %v7419_v13  ;;  %2737 = vmatpush.msrb.mxu1 %v7422_v15  ;;  %v7428_v11 = vld [vmem:[#allocation6 + $0x1b8] sm:$0xff] }
 0x4e2   :  { %9756 = vst [vmem:[#allocation46_spill] sm:$0xff] %v7413_v14  ;;  %2757 = vmatpush.msrb.mxu2 %v7425_v57  ;;  %2777 = vmatpush.msrb.mxu3 %v7428_v11  ;;  %v7431_v14 = vld [vmem:[#allocation6 + $0x180] sm:$0xff] }
 0x4e3   :  { %9757 = vst [vmem:[#allocation48_spill] sm:$0xff] %v7416_v23  ;;  %2718 = vmatpush.msrb.mxu0 %v7431_v14  ;;  %v7434_v23 = vld [vmem:[#allocation6 + $0x188] sm:$0xff] }
 0x4e4   :  { %9758 = vst [vmem:[#allocation63_spill] sm:$0xff] %v7419_v13  ;;  %2738 = vmatpush.msrb.mxu1 %v7434_v23  ;;  %v7437_v13 = vld [vmem:[#allocation6 + $0x190] sm:$0xff] }
 0x4e5   :  { %9759 = vst [vmem:[#allocation49_spill] sm:$0xff] %v7422_v15  ;;  %2758 = vmatpush.msrb.mxu2 %v7437_v13  ;;  %v7440_v15 = vld [vmem:[#allocation6 + $0x198] sm:$0xff] }
 0x4e6   :  { %9760 = vst [vmem:[#allocation50_spill] sm:$0xff] %v7425_v57  ;;  %2778 = vmatpush.msrb.mxu3 %v7440_v15  ;;  %v7443_v57 = vld [vmem:[#allocation6 + $0x160] sm:$0xff] }
 0x4e7   :  { %9761 = vst [vmem:[#allocation52_spill] sm:$0xff] %v7428_v11  ;;  %2719 = vmatpush.msrb.mxu0 %v7443_v57  ;;  %v7446_v11 = vld [vmem:[#allocation6 + $0x168] sm:$0xff] }
 0x4e8   :  { %9762 = vst [vmem:[#allocation67_spill] sm:$0xff] %v7431_v14  ;;  %2739 = vmatpush.msrb.mxu1 %v7446_v11  ;;  %v7449_v14 = vld [vmem:[#allocation6 + $0x170] sm:$0xff] }
 0x4e9   :  { %9763 = vst [vmem:[#allocation53_spill] sm:$0xff] %v7434_v23  ;;  %2759 = vmatpush.msrb.mxu2 %v7449_v14  ;;  %v7452_v23 = vld [vmem:[#allocation6 + $0x178] sm:$0xff] }
 0x4ea   :  { %9764 = vst [vmem:[#allocation54_spill] sm:$0xff] %v7437_v13  ;;  %2779 = vmatpush.msrb.mxu3 %v7452_v23  ;;  %v7455_v13 = vld [vmem:[#allocation6 + $0x140] sm:$0xff] }
 0x4eb   :  { %9765 = vst [vmem:[#allocation56_spill] sm:$0xff] %v7440_v15  ;;  %2720 = vmatpush.msrb.mxu0 %v7455_v13  ;;  %v7458_v15 = vld [vmem:[#allocation6 + $0x148] sm:$0xff] }
 0x4ec   :  { %9766 = vst [vmem:[#allocation71_spill] sm:$0xff] %v7443_v57  ;;  %2740 = vmatpush.msrb.mxu1 %v7458_v15  ;;  %v7461_v57 = vld [vmem:[#allocation6 + $0x150] sm:$0xff] }
 0x4ed   :  { %9767 = vst [vmem:[#allocation57_spill] sm:$0xff] %v7446_v11  ;;  %2760 = vmatpush.msrb.mxu2 %v7461_v57  ;;  %v7464_v11 = vld [vmem:[#allocation6 + $0x158] sm:$0xff] }
 0x4ee   :  { %9768 = vst [vmem:[#allocation58_spill] sm:$0xff] %v7449_v14  ;;  %2780 = vmatpush.msrb.mxu3 %v7464_v11  ;;  %v7467_v14 = vld [vmem:[#allocation6 + $0x120] sm:$0xff] }
 0x4ef   :  { %9769 = vst [vmem:[#allocation60_spill] sm:$0xff] %v7452_v23  ;;  %2721 = vmatpush.msrb.mxu0 %v7467_v14  ;;  %v7470_v23 = vld [vmem:[#allocation6 + $0x128] sm:$0xff] }
 0x4f0   :  { %9770 = vst [vmem:[#allocation75_spill] sm:$0xff] %v7455_v13  ;;  %2741 = vmatpush.msrb.mxu1 %v7470_v23  ;;  %v7473_v13 = vld [vmem:[#allocation6 + $0x130] sm:$0xff] }
 0x4f1   :  { %9771 = vst [vmem:[#allocation61_spill] sm:$0xff] %v7458_v15  ;;  %2761 = vmatpush.msrb.mxu2 %v7473_v13  ;;  %v7476_v15 = vld [vmem:[#allocation6 + $0x138] sm:$0xff] }
 0x4f2   :  { %9772 = vst [vmem:[#allocation62_spill] sm:$0xff] %v7461_v57  ;;  %2781 = vmatpush.msrb.mxu3 %v7476_v15  ;;  %v7479_v57 = vld [vmem:[#allocation6 + $0x100] sm:$0xff] }
 0x4f3   :  { %9773 = vst [vmem:[#allocation64_spill] sm:$0xff] %v7464_v11  ;;  %2722 = vmatpush.msrb.mxu0 %v7479_v57  ;;  %v7482_v11 = vld [vmem:[#allocation6 + $0x108] sm:$0xff] }
 0x4f4   :  { %9774 = vst [vmem:[#allocation79_spill] sm:$0xff] %v7467_v14  ;;  %2742 = vmatpush.msrb.mxu1 %v7482_v11  ;;  %v7485_v14 = vld [vmem:[#allocation6 + $0x110] sm:$0xff] }
 0x4f5   :  { %9775 = vst [vmem:[#allocation65_spill] sm:$0xff] %v7470_v23  ;;  %2762 = vmatpush.msrb.mxu2 %v7485_v14  ;;  %v7488_v23 = vld [vmem:[#allocation6 + $0x118] sm:$0xff] }
 0x4f6   :  { %9776 = vst [vmem:[#allocation66_spill] sm:$0xff] %v7473_v13  ;;  %2782 = vmatpush.msrb.mxu3 %v7488_v23  ;;  %v7491_v13 = vld [vmem:[#allocation6 + $0xe0] sm:$0xff] }
 0x4f7   :  { %9777 = vst [vmem:[#allocation68_spill] sm:$0xff] %v7476_v15  ;;  %2723 = vmatpush.msrb.mxu0 %v7491_v13  ;;  %v7494_v15 = vld [vmem:[#allocation6 + $0xe8] sm:$0xff] }
 0x4f8   :  { %9778 = vst [vmem:[#allocation83_spill] sm:$0xff] %v7479_v57  ;;  %2743 = vmatpush.msrb.mxu1 %v7494_v15  ;;  %v7497_v57 = vld [vmem:[#allocation6 + $0xf0] sm:$0xff] }
 0x4f9   :  { %9779 = vst [vmem:[#allocation69_spill] sm:$0xff] %v7482_v11  ;;  %2763 = vmatpush.msrb.mxu2 %v7497_v57  ;;  %v7500_v11 = vld [vmem:[#allocation6 + $0xf8] sm:$0xff] }
 0x4fa   :  { %9780 = vst [vmem:[#allocation70_spill] sm:$0xff] %v7485_v14  ;;  %2783 = vmatpush.msrb.mxu3 %v7500_v11  ;;  %v7503_v14 = vld [vmem:[#allocation6 + $0xc0] sm:$0xff] }
 0x4fb   :  { %9781 = vst [vmem:[#allocation72_spill] sm:$0xff] %v7488_v23  ;;  %2724 = vmatpush.msrb.mxu0 %v7503_v14  ;;  %v7506_v23 = vld [vmem:[#allocation6 + $0xc8] sm:$0xff] }
 0x4fc   :  { %9782 = vst [vmem:[#allocation87_spill] sm:$0xff] %v7491_v13  ;;  %2744 = vmatpush.msrb.mxu1 %v7506_v23  ;;  %v7509_v13 = vld [vmem:[#allocation6 + $0xd0] sm:$0xff] }
 0x4fd   :  { %9783 = vst [vmem:[#allocation73_spill] sm:$0xff] %v7494_v15  ;;  %2764 = vmatpush.msrb.mxu2 %v7509_v13  ;;  %v7512_v15 = vld [vmem:[#allocation6 + $0xd8] sm:$0xff] }
 0x4fe   :  { %9784 = vst [vmem:[#allocation74_spill] sm:$0xff] %v7497_v57  ;;  %2784 = vmatpush.msrb.mxu3 %v7512_v15  ;;  %v7515_v57 = vld [vmem:[#allocation6 + $0xa0] sm:$0xff] }
 0x4ff   :  { %9785 = vst [vmem:[#allocation76_spill] sm:$0xff] %v7500_v11  ;;  %2725 = vmatpush.msrb.mxu0 %v7515_v57  ;;  %v7518_v11 = vld [vmem:[#allocation6 + $0xa8] sm:$0xff] }
 0x500   :  { %9786 = vst [vmem:[#allocation77_spill] sm:$0xff] %v7503_v14  ;;  %2745 = vmatpush.msrb.mxu1 %v7518_v11  ;;  %v7521_v14 = vld [vmem:[#allocation6 + $0xb0] sm:$0xff] }
 0x501   :  { %9787 = vst [vmem:[#allocation78_spill] sm:$0xff] %v7506_v23  ;;  %2765 = vmatpush.msrb.mxu2 %v7521_v14  ;;  %v7524_v23 = vld [vmem:[#allocation6 + $0xb8] sm:$0xff] }
 0x502   :  { %9788 = vst [vmem:[#allocation80_spill] sm:$0xff] %v7509_v13  ;;  %2785 = vmatpush.msrb.mxu3 %v7524_v23  ;;  %v7527_v13 = vld [vmem:[#allocation6 + $0x80] sm:$0xff] }
 0x503   :  { %9789 = vst [vmem:[#allocation81_spill] sm:$0xff] %v7512_v15  ;;  %2726 = vmatpush.msrb.mxu0 %v7527_v13  ;;  %v7530_v15 = vld [vmem:[#allocation6 + $0x88] sm:$0xff] }
 0x504   :  { %9790 = vst [vmem:[#allocation82_spill] sm:$0xff] %v7515_v57  ;;  %2746 = vmatpush.msrb.mxu1 %v7530_v15  ;;  %v7533_v57 = vld [vmem:[#allocation6 + $0x90] sm:$0xff] }
 0x505   :  { %9791 = vst [vmem:[#allocation84_spill] sm:$0xff] %v7518_v11  ;;  %2766 = vmatpush.msrb.mxu2 %v7533_v57  ;;  %v7536_v11 = vld [vmem:[#allocation6 + $0x98] sm:$0xff] }
 0x506   :  { %9792 = vst [vmem:[#allocation85_spill] sm:$0xff] %v7521_v14  ;;  %2786 = vmatpush.msrb.mxu3 %v7536_v11  ;;  %v7539_v14 = vld [vmem:[#allocation6 + $0x60] sm:$0xff] }
 0x507   :  { %9793 = vst [vmem:[#allocation86_spill] sm:$0xff] %v7524_v23  ;;  %2727 = vmatpush.msrb.mxu0 %v7539_v14  ;;  %v7542_v23 = vld [vmem:[#allocation6 + $0x68] sm:$0xff] }
 0x508   :  { %9794 = vst [vmem:[#allocation88_spill] sm:$0xff] %v7527_v13  ;;  %2747 = vmatpush.msrb.mxu1 %v7542_v23  ;;  %v7545_v13 = vld [vmem:[#allocation6 + $0x70] sm:$0xff] }
 0x509   :  { %9795 = vst [vmem:[#allocation89_spill] sm:$0xff] %v7530_v15  ;;  %2767 = vmatpush.msrb.mxu2 %v7545_v13  ;;  %v7548_v15 = vld [vmem:[#allocation6 + $0x78] sm:$0xff] }
 0x50a   :  { %9796 = vst [vmem:[#allocation90_spill] sm:$0xff] %v7533_v57  ;;  %2787 = vmatpush.msrb.mxu3 %v7548_v15  ;;  %v7551_v57 = vld [vmem:[#allocation6 + $0x40] sm:$0xff] }
 0x50b   :  { %9797 = vst [vmem:[#allocation91_spill] sm:$0xff] %v7536_v11  ;;  %2728 = vmatpush.msrb.mxu0 %v7551_v57  ;;  %v7554_v11 = vld [vmem:[#allocation6 + $0x48] sm:$0xff] }
 0x50c   :  { %9798 = vst [vmem:[#allocation98_spill] sm:$0xff] %v7539_v14  ;;  %2748 = vmatpush.msrb.mxu1 %v7554_v11  ;;  %v7557_v14 = vld [vmem:[#allocation6 + $0x50] sm:$0xff] }
 0x50d   :  { %9799 = vst [vmem:[#allocation92_spill] sm:$0xff] %v7542_v23  ;;  %2768 = vmatpush.msrb.mxu2 %v7557_v14  ;;  %v7560_v23 = vld [vmem:[#allocation6 + $0x58] sm:$0xff] }
 0x50e   :  { %9800 = vst [vmem:[#allocation93_spill] sm:$0xff] %v7545_v13  ;;  %2788 = vmatpush.msrb.mxu3 %v7560_v23  ;;  %v7563_v13 = vld [vmem:[#allocation6 + $0x20] sm:$0xff] }
 0x50f   :  { %9801 = vst [vmem:[#allocation94_spill] sm:$0xff] %v7548_v15  ;;  %2729 = vmatpush.msrb.mxu0 %v7563_v13  ;;  %v7566_v15 = vld [vmem:[#allocation6 + $0x28] sm:$0xff] }
 0x510   :  { %9802 = vst [vmem:[#allocation99_spill] sm:$0xff] %v7551_v57  ;;  %2749 = vmatpush.msrb.mxu1 %v7566_v15  ;;  %v7569_v57 = vld [vmem:[#allocation6 + $0x30] sm:$0xff] }
 0x511   :  { %9803 = vst [vmem:[#allocation95_spill] sm:$0xff] %v7554_v11  ;;  %2769 = vmatpush.msrb.mxu2 %v7569_v57  ;;  %v7572_v11 = vld [vmem:[#allocation6 + $0x38] sm:$0xff] }
 0x512   :  { %9804 = vst [vmem:[#allocation96_spill] sm:$0xff] %v7557_v14  ;;  %2789 = vmatpush.msrb.mxu3 %v7572_v11  ;;  %v7575_v14 = vld [vmem:[#allocation6] sm:$0xff] }
 0x513   :  { %9805 = vst [vmem:[#allocation97_spill] sm:$0xff] %v7560_v23  ;;  %2730 = vmatpush.msrb.mxu0 %v7575_v14  ;;  %v7578_v23 = vld [vmem:[#allocation6 + $0x8] sm:$0xff] }
 0x514   :  { %9806 = vst [vmem:[#allocation100_spill] sm:$0xff] %v7563_v13  ;;  %2750 = vmatpush.msrb.mxu1 %v7578_v23  ;;  %v7581_v13 = vld [vmem:[#allocation6 + $0x10] sm:$0xff] }
 0x515   :  { %9807 = vst [vmem:[#allocation101_spill] sm:$0xff] %v7566_v15  ;;  %2770 = vmatpush.msrb.mxu2 %v7581_v13  ;;  %v7584_v15 = vld [vmem:[#allocation6 + $0x18] sm:$0xff] }
 0x516   :  { %9808 = vst [vmem:[#allocation102_spill] sm:$0xff] %v7569_v57  ;;  %2790 = vmatpush.msrb.mxu3 %v7584_v15  ;;  %v7587_v57 = vld [vmem:[#allocation4 + $0x1e0] sm:$0xff] }
 0x517   :  { %9809 = vst [vmem:[#allocation103_spill] sm:$0xff] %v7572_v11  ;;  %2795 = vmatpush.msra.mxu0 %v7587_v57  ;;  %v7590_v11 = vld [vmem:[#allocation4 + $0x1e8] sm:$0xff] }
 0x518   :  { %9810 = vst [vmem:[#allocation104_spill] sm:$0xff] %v7575_v14  ;;  %2815 = vmatpush.msra.mxu1 %v7590_v11  ;;  %v7593_v14 = vld [vmem:[#allocation4 + $0x1f0] sm:$0xff] }
 0x519   :  { %9811 = vst [vmem:[#allocation105_spill] sm:$0xff] %v7578_v23  ;;  %2835 = vmatpush.msra.mxu2 %v7593_v14  ;;  %v7596_v23 = vld [vmem:[#allocation4 + $0x1f8] sm:$0xff] }
 0x51a   :  { %9812 = vst [vmem:[#allocation106_spill] sm:$0xff] %v7581_v13  ;;  %2855 = vmatpush.msra.mxu3 %v7596_v23  ;;  %v7599_v13 = vld [vmem:[#allocation4 + $0x1c0] sm:$0xff] }
 0x51b   :  { %9813 = vst [vmem:[#allocation107_spill] sm:$0xff] %v7584_v15  ;;  %2796 = vmatpush.msra.mxu0 %v7599_v13  ;;  %v7602_v15 = vld [vmem:[#allocation4 + $0x1c8] sm:$0xff] }
 0x51c   :  { %9814 = vst [vmem:[#allocation108_spill] sm:$0xff] %v7587_v57  ;;  %2816 = vmatpush.msra.mxu1 %v7602_v15  ;;  %v7605_v57 = vld [vmem:[#allocation4 + $0x1d0] sm:$0xff] }
 0x51d   :  { %9815 = vst [vmem:[#allocation109_spill] sm:$0xff] %v7590_v11  ;;  %2836 = vmatpush.msra.mxu2 %v7605_v57  ;;  %v7608_v11 = vld [vmem:[#allocation4 + $0x1d8] sm:$0xff] }
 0x51e   :  { %9816 = vst [vmem:[#allocation110_spill] sm:$0xff] %v7593_v14  ;;  %2856 = vmatpush.msra.mxu3 %v7608_v11  ;;  %v7611_v14 = vld [vmem:[#allocation4 + $0x1a0] sm:$0xff] }
 0x51f   :  { %9817 = vst [vmem:[#allocation111_spill] sm:$0xff] %v7596_v23  ;;  %2797 = vmatpush.msra.mxu0 %v7611_v14  ;;  %v7614_v23 = vld [vmem:[#allocation4 + $0x1a8] sm:$0xff] }
 0x520   :  { %9818 = vst [vmem:[#allocation112_spill] sm:$0xff] %v7599_v13  ;;  %2817 = vmatpush.msra.mxu1 %v7614_v23  ;;  %v7617_v13 = vld [vmem:[#allocation4 + $0x1b0] sm:$0xff] }
 0x521   :  { %9819 = vst [vmem:[#allocation113_spill] sm:$0xff] %v7602_v15  ;;  %2837 = vmatpush.msra.mxu2 %v7617_v13  ;;  %v7620_v15 = vld [vmem:[#allocation4 + $0x1b8] sm:$0xff] }
 0x522   :  { %9820 = vst [vmem:[#allocation114_spill] sm:$0xff] %v7605_v57  ;;  %2857 = vmatpush.msra.mxu3 %v7620_v15  ;;  %v7623_v57 = vld [vmem:[#allocation4 + $0x180] sm:$0xff] }
 0x523   :  { %9821 = vst [vmem:[#allocation115_spill] sm:$0xff] %v7608_v11  ;;  %2798 = vmatpush.msra.mxu0 %v7623_v57  ;;  %v7626_v11 = vld [vmem:[#allocation4 + $0x188] sm:$0xff] }
 0x524   :  { %9822 = vst [vmem:[#allocation116_spill] sm:$0xff] %v7611_v14  ;;  %2818 = vmatpush.msra.mxu1 %v7626_v11  ;;  %v7629_v14 = vld [vmem:[#allocation4 + $0x190] sm:$0xff] }
 0x525   :  { %9823 = vst [vmem:[#allocation117_spill] sm:$0xff] %v7614_v23  ;;  %2838 = vmatpush.msra.mxu2 %v7629_v14  ;;  %v7632_v23 = vld [vmem:[#allocation4 + $0x198] sm:$0xff] }
 0x526   :  { %9824 = vst [vmem:[#allocation118_spill] sm:$0xff] %v7617_v13  ;;  %2858 = vmatpush.msra.mxu3 %v7632_v23  ;;  %v7635_v13 = vld [vmem:[#allocation4 + $0x160] sm:$0xff] }
 0x527   :  { %9825 = vst [vmem:[#allocation119_spill] sm:$0xff] %v7620_v15  ;;  %2799 = vmatpush.msra.mxu0 %v7635_v13  ;;  %v7638_v15 = vld [vmem:[#allocation4 + $0x168] sm:$0xff] }
 0x528   :  { %9826 = vst [vmem:[#allocation120_spill] sm:$0xff] %v7623_v57  ;;  %2819 = vmatpush.msra.mxu1 %v7638_v15  ;;  %v7641_v57 = vld [vmem:[#allocation4 + $0x170] sm:$0xff] }
 0x529   :  { %9827 = vst [vmem:[#allocation121_spill] sm:$0xff] %v7626_v11  ;;  %2839 = vmatpush.msra.mxu2 %v7641_v57  ;;  %v7644_v11 = vld [vmem:[#allocation4 + $0x178] sm:$0xff] }
 0x52a   :  { %9828 = vst [vmem:[#allocation122_spill] sm:$0xff] %v7629_v14  ;;  %2859 = vmatpush.msra.mxu3 %v7644_v11  ;;  %v7647_v14 = vld [vmem:[#allocation4 + $0x140] sm:$0xff] }
 0x52b   :  { %9829 = vst [vmem:[#allocation123_spill] sm:$0xff] %v7632_v23  ;;  %2800 = vmatpush.msra.mxu0 %v7647_v14  ;;  %v7650_v23 = vld [vmem:[#allocation4 + $0x148] sm:$0xff] }
 0x52c   :  { %9830 = vst [vmem:[#allocation124_spill] sm:$0xff] %v7635_v13  ;;  %2820 = vmatpush.msra.mxu1 %v7650_v23  ;;  %v7653_v13 = vld [vmem:[#allocation4 + $0x150] sm:$0xff] }
 0x52d   :  { %9831 = vst [vmem:[#allocation125_spill] sm:$0xff] %v7638_v15  ;;  %2840 = vmatpush.msra.mxu2 %v7653_v13  ;;  %v7656_v15 = vld [vmem:[#allocation4 + $0x158] sm:$0xff] }
 0x52e   :  { %9832 = vst [vmem:[#allocation126_spill] sm:$0xff] %v7641_v57  ;;  %2860 = vmatpush.msra.mxu3 %v7656_v15  ;;  %v7659_v57 = vld [vmem:[#allocation4 + $0x120] sm:$0xff] }
 0x52f   :  { %9833 = vst [vmem:[#allocation127_spill] sm:$0xff] %v7644_v11  ;;  %2801 = vmatpush.msra.mxu0 %v7659_v57  ;;  %v7662_v11 = vld [vmem:[#allocation4 + $0x128] sm:$0xff] }
 0x530   :  { %9834 = vst [vmem:[#allocation128_spill] sm:$0xff] %v7647_v14  ;;  %2821 = vmatpush.msra.mxu1 %v7662_v11  ;;  %v7665_v14 = vld [vmem:[#allocation4 + $0x130] sm:$0xff] }
 0x531   :  { %9835 = vst [vmem:[#allocation129_spill] sm:$0xff] %v7650_v23  ;;  %2841 = vmatpush.msra.mxu2 %v7665_v14  ;;  %v7668_v23 = vld [vmem:[#allocation4 + $0x138] sm:$0xff] }
 0x532   :  { %9836 = vst [vmem:[#allocation130_spill] sm:$0xff] %v7653_v13  ;;  %2861 = vmatpush.msra.mxu3 %v7668_v23  ;;  %v7671_v13 = vld [vmem:[#allocation4 + $0x100] sm:$0xff] }
 0x533   :  { %9837 = vst [vmem:[#allocation131_spill] sm:$0xff] %v7656_v15  ;;  %2802 = vmatpush.msra.mxu0 %v7671_v13  ;;  %v7674_v15 = vld [vmem:[#allocation4 + $0x108] sm:$0xff] }
 0x534   :  { %9838 = vst [vmem:[#allocation132_spill] sm:$0xff] %v7659_v57  ;;  %2822 = vmatpush.msra.mxu1 %v7674_v15  ;;  %v7677_v57 = vld [vmem:[#allocation4 + $0x110] sm:$0xff]  ;;  %v2373_v20 = vpop.f32.mrf.mxu1 }
 0x535   :  { %9839 = vst [vmem:[#allocation133_spill] sm:$0xff] %v7662_v11  ;;  %2842 = vmatpush.msra.mxu2 %v7677_v57  ;;  %v7680_v11 = vld [vmem:[#allocation4 + $0x118] sm:$0xff] }
 0x536   :  { %9840 = vst [vmem:[#allocation134_spill] sm:$0xff] %v7665_v14  ;;  %2862 = vmatpush.msra.mxu3 %v7680_v11  ;;  %v7683_v14 = vld [vmem:[#allocation4 + $0xe0] sm:$0xff] }
 0x537   :  { %9841 = vst [vmem:[#allocation135_spill] sm:$0xff] %v7668_v23  ;;  %2803 = vmatpush.msra.mxu0 %v7683_v14  ;;  %v7686_v23 = vld [vmem:[#allocation4 + $0xe8] sm:$0xff] }
 0x538   :  { %9842 = vst [vmem:[#allocation136_spill] sm:$0xff] %v7671_v13  ;;  %2823 = vmatpush.msra.mxu1 %v7686_v23  ;;  %v7689_v13 = vld [vmem:[#allocation4 + $0xf0] sm:$0xff] }
 0x539   :  { %9843 = vst [vmem:[#allocation137_spill] sm:$0xff] %v7674_v15  ;;  %2843 = vmatpush.msra.mxu2 %v7689_v13  ;;  %v7692_v15 = vld [vmem:[#allocation4 + $0xf8] sm:$0xff] }
 0x53a   :  { %9844 = vst [vmem:[#allocation138_spill] sm:$0xff] %v7677_v57  ;;  %2863 = vmatpush.msra.mxu3 %v7692_v15  ;;  %v7695_v57 = vld [vmem:[#allocation4 + $0xc0] sm:$0xff] }
 0x53b   :  { %9845 = vst [vmem:[#allocation139_spill] sm:$0xff] %v7680_v11  ;;  %2804 = vmatpush.msra.mxu0 %v7695_v57  ;;  %v7698_v11 = vld [vmem:[#allocation4 + $0xc8] sm:$0xff]  ;;  %v2393_v58 = vpop.f32.mrf.mxu2 }
 0x53c   :  { %9846 = vst [vmem:[#allocation140_spill] sm:$0xff] %v7683_v14  ;;  %2824 = vmatpush.msra.mxu1 %v7698_v11  ;;  %v7701_v14 = vld [vmem:[#allocation4 + $0xd0] sm:$0xff] }
 0x53d   :  { %9847 = vst [vmem:[#allocation141_spill] sm:$0xff] %v7686_v23  ;;  %2844 = vmatpush.msra.mxu2 %v7701_v14  ;;  %v7704_v23 = vld [vmem:[#allocation4 + $0xd8] sm:$0xff] }
 0x53e   :  { %9848 = vst [vmem:[#allocation142_spill] sm:$0xff] %v7689_v13  ;;  %2864 = vmatpush.msra.mxu3 %v7704_v23  ;;  %v7707_v13 = vld [vmem:[#allocation4 + $0xa0] sm:$0xff] }
 0x53f   :  { %9849 = vst [vmem:[#allocation143_spill] sm:$0xff] %v7692_v15  ;;  %2805 = vmatpush.msra.mxu0 %v7707_v13  ;;  %v7710_v15 = vld [vmem:[#allocation4 + $0xa8] sm:$0xff]  ;;  %v2453_v59 = vpop.f32.mrf.mxu1 }
 0x540   :  { %9850 = vst [vmem:[#allocation144_spill] sm:$0xff] %v7695_v57  ;;  %2825 = vmatpush.msra.mxu1 %v7710_v15  ;;  %v7713_v57 = vld [vmem:[#allocation4 + $0xb0] sm:$0xff]  ;;  %v2454_v22 = vadd.f32 %v2453_v59, %v2373_v20 }
 0x541   :  { %9851 = vst [vmem:[#allocation145_spill] sm:$0xff] %v7698_v11  ;;  %2845 = vmatpush.msra.mxu2 %v7713_v57  ;;  %v7716_v11 = vld [vmem:[#allocation4 + $0xb8] sm:$0xff] }
 0x542   :  { %9852 = vst [vmem:[#allocation146_spill] sm:$0xff] %v7701_v14  ;;  %2865 = vmatpush.msra.mxu3 %v7716_v11  ;;  %v7719_v14 = vld [vmem:[#allocation4 + $0x80] sm:$0xff]  ;;  %v2497_v1 = vadd.f32 %v2454_v22, %v9712_v32 }
 0x543   :  { %9853 = vst [vmem:[#allocation147_spill] sm:$0xff] %v7704_v23  ;;  %2806 = vmatpush.msra.mxu0 %v7719_v14  ;;  %v7722_v23 = vld [vmem:[#allocation4 + $0x88] sm:$0xff] }
 0x544   :  { %9854 = vst [vmem:[#allocation148_spill] sm:$0xff] %v7707_v13  ;;  %2826 = vmatpush.msra.mxu1 %v7722_v23  ;;  %v7725_v13 = vld [vmem:[#allocation4 + $0x90] sm:$0xff]  ;;  %v3438_v46 = vmul.f32 -1.442695, %v2497_v1 }
 0x545   :  { %9855 = vst [vmem:[#allocation149_spill] sm:$0xff] %v7710_v15  ;;  %2846 = vmatpush.msra.mxu2 %v7725_v13  ;;  %v7728_v15 = vld [vmem:[#allocation4 + $0x98] sm:$0xff] }
 0x546   :  { %9856 = vst [vmem:[#allocation150_spill] sm:$0xff] %v7713_v57  ;;  %2866 = vmatpush.msra.mxu3 %v7728_v15  ;;  %v7731_v57 = vld [vmem:[#allocation4 + $0x60] sm:$0xff] }
 0x547   :  { %9857 = vst [vmem:[#allocation151_spill] sm:$0xff] %v7716_v11  ;;  %2807 = vmatpush.msra.mxu0 %v7731_v57  ;;  %v7734_v11 = vld [vmem:[#allocation4 + $0x68] sm:$0xff] }
 0x548   :  { %9858 = vst [vmem:[#allocation152_spill] sm:$0xff] %v7719_v14  ;;  %2827 = vmatpush.msra.mxu1 %v7734_v11  ;;  %v7737_v14 = vld [vmem:[#allocation4 + $0x70] sm:$0xff] }
 0x549   :  { %9859 = vst [vmem:[#allocation153_spill] sm:$0xff] %v7722_v23  ;;  %2847 = vmatpush.msra.mxu2 %v7737_v14  ;;  %v7740_v23 = vld [vmem:[#allocation4 + $0x78] sm:$0xff] }
 0x54a   :  { %9860 = vst [vmem:[#allocation154_spill] sm:$0xff] %v7725_v13  ;;  %2867 = vmatpush.msra.mxu3 %v7740_v23  ;;  %v7743_v13 = vld [vmem:[#allocation4 + $0x40] sm:$0xff] }
 0x54b   :  { %9861 = vst [vmem:[#allocation155_spill] sm:$0xff] %v7728_v15  ;;  %2808 = vmatpush.msra.mxu0 %v7743_v13  ;;  %v7746_v15 = vld [vmem:[#allocation4 + $0x48] sm:$0xff] }
 0x54c   :  { %9862 = vst [vmem:[#allocation156_spill] sm:$0xff] %v7731_v57  ;;  %2828 = vmatpush.msra.mxu1 %v7746_v15  ;;  %v7749_v57 = vld [vmem:[#allocation4 + $0x50] sm:$0xff] }
 0x54d   :  { %9863 = vst [vmem:[#allocation157_spill] sm:$0xff] %v7734_v11  ;;  %2848 = vmatpush.msra.mxu2 %v7749_v57  ;;  %v7752_v11 = vld [vmem:[#allocation4 + $0x58] sm:$0xff] }
 0x54e   :  { %9864 = vst [vmem:[#allocation158_spill] sm:$0xff] %v7737_v14  ;;  %2868 = vmatpush.msra.mxu3 %v7752_v11  ;;  %v7755_v14 = vld [vmem:[#allocation4 + $0x20] sm:$0xff] }
 0x54f   :  { %9865 = vst [vmem:[#allocation159_spill] sm:$0xff] %v7740_v23  ;;  %2809 = vmatpush.msra.mxu0 %v7755_v14  ;;  %v7758_v23 = vld [vmem:[#allocation4 + $0x28] sm:$0xff] }
 0x550   :  { %9866 = vst [vmem:[#allocation160_spill] sm:$0xff] %v7743_v13  ;;  %2829 = vmatpush.msra.mxu1 %v7758_v23  ;;  %v7761_v13 = vld [vmem:[#allocation4 + $0x30] sm:$0xff] }
 0x551   :  { %9867 = vst [vmem:[#allocation161_spill] sm:$0xff] %v7746_v15  ;;  %2849 = vmatpush.msra.mxu2 %v7761_v13  ;;  %v7764_v15 = vld [vmem:[#allocation4 + $0x38] sm:$0xff] }
 0x552   :  { %9868 = vst [vmem:[#allocation162_spill] sm:$0xff] %v7749_v57  ;;  %2869 = vmatpush.msra.mxu3 %v7764_v15  ;;  %v7767_v57 = vld [vmem:[#allocation4] sm:$0xff] }
 0x553   :  { %9869 = vst [vmem:[#allocation163_spill] sm:$0xff] %v7752_v11  ;;  %2810 = vmatpush.msra.mxu0 %v7767_v57  ;;  %v7770_v11 = vld [vmem:[#allocation4 + $0x8] sm:$0xff] }
 0x554   :  { %9870 = vst [vmem:[#allocation164_spill] sm:$0xff] %v7755_v14  ;;  %2830 = vmatpush.msra.mxu1 %v7770_v11  ;;  %v7773_v14 = vld [vmem:[#allocation4 + $0x10] sm:$0xff] }
 0x555   :  { %9871 = vst [vmem:[#allocation165_spill] sm:$0xff] %v7758_v23  ;;  %2850 = vmatpush.msra.mxu2 %v7773_v14  ;;  %v7776_v23 = vld [vmem:[#allocation4 + $0x18] sm:$0xff] }
 0x556   :  { %9872 = vst [vmem:[#allocation166_spill] sm:$0xff] %v7761_v13  ;;  %2870 = vmatpush.msra.mxu3 %v7776_v23  ;;  %v2353_v13 = vpop.f32.mrf.mxu0 }
 0x557   :  { %9873 = vst [vmem:[#allocation167_spill] sm:$0xff] %v7764_v15 }
 0x558   :  { %9874 = vst [vmem:[#allocation168_spill] sm:$0xff] %v7767_v57 }
 0x559   :  { %9875 = vst [vmem:[#allocation169_spill] sm:$0xff] %v7770_v11  ;;  %v2413_v11 = vpop.f32.mrf.mxu3 }
 0x55a   :  { %9876 = vst [vmem:[#allocation170_spill] sm:$0xff] %v7773_v14  ;;  %v2473_v14 = vpop.f32.mrf.mxu2 }
 0x55b   :  { %9877 = vst [vmem:[#allocation171_spill] sm:$0xff] %v7776_v23  ;;  %v2474_v16 = vadd.f32 %v2473_v14, %v2393_v58 }
 0x55d   :  { %v2498_v23 = vadd.f32 %v2474_v16, %v9713_v61 }
 0x55e   :  { %v2433_v15 = vpop.f32.mrf.mxu0 }
 0x55f   :  { %v2434_v5 = vadd.f32 %v2433_v15, %v2353_v13  ;;  %v3439_v6 = vmul.f32 -1.442695, %v2498_v23  ;;  %v2600_v23 = vpop.f32.mrf.mxu1 }
 0x561   :  { %v2496_v57 = vadd.f32 %v2434_v5, %v9711_v49  ;;  %v2493_v15 = vpop.f32.mrf.mxu3 }
 0x562   :  { %v2494_v5 = vadd.f32 %v2493_v15, %v2413_v11 }
 0x563   :  { %v3437_v21 = vmul.f32 -1.442695, %v2496_v57 }
 0x565   :  { %3644 = vpow2.f32 %v3437_v21  ;;  %v2499_v21 = vadd.f32 %v2494_v5, %v9714_v60 }
 0x566   :  { %3646 = vpow2.f32 %v3438_v46  ;;  %v2580_v14 = vpop.f32.mrf.mxu0 }
 0x567   :  { %3648 = vpow2.f32 %v3439_v6 }
 0x56b   :  { %v3645_v55 = vpop.eup %3644 }
 0x56c   :  { %v3647_v24 = vpop.eup %3646  ;;  %v2509_v19 = vadd.f32 1.0, %v3645_v55  ;;  %v3440_v55 = vld [vmem:[%s8168_s0 + $0xc0] sm:$0xff] }
 0x56d   :  { %v2510_v59 = vadd.f32 1.0, %v3647_v24  ;;  %v3649_v22 = vpop.eup %3648  ;;  %v3441_v24 = vld [vmem:[%s8168_s0 + $0xc8] sm:$0xff]  ;;  %v2648_v15 = vadd.f32 %v3440_v55, %v2580_v14  ;;  %v3442_v55 = vld [vmem:[%s8168_s0 + $0xd0] sm:$0xff] }
 0x56e   :  { %3650 = vrcp.f32 %v2509_v19  ;;  %v7782_v20 = vadd.f32 1.0, %v3649_v22  ;;  %v2521_v57 = vand.u32 2147483647, %v2509_v19  ;;  %v2523_v11 = vand.u32 2147483648, %v2509_v19 }
 0x56f   :  { %3652 = vrcp.f32 %v2510_v59  ;;  %v2649_v5 = vadd.f32 %v3441_v24, %v2600_v23  ;;  %v2538_v22 = vand.u32 2147483648, %v2510_v59  ;;  %v2536_v61 = vand.u32 2147483647, %v2510_v59 }
 0x570   :  { %3654 = vrcp.f32 %v7782_v20  ;;  %v3444_v49 = vmul.f32 -1.442695, %v2648_v15  ;;  %vm2532_vm6 = vweird.f32 %v2510_v59  ;;  %vm2517_vm7 = vweird.f32 %v2509_v19 }
 0x571   :  { %3656 = vtanh.f32 %v2499_v21  ;;  %v3445_v12 = vmul.f32 -1.442695, %v2649_v5  ;;  %vm2522_vm10 = vcmp.eq.f32.partialorder %v2521_v57, 8.507059e+37  ;;  %vm2537_vm11 = vcmp.eq.f32.partialorder %v2536_v61, 8.507059e+37 }
 0x572   :  { %3658 = vpow2.f32 %v3444_v49  ;;  %vm2547_vm13 = vweird.f32 %v7782_v20 }
 0x573   :  { %3660 = vpow2.f32 %v3445_v12  ;;  %v2553_v12 = vand.u32 2147483648, %v7782_v20 }
 0x574   :  { %v3651_v1 = vpop.eup %3650 }
 0x575   :  { %v3653_v46 = vpop.eup %3652  ;;  %v2513_v58 = vmul.f32 %v3651_v1, %v2509_v19  ;;  %vm2518_vm4 = vweird.f32 %v3651_v1  ;;  %v2620_v19 = vpop.f32.mrf.mxu2  ;;  %v2554_v57 = vor.u32 1.1754944e-38, %v2553_v12  ;;  %v9893_v12 = vld [vmem:[#allocation39_spill] sm:$0xff] }
 0x576   :  { %v2528_v6 = vmul.f32 %v3653_v46, %v2510_v59  ;;  %vm2533_vm5 = vweird.f32 %v3653_v46  ;;  %v3655_v3 = vpop.eup %3654  ;;  %vm2519_vm8 = vmor %vm2517_vm7, %vm2518_vm4 }
 0x577   :  { %v2514_v16 = vsub.f32 1.0, %v2513_v58  ;;  %v2543_v21 = vmul.f32 %v3655_v3, %v7782_v20  ;;  %v2524_v58 = vor.u32 1.1754944e-38, %v2523_v11  ;;  %v3657_v24 = vpop.eup %3656  ;;  %vm2534_vm9 = vmor %vm2532_vm6, %vm2533_vm5  ;;  %v2650_v11 = vadd.f32 %v3442_v55, %v2620_v19 }
 0x578   :  { %v2529_v13 = vsub.f32 1.0, %v2528_v6  ;;  %v3659_v7 = vpop.eup %3658  ;;  %vm2548_vm12 = vweird.f32 %v3655_v3 }
 0x579   :  { %v2515_v60 = vmul.f32 %v3651_v1, %v2514_v16  ;;  %v2539_v16 = vor.u32 1.1754944e-38, %v2538_v22  ;;  %v2544_v23 = vsub.f32 1.0, %v2543_v21  ;;  %v3446_v5 = vmul.f32 -1.442695, %v2650_v11  ;;  %v3661_v4 = vpop.eup %3660  ;;  %vm2549_vm14 = vmor %vm2547_vm13, %vm2548_vm12 }
 0x57a   :  { %v2530_v32 = vmul.f32 %v3653_v46, %v2529_v13  ;;  %v7799_v22 = vadd.f32 1.0, %v3659_v7  ;;  %v7802_v61 = vadd.f32 1.0, %v3661_v4 }
 0x57b   :  { %v2516_v38 = vadd.f32 %v3651_v1, %v2515_v60  ;;  %3662 = vpow2.f32 %v3446_v5 }
 0x57c   :  { %v2531_v6 = vadd.f32 %v3653_v46, %v2530_v32  ;;  %v2545_v32 = vmul.f32 %v3655_v3, %v2544_v23  ;;  %v2690_v19 = vand.u32 2147483648, %v7802_v61  ;;  %vm2669_vm2 = vweird.f32 %v7799_v22 }
 0x57d   :  { %v2520_v14 = vsel %vm2519_vm8, %v3651_v1, %v2516_v38  ;;  %v2640_v1 = vpop.f32.mrf.mxu3  ;;  %vm2684_vm3 = vweird.f32 %v7802_v61 }
 0x57e   :  { %v2525_v59 = vsel %vm2522_vm10, %v2524_v58, %v2520_v14  ;;  %v2535_v60 = vsel %vm2534_vm9, %v3653_v46, %v2531_v6  ;;  %v2546_v38 = vadd.f32 %v3655_v3, %v2545_v32  ;;  %v3443_v46 = vld [vmem:[%s8168_s0 + $0xd8] sm:$0xff] }
 0x57f   :  { %v2540_v13 = vsel %vm2537_vm11, %v2539_v16, %v2535_v60  ;;  %v2559_v15 = vmul.f32 %v3657_v24, %v2525_v59  ;;  %v2651_v24 = vadd.f32 %v3443_v46, %v2640_v1  ;;  %v2675_v60 = vand.u32 2147483648, %v7799_v22  ;;  %v9896_v1 = vld [vmem:[#allocation27_spill] sm:$0xff] }
 0x580   :  { %v2558_v49 = vmul.f32 %v2540_v13, %v7148_v36  ;;  %v2551_v36 = vand.u32 2147483647, %v7782_v20  ;;  %v2550_v7 = vsel %vm2549_vm14, %v3655_v3, %v2546_v38  ;;  %v9897_v46 = vld [vmem:[#allocation43_spill] sm:$0xff] }
 0x581   :  { %v3663_v4 = vpop.eup %3662 }
 0x582   :  { %v7797_v34 = vadd.f32 %v2559_v15, %v2558_v49  ;;  %vm2552_vm15 = vcmp.eq.f32.partialorder %v2551_v36, 8.507059e+37  ;;  %v7812_v58 = vadd.f32 1.0, %v3663_v4  ;;  %v2673_v15 = vand.u32 2147483647, %v7799_v22  ;;  %v9894_v36 = vld [vmem:[#allocation25_spill] sm:$0xff]  ;;  %v9899_v4 = vld [vmem:[#allocation30_spill] sm:$0xff] }
 0x583   :  { %v2555_v6 = vsel %vm2552_vm15, %v2554_v57, %v2550_v7  ;;  %v2688_v49 = vand.u32 2147483647, %v7802_v61  ;;  %v9895_v7 = vld [vmem:[#allocation26_spill] sm:$0xff]  ;;  %v9898_v57 = vld [vmem:[#allocation29_spill] sm:$0xff] }
 0x584   :  { %3664 = vtanh.f32 %v7797_v34  ;;  %vm2674_vm6 = vcmp.eq.f32.partialorder %v2673_v15, 8.507059e+37  ;;  %vm2699_vm9 = vweird.f32 %v7812_v58  ;;  %v9914_v15 = vld [vmem:[#allocation45_spill] sm:$0xff] }
 0x585   :  { %3666 = vrcp.f32 %v7799_v22  ;;  %vm2689_vm7 = vcmp.eq.f32.partialorder %v2688_v49, 8.507059e+37  ;;  %v9916_v49 = vld [vmem:[#allocation48_spill] sm:$0xff] }
 0x586   :  { %3668 = vrcp.f32 %v7802_v61 }
 0x587   :  { %3670 = vrcp.f32 %v7812_v58 }
 0x588   :  { %3672 = vtanh.f32 %v2651_v24  ;;  %v9904_v24 = vld [vmem:[#allocation36_spill] sm:$0xff] }
 0x58a   :  { %v3665_v21 = vpop.eup %3664 }
 0x58b   :  { %v3667_v55 = vpop.eup %3666  ;;  %v2562_v16 = vmul.f32 %v3665_v21, %v2555_v6  ;;  %v9900_v21 = vld [vmem:[#allocation31_spill] sm:$0xff]  ;;  %v9902_v6 = vld [vmem:[#allocation33_spill] sm:$0xff] }
 0x58c   :  { %v3669_v20 = vpop.eup %3668  ;;  %v2665_v14 = vmul.f32 %v3667_v55, %v7799_v22  ;;  %vm2670_vm0 = vweird.f32 %v3667_v55 }
 0x58d   :  { %v2680_v3 = vmul.f32 %v3669_v20, %v7802_v61  ;;  %2731 = vmatmul.f32.vlgmr.msrb.gmra.mxu0 %v2562_v16  ;;  %2751 = vmatmul.f32.vlgmr.msrb.gmra.mxu1 %v2562_v16  ;;  %vm2685_vm1 = vweird.f32 %v3669_v20  ;;  %vm2671_vm4 = vmor %vm2669_vm2, %vm2670_vm0  ;;  %v9892_v61 = vld [vmem:[#allocation24_spill] sm:$0xff] }
 0x58e   :  { %v2666_v23 = vsub.f32 1.0, %v2665_v14  ;;  %2771 = vmatmul.f32.vlgmr.msrb.gmra.mxu2 %v2562_v16  ;;  %2791 = vmatmul.f32.vlgmr.msrb.gmra.mxu3 %v2562_v16  ;;  %vm2686_vm5 = vmor %vm2684_vm3, %vm2685_vm1  ;;  %v9905_v16 = vld [vmem:[#allocation51_spill] sm:$0xff]  ;;  %v9907_v14 = vld [vmem:[#allocation38_spill] sm:$0xff] }
 0x58f   :  { %v2681_v59 = vsub.f32 1.0, %v2680_v3  ;;  %2942 = vmatpush.msrb.mxu0 %v7182_v54  ;;  %2962 = vmatpush.msrb.mxu1 %v7185_v62  ;;  %v7827_v54 = vpop.eup %3670  ;;  %v9908_v3 = vld [vmem:[#allocation40_spill] sm:$0xff] }
 0x590   :  { %v2667_v13 = vmul.f32 %v3667_v55, %v2666_v23  ;;  %2982 = vmatpush.msrb.mxu2 %v7190_v2  ;;  %3002 = vmatpush.msrb.mxu3 %v7193_v17  ;;  %v2695_v2 = vmul.f32 %v7827_v54, %v7812_v58  ;;  %v2676_v17 = vor.u32 1.1754944e-38, %v2675_v60  ;;  %vm2700_vm8 = vweird.f32 %v7827_v54  ;;  %v9909_v23 = vld [vmem:[#allocation55_spill] sm:$0xff]  ;;  %v9911_v60 = vld [vmem:[#allocation42_spill] sm:$0xff] }
 0x591   :  { %v2682_v11 = vmul.f32 %v3669_v20, %v2681_v59  ;;  %2943 = vmatpush.msrb.mxu0 %v7202_v33  ;;  %2963 = vmatpush.msrb.mxu1 %v7205_v31  ;;  %v2691_v31 = vor.u32 1.1754944e-38, %v2690_v19  ;;  %vm2701_vm10 = vmor %vm2699_vm9, %vm2700_vm8  ;;  %v9910_v59 = vld [vmem:[#allocation41_spill] sm:$0xff]  ;;  %v9912_v19 = vld [vmem:[#allocation44_spill] sm:$0xff] }
 0x592   :  { %v2668_v62 = vadd.f32 %v3667_v55, %v2667_v13  ;;  %2983 = vmatpush.msrb.mxu2 %v7211_v29  ;;  %3003 = vmatpush.msrb.mxu3 %v7214_v50  ;;  %v3673_v29 = vpop.eup %3672  ;;  %v2696_v50 = vsub.f32 1.0, %v2695_v2  ;;  %v9913_v13 = vld [vmem:[#allocation59_spill] sm:$0xff]  ;;  %v9919_v2 = vld [vmem:[#allocation50_spill] sm:$0xff] }
 0x593   :  { %v2683_v33 = vadd.f32 %v3669_v20, %v2682_v11  ;;  %2944 = vmatpush.msrb.mxu0 %v7217_v56  ;;  %2964 = vmatpush.msrb.mxu1 %v7220_v48  ;;  %v9915_v11 = vld [vmem:[#allocation46_spill] sm:$0xff] }
 0x594   :  { %v2672_v32 = vsel %vm2671_vm4, %v3667_v55, %v2668_v62  ;;  %2984 = vmatpush.msrb.mxu2 %v7223_v25  ;;  %3004 = vmatpush.msrb.mxu3 %v7226_v27  ;;  %v2697_v38 = vmul.f32 %v7827_v54, %v2696_v50  ;;  %v9903_v55 = vld [vmem:[#allocation34_spill] sm:$0xff]  ;;  %v9918_v62 = vld [vmem:[#allocation49_spill] sm:$0xff]  ;;  %v9925_v50 = vld [vmem:[#allocation71_spill] sm:$0xff] }
 0x595   :  { %v2677_v5 = vsel %vm2674_vm6, %v2676_v17, %v2672_v32  ;;  %v2687_v22 = vsel %vm2686_vm5, %v3669_v20, %v2683_v33  ;;  %2945 = vmatpush.msrb.mxu0 %v7229_v30  ;;  %2965 = vmatpush.msrb.mxu1 %v7232_v9  ;;  %v2703_v9 = vand.u32 2147483647, %v7812_v58  ;;  %v9906_v20 = vld [vmem:[#allocation37_spill] sm:$0xff]  ;;  %v9920_v17 = vld [vmem:[#allocation52_spill] sm:$0xff]  ;;  %v9921_v33 = vld [vmem:[#allocation67_spill] sm:$0xff] }
 0x596   :  { %v2692_v56 = vsel %vm2689_vm7, %v2691_v31, %v2687_v22  ;;  %v2711_v48 = vmul.f32 %v3673_v29, %v2677_v5  ;;  %2985 = vmatpush.msrb.mxu2 %v7237_v52  ;;  %3005 = vmatpush.msrb.mxu3 %v7240_v26  ;;  %v2698_v30 = vadd.f32 %v7827_v54, %v2697_v38  ;;  %v9922_v31 = vld [vmem:[#allocation53_spill] sm:$0xff]  ;;  %v9923_v32 = vld [vmem:[#allocation54_spill] sm:$0xff]  ;;  %v9924_v29 = vld [vmem:[#allocation56_spill] sm:$0xff] }
 0x597   :  { %v2710_v25 = vmul.f32 %v2692_v56, %v7176_v28  ;;  %2946 = vmatpush.msrb.mxu0 %v7243_v10  ;;  %2966 = vmatpush.msrb.mxu1 %v7246_v37  ;;  %v2705_v28 = vand.u32 2147483648, %v7812_v58  ;;  %v9878_v10 = vld [vmem:[#allocation12_spill] sm:$0xff]  ;;  %vm2704_vm11 = vcmp.eq.f32.partialorder %v2703_v9, 8.507059e+37  ;;  %v9879_v37 = vld [vmem:[#allocation13_spill] sm:$0xff]  ;;  %v9901_v58 = vld [vmem:[#allocation47_spill] sm:$0xff] }
 0x598   :  { %2986 = vmatpush.msrb.mxu2 %v7253_v18  ;;  %3006 = vmatpush.msrb.mxu3 %v7256_v39  ;;  %v2702_v52 = vsel %vm2701_vm10, %v7827_v54, %v2698_v30  ;;  %v9880_v18 = vld [vmem:[#allocation14_spill] sm:$0xff]  ;;  %v9917_v54 = vld [vmem:[#allocation63_spill] sm:$0xff]  ;;  %v9926_v5 = vld [vmem:[#allocation57_spill] sm:$0xff] }
 0x599   :  { %v7851_v27 = vadd.f32 %v2711_v48, %v2710_v25  ;;  %2947 = vmatpush.msrb.mxu0 %v7259_v63  ;;  %2967 = vmatpush.msrb.mxu1 %v7262_v40  ;;  %v2706_v26 = vor.u32 1.1754944e-38, %v2705_v28  ;;  %v9881_v40 = vld [vmem:[#allocation28_spill] sm:$0xff]  ;;  %v9927_v22 = vld [vmem:[#allocation58_spill] sm:$0xff]  ;;  %v9929_v48 = vld [vmem:[#allocation75_spill] sm:$0xff] }
 0x59a   :  { %2987 = vmatpush.msrb.mxu2 %v7265_v35  ;;  %3007 = vmatpush.msrb.mxu3 %v7268_v41  ;;  %v9882_v35 = vld [vmem:[#allocation15_spill] sm:$0xff]  ;;  %v9928_v56 = vld [vmem:[#allocation60_spill] sm:$0xff]  ;;  %v9930_v38 = vld [vmem:[#allocation61_spill] sm:$0xff] }
 0x59b   :  { %3674 = vtanh.f32 %v7851_v27  ;;  %2948 = vmatpush.msrb.mxu0 %v7271_v42  ;;  %2968 = vmatpush.msrb.mxu1 %v7274_v8  ;;  %v2707_v63 = vsel %vm2704_vm11, %v2706_v26, %v2702_v52  ;;  %v9883_v42 = vld [vmem:[#allocation16_spill] sm:$0xff]  ;;  %v9884_v8 = vld [vmem:[#allocation17_spill] sm:$0xff]  ;;  %v9931_v25 = vld [vmem:[#allocation62_spill] sm:$0xff] }
 0x59c   :  { %2988 = vmatpush.msrb.mxu2 %v7277_v43  ;;  %3008 = vmatpush.msrb.mxu3 %v7280_v44  ;;  %v9885_v43 = vld [vmem:[#allocation32_spill] sm:$0xff]  ;;  %v9886_v44 = vld [vmem:[#allocation18_spill] sm:$0xff]  ;;  %v9933_v28 = vld [vmem:[#allocation79_spill] sm:$0xff] }
 0x59d   :  { %2949 = vmatpush.msrb.mxu0 %v7283_v45  ;;  %2969 = vmatpush.msrb.mxu1 %v7286_v47  ;;  %v9887_v45 = vld [vmem:[#allocation19_spill] sm:$0xff]  ;;  %v9888_v47 = vld [vmem:[#allocation20_spill] sm:$0xff]  ;;  %v9934_v9 = vld [vmem:[#allocation65_spill] sm:$0xff] }
 0x59e   :  { %2989 = vmatpush.msrb.mxu2 %v7289_v51  ;;  %3009 = vmatpush.msrb.mxu3 %v7292_v53  ;;  %v9889_v51 = vld [vmem:[#allocation35_spill] sm:$0xff]  ;;  %v9890_v53 = vld [vmem:[#allocation22_spill] sm:$0xff]  ;;  %v9932_v30 = vld [vmem:[#allocation64_spill] sm:$0xff] }
 0x59f   :  { %2950 = vmatpush.msrb.mxu0 %v7295_v0  ;;  %2970 = vmatpush.msrb.mxu1 %v9878_v10  ;;  %v9891_v0 = vld [vmem:[#allocation23_spill] sm:$0xff]  ;;  %v9935_v52 = vld [vmem:[#allocation66_spill] sm:$0xff]  ;;  %v9936_v26 = vld [vmem:[#allocation68_spill] sm:$0xff] }
 0x5a0   :  { %2990 = vmatpush.msrb.mxu2 %v9879_v37  ;;  %3010 = vmatpush.msrb.mxu3 %v9880_v18  ;;  %v9937_v10 = vld [vmem:[#allocation83_spill] sm:$0xff]  ;;  %v9938_v37 = vld [vmem:[#allocation69_spill] sm:$0xff]  ;;  %v9939_v18 = vld [vmem:[#allocation70_spill] sm:$0xff] }
 0x5a1   :  { %v3675_v39 = vpop.eup %3674  ;;  %2951 = vmatpush.msrb.mxu0 %v9881_v40  ;;  %2971 = vmatpush.msrb.mxu1 %v9882_v35  ;;  %v9942_v40 = vld [vmem:[#allocation73_spill] sm:$0xff]  ;;  %v9943_v35 = vld [vmem:[#allocation74_spill] sm:$0xff] }
 0x5a2   :  { %v2714_v41 = vmul.f32 %v3675_v39, %v2707_v63  ;;  %2991 = vmatpush.msrb.mxu2 %v9883_v42  ;;  %3011 = vmatpush.msrb.mxu3 %v9884_v8  ;;  %v9940_v39 = vld [vmem:[#allocation72_spill] sm:$0xff]  ;;  %v9941_v63 = vld [vmem:[#allocation87_spill] sm:$0xff]  ;;  %v9945_v42 = vld [vmem:[#allocation77_spill] sm:$0xff] }
 0x5a3   :  { %2952 = vmatpush.msrb.mxu0 %v9885_v43  ;;  %2972 = vmatpush.msrb.mxu1 %v9886_v44  ;;  %v9946_v8 = vld [vmem:[#allocation78_spill] sm:$0xff]  ;;  %v9947_v43 = vld [vmem:[#allocation80_spill] sm:$0xff]  ;;  %v9948_v44 = vld [vmem:[#allocation81_spill] sm:$0xff] }
 0x5a4   :  { %2992 = vmatpush.msrb.mxu2 %v9887_v45  ;;  %3012 = vmatpush.msrb.mxu3 %v9888_v47  ;;  %v9949_v45 = vld [vmem:[#allocation82_spill] sm:$0xff]  ;;  %v9950_v47 = vld [vmem:[#allocation84_spill] sm:$0xff] }
 0x5a5   :  { %2811 = vmatmul.f32.vlgmr.msra.gmra.mxu0 %v2714_v41  ;;  %2831 = vmatmul.f32.vlgmr.msra.gmra.mxu1 %v2714_v41 }
 0x5a6   :  { %2851 = vmatmul.f32.vlgmr.msra.gmra.mxu2 %v2714_v41  ;;  %2871 = vmatmul.f32.vlgmr.msra.gmra.mxu3 %v2714_v41 }
 0x5a7   :  { %2953 = vmatpush.msrb.mxu0 %v9889_v51  ;;  %2973 = vmatpush.msrb.mxu1 %v9890_v53  ;;  %v9951_v51 = vld [vmem:[#allocation85_spill] sm:$0xff]  ;;  %v9952_v53 = vld [vmem:[#allocation86_spill] sm:$0xff] }
 0x5a8   :  { %2993 = vmatpush.msrb.mxu2 %v9891_v0  ;;  %3013 = vmatpush.msrb.mxu3 %v9892_v61  ;;  %v9953_v0 = vld [vmem:[#allocation88_spill] sm:$0xff]  ;;  %v9954_v61 = vld [vmem:[#allocation89_spill] sm:$0xff] }
 0x5a9   :  { %2954 = vmatpush.msrb.mxu0 %v9893_v12  ;;  %2974 = vmatpush.msrb.mxu1 %v9894_v36  ;;  %v9955_v12 = vld [vmem:[#allocation90_spill] sm:$0xff]  ;;  %v9956_v36 = vld [vmem:[#allocation91_spill] sm:$0xff] }
 0x5aa   :  { %2994 = vmatpush.msrb.mxu2 %v9895_v7  ;;  %3014 = vmatpush.msrb.mxu3 %v9896_v1  ;;  %v9957_v7 = vld [vmem:[#allocation98_spill] sm:$0xff]  ;;  %v9958_v1 = vld [vmem:[#allocation92_spill] sm:$0xff] }
 0x5ab   :  { %2955 = vmatpush.msrb.mxu0 %v9897_v46  ;;  %2975 = vmatpush.msrb.mxu1 %v9898_v57  ;;  %v9959_v46 = vld [vmem:[#allocation93_spill] sm:$0xff]  ;;  %v9960_v57 = vld [vmem:[#allocation94_spill] sm:$0xff] }
 0x5ac   :  { %2995 = vmatpush.msrb.mxu2 %v9899_v4  ;;  %3015 = vmatpush.msrb.mxu3 %v9900_v21  ;;  %v9961_v4 = vld [vmem:[#allocation99_spill] sm:$0xff] }
 0x5ad   :  { %2956 = vmatpush.msrb.mxu0 %v9901_v58  ;;  %2976 = vmatpush.msrb.mxu1 %v9902_v6  ;;  %v9962_v21 = vld [vmem:[#allocation95_spill] sm:$0xff]  ;;  %v9963_v58 = vld [vmem:[#allocation96_spill] sm:$0xff]  ;;  %v9964_v6 = vld [vmem:[#allocation97_spill] sm:$0xff] }
 0x5ae   :  { %2996 = vmatpush.msrb.mxu2 %v9903_v55  ;;  %3016 = vmatpush.msrb.mxu3 %v9904_v24  ;;  %v9965_v55 = vld [vmem:[#allocation100_spill] sm:$0xff]  ;;  %v9966_v24 = vld [vmem:[#allocation101_spill] sm:$0xff] }
 0x5af   :  { %2957 = vmatpush.msrb.mxu0 %v9905_v16  ;;  %2977 = vmatpush.msrb.mxu1 %v9906_v20  ;;  %v9967_v16 = vld [vmem:[#allocation102_spill] sm:$0xff]  ;;  %v9968_v20 = vld [vmem:[#allocation103_spill] sm:$0xff] }
 0x5b0   :  { %2997 = vmatpush.msrb.mxu2 %v9907_v14  ;;  %3017 = vmatpush.msrb.mxu3 %v9908_v3  ;;  %v9969_v14 = vld [vmem:[#allocation104_spill] sm:$0xff]  ;;  %v9970_v3 = vld [vmem:[#allocation105_spill] sm:$0xff] }
 0x5b1   :  { %2958 = vmatmul.f32.vlgmr.msrb.gmra.mxu0 %v2714_v41  ;;  %2978 = vmatmul.f32.vlgmr.msrb.gmra.mxu1 %v2714_v41 }
 0x5b2   :  { %2998 = vmatmul.f32.vlgmr.msrb.gmra.mxu2 %v2714_v41  ;;  %3018 = vmatmul.f32.vlgmr.msrb.gmra.mxu3 %v2714_v41  ;;  %v9944_v41 = vld [vmem:[#allocation76_spill] sm:$0xff] }
 0x5b3   :  { %3094 = vmatpush.msra.mxu0 %v9909_v23  ;;  %3114 = vmatpush.msra.mxu1 %v9910_v59  ;;  %v9971_v23 = vld [vmem:[#allocation106_spill] sm:$0xff]  ;;  %v9972_v59 = vld [vmem:[#allocation107_spill] sm:$0xff] }
 0x5b4   :  { %3134 = vmatpush.msra.mxu2 %v9911_v60  ;;  %3154 = vmatpush.msra.mxu3 %v9912_v19  ;;  %v9973_v60 = vld [vmem:[#allocation108_spill] sm:$0xff]  ;;  %v9974_v19 = vld [vmem:[#allocation109_spill] sm:$0xff] }
 0x5b5   :  { %3095 = vmatpush.msra.mxu0 %v9913_v13  ;;  %3115 = vmatpush.msra.mxu1 %v9914_v15  ;;  %v9975_v13 = vld [vmem:[#allocation110_spill] sm:$0xff]  ;;  %v9976_v15 = vld [vmem:[#allocation111_spill] sm:$0xff] }
 0x5b6   :  { %3135 = vmatpush.msra.mxu2 %v9915_v11  ;;  %3155 = vmatpush.msra.mxu3 %v9916_v49  ;;  %v9977_v11 = vld [vmem:[#allocation112_spill] sm:$0xff]  ;;  %v9978_v49 = vld [vmem:[#allocation113_spill] sm:$0xff] }
 0x5b7   :  { %3096 = vmatpush.msra.mxu0 %v9917_v54  ;;  %3116 = vmatpush.msra.mxu1 %v9918_v62  ;;  %v9979_v54 = vld [vmem:[#allocation114_spill] sm:$0xff]  ;;  %v9980_v62 = vld [vmem:[#allocation115_spill] sm:$0xff] }
 0x5b8   :  { %3136 = vmatpush.msra.mxu2 %v9919_v2  ;;  %3156 = vmatpush.msra.mxu3 %v9920_v17  ;;  %v9981_v2 = vld [vmem:[#allocation116_spill] sm:$0xff]  ;;  %v9982_v17 = vld [vmem:[#allocation117_spill] sm:$0xff] }
 0x5b9   :  { %3097 = vmatpush.msra.mxu0 %v9921_v33  ;;  %3117 = vmatpush.msra.mxu1 %v9922_v31  ;;  %v9983_v33 = vld [vmem:[#allocation118_spill] sm:$0xff]  ;;  %v9984_v31 = vld [vmem:[#allocation119_spill] sm:$0xff] }
 0x5ba   :  { %3137 = vmatpush.msra.mxu2 %v9923_v32  ;;  %3157 = vmatpush.msra.mxu3 %v9924_v29  ;;  %v9985_v32 = vld [vmem:[#allocation120_spill] sm:$0xff]  ;;  %v9986_v29 = vld [vmem:[#allocation121_spill] sm:$0xff] }
 0x5bb   :  { %3098 = vmatpush.msra.mxu0 %v9925_v50  ;;  %3118 = vmatpush.msra.mxu1 %v9926_v5  ;;  %v9987_v50 = vld [vmem:[#allocation122_spill] sm:$0xff]  ;;  %v9988_v5 = vld [vmem:[#allocation123_spill] sm:$0xff] }
 0x5bc   :  { %3138 = vmatpush.msra.mxu2 %v9927_v22  ;;  %3158 = vmatpush.msra.mxu3 %v9928_v56  ;;  %v9989_v22 = vld [vmem:[#allocation124_spill] sm:$0xff]  ;;  %v9990_v56 = vld [vmem:[#allocation125_spill] sm:$0xff] }
 0x5bd   :  { %3099 = vmatpush.msra.mxu0 %v9929_v48  ;;  %3119 = vmatpush.msra.mxu1 %v9930_v38  ;;  %v9991_v48 = vld [vmem:[#allocation126_spill] sm:$0xff]  ;;  %v9992_v38 = vld [vmem:[#allocation127_spill] sm:$0xff] }
 0x5be   :  { %3139 = vmatpush.msra.mxu2 %v9931_v25  ;;  %3159 = vmatpush.msra.mxu3 %v9932_v30  ;;  %v9993_v25 = vld [vmem:[#allocation128_spill] sm:$0xff]  ;;  %v9994_v30 = vld [vmem:[#allocation129_spill] sm:$0xff] }
 0x5bf   :  { %3100 = vmatpush.msra.mxu0 %v9933_v28  ;;  %3120 = vmatpush.msra.mxu1 %v9934_v9  ;;  %v9995_v28 = vld [vmem:[#allocation130_spill] sm:$0xff]  ;;  %v9996_v9 = vld [vmem:[#allocation131_spill] sm:$0xff] }
 0x5c0   :  { %3140 = vmatpush.msra.mxu2 %v9935_v52  ;;  %3160 = vmatpush.msra.mxu3 %v9936_v26  ;;  %v9997_v52 = vld [vmem:[#allocation132_spill] sm:$0xff]  ;;  %v9998_v26 = vld [vmem:[#allocation133_spill] sm:$0xff] }
 0x5c1   :  { %3101 = vmatpush.msra.mxu0 %v9937_v10  ;;  %3121 = vmatpush.msra.mxu1 %v9938_v37  ;;  %v9999_v10 = vld [vmem:[#allocation134_spill] sm:$0xff]  ;;  %v10000_v37 = vld [vmem:[#allocation135_spill] sm:$0xff] }
 0x5c2   :  { %3141 = vmatpush.msra.mxu2 %v9939_v18  ;;  %3161 = vmatpush.msra.mxu3 %v9940_v39  ;;  %v10001_v18 = vld [vmem:[#allocation136_spill] sm:$0xff]  ;;  %v10002_v39 = vld [vmem:[#allocation137_spill] sm:$0xff] }
 0x5c3   :  { %3102 = vmatpush.msra.mxu0 %v9941_v63  ;;  %3122 = vmatpush.msra.mxu1 %v9942_v40  ;;  %v10003_v63 = vld [vmem:[#allocation138_spill] sm:$0xff]  ;;  %v10004_v40 = vld [vmem:[#allocation139_spill] sm:$0xff] }
 0x5c4   :  { %3142 = vmatpush.msra.mxu2 %v9943_v35  ;;  %3162 = vmatpush.msra.mxu3 %v9944_v41  ;;  %v10005_v35 = vld [vmem:[#allocation140_spill] sm:$0xff]  ;;  %v10006_v41 = vld [vmem:[#allocation141_spill] sm:$0xff] }
 0x5c5   :  { %3103 = vmatpush.msra.mxu0 %v9945_v42  ;;  %3123 = vmatpush.msra.mxu1 %v9946_v8  ;;  %v10007_v42 = vld [vmem:[#allocation142_spill] sm:$0xff]  ;;  %v10008_v8 = vld [vmem:[#allocation143_spill] sm:$0xff] }
 0x5c6   :  { %3143 = vmatpush.msra.mxu2 %v9947_v43  ;;  %3163 = vmatpush.msra.mxu3 %v9948_v44  ;;  %v10009_v43 = vld [vmem:[#allocation144_spill] sm:$0xff]  ;;  %v10010_v44 = vld [vmem:[#allocation145_spill] sm:$0xff] }
 0x5c7   :  { %3104 = vmatpush.msra.mxu0 %v9949_v45  ;;  %3124 = vmatpush.msra.mxu1 %v9950_v47  ;;  %v10011_v45 = vld [vmem:[#allocation146_spill] sm:$0xff]  ;;  %v10012_v47 = vld [vmem:[#allocation147_spill] sm:$0xff] }
 0x5c8   :  { %3144 = vmatpush.msra.mxu2 %v9951_v51  ;;  %3164 = vmatpush.msra.mxu3 %v9952_v53  ;;  %v10013_v51 = vld [vmem:[#allocation148_spill] sm:$0xff]  ;;  %v10014_v53 = vld [vmem:[#allocation149_spill] sm:$0xff] }
 0x5c9   :  { %3105 = vmatpush.msra.mxu0 %v9953_v0  ;;  %3125 = vmatpush.msra.mxu1 %v9954_v61  ;;  %v10015_v0 = vld [vmem:[#allocation150_spill] sm:$0xff]  ;;  %v10016_v61 = vld [vmem:[#allocation151_spill] sm:$0xff] }
 0x5ca   :  { %3145 = vmatpush.msra.mxu2 %v9955_v12  ;;  %3165 = vmatpush.msra.mxu3 %v9956_v36  ;;  %v10017_v12 = vld [vmem:[#allocation152_spill] sm:$0xff]  ;;  %v10018_v36 = vld [vmem:[#allocation153_spill] sm:$0xff] }
 0x5cb   :  { %3106 = vmatpush.msra.mxu0 %v9957_v7  ;;  %3126 = vmatpush.msra.mxu1 %v9958_v1  ;;  %v10019_v7 = vld [vmem:[#allocation154_spill] sm:$0xff]  ;;  %v10020_v1 = vld [vmem:[#allocation155_spill] sm:$0xff] }
 0x5cc   :  { %3146 = vmatpush.msra.mxu2 %v9959_v46  ;;  %3166 = vmatpush.msra.mxu3 %v9960_v57  ;;  %v10021_v46 = vld [vmem:[#allocation156_spill] sm:$0xff]  ;;  %v10022_v57 = vld [vmem:[#allocation157_spill] sm:$0xff] }
 0x5cd   :  { %3107 = vmatpush.msra.mxu0 %v9961_v4  ;;  %3127 = vmatpush.msra.mxu1 %v9962_v21  ;;  %v10023_v4 = vld [vmem:[#allocation158_spill] sm:$0xff]  ;;  %v10024_v21 = vld [vmem:[#allocation159_spill] sm:$0xff] }
 0x5ce   :  { %3147 = vmatpush.msra.mxu2 %v9963_v58  ;;  %3167 = vmatpush.msra.mxu3 %v9964_v6  ;;  %v10025_v58 = vld [vmem:[#allocation160_spill] sm:$0xff]  ;;  %v10026_v6 = vld [vmem:[#allocation161_spill] sm:$0xff] }
 0x5cf   :  { %3108 = vmatpush.msra.mxu0 %v9965_v55  ;;  %3128 = vmatpush.msra.mxu1 %v9966_v24  ;;  %v10027_v55 = vld [vmem:[#allocation162_spill] sm:$0xff]  ;;  %v10028_v24 = vld [vmem:[#allocation163_spill] sm:$0xff] }
 0x5d0   :  { %3148 = vmatpush.msra.mxu2 %v9967_v16  ;;  %3168 = vmatpush.msra.mxu3 %v9968_v20  ;;  %v10029_v16 = vld [vmem:[#allocation164_spill] sm:$0xff]  ;;  %v10030_v20 = vld [vmem:[#allocation165_spill] sm:$0xff] }
 0x5d1   :  { %3109 = vmatpush.msra.mxu0 %v9969_v14  ;;  %3129 = vmatpush.msra.mxu1 %v9970_v3  ;;  %v10031_v14 = vld [vmem:[#allocation166_spill] sm:$0xff]  ;;  %v10032_v3 = vld [vmem:[#allocation167_spill] sm:$0xff] }
 0x5d2   :  { %3149 = vmatpush.msra.mxu2 %v9971_v23  ;;  %3169 = vmatpush.msra.mxu3 %v9972_v59  ;;  %v10033_v23 = vld [vmem:[#allocation168_spill] sm:$0xff]  ;;  %v10034_v59 = vld [vmem:[#allocation169_spill] sm:$0xff] }
 0x5d3   :  { %3174 = vmatpush.msrb.mxu0 %v9973_v60  ;;  %3194 = vmatpush.msrb.mxu1 %v9974_v19  ;;  %v10035_v60 = vld [vmem:[#allocation170_spill] sm:$0xff]  ;;  %v10036_v19 = vld [vmem:[#allocation171_spill] sm:$0xff] }
 0x5d4   :  { %3214 = vmatpush.msrb.mxu2 %v9975_v13  ;;  %3234 = vmatpush.msrb.mxu3 %v9976_v15 }
 0x5d5   :  { %3175 = vmatpush.msrb.mxu0 %v9977_v11  ;;  %3195 = vmatpush.msrb.mxu1 %v9978_v49 }
 0x5d6   :  { %3215 = vmatpush.msrb.mxu2 %v9979_v54  ;;  %3235 = vmatpush.msrb.mxu3 %v9980_v62 }
 0x5d7   :  { %3176 = vmatpush.msrb.mxu0 %v9981_v2  ;;  %3196 = vmatpush.msrb.mxu1 %v9982_v17  ;;  %v10037_v17 = vld [vmem:[#allocation21_spill] sm:$0xff] }
 0x5d8   :  { %3216 = vmatpush.msrb.mxu2 %v9983_v33  ;;  %3236 = vmatpush.msrb.mxu3 %v9984_v31  ;;  %v10038_v31 = vld [vmem:[#allocation9_spill] sm:$0xff] }
 0x5d9   :  { %3177 = vmatpush.msrb.mxu0 %v9985_v32  ;;  %3197 = vmatpush.msrb.mxu1 %v9986_v29 }
 0x5da   :  { %3217 = vmatpush.msrb.mxu2 %v9987_v50  ;;  %3237 = vmatpush.msrb.mxu3 %v9988_v5 }
 0x5db   :  { %3178 = vmatpush.msrb.mxu0 %v9989_v22  ;;  %3198 = vmatpush.msrb.mxu1 %v9990_v56 }
 0x5dc   :  { %3218 = vmatpush.msrb.mxu2 %v9991_v48  ;;  %3238 = vmatpush.msrb.mxu3 %v9992_v38  ;;  %v10039_v48 = vld [vmem:[#allocation10_spill] sm:$0xff] }
 0x5dd   :  { %3179 = vmatpush.msrb.mxu0 %v9993_v25  ;;  %3199 = vmatpush.msrb.mxu1 %v9994_v30  ;;  %v3450_v25 = vld [vmem:[%s8168_s0 + $0xe0] sm:$0xff]  ;;  %v3451_v30 = vld [vmem:[%s8168_s0 + $0xe8] sm:$0xff] }
 0x5de   :  { %3219 = vmatpush.msrb.mxu2 %v9995_v28  ;;  %3239 = vmatpush.msrb.mxu3 %v9996_v9 }
 0x5df   :  { %3180 = vmatpush.msrb.mxu0 %v9997_v52  ;;  %3200 = vmatpush.msrb.mxu1 %v9998_v26 }
 0x5e0   :  { %3220 = vmatpush.msrb.mxu2 %v9999_v10  ;;  %3240 = vmatpush.msrb.mxu3 %v10000_v37 }
 0x5e1   :  { %3181 = vmatpush.msrb.mxu0 %v10001_v18  ;;  %3201 = vmatpush.msrb.mxu1 %v10002_v39 }
 0x5e2   :  { %3221 = vmatpush.msrb.mxu2 %v10003_v63  ;;  %3241 = vmatpush.msrb.mxu3 %v10004_v40 }
 0x5e3   :  { %3182 = vmatpush.msrb.mxu0 %v10005_v35  ;;  %3202 = vmatpush.msrb.mxu1 %v10006_v41 }
 0x5e4   :  { %3222 = vmatpush.msrb.mxu2 %v10007_v42  ;;  %3242 = vmatpush.msrb.mxu3 %v10008_v8  ;;  %v3452_v8 = vld [vmem:[%s8168_s0 + $0xf0] sm:$0xff] }
 0x5e5   :  { %3183 = vmatpush.msrb.mxu0 %v10009_v43  ;;  %3203 = vmatpush.msrb.mxu1 %v10010_v44 }
 0x5e6   :  { %3223 = vmatpush.msrb.mxu2 %v10011_v45  ;;  %3243 = vmatpush.msrb.mxu3 %v10012_v47 }
 0x5e7   :  { %3184 = vmatpush.msrb.mxu0 %v10013_v51  ;;  %3204 = vmatpush.msrb.mxu1 %v10014_v53  ;;  %v10040_v51 = vld [vmem:[#allocation11_spill] sm:$0xff] }
 0x5e8   :  { %3224 = vmatpush.msrb.mxu2 %v10015_v0  ;;  %3244 = vmatpush.msrb.mxu3 %v10016_v61 }
 0x5e9   :  { %3185 = vmatpush.msrb.mxu0 %v10017_v12  ;;  %3205 = vmatpush.msrb.mxu1 %v10018_v36 }
 0x5ea   :  { %3225 = vmatpush.msrb.mxu2 %v10019_v7  ;;  %3245 = vmatpush.msrb.mxu3 %v10020_v1 }
 0x5eb   :  { %3186 = vmatpush.msrb.mxu0 %v10021_v46  ;;  %3206 = vmatpush.msrb.mxu1 %v10022_v57 }
 0x5ec   :  { %3226 = vmatpush.msrb.mxu2 %v10023_v4  ;;  %3246 = vmatpush.msrb.mxu3 %v10024_v21 }
 0x5ed   :  { %3187 = vmatpush.msrb.mxu0 %v10025_v58  ;;  %3207 = vmatpush.msrb.mxu1 %v10026_v6 }
 0x5ee   :  { %3227 = vmatpush.msrb.mxu2 %v10027_v55  ;;  %3247 = vmatpush.msrb.mxu3 %v10028_v24 }
 0x5ef   :  { %3188 = vmatpush.msrb.mxu0 %v10029_v16  ;;  %3208 = vmatpush.msrb.mxu1 %v10030_v20 }
 0x5f0   :  { %3228 = vmatpush.msrb.mxu2 %v10031_v14  ;;  %3248 = vmatpush.msrb.mxu3 %v10032_v3 }
 0x5f1   :  { %3189 = vmatpush.msrb.mxu0 %v10033_v23  ;;  %3209 = vmatpush.msrb.mxu1 %v10034_v59  ;;  %v3453_v23 = vld [vmem:[%s8168_s0 + $0xf8] sm:$0xff] }
 0x5f2   :  { %3229 = vmatpush.msrb.mxu2 %v10035_v60  ;;  %3249 = vmatpush.msrb.mxu3 %v10036_v19 }
 0x60a   :  { %v2732_v13 = vpop.f32.mrf.mxu0  ;;  %v2752_v15 = vpop.f32.mrf.mxu1 }
 0x611   :  { %v2772_v11 = vpop.f32.mrf.mxu2  ;;  %v2792_v5 = vpop.f32.mrf.mxu3 }
 0x622   :  { %v2812_v49 = vpop.f32.mrf.mxu0  ;;  %v2832_v54 = vpop.f32.mrf.mxu1 }
 0x623   :  { %v2813_v62 = vadd.f32 %v2812_v49, %v2732_v13  ;;  %v2833_v2 = vadd.f32 %v2832_v54, %v2752_v15 }
 0x625   :  { %v2875_v33 = vadd.f32 %v2813_v62, %v10037_v17  ;;  %v2876_v32 = vadd.f32 %v2833_v2, %v10038_v31 }
 0x627   :  { %v3447_v29 = vmul.f32 -1.442695, %v2875_v33  ;;  %v3448_v50 = vmul.f32 -1.442695, %v2876_v32 }
 0x629   :  { %3676 = vpow2.f32 %v3447_v29  ;;  %v2852_v22 = vpop.f32.mrf.mxu2  ;;  %v2872_v63 = vpop.f32.mrf.mxu3 }
 0x62a   :  { %3678 = vpow2.f32 %v3448_v50  ;;  %v2853_v56 = vadd.f32 %v2852_v22, %v2772_v11  ;;  %v2873_v42 = vadd.f32 %v2872_v63, %v2792_v5 }
 0x62c   :  { %v2877_v38 = vadd.f32 %v2853_v56, %v10039_v48  ;;  %v2878_v53 = vadd.f32 %v2873_v42, %v10040_v51 }
 0x62e   :  { %v3449_v28 = vmul.f32 -1.442695, %v2877_v38  ;;  %v2959_v9 = vpop.f32.mrf.mxu0  ;;  %v2979_v52 = vpop.f32.mrf.mxu1 }
 0x62f   :  { %v3677_v26 = vpop.eup %3676  ;;  %v3027_v10 = vadd.f32 %v3450_v25, %v2959_v9  ;;  %v3028_v37 = vadd.f32 %v3451_v30, %v2979_v52 }
 0x630   :  { %v3679_v18 = vpop.eup %3678  ;;  %v2888_v39 = vadd.f32 1.0, %v3677_v26  ;;  %3680 = vpow2.f32 %v3449_v28 }
 0x631   :  { %v2889_v40 = vadd.f32 1.0, %v3679_v18  ;;  %v3454_v35 = vmul.f32 -1.442695, %v3027_v10  ;;  %v3455_v41 = vmul.f32 -1.442695, %v3028_v37 }
 0x632   :  { %3682 = vrcp.f32 %v2888_v39  ;;  %v2900_v58 = vand.u32 2147483647, %v2888_v39  ;;  %v2902_v6 = vand.u32 2147483648, %v2888_v39  ;;  %vm2896_vm15 = vweird.f32 %v2888_v39 }
 0x633   :  { %3684 = vrcp.f32 %v2889_v40  ;;  %v2917_v24 = vand.u32 2147483648, %v2889_v40  ;;  %v2915_v14 = vand.u32 2147483647, %v2889_v40  ;;  %vm2911_vm14 = vweird.f32 %v2889_v40 }
 0x634   :  { %3686 = vpow2.f32 %v3454_v35  ;;  %vm2901_vm1 = vcmp.eq.f32.partialorder %v2900_v58, 8.507059e+37  ;;  %v2903_v15 = vor.u32 1.1754944e-38, %v2902_v6 }
 0x635   :  { %3688 = vpow2.f32 %v3455_v41  ;;  %v2999_v43 = vpop.f32.mrf.mxu2  ;;  %v3019_v3 = vpop.f32.mrf.mxu3  ;;  %v2918_v54 = vor.u32 1.1754944e-38, %v2917_v24  ;;  %vm2916_vm3 = vcmp.eq.f32.partialorder %v2915_v14, 8.507059e+37 }
 0x636   :  { %v3681_v44 = vpop.eup %3680  ;;  %v3029_v45 = vadd.f32 %v3452_v8, %v2999_v43  ;;  %v3030_v33 = vadd.f32 %v3453_v23, %v3019_v3 }
 0x637   :  { %v8044_v47 = vadd.f32 1.0, %v3681_v44 }
 0x638   :  { %v3683_v0 = vpop.eup %3682  ;;  %v3456_v61 = vmul.f32 -1.442695, %v3029_v45  ;;  %v3327_v45 = vld [vmem:[%s8175_s7] sm:$0xff] }
 0x639   :  { %v3685_v12 = vpop.eup %3684  ;;  %v2892_v36 = vmul.f32 %v3683_v0, %v2888_v39  ;;  %3690 = vrcp.f32 %v8044_v47  ;;  %vm2897_vm12 = vweird.f32 %v3683_v0  ;;  %vm2926_vm4 = vweird.f32 %v8044_v47 }
 0x63a   :  { %v3687_v7 = vpop.eup %3686  ;;  %v2907_v1 = vmul.f32 %v3685_v12, %v2889_v40  ;;  %3692 = vpow2.f32 %v3456_v61  ;;  %vm2912_vm13 = vweird.f32 %v3685_v12  ;;  %vm2898_vm0 = vmor %vm2896_vm15, %vm2897_vm12  ;;  %v2932_v37 = vand.u32 2147483648, %v8044_v47 }
 0x63b   :  { %v3689_v46 = vpop.eup %3688  ;;  %v2893_v57 = vsub.f32 1.0, %v2892_v36  ;;  %3694 = vtanh.f32 %v2878_v53  ;;  %v8048_v4 = vadd.f32 1.0, %v3687_v7  ;;  %vm2913_vm2 = vmor %vm2911_vm14, %vm2912_vm13  ;;  %v2930_v8 = vand.u32 2147483647, %v8044_v47 }
 0x63c   :  { %v2908_v21 = vsub.f32 1.0, %v2907_v1  ;;  %v8050_v55 = vadd.f32 1.0, %v3689_v46  ;;  %v2933_v46 = vor.u32 1.1754944e-38, %v2932_v37 }
 0x63d   :  { %v2894_v16 = vmul.f32 %v3683_v0, %v2893_v57  ;;  %3696 = vrcp.f32 %v8048_v4  ;;  %v3052_v10 = vand.u32 2147483647, %v8048_v4  ;;  %v3054_v39 = vand.u32 2147483648, %v8048_v4 }
 0x63e   :  { %v2909_v20 = vmul.f32 %v3685_v12, %v2908_v21  ;;  %3698 = vrcp.f32 %v8050_v55  ;;  %v3069_v63 = vand.u32 2147483648, %v8050_v55  ;;  %v3067_v42 = vand.u32 2147483647, %v8050_v55 }
 0x63f   :  { %v8057_v59 = vpop.eup %3690  ;;  %v2895_v60 = vadd.f32 %v3683_v0, %v2894_v16  ;;  %vm3063_vm8 = vweird.f32 %v8050_v55  ;;  %vm3048_vm9 = vweird.f32 %v8048_v4  ;;  %vm3053_vm12 = vcmp.eq.f32.partialorder %v3052_v10, 8.507059e+37 }
 0x640   :  { %v3693_v19 = vpop.eup %3692  ;;  %v2922_v13 = vmul.f32 %v8057_v59, %v8044_v47  ;;  %v2910_v11 = vadd.f32 %v3685_v12, %v2909_v20  ;;  %vm2927_vm5 = vweird.f32 %v8057_v59  ;;  %v3070_v36 = vor.u32 1.1754944e-38, %v3069_v63  ;;  %v3330_v63 = vld [vmem:[%s8175_s7 + $0x18] sm:$0xff] }
 0x641   :  { %v3695_v49 = vpop.eup %3694  ;;  %v2899_v62 = vsel %vm2898_vm0, %v3683_v0, %v2895_v60  ;;  %v8062_v2 = vadd.f32 1.0, %v3693_v19  ;;  %vm8086_vm10 = vmor %vm2926_vm4, %vm2927_vm5  ;;  %v3055_v0 = vor.u32 1.1754944e-38, %v3054_v39  ;;  %vm3068_vm14 = vcmp.eq.f32.partialorder %v3067_v42, 8.507059e+37  ;;  %v3332_v39 = vld [vmem:[%s8175_s7 + $0x28] sm:$0xff] }
 0x642   :  { %v2923_v32 = vsub.f32 1.0, %v2922_v13  ;;  %v2904_v29 = vsel %vm2901_vm1, %v2903_v15, %v2899_v62  ;;  %v2914_v50 = vsel %vm2913_vm2, %v3685_v12, %v2910_v11  ;;  %vm2931_vm15 = vcmp.eq.f32.partialorder %v2930_v8, 8.507059e+37  ;;  %v3342_v15 = vld [vmem:[%s8175_s7 + $0x78] sm:$0xff]  ;;  %v3341_v11 = vld [vmem:[%s8175_s7 + $0x70] sm:$0xff]  ;;  %v3340_v62 = vld [vmem:[%s8175_s7 + $0x68] sm:$0xff] }
 0x643   :  { %v3697_v5 = vpop.eup %3696  ;;  %v2919_v22 = vsel %vm2916_vm3, %v2918_v54, %v2914_v50  ;;  %v2938_v56 = vmul.f32 %v3695_v49, %v2904_v29  ;;  %3700 = vrcp.f32 %v8062_v2  ;;  %v3084_v3 = vand.u32 2147483648, %v8062_v2  ;;  %v3336_v50 = vld [vmem:[%s8175_s7 + $0x48] sm:$0xff] }
 0x644   :  { %v3699_v38 = vpop.eup %3698  ;;  %v2937_v25 = vmul.f32 %v2919_v22, %v7797_v34  ;;  %v3044_v30 = vmul.f32 %v3697_v5, %v8048_v4  ;;  %3702 = vtanh.f32 %v3030_v33  ;;  %v2924_v9 = vmul.f32 %v8057_v59, %v2923_v32  ;;  %v3338_v33 = vld [vmem:[%s8175_s7 + $0x58] sm:$0xff]  ;;  %v3337_v32 = vld [vmem:[%s8175_s7 + $0x50] sm:$0xff]  ;;  %v3328_v42 = vld [vmem:[%s8175_s7 + $0x8] sm:$0xff] }
 0x645   :  { %v3059_v28 = vmul.f32 %v3699_v38, %v8050_v55  ;;  %vm3049_vm6 = vweird.f32 %v3697_v5  ;;  %vm3064_vm7 = vweird.f32 %v3699_v38  ;;  %vm3078_vm1 = vweird.f32 %v8062_v2 }
 0x646   :  { %v8070_v52 = vadd.f32 %v2938_v56, %v2937_v25  ;;  %v3045_v26 = vsub.f32 1.0, %v3044_v30  ;;  %v2925_v34 = vadd.f32 %v8057_v59, %v2924_v9  ;;  %vm3050_vm11 = vmor %vm3048_vm9, %vm3049_vm6  ;;  %v3082_v23 = vand.u32 2147483647, %v8062_v2  ;;  %v3335_v56 = vld [vmem:[%s8175_s7 + $0x40] sm:$0xff]  ;;  %v3334_v30 = vld [vmem:[%s8175_s7 + $0x38] sm:$0xff] }
 0x647   :  { %v3060_v18 = vsub.f32 1.0, %v3059_v28  ;;  %vm3065_vm13 = vmor %vm3063_vm8, %vm3064_vm7 }
 0x648   :  { %3704 = vtanh.f32 %v8070_v52  ;;  %v3046_v40 = vmul.f32 %v3697_v5, %v3045_v26  ;;  %v2929_v12 = vsel %vm8086_vm10, %v8057_v59, %v2925_v34  ;;  %v3085_v59 = vor.u32 1.1754944e-38, %v3084_v3  ;;  %v3333_v26 = vld [vmem:[%s8175_s7 + $0x30] sm:$0xff]  ;;  %v3331_v34 = vld [vmem:[%s8175_s7 + $0x20] sm:$0xff] }
 0x649   :  { %v3701_v35 = vpop.eup %3700  ;;  %v3061_v41 = vmul.f32 %v3699_v38, %v3060_v18  ;;  %v2934_v55 = vsel %vm2931_vm15, %v2933_v46, %v2929_v12  ;;  %vm3083_vm3 = vcmp.eq.f32.partialorder %v3082_v23, 8.507059e+37 }
 0x64a   :  { %v3074_v43 = vmul.f32 %v3701_v35, %v8062_v2  ;;  %v3047_v44 = vadd.f32 %v3697_v5, %v3046_v40  ;;  %v3703_v53 = vpop.eup %3702  ;;  %vm3079_vm0 = vweird.f32 %v3701_v35  ;;  %v3339_v2 = vld [vmem:[%s8175_s7 + $0x60] sm:$0xff] }
 0x64b   :  { %v3062_v61 = vadd.f32 %v3699_v38, %v3061_v41  ;;  %vm3080_vm2 = vmor %vm3078_vm1, %vm3079_vm0 }
 0x64c   :  { %v3075_v7 = vsub.f32 1.0, %v3074_v43  ;;  %v3051_v1 = vsel %vm3050_vm11, %v3697_v5, %v3047_v44 }
 0x64d   :  { %v3056_v57 = vsel %vm3053_vm12, %v3055_v0, %v3051_v1  ;;  %v3066_v47 = vsel %vm3065_vm13, %v3699_v38, %v3062_v61 }
 0x64e   :  { %v3705_v4 = vpop.eup %3704  ;;  %v3076_v21 = vmul.f32 %v3701_v35, %v3075_v7  ;;  %v3071_v58 = vsel %vm3068_vm14, %v3070_v36, %v3066_v47  ;;  %v3090_v6 = vmul.f32 %v3703_v53, %v3056_v57 }
 0x64f   :  { %v3089_v24 = vmul.f32 %v3071_v58, %v7851_v27  ;;  %v2941_v16 = vmul.f32 %v3705_v4, %v2934_v55 }
 0x650   :  { %v3077_v14 = vadd.f32 %v3701_v35, %v3076_v21 }
 0x651   :  { %v3091_v20 = vadd.f32 %v3090_v6, %v3089_v24  ;;  %3110 = vmatmul.f32.vlgmr.msra.gmra.mxu0 %v2941_v16  ;;  %3130 = vmatmul.f32.vlgmr.msra.gmra.mxu1 %v2941_v16 }
 0x652   :  { %3150 = vmatmul.f32.vlgmr.msra.gmra.mxu2 %v2941_v16  ;;  %3170 = vmatmul.f32.vlgmr.msra.gmra.mxu3 %v2941_v16  ;;  %v3081_v27 = vsel %vm3080_vm2, %v3701_v35, %v3077_v14  ;;  %v3329_v35 = vld [vmem:[%s8175_s7 + $0x10] sm:$0xff] }
 0x653   :  { %3706 = vtanh.f32 %v3091_v20  ;;  %3322 = vst [vmem:[%s8178_s10] sm:$0xff] %v3091_v20  ;;  %v3086_v19 = vsel %vm3083_vm3, %v3085_v59, %v3081_v27  ;;  %3347 = vmatpush.msra.mxu0 %v3342_v15 }
 0x655   :  { %3348 = vmatpush.msra.mxu0 %v3341_v11 }
 0x657   :  { %3349 = vmatpush.msra.mxu0 %v3340_v62 }
 0x659   :  { %v3707_v60 = vpop.eup %3706  ;;  %3350 = vmatpush.msra.mxu0 %v3339_v2 }
 0x65a   :  { %v3093_v13 = vmul.f32 %v3707_v60, %v3086_v19 }
 0x65b   :  { %3351 = vmatpush.msra.mxu0 %v3338_v33 }
 0x65c   :  { %3190 = vmatmul.f32.vlgmr.msrb.gmra.mxu0 %v3093_v13  ;;  %3321 = vst [vmem:[%s8177_s9] sm:$0xff] %v3093_v13  ;;  %3210 = vmatmul.f32.vlgmr.msrb.gmra.mxu1 %v3093_v13 }
 0x65d   :  { %3230 = vmatmul.f32.vlgmr.msrb.gmra.mxu2 %v3093_v13  ;;  %3250 = vmatmul.f32.vlgmr.msrb.gmra.mxu3 %v3093_v13 }
 0x65e   :  { %3352 = vmatpush.msra.mxu0 %v3337_v32 }
 0x660   :  { %3353 = vmatpush.msra.mxu0 %v3336_v50 }
 0x662   :  { %3354 = vmatpush.msra.mxu0 %v3335_v56 }
 0x664   :  { %3355 = vmatpush.msra.mxu0 %v3334_v30 }
 0x666   :  { %3356 = vmatpush.msra.mxu0 %v3333_v26 }
 0x668   :  { %3357 = vmatpush.msra.mxu0 %v3332_v39 }
 0x66a   :  { %3358 = vmatpush.msra.mxu0 %v3331_v34 }
 0x66c   :  { %3359 = vmatpush.msra.mxu0 %v3330_v63 }
 0x66e   :  { %3360 = vmatpush.msra.mxu0 %v3329_v35 }
 0x670   :  { %3361 = vmatpush.msra.mxu0 %v3328_v42 }
 0x672   :  { %3362 = vmatpush.msra.mxu0 %v3327_v45 }
 0x6ce   :  { %v3111_v49 = vpop.f32.mrf.mxu0  ;;  %v3131_v54 = vpop.f32.mrf.mxu1 }
 0x6d5   :  { %v3151_v29 = vpop.f32.mrf.mxu2  ;;  %v3171_v10 = vpop.f32.mrf.mxu3 }
 0x6d9   :  { %v3191_v5 = vpop.f32.mrf.mxu0  ;;  %v3211_v22 = vpop.f32.mrf.mxu1 }
 0x6da   :  { %v3192_v38 = vadd.f32 %v3191_v5, %v3111_v49  ;;  %v3212_v25 = vadd.f32 %v3211_v22, %v3131_v54 }
 0x6dc   :  { %v3254_v28 = vadd.f32 %v3192_v38, %v10037_v17  ;;  %v3255_v9 = vadd.f32 %v3212_v25, %v10038_v31 }
 0x6de   :  { %v3457_v37 = vmul.f32 -1.442695, %v3254_v28  ;;  %v3458_v18 = vmul.f32 -1.442695, %v3255_v9 }
 0x6e0   :  { %3708 = vpow2.f32 %v3457_v37  ;;  %v3231_v17 = vpop.f32.mrf.mxu2  ;;  %v3251_v53 = vpop.f32.mrf.mxu3 }
 0x6e1   :  { %3710 = vpow2.f32 %v3458_v18  ;;  %v3232_v31 = vadd.f32 %v3231_v17, %v3151_v29  ;;  %v3252_v0 = vadd.f32 %v3251_v53, %v3171_v10 }
 0x6e3   :  { %v3256_v40 = vadd.f32 %v3232_v31, %v10039_v48  ;;  %v3257_v7 = vadd.f32 %v3252_v0, %v10040_v51 }
 0x6e5   :  { %v3459_v41 = vmul.f32 -1.442695, %v3256_v40 }
 0x6e6   :  { %v3709_v8 = vpop.eup %3708 }
 0x6e7   :  { %v3711_v43 = vpop.eup %3710  ;;  %v3267_v44 = vadd.f32 1.0, %v3709_v8  ;;  %3712 = vpow2.f32 %v3459_v41 }
 0x6e8   :  { %v3268_v48 = vadd.f32 1.0, %v3711_v43 }
 0x6e9   :  { %3714 = vrcp.f32 %v3267_v44  ;;  %v3281_v21 = vand.u32 2147483648, %v3267_v44  ;;  %v3279_v55 = vand.u32 2147483647, %v3267_v44  ;;  %vm3275_vm6 = vweird.f32 %v3267_v44 }
 0x6ea   :  { %3716 = vrcp.f32 %v3268_v48  ;;  %v3296_v58 = vand.u32 2147483648, %v3268_v48  ;;  %v3294_v16 = vand.u32 2147483647, %v3268_v48  ;;  %vm3290_vm7 = vweird.f32 %v3268_v48 }
 0x6eb   :  { %v3282_v3 = vor.u32 1.1754944e-38, %v3281_v21  ;;  %vm3280_vm10 = vcmp.eq.f32.partialorder %v3279_v55, 8.507059e+37 }
 0x6ec   :  { %v3297_v27 = vor.u32 1.1754944e-38, %v3296_v58  ;;  %vm3295_vm11 = vcmp.eq.f32.partialorder %v3294_v16, 8.507059e+37 }
 0x6ed   :  { %v3713_v61 = vpop.eup %3712 }
 0x6ee   :  { %v3269_v12 = vadd.f32 1.0, %v3713_v61 }
 0x6ef   :  { %v3715_v36 = vpop.eup %3714 }
 0x6f0   :  { %v3717_v1 = vpop.eup %3716  ;;  %v3271_v46 = vmul.f32 %v3715_v36, %v3267_v44  ;;  %3718 = vrcp.f32 %v3269_v12  ;;  %vm3276_vm4 = vweird.f32 %v3715_v36  ;;  %v3311_v32 = vand.u32 2147483648, %v3269_v12 }
 0x6f1   :  { %v3286_v57 = vmul.f32 %v3717_v1, %v3268_v48  ;;  %3720 = vtanh.f32 %v3257_v7  ;;  %vm3291_vm5 = vweird.f32 %v3717_v1  ;;  %vm3277_vm8 = vmor %vm3275_vm6, %vm3276_vm4  ;;  %vm3305_vm13 = vweird.f32 %v3269_v12 }
 0x6f2   :  { %v3272_v47 = vsub.f32 1.0, %v3271_v46  ;;  %vm3292_vm9 = vmor %vm3290_vm7, %vm3291_vm5  ;;  %v3309_v29 = vand.u32 2147483647, %v3269_v12  ;;  %v3312_v5 = vor.u32 1.1754944e-38, %v3311_v32 }
 0x6f3   :  { %v3287_v4 = vsub.f32 1.0, %v3286_v57 }
 0x6f4   :  { %v3273_v6 = vmul.f32 %v3715_v36, %v3272_v47  ;;  %vm3310_vm15 = vcmp.eq.f32.partialorder %v3309_v29, 8.507059e+37 }
 0x6f5   :  { %v3288_v24 = vmul.f32 %v3717_v1, %v3287_v4 }
 0x6f6   :  { %v3719_v20 = vpop.eup %3718  ;;  %v3274_v14 = vadd.f32 %v3715_v36, %v3273_v6 }
 0x6f7   :  { %v3301_v51 = vmul.f32 %v3719_v20, %v3269_v12  ;;  %v3289_v23 = vadd.f32 %v3717_v1, %v3288_v24  ;;  %v3721_v60 = vpop.eup %3720  ;;  %vm3306_vm12 = vweird.f32 %v3719_v20 }
 0x6f8   :  { %v3278_v59 = vsel %vm3277_vm8, %v3715_v36, %v3274_v14  ;;  %vm3307_vm14 = vmor %vm3305_vm13, %vm3306_vm12 }
 0x6f9   :  { %v3302_v19 = vsub.f32 1.0, %v3301_v51  ;;  %v3283_v13 = vsel %vm3280_vm10, %v3282_v3, %v3278_v59  ;;  %v3293_v15 = vsel %vm3292_vm9, %v3717_v1, %v3289_v23 }
 0x6fa   :  { %v3298_v11 = vsel %vm3295_vm11, %v3297_v27, %v3293_v15  ;;  %v3317_v49 = vmul.f32 %v3721_v60, %v3283_v13 }
 0x6fb   :  { %v3303_v54 = vmul.f32 %v3719_v20, %v3302_v19  ;;  %v3316_v62 = vmul.f32 %v3298_v11, %v8070_v52  ;;  %v3467_v52 = vld [vmem:[%s8176_s8] ss:$0 sm:$0xff] }
 0x6fd   :  { %v3318_v2 = vadd.f32 %v3317_v49, %v3316_v62  ;;  %v3304_v33 = vadd.f32 %v3719_v20, %v3303_v54 }
 0x6ff   :  { %3722 = vtanh.f32 %v3318_v2  ;;  %3461 = vst [vmem:[%s8178_s10 + $0x8] sm:$0xff] %v3318_v2  ;;  %v3308_v50 = vsel %vm3307_vm14, %v3719_v20, %v3304_v33 }
 0x700   :  { %v3313_v56 = vsel %vm3310_vm15, %v3312_v5, %v3308_v50 }
 0x705   :  { %v3723_v22 = vpop.eup %3722 }
 0x706   :  { %v3320_v38 = vmul.f32 %v3723_v22, %v3313_v56 }
 0x708   :  { %3460 = vst [vmem:[%s8177_s9 + $0x8] sm:$0xff] %v3320_v38  ;;  %3363 = vmatmul.f32.vlgmr.msra.gmra.mxu0 %v3320_v38 }
 0x785   :  { %v3364_v25 = vpop.f32.mrf.mxu0 }
 0x786   :  { %v3365_v30 = vadd.f32 %v3467_v52, %v3364_v25 }
 0x788   :  { %3367 = vst [vmem:[%s8179_s11] sm:$0xff] %v3365_v30 }
 0x789   :  { %3380 = vsyncpa [#allocation3], 1 }
 0x78a   :  { %3381 = vsyncpa [#allocation5], 1 }

</bundles_post_ra>
